<compile_context>
chip_gen: v5e
topology: v5e:2x2
jax: 0.10.0
libtpu: 0.0.40
codegen_flags: <defaults>
</compile_context>

<pallas_src>
import functools

import numpy as np
import jax
import jax.numpy as jnp
from jax.experimental import pallas as pl
from jax.experimental.pallas import tpu as pltpu

EPS = 1e-5
LANE = 128


# ------------------------------ small helpers ------------------------------

def _round_up(x, m):
    return (x + m - 1) // m * m


def _vmem_capacity_bytes():
    try:
        return int(pltpu.get_tpu_info().vmem_capacity_bytes)
    except Exception:
        return 64 * 1024 * 1024  # conservative (v7x-sized) fallback


def _cparams(vmem_limit):
    return pltpu.CompilerParams(
        dimension_semantics=("parallel",),
        vmem_limit_bytes=int(vmem_limit),
    )


def _choose_m_tiling(m, block_m):
    """Pick (bm, m_pad): bm % 8 == 0, m_pad % bm == 0, bm <= block_m (roughly).

    Prefers an exact divisor (no M padding); otherwise pads M up instead of
    falling back to degenerate 8-row tiles.
    """
    m8 = _round_up(max(m, 8), 8)
    target = max(8, min(block_m, m8))
    target -= target % 8
    for bm in range(target, 7, -8):
        if m % bm == 0 and (bm >= 256 or bm == target):
            return bm, m
    bm = min(target, max(256, _round_up((m + 7) // 8, 8)))
    return bm, _round_up(m, bm)


# ------------------------------ Pallas kernels ------------------------------

def _matmul_bn_kernel(*refs, fuse_input_norm, compute_dtype, bm, m_valid):
    """1x1 conv as a row-tiled matmul.

    z = (optionally relu(x*scale+shift)) @ w; also emits per-tile sum / sumsq
    of z (f32) for the two-phase training-mode BatchNorm.
    """
    if fuse_input_norm:
        x_ref, s_ref, t_ref, w_ref, z_ref, sum_ref, ssq_ref = refs
        a = x_ref[...] * s_ref[...] + t_ref[...]      # runs in norm dtype
        a = jnp.maximum(a, 0.0).astype(compute_dtype)
    else:
        x_ref, w_ref, z_ref, sum_ref, ssq_ref = refs
        a = x_ref[...].astype(compute_dtype)

    if m_valid is not None:
        # M was padded and the fused shift can make padded rows nonzero:
        # zero them so they contribute nothing to z or to the BN statistics.
        row = pl.program_id(0) * bm + jax.lax.broadcasted_iota(
            jnp.int32, (bm, 1), 0)
        a = jnp.where(row < m_valid, a, jnp.zeros_like(a))

    z = jnp.dot(a, w_ref[...], preferred_element_type=jnp.float32)
    z_ref[...] = z.astype(z_ref.dtype)

    # Per-tile BN partials (f32), stored as an (8, C) sublane-aligned tile;
    # every row carries the same partial, the wrapper reads row 0.
    ps = jnp.sum(z, axis=0, keepdims=True)
    pq = jnp.sum(z * z, axis=0, keepdims=True)
    sum_ref[...] = jnp.broadcast_to(ps, sum_ref.shape)
    ssq_ref[...] = jnp.broadcast_to(pq, ssq_ref.shape)


def _conv3x3_bn_kernel(z_ref, s_ref, t_ref, w_ref, zo_ref, sum_ref, ssq_ref,
                       abuf_ref, *, dilation, compute_dtype):
    """3x3 (dilated, 'same') conv over one image, with the previous layer's
    BN+ReLU fused on the input and BN statistics emitted for the output."""
    d = dilation
    _, hh, ww, cin = z_ref.shape
    cout = w_ref.shape[-1]
    hp, wp = hh + 2 * d, ww + 2 * d

    # Zero the halo border every step (cheap VMEM traffic, and megacore-safe:
    # on v7x each TensorCore owns a private scratch while sharing the grid).
    zrow = jnp.zeros((d, wp, cin), compute_dtype)
    zcol = jnp.zeros((hp, d, cin), compute_dtype)
    abuf_ref[0:d, :, :] = zrow
    abuf_ref[hp - d:hp, :, :] = zrow
    abuf_ref[:, 0:d, :] = zcol
    abuf_ref[:, wp - d:wp, :] = zcol

    # Fused BN (scale/shift) + ReLU of the previous layer into the interior.
    # (Padding must happen in *activation* space, hence in-kernel, not on z.)
    a = z_ref[0] * s_ref[...] + t_ref[...]
    abuf_ref[d:d + hh, d:d + ww, :] = jnp.maximum(a, 0.0).astype(compute_dtype)

    # Nine-tap accumulation on the MXU, f32 accumulator.
    acc = jnp.zeros((hh * ww, cout), jnp.float32)
    for kh in range(3):
        for kw in range(3):
            tap = abuf_ref[kh * d:kh * d + hh, kw * d:kw * d + ww, :]
            acc = acc + jnp.dot(tap.reshape(hh * ww, cin),
                                w_ref[kh * 3 + kw],
                                preferred_element_type=jnp.float32)

    zo_ref[0] = acc.astype(zo_ref.dtype)

    ps = jnp.sum(acc, axis=0, keepdims=True)
    pq = jnp.sum(acc * acc, axis=0, keepdims=True)
    sum_ref[...] = jnp.broadcast_to(ps, sum_ref.shape)
    ssq_ref[...] = jnp.broadcast_to(pq, ssq_ref.shape)


def _norm_relu_residual_kernel(z_ref, s_ref, t_ref, zr_ref, sr_ref, tr_ref,
                               o_ref):
    y = jnp.maximum(z_ref[...].astype(jnp.float32) * s_ref[...] + t_ref[...], 0.0)
    r = jnp.maximum(zr_ref[...].astype(jnp.float32) * sr_ref[...] + tr_ref[...], 0.0)
    o_ref[...] = (y + r).astype(o_ref.dtype)


# ------------------------------ layer wrappers ------------------------------

def conv1x1_bn_stats(x2d, w, *, in_scale=None, in_shift=None, compute_dtype,
                     bm, m_real, vmem_limit):
    """Tiled 1x1 conv-as-matmul that also returns per-channel sum/sumsq of z."""
    m_pad, k = x2d.shape
    cout = w.shape[-1]
    nt = m_pad // bm
    fuse = in_scale is not None
    mask_rows = fuse and (m_pad != m_real)

    kern = functools.partial(
        _matmul_bn_kernel, fuse_input_norm=fuse, compute_dtype=compute_dtype,
        bm=bm, m_valid=(m_real if mask_rows else None))

    in_specs = [pl.BlockSpec((bm, k), lambda i: (i, 0))]
    args = [x2d]
    if fuse:
        in_specs += [pl.BlockSpec((1, k), lambda i: (0, 0)),
                     pl.BlockSpec((1, k), lambda i: (0, 0))]
        args += [in_scale.reshape(1, k), in_shift.reshape(1, k)]
    # TODO(synk): on VMEM-tight configs mark this invariant weight block
    # pipeline_mode=pl.Buffered(1) to avoid double-buffering it.
    in_specs += [pl.BlockSpec((k, cout), lambda i: (0, 0))]
    args += [w.astype(compute_dtype)]

    isz = jnp.dtype(compute_dtype).itemsize
    cost = pl.CostEstimate(
        flops=2 * m_pad * k * cout,
        transcendentals=0,
        bytes_accessed=(m_pad * k + k * cout + m_pad * cout) * isz
        + 2 * nt * 8 * cout * 4)

    z, ps, pq = pl.pallas_call(
        kern,
        grid=(nt,),
        in_specs=in_specs,
        out_specs=(pl.BlockSpec((bm, cout), lambda i: (i, 0)),
                   pl.BlockSpec((8, cout), lambda i: (i, 0)),
                   pl.BlockSpec((8, cout), lambda i: (i, 0))),
        out_shape=(jax.ShapeDtypeStruct((m_pad, cout), compute_dtype),
                   jax.ShapeDtypeStruct((nt * 8, cout), jnp.float32),
                   jax.ShapeDtypeStruct((nt * 8, cout), jnp.float32)),
        compiler_params=_cparams(vmem_limit),
        cost_estimate=cost,
    )(*args)

    csum = ps.reshape(nt, 8, cout)[:, 0, :].sum(axis=0)
    cssq = pq.reshape(nt, 8, cout)[:, 0, :].sum(axis=0)
    return z, csum, cssq


def conv3x3_bn_stats(z_nhwc, in_scale, in_shift, w9, *, dilation,
                     compute_dtype, vmem_limit):
    """3x3 'same' conv (dilation=d) with fused input BN+ReLU, per-image grid."""
    n, h, wd, c = z_nhwc.shape
    cout = w9.shape[-1]
    d = dilation
    hp, wp = h + 2 * d, wd + 2 * d
    isz = jnp.dtype(compute_dtype).itemsize

    # Rough per-step VMEM estimate (double-buffered pipeline blocks + scratch
    # + f32 accumulator + one staged tap).
    per_step = ((2 * h * wd * c + 2 * h * wd * cout + 2 * 9 * c * cout
                 + hp * wp * c + h * wd * c) * isz + h * wd * cout * 4)
    if per_step > vmem_limit:
        # TODO(synk): row-block the image with a manual halo DMA
        # (memory_space=pl.ANY + pltpu.make_async_copy) for very large maps.
        raise ValueError("conv3x3 image tile does not fit in VMEM; "
                         "feature map too large for the whole-image grid")

    kern = functools.partial(_conv3x3_bn_kernel, dilation=d,
                             compute_dtype=compute_dtype)

    cost = pl.CostEstimate(
        flops=2 * n * h * wd * 9 * c * cout,
        transcendentals=0,
        bytes_accessed=(n * h * wd * (c + cout) + 9 * c * cout) * isz
        + 2 * n * 8 * cout * 4)

    z, ps, pq = pl.pallas_call(
        kern,
        grid=(n,),
        in_specs=[pl.BlockSpec((1, h, wd, c), lambda i: (i, 0, 0, 0)),
                  pl.BlockSpec((1, c), lambda i: (0, 0)),
                  pl.BlockSpec((1, c), lambda i: (0, 0)),
                  pl.BlockSpec((9, c, cout), lambda i: (0, 0, 0))],
        out_specs=(pl.BlockSpec((1, h * wd, cout), lambda i: (i, 0, 0)),
                   pl.BlockSpec((8, cout), lambda i: (i, 0)),
                   pl.BlockSpec((8, cout), lambda i: (i, 0))),
        out_shape=(jax.ShapeDtypeStruct((n, h * wd, cout), compute_dtype),
                   jax.ShapeDtypeStruct((n * 8, cout), jnp.float32),
                   jax.ShapeDtypeStruct((n * 8, cout), jnp.float32)),
        scratch_shapes=[pltpu.VMEM((hp, wp, c), compute_dtype)],
        compiler_params=_cparams(vmem_limit),
        cost_estimate=cost,
    )(z_nhwc, in_scale.reshape(1, c), in_shift.reshape(1, c),
      w9.astype(compute_dtype))

    csum = ps.reshape(n, 8, cout)[:, 0, :].sum(axis=0)
    cssq = pq.reshape(n, 8, cout)[:, 0, :].sum(axis=0)
    return z, csum, cssq


def norm_relu_residual(z2d, scale, shift, zr2d, scale_r, shift_r, *, bm,
                       vmem_limit):
    m_pad, c = z2d.shape
    nt = m_pad // bm
    tile = pl.BlockSpec((bm, c), lambda i: (i, 0))
    vec = pl.BlockSpec((1, c), lambda i: (0, 0))
    return pl.pallas_call(
        _norm_relu_residual_kernel,
        grid=(nt,),
        in_specs=[tile, vec, vec, tile, vec, vec],
        out_specs=tile,
        out_shape=jax.ShapeDtypeStruct((m_pad, c), jnp.float32),
        compiler_params=_cparams(vmem_limit),
    )(z2d,
      scale.reshape(1, c).astype(jnp.float32),
      shift.reshape(1, c).astype(jnp.float32),
      zr2d,
      scale_r.reshape(1, c).astype(jnp.float32),
      shift_r.reshape(1, c).astype(jnp.float32))


# ---------------------------- small XLA-side glue ----------------------------

def _bn_scale_shift(csum, cssq, count, gamma, beta):
    # Training-mode BatchNorm: batch statistics, biased variance, eps=1e-5.
    mean = csum / count
    var = jnp.maximum(cssq / count - mean * mean, 0.0)
    scale = gamma * jax.lax.rsqrt(var + EPS)
    shift = beta - mean * scale
    return scale, shift


def _pad_vec(v, c):
    return jnp.pad(v, (0, c - v.shape[0]))


def _pad_w1x1(w, cin_p, cout_p):
    return jnp.pad(w, ((0, cin_p - w.shape[0]), (0, cout_p - w.shape[1])))


def _pad_w3x3(w, cin_p, cout_p):
    w = jnp.pad(w, ((0, 0), (0, 0),
                    (0, cin_p - w.shape[2]), (0, cout_p - w.shape[3])))
    return w.reshape(9, cin_p, cout_p)


# --------------------------------- forward ---------------------------------

def bottleneck_forward(x_nchw, params, dilation=2, compute_dtype=jnp.bfloat16,
                       norm_dtype=None, block_m=None):
    """Pallas forward of Bottleneck (training-mode BatchNorm, batch stats).

    norm_dtype: dtype of the fused scale/shift+ReLU math inside the conv
    kernels.  Defaults to compute_dtype (bf16 VALUs on v6e/v7x); pass
    jnp.float32 on v5e whose VPU has no bf16 support.
    """
    if norm_dtype is None:
        norm_dtype = compute_dtype

    vmem_cap = _vmem_capacity_bytes()
    vmem_limit = min(vmem_cap * 3 // 4, 100 * 1024 * 1024)
    if block_m is None:
        block_m = 2048 if vmem_cap >= (96 << 20) else 512

    n, cin, h, w = x_nchw.shape
    m = n * h * w
    in_ch, out_ch = params["pre1"][0].shape
    assert cin == in_ch
    cin_p = _round_up(in_ch, LANE)
    cout_p = _round_up(out_ch, LANE)

    bm, m_pad = _choose_m_tiling(m, block_m)

    def finalize(csum, cssq, p):
        return _bn_scale_shift(csum, cssq, m,
                               _pad_vec(p[2], cout_p), _pad_vec(p[3], cout_p))

    def rows(z_img):
        """(N, H*W, C) -> (m_pad, C): flatten + optional zero M padding."""
        z2d = z_img.reshape(m, cout_p)
        if m_pad != m:
            z2d = jnp.pad(z2d, ((0, m_pad - m), (0, 0)))
        return z2d

    def images(z2d):
        """(m_pad, C) -> (N, H, W, C) (drop M padding)."""
        return z2d[:m].reshape(n, h, w, cout_p)

    # Input: NCHW -> NHWC, lane-pad channels, flatten to rows (zero pad rows).
    x = jnp.transpose(x_nchw, (0, 2, 3, 1))
    x = jnp.pad(x, ((0, 0), (0, 0), (0, 0), (0, cin_p - in_ch)))
    x2d = x.reshape(m, cin_p).astype(compute_dtype)
    if m_pad != m:
        x2d = jnp.pad(x2d, ((0, m_pad - m), (0, 0)))

    common = dict(compute_dtype=compute_dtype, bm=bm, m_real=m,
                  vmem_limit=vmem_limit)

    # NOTE: conv biases (params[...][1]) are intentionally unused: a bias right
    # before training-mode BatchNorm cancels exactly in the forward output.

    # pre1: 1x1 conv (in_ch -> out_ch) + BN stats.
    z1, s1, q1 = conv1x1_bn_stats(
        x2d, _pad_w1x1(params["pre1"][0], cin_p, cout_p), **common)
    sc1, sh1 = finalize(s1, q1, params["pre1"])

    # pre2: 3x3 conv, padding=1, dilation=1, with fused bn1+relu of z1.
    z2, s2, q2 = conv3x3_bn_stats(
        images(z1), sc1.astype(norm_dtype), sh1.astype(norm_dtype),
        _pad_w3x3(params["pre2"][0], cout_p, cout_p),
        dilation=1, compute_dtype=compute_dtype, vmem_limit=vmem_limit)
    sc2, sh2 = finalize(s2, q2, params["pre2"])
    # identity = relu(bn2(z2)) is never materialized; recomputed in consumers.
    z2_rows = rows(z2)

    # conv1: 1x1, fused bn2+relu.
    z3, s3, q3 = conv1x1_bn_stats(
        z2_rows, _pad_w1x1(params["conv1"][0], cout_p, cout_p),
        in_scale=sc2.astype(norm_dtype), in_shift=sh2.astype(norm_dtype),
        **common)
    sc3, sh3 = finalize(s3, q3, params["conv1"])

    # conv2: 3x3, padding=dilation, dilation=dilation, fused bn3+relu.
    z4, s4, q4 = conv3x3_bn_stats(
        images(z3), sc3.astype(norm_dtype), sh3.astype(norm_dtype),
        _pad_w3x3(params["conv2"][0], cout_p, cout_p),
        dilation=dilation, compute_dtype=compute_dtype, vmem_limit=vmem_limit)
    sc4, sh4 = finalize(s4, q4, params["conv2"])

    # conv3: 1x1, fused bn4+relu.
    z5, s5, q5 = conv1x1_bn_stats(
        rows(z4), _pad_w1x1(params["conv3"][0], cout_p, cout_p),
        in_scale=sc4.astype(norm_dtype), in_shift=sh4.astype(norm_dtype),
        **common)
    sc5, sh5 = finalize(s5, q5, params["conv3"])

    # out = relu(bn5(z5)) + relu(bn2(z2))   (residual fused; identity recomputed)
    out2d = norm_relu_residual(z5, sc5, sh5, z2_rows, sc2, sh2,
                               bm=bm, vmem_limit=vmem_limit)
    out = out2d[:m, :out_ch].reshape(n, h, w, out_ch)
    return jnp.transpose(out, (0, 3, 1, 2))  # NHWC -> NCHW


def init_params(key, in_ch, out_ch):
    keys = jax.random.split(key, 5)

    def conv1x1_p(k, cin, cout):
        kw, kb = jax.random.split(k)
        w = jax.random.normal(kw, (cin, cout), jnp.float32) / np.sqrt(cin)
        b = jax.random.normal(kb, (cout,), jnp.float32) * 0.1
        return (w, b, jnp.ones((cout,), jnp.float32),
                jnp.zeros((cout,), jnp.float32))

    def conv3x3_p(k, cin, cout):
        kw, kb = jax.random.split(k)
        w = jax.random.normal(kw, (3, 3, cin, cout), jnp.float32) / np.sqrt(9 * cin)
        b = jax.random.normal(kb, (cout,), jnp.float32) * 0.1
        return (w, b, jnp.ones((cout,), jnp.float32),
                jnp.zeros((cout,), jnp.float32))

    return {
        "pre1": conv1x1_p(keys[0], in_ch, out_ch),
        "pre2": conv3x3_p(keys[1], out_ch, out_ch),
        "conv1": conv1x1_p(keys[2], out_ch, out_ch),
        "conv2": conv3x3_p(keys[3], out_ch, out_ch),
        "conv3": conv1x1_p(keys[4], out_ch, out_ch),
    }


# ---------------------- pure-JAX reference (for checking) ----------------------

def _ref_bn_relu(z, gamma, beta):
    mean = jnp.mean(z, axis=(0, 1, 2), keepdims=True)
    var = jnp.mean((z - mean) ** 2, axis=(0, 1, 2), keepdims=True)
    return jnp.maximum((z - mean) * jax.lax.rsqrt(var + EPS) * gamma + beta, 0.0)


def _ref_conv(x, w4, b, padding, dilation):
    y = jax.lax.conv_general_dilated(
        x, w4, (1, 1), [(padding, padding), (padding, padding)],
        rhs_dilation=(dilation, dilation),
        dimension_numbers=("NHWC", "HWIO", "NHWC"))
    return y + b


def bottleneck_ref(x_nchw, params, dilation=2):
    x = jnp.transpose(x_nchw, (0, 2, 3, 1))

    def l1(x, p):
        w, b, g, be = p
        return _ref_bn_relu(_ref_conv(x, w.reshape(1, 1, *w.shape), b, 0, 1), g, be)

    def l3(x, p, d):
        w, b, g, be = p
        return _ref_bn_relu(_ref_conv(x, w, b, d, d), g, be)

    identity = l3(l1(x, params["pre1"]), params["pre2"], 1)
    out = l1(identity, params["conv1"])
    out = l3(out, params["conv2"], dilation)
    out = l1(out, params["conv3"]) + identity
    return jnp.transpose(out, (0, 3, 1, 2))


if __name__ == "__main__":
    key = jax.random.PRNGKey(0)
    kx, kp = jax.random.split(key)
    # Small shapes consistent with the module (scaled-down channels).
    N, IN_CH, OUT_CH, H, W = 2, 8, 8, 16, 16
    x = jax.random.normal(kx, (N, IN_CH, H, W), jnp.float32)
    params = init_params(kp, IN_CH, OUT_CH)

    ref = jax.block_until_ready(bottleneck_ref(x, params))

    # f32 MXU path: strict correctness check.  block_m=128 -> 4 M-tiles per
    # 1x1 layer, exercising the tiled two-phase BN statistics path.
    fwd_f32 = jax.jit(functools.partial(
        bottleneck_forward, compute_dtype=jnp.float32, block_m=128))
    out_f32 = jax.block_until_ready(fwd_f32(x, params))
    assert out_f32.shape == (N, OUT_CH, H, W)
    np.testing.assert_allclose(np.asarray(out_f32), np.asarray(ref),
                               rtol=1e-3, atol=1e-3)

    # bf16 MXU path (f32 accumulation + f32 BN stats): loose sanity check.
    fwd_bf16 = jax.jit(functools.partial(
        bottleneck_forward, compute_dtype=jnp.bfloat16, block_m=128))
    out_bf16 = jax.block_until_ready(fwd_bf16(x, params))
    np.testing.assert_allclose(np.asarray(out_bf16), np.asarray(ref),
                               rtol=0.1, atol=0.25)

    print("KERNEL_OK")
</pallas_src>

<mosaic_0001>
module attributes {stable_mosaic.version = 11 : i64} {
  func.func @_matmul_bn_kernel(%arg0: i32, %arg1: memref<128x128xf32, #tpu.memory_space<vmem>>, %arg2: memref<128x128xf32, #tpu.memory_space<vmem>>, %arg3: memref<128x128xf32, #tpu.memory_space<vmem>>, %arg4: memref<8x128xf32, #tpu.memory_space<vmem>>, %arg5: memref<8x128xf32, #tpu.memory_space<vmem>>) attributes {dimension_semantics = [#tpu.dimension_semantics<parallel>], iteration_bounds = array<i64: 4>, scalar_prefetch = 0 : i64, scratch_operands = 0 : i64, tpu.core_type = #tpu.core_type<tc>, window_params = [{transform_indices = @transform_0, window_bounds = array<i64: 128, 128>}, {pipeline_mode = #tpu.pipeline_mode<synchronous>, transform_indices = @transform_1, window_bounds = array<i64: 128, 128>}, {transform_indices = @transform_2, window_bounds = array<i64: 128, 128>}, {transform_indices = @transform_3, window_bounds = array<i64: 8, 128>}, {transform_indices = @transform_4, window_bounds = array<i64: 8, 128>}]} {
    %c0 = arith.constant 0 : index
    %c0_0 = arith.constant 0 : index
    %0 = vector.load %arg1[%c0, %c0_0] : memref<128x128xf32, #tpu.memory_space<vmem>>, vector<128x128xf32>
    %c0_1 = arith.constant 0 : index
    %c0_2 = arith.constant 0 : index
    %1 = vector.load %arg2[%c0_1, %c0_2] : memref<128x128xf32, #tpu.memory_space<vmem>>, vector<128x128xf32>
    %cst = arith.constant dense<0.000000e+00> : vector<128x128xf32>
    %2 = tpu.matmul %0, %1, %cst {dimension_numbers = #tpu.dot_dimension_numbers<[1], [0], [0], [1], [0, 0, 1, 1], [], []>} : vector<128x128xf32>, vector<128x128xf32>, vector<128x128xf32> -> vector<128x128xf32>
    %c0_3 = arith.constant 0 : index
    %c0_4 = arith.constant 0 : index
    %3 = vector.load %arg3[%c0_3, %c0_4] : memref<128x128xf32, #tpu.memory_space<vmem>>, vector<128x128xf32>
    tpu.vector_store %arg3[%c0_3, %c0_4], %2 {strides = array<i32>} : memref<128x128xf32, #tpu.memory_space<vmem>>, vector<128x128xf32>,
    %cst_5 = arith.constant dense<0.000000e+00> : vector<128xf32>
    %4 = vector.multi_reduction <add>, %2, %cst_5 [0] : vector<128x128xf32> to vector<128xf32>
    %5 = vector.shape_cast %4 : vector<128xf32> to vector<1x128xf32>
    %6 = arith.mulf %2, %2 : vector<128x128xf32>
    %cst_6 = arith.constant dense<0.000000e+00> : vector<128xf32>
    %7 = vector.multi_reduction <add>, %6, %cst_6 [0] : vector<128x128xf32> to vector<128xf32>
    %8 = vector.shape_cast %7 : vector<128xf32> to vector<1x128xf32>
    %9 = vector.shape_cast %5 : vector<1x128xf32> to vector<1x128xf32>
    %10 = vector.broadcast %9 : vector<1x128xf32> to vector<8x128xf32>
    %c0_7 = arith.constant 0 : index
    %c0_8 = arith.constant 0 : index
    %11 = vector.load %arg4[%c0_7, %c0_8] : memref<8x128xf32, #tpu.memory_space<vmem>>, vector<8x128xf32>
    tpu.vector_store %arg4[%c0_7, %c0_8], %10 {strides = array<i32>} : memref<8x128xf32, #tpu.memory_space<vmem>>, vector<8x128xf32>,
    %12 = vector.shape_cast %8 : vector<1x128xf32> to vector<1x128xf32>
    %13 = vector.broadcast %12 : vector<1x128xf32> to vector<8x128xf32>
    %c0_9 = arith.constant 0 : index
    %c0_10 = arith.constant 0 : index
    %14 = vector.load %arg5[%c0_9, %c0_10] : memref<8x128xf32, #tpu.memory_space<vmem>>, vector<8x128xf32>
    tpu.vector_store %arg5[%c0_9, %c0_10], %13 {strides = array<i32>} : memref<8x128xf32, #tpu.memory_space<vmem>>, vector<8x128xf32>,
    return
  }
  func.func @transform_0(%arg0: i32) -> (i32, i32) {
    %c0_i32 = arith.constant 0 : i32
    %c0_i32_0 = arith.constant 0 : i32
    return %arg0, %c0_i32 : i32, i32
  }
  func.func @transform_1(%arg0: i32) -> (i32, i32) {
    %c0_i32 = arith.constant 0 : i32
    %c0_i32_0 = arith.constant 0 : i32
    %c0_i32_1 = arith.constant 0 : i32
    return %c0_i32, %c0_i32_0 : i32, i32
  }
  func.func @transform_2(%arg0: i32) -> (i32, i32) {
    %c0_i32 = arith.constant 0 : i32
    %c0_i32_0 = arith.constant 0 : i32
    return %arg0, %c0_i32 : i32, i32
  }
  func.func @transform_3(%arg0: i32) -> (i32, i32) {
    %c0_i32 = arith.constant 0 : i32
    %c0_i32_0 = arith.constant 0 : i32
    return %arg0, %c0_i32 : i32, i32
  }
  func.func @transform_4(%arg0: i32) -> (i32, i32) {
    %c0_i32 = arith.constant 0 : i32
    %c0_i32_0 = arith.constant 0 : i32
    return %arg0, %c0_i32 : i32, i32
  }
}

module attributes {stable_mosaic.version = 11 : i64} {
  func.func @_matmul_bn_kernel(%arg0: i32, %arg1: memref<128x128xf32, #tpu.memory_space<vmem>>, %arg2: memref<1x128xf32, #tpu.memory_space<vmem>>, %arg3: memref<1x128xf32, #tpu.memory_space<vmem>>, %arg4: memref<128x128xf32, #tpu.memory_space<vmem>>, %arg5: memref<128x128xf32, #tpu.memory_space<vmem>>, %arg6: memref<8x128xf32, #tpu.memory_space<vmem>>, %arg7: memref<8x128xf32, #tpu.memory_space<vmem>>) attributes {dimension_semantics = [#tpu.dimension_semantics<parallel>], iteration_bounds = array<i64: 4>, scalar_prefetch = 0 : i64, scratch_operands = 0 : i64, tpu.core_type = #tpu.core_type<tc>, window_params = [{transform_indices = @transform_0, window_bounds = array<i64: 128, 128>}, {pipeline_mode = #tpu.pipeline_mode<synchronous>, transform_indices = @transform_1, window_bounds = array<i64: 1, 128>}, {pipeline_mode = #tpu.pipeline_mode<synchronous>, transform_indices = @transform_2, window_bounds = array<i64: 1, 128>}, {pipeline_mode = #tpu.pipeline_mode<synchronous>, transform_indices = @transform_3, window_bounds = array<i64: 128, 128>}, {transform_indices = @transform_4, window_bounds = array<i64: 128, 128>}, {transform_indices = @transform_5, window_bounds = array<i64: 8, 128>}, {transform_indices = @transform_6, window_bounds = array<i64: 8, 128>}]} {
    %c0 = arith.constant 0 : index
    %c0_0 = arith.constant 0 : index
    %0 = vector.load %arg1[%c0, %c0_0] : memref<128x128xf32, #tpu.memory_space<vmem>>, vector<128x128xf32>
    %c0_1 = arith.constant 0 : index
    %c0_2 = arith.constant 0 : index
    %1 = vector.load %arg2[%c0_1, %c0_2] : memref<1x128xf32, #tpu.memory_space<vmem>>, vector<1x128xf32>
    %2 = vector.broadcast %1 : vector<1x128xf32> to vector<128x128xf32>
    %3 = arith.mulf %0, %2 : vector<128x128xf32>
    %c0_3 = arith.constant 0 : index
    %c0_4 = arith.constant 0 : index
    %4 = vector.load %arg3[%c0_3, %c0_4] : memref<1x128xf32, #tpu.memory_space<vmem>>, vector<1x128xf32>
    %5 = vector.broadcast %4 : vector<1x128xf32> to vector<128x128xf32>
    %6 = arith.addf %3, %5 : vector<128x128xf32>
    %cst = arith.constant 0.000000e+00 : f32
    %7 = vector.broadcast %cst : f32 to vector<128x128xf32>
    %8 = arith.maximumf %6, %7 : vector<128x128xf32>
    %c0_5 = arith.constant 0 : index
    %c0_6 = arith.constant 0 : index
    %9 = vector.load %arg4[%c0_5, %c0_6] : memref<128x128xf32, #tpu.memory_space<vmem>>, vector<128x128xf32>
    %cst_7 = arith.constant dense<0.000000e+00> : vector<128x128xf32>
    %10 = tpu.matmul %8, %9, %cst_7 {dimension_numbers = #tpu.dot_dimension_numbers<[1], [0], [0], [1], [0, 0, 1, 1], [], []>} : vector<128x128xf32>, vector<128x128xf32>, vector<128x128xf32> -> vector<128x128xf32>
    %c0_8 = arith.constant 0 : index
    %c0_9 = arith.constant 0 : index
    %11 = vector.load %arg5[%c0_8, %c0_9] : memref<128x128xf32, #tpu.memory_space<vmem>>, vector<128x128xf32>
    tpu.vector_store %arg5[%c0_8, %c0_9], %10 {strides = array<i32>} : memref<128x128xf32, #tpu.memory_space<vmem>>, vector<128x128xf32>,
    %cst_10 = arith.constant dense<0.000000e+00> : vector<128xf32>
    %12 = vector.multi_reduction <add>, %10, %cst_10 [0] : vector<128x128xf32> to vector<128xf32>
    %13 = vector.shape_cast %12 : vector<128xf32> to vector<1x128xf32>
    %14 = arith.mulf %10, %10 : vector<128x128xf32>
    %cst_11 = arith.constant dense<0.000000e+00> : vector<128xf32>
    %15 = vector.multi_reduction <add>, %14, %cst_11 [0] : vector<128x128xf32> to vector<128xf32>
    %16 = vector.shape_cast %15 : vector<128xf32> to vector<1x128xf32>
    %17 = vector.shape_cast %13 : vector<1x128xf32> to vector<1x128xf32>
    %18 = vector.broadcast %17 : vector<1x128xf32> to vector<8x128xf32>
    %c0_12 = arith.constant 0 : index
    %c0_13 = arith.constant 0 : index
    %19 = vector.load %arg6[%c0_12, %c0_13] : memref<8x128xf32, #tpu.memory_space<vmem>>, vector<8x128xf32>
    tpu.vector_store %arg6[%c0_12, %c0_13], %18 {strides = array<i32>} : memref<8x128xf32, #tpu.memory_space<vmem>>, vector<8x128xf32>,
    %20 = vector.shape_cast %16 : vector<1x128xf32> to vector<1x128xf32>
    %21 = vector.broadcast %20 : vector<1x128xf32> to vector<8x128xf32>
    %c0_14 = arith.constant 0 : index
    %c0_15 = arith.constant 0 : index
    %22 = vector.load %arg7[%c0_14, %c0_15] : memref<8x128xf32, #tpu.memory_space<vmem>>, vector<8x128xf32>
    tpu.vector_store %arg7[%c0_14, %c0_15], %21 {strides = array<i32>} : memref<8x128xf32, #tpu.memory_space<vmem>>, vector<8x128xf32>,
    return
  }
  func.func @transform_0(%arg0: i32) -> (i32, i32) {
    %c0_i32 = arith.constant 0 : i32
    %c0_i32_0 = arith.constant 0 : i32
    return %arg0, %c0_i32 : i32, i32
  }
  func.func @transform_1(%arg0: i32) -> (i32, i32) {
    %c0_i32 = arith.constant 0 : i32
    %c0_i32_0 = arith.constant 0 : i32
    %c0_i32_1 = arith.constant 0 : i32
    return %c0_i32, %c0_i32_0 : i32, i32
  }
  func.func @transform_2(%arg0: i32) -> (i32, i32) {
    %c0_i32 = arith.constant 0 : i32
    %c0_i32_0 = arith.constant 0 : i32
    %c0_i32_1 = arith.constant 0 : i32
    return %c0_i32, %c0_i32_0 : i32, i32
  }
  func.func @transform_3(%arg0: i32) -> (i32, i32) {
    %c0_i32 = arith.constant 0 : i32
    %c0_i32_0 = arith.constant 0 : i32
    %c0_i32_1 = arith.constant 0 : i32
    return %c0_i32, %c0_i32_0 : i32, i32
  }
  func.func @transform_4(%arg0: i32) -> (i32, i32) {
    %c0_i32 = arith.constant 0 : i32
    %c0_i32_0 = arith.constant 0 : i32
    return %arg0, %c0_i32 : i32, i32
  }
  func.func @transform_5(%arg0: i32) -> (i32, i32) {
    %c0_i32 = arith.constant 0 : i32
    %c0_i32_0 = arith.constant 0 : i32
    return %arg0, %c0_i32 : i32, i32
  }
  func.func @transform_6(%arg0: i32) -> (i32, i32) {
    %c0_i32 = arith.constant 0 : i32
    %c0_i32_0 = arith.constant 0 : i32
    return %arg0, %c0_i32 : i32, i32
  }
}

module attributes {stable_mosaic.version = 11 : i64} {
  func.func @_conv3x3_bn_kernel(%arg0: i32, %arg1: memref<1x16x16x128xf32, #tpu.memory_space<vmem>>, %arg2: memref<1x128xf32, #tpu.memory_space<vmem>>, %arg3: memref<1x128xf32, #tpu.memory_space<vmem>>, %arg4: memref<9x128x128xf32, #tpu.memory_space<vmem>>, %arg5: memref<1x256x128xf32, #tpu.memory_space<vmem>>, %arg6: memref<8x128xf32, #tpu.memory_space<vmem>>, %arg7: memref<8x128xf32, #tpu.memory_space<vmem>>, %arg8: memref<18x18x128xf32, #tpu.memory_space<vmem>>) attributes {dimension_semantics = [#tpu.dimension_semantics<parallel>], iteration_bounds = array<i64: 2>, scalar_prefetch = 0 : i64, scratch_operands = 1 : i64, tpu.core_type = #tpu.core_type<tc>, window_params = [{transform_indices = @transform_0, window_bounds = array<i64: 1, 16, 16, 128>}, {pipeline_mode = #tpu.pipeline_mode<synchronous>, transform_indices = @transform_1, window_bounds = array<i64: 1, 128>}, {pipeline_mode = #tpu.pipeline_mode<synchronous>, transform_indices = @transform_2, window_bounds = array<i64: 1, 128>}, {pipeline_mode = #tpu.pipeline_mode<synchronous>, transform_indices = @transform_3, window_bounds = array<i64: 9, 128, 128>}, {transform_indices = @transform_4, window_bounds = array<i64: 1, 256, 128>}, {transform_indices = @transform_5, window_bounds = array<i64: 8, 128>}, {transform_indices = @transform_6, window_bounds = array<i64: 8, 128>}]} {
    %cst = arith.constant 0.000000e+00 : f32
    %0 = vector.broadcast %cst : f32 to vector<1x18x128xf32>
    %cst_0 = arith.constant 0.000000e+00 : f32
    %1 = vector.broadcast %cst_0 : f32 to vector<18x1x128xf32>
    %c0 = arith.constant 0 : index
    %c0_1 = arith.constant 0 : index
    %c0_2 = arith.constant 0 : index
    %2 = vector.load %arg8[%c0, %c0_1, %c0_2] : memref<18x18x128xf32, #tpu.memory_space<vmem>>, vector<1x18x128xf32>
    tpu.vector_store %arg8[%c0, %c0_1, %c0_2], %0 {strides = array<i32>} : memref<18x18x128xf32, #tpu.memory_space<vmem>>, vector<1x18x128xf32>,
    %c17 = arith.constant 17 : index
    %c0_3 = arith.constant 0 : index
    %c0_4 = arith.constant 0 : index
    %3 = vector.load %arg8[%c17, %c0_3, %c0_4] : memref<18x18x128xf32, #tpu.memory_space<vmem>>, vector<1x18x128xf32>
    tpu.vector_store %arg8[%c17, %c0_3, %c0_4], %0 {strides = array<i32>} : memref<18x18x128xf32, #tpu.memory_space<vmem>>, vector<1x18x128xf32>,
    %c0_5 = arith.constant 0 : index
    %c0_6 = arith.constant 0 : index
    %c0_7 = arith.constant 0 : index
    %4 = vector.load %arg8[%c0_5, %c0_6, %c0_7] : memref<18x18x128xf32, #tpu.memory_space<vmem>>, vector<18x1x128xf32>
    tpu.vector_store %arg8[%c0_5, %c0_6, %c0_7], %1 {strides = array<i32>} : memref<18x18x128xf32, #tpu.memory_space<vmem>>, vector<18x1x128xf32>,
    %c0_8 = arith.constant 0 : index
    %c17_9 = arith.constant 17 : index
    %c0_10 = arith.constant 0 : index
    %5 = vector.load %arg8[%c0_8, %c17_9, %c0_10] : memref<18x18x128xf32, #tpu.memory_space<vmem>>, vector<18x1x128xf32>
    tpu.vector_store %arg8[%c0_8, %c17_9, %c0_10], %1 {strides = array<i32>} : memref<18x18x128xf32, #tpu.memory_space<vmem>>, vector<18x1x128xf32>,
    %c0_11 = arith.constant 0 : index
    %c0_12 = arith.constant 0 : index
    %c0_13 = arith.constant 0 : index
    %c0_14 = arith.constant 0 : index
    %6 = vector.load %arg1[%c0_11, %c0_12, %c0_13, %c0_14] : memref<1x16x16x128xf32, #tpu.memory_space<vmem>>, vector<1x16x16x128xf32>
    %7 = vector.shape_cast %6 : vector<1x16x16x128xf32> to vector<16x16x128xf32>
    %c0_15 = arith.constant 0 : index
    %c0_16 = arith.constant 0 : index
    %8 = vector.load %arg2[%c0_15, %c0_16] : memref<1x128xf32, #tpu.memory_space<vmem>>, vector<1x128xf32>
    %9 = vector.shape_cast %8 : vector<1x128xf32> to vector<1x1x128xf32>
    %10 = vector.broadcast %9 : vector<1x1x128xf32> to vector<16x16x128xf32>
    %11 = arith.mulf %7, %10 : vector<16x16x128xf32>
    %c0_17 = arith.constant 0 : index
    %c0_18 = arith.constant 0 : index
    %12 = vector.load %arg3[%c0_17, %c0_18] : memref<1x128xf32, #tpu.memory_space<vmem>>, vector<1x128xf32>
    %13 = vector.shape_cast %12 : vector<1x128xf32> to vector<1x1x128xf32>
    %14 = vector.broadcast %13 : vector<1x1x128xf32> to vector<16x16x128xf32>
    %15 = arith.addf %11, %14 : vector<16x16x128xf32>
    %cst_19 = arith.constant 0.000000e+00 : f32
    %16 = vector.broadcast %cst_19 : f32 to vector<16x16x128xf32>
    %17 = arith.maximumf %15, %16 : vector<16x16x128xf32>
    %c1 = arith.constant 1 : index
    %c1_20 = arith.constant 1 : index
    %c0_21 = arith.constant 0 : index
    %18 = vector.load %arg8[%c1, %c1_20, %c0_21] : memref<18x18x128xf32, #tpu.memory_space<vmem>>, vector<16x16x128xf32>
    tpu.vector_store %arg8[%c1, %c1_20, %c0_21], %17 {strides = array<i32>} : memref<18x18x128xf32, #tpu.memory_space<vmem>>, vector<16x16x128xf32>,
    %cst_22 = arith.constant 0.000000e+00 : f32
    %19 = vector.broadcast %cst_22 : f32 to vector<256x128xf32>
    %c0_23 = arith.constant 0 : index
    %c0_24 = arith.constant 0 : index
    %c0_25 = arith.constant 0 : index
    %20 = vector.load %arg8[%c0_23, %c0_24, %c0_25] : memref<18x18x128xf32, #tpu.memory_space<vmem>>, vector<16x16x128xf32>
    %21 = vector.shape_cast %20 : vector<16x16x128xf32> to vector<256x128xf32>
    %c0_26 = arith.constant 0 : index
    %c0_27 = arith.constant 0 : index
    %c0_28 = arith.constant 0 : index
    %22 = vector.load %arg4[%c0_26, %c0_27, %c0_28] : memref<9x128x128xf32, #tpu.memory_space<vmem>>, vector<1x128x128xf32>
    %23 = vector.shape_cast %22 : vector<1x128x128xf32> to vector<128x128xf32>
    %cst_29 = arith.constant dense<0.000000e+00> : vector<256x128xf32>
    %24 = tpu.matmul %21, %23, %cst_29 {dimension_numbers = #tpu.dot_dimension_numbers<[1], [0], [0], [1], [0, 0, 1, 1], [], []>} : vector<256x128xf32>, vector<128x128xf32>, vector<256x128xf32> -> vector<256x128xf32>
    %25 = arith.addf %19, %24 : vector<256x128xf32>
    %c0_30 = arith.constant 0 : index
    %c1_31 = arith.constant 1 : index
    %c0_32 = arith.constant 0 : index
    %26 = vector.load %arg8[%c0_30, %c1_31, %c0_32] : memref<18x18x128xf32, #tpu.memory_space<vmem>>, vector<16x16x128xf32>
    %27 = vector.shape_cast %26 : vector<16x16x128xf32> to vector<256x128xf32>
    %c1_33 = arith.constant 1 : index
    %c0_34 = arith.constant 0 : index
    %c0_35 = arith.constant 0 : index
    %28 = vector.load %arg4[%c1_33, %c0_34, %c0_35] : memref<9x128x128xf32, #tpu.memory_space<vmem>>, vector<1x128x128xf32>
    %29 = vector.shape_cast %28 : vector<1x128x128xf32> to vector<128x128xf32>
    %cst_36 = arith.constant dense<0.000000e+00> : vector<256x128xf32>
    %30 = tpu.matmul %27, %29, %cst_36 {dimension_numbers = #tpu.dot_dimension_numbers<[1], [0], [0], [1], [0, 0, 1, 1], [], []>} : vector<256x128xf32>, vector<128x128xf32>, vector<256x128xf32> -> vector<256x128xf32>
    %31 = arith.addf %25, %30 : vector<256x128xf32>
    %c0_37 = arith.constant 0 : index
    %c2 = arith.constant 2 : index
    %c0_38 = arith.constant 0 : index
    %32 = vector.load %arg8[%c0_37, %c2, %c0_38] : memref<18x18x128xf32, #tpu.memory_space<vmem>>, vector<16x16x128xf32>
    %33 = vector.shape_cast %32 : vector<16x16x128xf32> to vector<256x128xf32>
    %c2_39 = arith.constant 2 : index
    %c0_40 = arith.constant 0 : index
    %c0_41 = arith.constant 0 : index
    %34 = vector.load %arg4[%c2_39, %c0_40, %c0_41] : memref<9x128x128xf32, #tpu.memory_space<vmem>>, vector<1x128x128xf32>
    %35 = vector.shape_cast %34 : vector<1x128x128xf32> to vector<128x128xf32>
    %cst_42 = arith.constant dense<0.000000e+00> : vector<256x128xf32>
    %36 = tpu.matmul %33, %35, %cst_42 {dimension_numbers = #tpu.dot_dimension_numbers<[1], [0], [0], [1], [0, 0, 1, 1], [], []>} : vector<256x128xf32>, vector<128x128xf32>, vector<256x128xf32> -> vector<256x128xf32>
    %37 = arith.addf %31, %36 : vector<256x128xf32>
    %c1_43 = arith.constant 1 : index
    %c0_44 = arith.constant 0 : index
    %c0_45 = arith.constant 0 : index
    %38 = vector.load %arg8[%c1_43, %c0_44, %c0_45] : memref<18x18x128xf32, #tpu.memory_space<vmem>>, vector<16x16x128xf32>
    %39 = vector.shape_cast %38 : vector<16x16x128xf32> to vector<256x128xf32>
    %c3 = arith.constant 3 : index
    %c0_46 = arith.constant 0 : index
    %c0_47 = arith.constant 0 : index
    %40 = vector.load %arg4[%c3, %c0_46, %c0_47] : memref<9x128x128xf32, #tpu.memory_space<vmem>>, vector<1x128x128xf32>
    %41 = vector.shape_cast %40 : vector<1x128x128xf32> to vector<128x128xf32>
    %cst_48 = arith.constant dense<0.000000e+00> : vector<256x128xf32>
    %42 = tpu.matmul %39, %41, %cst_48 {dimension_numbers = #tpu.dot_dimension_numbers<[1], [0], [0], [1], [0, 0, 1, 1], [], []>} : vector<256x128xf32>, vector<128x128xf32>, vector<256x128xf32> -> vector<256x128xf32>
    %43 = arith.addf %37, %42 : vector<256x128xf32>
    %c1_49 = arith.constant 1 : index
    %c1_50 = arith.constant 1 : index
    %c0_51 = arith.constant 0 : index
    %44 = vector.load %arg8[%c1_49, %c1_50, %c0_51] : memref<18x18x128xf32, #tpu.memory_space<vmem>>, vector<16x16x128xf32>
    %45 = vector.shape_cast %44 : vector<16x16x128xf32> to vector<256x128xf32>
    %c4 = arith.constant 4 : index
    %c0_52 = arith.constant 0 : index
    %c0_53 = arith.constant 0 : index
    %46 = vector.load %arg4[%c4, %c0_52, %c0_53] : memref<9x128x128xf32, #tpu.memory_space<vmem>>, vector<1x128x128xf32>
    %47 = vector.shape_cast %46 : vector<1x128x128xf32> to vector<128x128xf32>
    %cst_54 = arith.constant dense<0.000000e+00> : vector<256x128xf32>
    %48 = tpu.matmul %45, %47, %cst_54 {dimension_numbers = #tpu.dot_dimension_numbers<[1], [0], [0], [1], [0, 0, 1, 1], [], []>} : vector<256x128xf32>, vector<128x128xf32>, vector<256x128xf32> -> vector<256x128xf32>
    %49 = arith.addf %43, %48 : vector<256x128xf32>
    %c1_55 = arith.constant 1 : index
    %c2_56 = arith.constant 2 : index
    %c0_57 = arith.constant 0 : index
    %50 = vector.load %arg8[%c1_55, %c2_56, %c0_57] : memref<18x18x128xf32, #tpu.memory_space<vmem>>, vector<16x16x128xf32>
    %51 = vector.shape_cast %50 : vector<16x16x128xf32> to vector<256x128xf32>
    %c5 = arith.constant 5 : index
    %c0_58 = arith.constant 0 : index
    %c0_59 = arith.constant 0 : index
    %52 = vector.load %arg4[%c5, %c0_58, %c0_59] : memref<9x128x128xf32, #tpu.memory_space<vmem>>, vector<1x128x128xf32>
    %53 = vector.shape_cast %52 : vector<1x128x128xf32> to vector<128x128xf32>
    %cst_60 = arith.constant dense<0.000000e+00> : vector<256x128xf32>
    %54 = tpu.matmul %51, %53, %cst_60 {dimension_numbers = #tpu.dot_dimension_numbers<[1], [0], [0], [1], [0, 0, 1, 1], [], []>} : vector<256x128xf32>, vector<128x128xf32>, vector<256x128xf32> -> vector<256x128xf32>
    %55 = arith.addf %49, %54 : vector<256x128xf32>
    %c2_61 = arith.constant 2 : index
    %c0_62 = arith.constant 0 : index
    %c0_63 = arith.constant 0 : index
    %56 = vector.load %arg8[%c2_61, %c0_62, %c0_63] : memref<18x18x128xf32, #tpu.memory_space<vmem>>, vector<16x16x128xf32>
    %57 = vector.shape_cast %56 : vector<16x16x128xf32> to vector<256x128xf32>
    %c6 = arith.constant 6 : index
    %c0_64 = arith.constant 0 : index
    %c0_65 = arith.constant 0 : index
    %58 = vector.load %arg4[%c6, %c0_64, %c0_65] : memref<9x128x128xf32, #tpu.memory_space<vmem>>, vector<1x128x128xf32>
    %59 = vector.shape_cast %58 : vector<1x128x128xf32> to vector<128x128xf32>
    %cst_66 = arith.constant dense<0.000000e+00> : vector<256x128xf32>
    %60 = tpu.matmul %57, %59, %cst_66 {dimension_numbers = #tpu.dot_dimension_numbers<[1], [0], [0], [1], [0, 0, 1, 1], [], []>} : vector<256x128xf32>, vector<128x128xf32>, vector<256x128xf32> -> vector<256x128xf32>
    %61 = arith.addf %55, %60 : vector<256x128xf32>
    %c2_67 = arith.constant 2 : index
    %c1_68 = arith.constant 1 : index
    %c0_69 = arith.constant 0 : index
    %62 = vector.load %arg8[%c2_67, %c1_68, %c0_69] : memref<18x18x128xf32, #tpu.memory_space<vmem>>, vector<16x16x128xf32>
    %63 = vector.shape_cast %62 : vector<16x16x128xf32> to vector<256x128xf32>
    %c7 = arith.constant 7 : index
    %c0_70 = arith.constant 0 : index
    %c0_71 = arith.constant 0 : index
    %64 = vector.load %arg4[%c7, %c0_70, %c0_71] : memref<9x128x128xf32, #tpu.memory_space<vmem>>, vector<1x128x128xf32>
    %65 = vector.shape_cast %64 : vector<1x128x128xf32> to vector<128x128xf32>
    %cst_72 = arith.constant dense<0.000000e+00> : vector<256x128xf32>
    %66 = tpu.matmul %63, %65, %cst_72 {dimension_numbers = #tpu.dot_dimension_numbers<[1], [0], [0], [1], [0, 0, 1, 1], [], []>} : vector<256x128xf32>, vector<128x128xf32>, vector<256x128xf32> -> vector<256x128xf32>
    %67 = arith.addf %61, %66 : vector<256x128xf32>
    %c2_73 = arith.constant 2 : index
    %c2_74 = arith.constant 2 : index
    %c0_75 = arith.constant 0 : index
    %68 = vector.load %arg8[%c2_73, %c2_74, %c0_75] : memref<18x18x128xf32, #tpu.memory_space<vmem>>, vector<16x16x128xf32>
    %69 = vector.shape_cast %68 : vector<16x16x128xf32> to vector<256x128xf32>
    %c8 = arith.constant 8 : index
    %c0_76 = arith.constant 0 : index
    %c0_77 = arith.constant 0 : index
    %70 = vector.load %arg4[%c8, %c0_76, %c0_77] : memref<9x128x128xf32, #tpu.memory_space<vmem>>, vector<1x128x128xf32>
    %71 = vector.shape_cast %70 : vector<1x128x128xf32> to vector<128x128xf32>
    %cst_78 = arith.constant dense<0.000000e+00> : vector<256x128xf32>
    %72 = tpu.matmul %69, %71, %cst_78 {dimension_numbers = #tpu.dot_dimension_numbers<[1], [0], [0], [1], [0, 0, 1, 1], [], []>} : vector<256x128xf32>, vector<128x128xf32>, vector<256x128xf32> -> vector<256x128xf32>
    %73 = arith.addf %67, %72 : vector<256x128xf32>
    %c0_79 = arith.constant 0 : index
    %c0_80 = arith.constant 0 : index
    %c0_81 = arith.constant 0 : index
    %74 = vector.load %arg5[%c0_79, %c0_80, %c0_81] : memref<1x256x128xf32, #tpu.memory_space<vmem>>, vector<1x256x128xf32>
    %75 = vector.shape_cast %74 : vector<1x256x128xf32> to vector<256x128xf32>
    %76 = vector.shape_cast %73 : vector<256x128xf32> to vector<1x256x128xf32>
    tpu.vector_store %arg5[%c0_79, %c0_80, %c0_81], %76 {strides = array<i32>} : memref<1x256x128xf32, #tpu.memory_space<vmem>>, vector<1x256x128xf32>,
    %cst_82 = arith.constant dense<0.000000e+00> : vector<128xf32>
    %77 = vector.multi_reduction <add>, %73, %cst_82 [0] : vector<256x128xf32> to vector<128xf32>
    %78 = vector.shape_cast %77 : vector<128xf32> to vector<1x128xf32>
    %79 = arith.mulf %73, %73 : vector<256x128xf32>
    %cst_83 = arith.constant dense<0.000000e+00> : vector<128xf32>
    %80 = vector.multi_reduction <add>, %79, %cst_83 [0] : vector<256x128xf32> to vector<128xf32>
    %81 = vector.shape_cast %80 : vector<128xf32> to vector<1x128xf32>
    %82 = vector.shape_cast %78 : vector<1x128xf32> to vector<1x128xf32>
    %83 = vector.broadcast %82 : vector<1x128xf32> to vector<8x128xf32>
    %c0_84 = arith.constant 0 : index
    %c0_85 = arith.constant 0 : index
    %84 = vector.load %arg6[%c0_84, %c0_85] : memref<8x128xf32, #tpu.memory_space<vmem>>, vector<8x128xf32>
    tpu.vector_store %arg6[%c0_84, %c0_85], %83 {strides = array<i32>} : memref<8x128xf32, #tpu.memory_space<vmem>>, vector<8x128xf32>,
    %85 = vector.shape_cast %81 : vector<1x128xf32> to vector<1x128xf32>
    %86 = vector.broadcast %85 : vector<1x128xf32> to vector<8x128xf32>
    %c0_86 = arith.constant 0 : index
    %c0_87 = arith.constant 0 : index
    %87 = vector.load %arg7[%c0_86, %c0_87] : memref<8x128xf32, #tpu.memory_space<vmem>>, vector<8x128xf32>
    tpu.vector_store %arg7[%c0_86, %c0_87], %86 {strides = array<i32>} : memref<8x128xf32, #tpu.memory_space<vmem>>, vector<8x128xf32>,
    return
  }
  func.func @transform_0(%arg0: i32) -> (i32, i32, i32, i32) {
    %c0_i32 = arith.constant 0 : i32
    %c0_i32_0 = arith.constant 0 : i32
    %c0_i32_1 = arith.constant 0 : i32
    %c0_i32_2 = arith.constant 0 : i32
    return %arg0, %c0_i32, %c0_i32_0, %c0_i32_1 : i32, i32, i32, i32
  }
  func.func @transform_1(%arg0: i32) -> (i32, i32) {
    %c0_i32 = arith.constant 0 : i32
    %c0_i32_0 = arith.constant 0 : i32
    %c0_i32_1 = arith.constant 0 : i32
    return %c0_i32, %c0_i32_0 : i32, i32
  }
  func.func @transform_2(%arg0: i32) -> (i32, i32) {
    %c0_i32 = arith.constant 0 : i32
    %c0_i32_0 = arith.constant 0 : i32
    %c0_i32_1 = arith.constant 0 : i32
    return %c0_i32, %c0_i32_0 : i32, i32
  }
  func.func @transform_3(%arg0: i32) -> (i32, i32, i32) {
    %c0_i32 = arith.constant 0 : i32
    %c0_i32_0 = arith.constant 0 : i32
    %c0_i32_1 = arith.constant 0 : i32
    %c0_i32_2 = arith.constant 0 : i32
    return %c0_i32, %c0_i32_0, %c0_i32_1 : i32, i32, i32
  }
  func.func @transform_4(%arg0: i32) -> (i32, i32, i32) {
    %c0_i32 = arith.constant 0 : i32
    %c0_i32_0 = arith.constant 0 : i32
    %c0_i32_1 = arith.constant 0 : i32
    return %arg0, %c0_i32, %c0_i32_0 : i32, i32, i32
  }
  func.func @transform_5(%arg0: i32) -> (i32, i32) {
    %c0_i32 = arith.constant 0 : i32
    %c0_i32_0 = arith.constant 0 : i32
    return %arg0, %c0_i32 : i32, i32
  }
  func.func @transform_6(%arg0: i32) -> (i32, i32) {
    %c0_i32 = arith.constant 0 : i32
    %c0_i32_0 = arith.constant 0 : i32
    return %arg0, %c0_i32 : i32, i32
  }
}

module attributes {stable_mosaic.version = 11 : i64} {
  func.func @_conv3x3_bn_kernel(%arg0: i32, %arg1: memref<1x16x16x128xf32, #tpu.memory_space<vmem>>, %arg2: memref<1x128xf32, #tpu.memory_space<vmem>>, %arg3: memref<1x128xf32, #tpu.memory_space<vmem>>, %arg4: memref<9x128x128xf32, #tpu.memory_space<vmem>>, %arg5: memref<1x256x128xf32, #tpu.memory_space<vmem>>, %arg6: memref<8x128xf32, #tpu.memory_space<vmem>>, %arg7: memref<8x128xf32, #tpu.memory_space<vmem>>, %arg8: memref<20x20x128xf32, #tpu.memory_space<vmem>>) attributes {dimension_semantics = [#tpu.dimension_semantics<parallel>], iteration_bounds = array<i64: 2>, scalar_prefetch = 0 : i64, scratch_operands = 1 : i64, tpu.core_type = #tpu.core_type<tc>, window_params = [{transform_indices = @transform_0, window_bounds = array<i64: 1, 16, 16, 128>}, {pipeline_mode = #tpu.pipeline_mode<synchronous>, transform_indices = @transform_1, window_bounds = array<i64: 1, 128>}, {pipeline_mode = #tpu.pipeline_mode<synchronous>, transform_indices = @transform_2, window_bounds = array<i64: 1, 128>}, {pipeline_mode = #tpu.pipeline_mode<synchronous>, transform_indices = @transform_3, window_bounds = array<i64: 9, 128, 128>}, {transform_indices = @transform_4, window_bounds = array<i64: 1, 256, 128>}, {transform_indices = @transform_5, window_bounds = array<i64: 8, 128>}, {transform_indices = @transform_6, window_bounds = array<i64: 8, 128>}]} {
    %cst = arith.constant 0.000000e+00 : f32
    %0 = vector.broadcast %cst : f32 to vector<2x20x128xf32>
    %cst_0 = arith.constant 0.000000e+00 : f32
    %1 = vector.broadcast %cst_0 : f32 to vector<20x2x128xf32>
    %c0 = arith.constant 0 : index
    %c0_1 = arith.constant 0 : index
    %c0_2 = arith.constant 0 : index
    %2 = vector.load %arg8[%c0, %c0_1, %c0_2] : memref<20x20x128xf32, #tpu.memory_space<vmem>>, vector<2x20x128xf32>
    tpu.vector_store %arg8[%c0, %c0_1, %c0_2], %0 {strides = array<i32>} : memref<20x20x128xf32, #tpu.memory_space<vmem>>, vector<2x20x128xf32>,
    %c18 = arith.constant 18 : index
    %c0_3 = arith.constant 0 : index
    %c0_4 = arith.constant 0 : index
    %3 = vector.load %arg8[%c18, %c0_3, %c0_4] : memref<20x20x128xf32, #tpu.memory_space<vmem>>, vector<2x20x128xf32>
    tpu.vector_store %arg8[%c18, %c0_3, %c0_4], %0 {strides = array<i32>} : memref<20x20x128xf32, #tpu.memory_space<vmem>>, vector<2x20x128xf32>,
    %c0_5 = arith.constant 0 : index
    %c0_6 = arith.constant 0 : index
    %c0_7 = arith.constant 0 : index
    %4 = vector.load %arg8[%c0_5, %c0_6, %c0_7] : memref<20x20x128xf32, #tpu.memory_space<vmem>>, vector<20x2x128xf32>
    tpu.vector_store %arg8[%c0_5, %c0_6, %c0_7], %1 {strides = array<i32>} : memref<20x20x128xf32, #tpu.memory_space<vmem>>, vector<20x2x128xf32>,
    %c0_8 = arith.constant 0 : index
    %c18_9 = arith.constant 18 : index
    %c0_10 = arith.constant 0 : index
    %5 = vector.load %arg8[%c0_8, %c18_9, %c0_10] : memref<20x20x128xf32, #tpu.memory_space<vmem>>, vector<20x2x128xf32>
    tpu.vector_store %arg8[%c0_8, %c18_9, %c0_10], %1 {strides = array<i32>} : memref<20x20x128xf32, #tpu.memory_space<vmem>>, vector<20x2x128xf32>,
    %c0_11 = arith.constant 0 : index
    %c0_12 = arith.constant 0 : index
    %c0_13 = arith.constant 0 : index
    %c0_14 = arith.constant 0 : index
    %6 = vector.load %arg1[%c0_11, %c0_12, %c0_13, %c0_14] : memref<1x16x16x128xf32, #tpu.memory_space<vmem>>, vector<1x16x16x128xf32>
    %7 = vector.shape_cast %6 : vector<1x16x16x128xf32> to vector<16x16x128xf32>
    %c0_15 = arith.constant 0 : index
    %c0_16 = arith.constant 0 : index
    %8 = vector.load %arg2[%c0_15, %c0_16] : memref<1x128xf32, #tpu.memory_space<vmem>>, vector<1x128xf32>
    %9 = vector.shape_cast %8 : vector<1x128xf32> to vector<1x1x128xf32>
    %10 = vector.broadcast %9 : vector<1x1x128xf32> to vector<16x16x128xf32>
    %11 = arith.mulf %7, %10 : vector<16x16x128xf32>
    %c0_17 = arith.constant 0 : index
    %c0_18 = arith.constant 0 : index
    %12 = vector.load %arg3[%c0_17, %c0_18] : memref<1x128xf32, #tpu.memory_space<vmem>>, vector<1x128xf32>
    %13 = vector.shape_cast %12 : vector<1x128xf32> to vector<1x1x128xf32>
    %14 = vector.broadcast %13 : vector<1x1x128xf32> to vector<16x16x128xf32>
    %15 = arith.addf %11, %14 : vector<16x16x128xf32>
    %cst_19 = arith.constant 0.000000e+00 : f32
    %16 = vector.broadcast %cst_19 : f32 to vector<16x16x128xf32>
    %17 = arith.maximumf %15, %16 : vector<16x16x128xf32>
    %c2 = arith.constant 2 : index
    %c2_20 = arith.constant 2 : index
    %c0_21 = arith.constant 0 : index
    %18 = vector.load %arg8[%c2, %c2_20, %c0_21] : memref<20x20x128xf32, #tpu.memory_space<vmem>>, vector<16x16x128xf32>
    tpu.vector_store %arg8[%c2, %c2_20, %c0_21], %17 {strides = array<i32>} : memref<20x20x128xf32, #tpu.memory_space<vmem>>, vector<16x16x128xf32>,
    %cst_22 = arith.constant 0.000000e+00 : f32
    %19 = vector.broadcast %cst_22 : f32 to vector<256x128xf32>
    %c0_23 = arith.constant 0 : index
    %c0_24 = arith.constant 0 : index
    %c0_25 = arith.constant 0 : index
    %20 = vector.load %arg8[%c0_23, %c0_24, %c0_25] : memref<20x20x128xf32, #tpu.memory_space<vmem>>, vector<16x16x128xf32>
    %21 = vector.shape_cast %20 : vector<16x16x128xf32> to vector<256x128xf32>
    %c0_26 = arith.constant 0 : index
    %c0_27 = arith.constant 0 : index
    %c0_28 = arith.constant 0 : index
    %22 = vector.load %arg4[%c0_26, %c0_27, %c0_28] : memref<9x128x128xf32, #tpu.memory_space<vmem>>, vector<1x128x128xf32>
    %23 = vector.shape_cast %22 : vector<1x128x128xf32> to vector<128x128xf32>
    %cst_29 = arith.constant dense<0.000000e+00> : vector<256x128xf32>
    %24 = tpu.matmul %21, %23, %cst_29 {dimension_numbers = #tpu.dot_dimension_numbers<[1], [0], [0], [1], [0, 0, 1, 1], [], []>} : vector<256x128xf32>, vector<128x128xf32>, vector<256x128xf32> -> vector<256x128xf32>
    %25 = arith.addf %19, %24 : vector<256x128xf32>
    %c0_30 = arith.constant 0 : index
    %c2_31 = arith.constant 2 : index
    %c0_32 = arith.constant 0 : index
    %26 = vector.load %arg8[%c0_30, %c2_31, %c0_32] : memref<20x20x128xf32, #tpu.memory_space<vmem>>, vector<16x16x128xf32>
    %27 = vector.shape_cast %26 : vector<16x16x128xf32> to vector<256x128xf32>
    %c1 = arith.constant 1 : index
    %c0_33 = arith.constant 0 : index
    %c0_34 = arith.constant 0 : index
    %28 = vector.load %arg4[%c1, %c0_33, %c0_34] : memref<9x128x128xf32, #tpu.memory_space<vmem>>, vector<1x128x128xf32>
    %29 = vector.shape_cast %28 : vector<1x128x128xf32> to vector<128x128xf32>
    %cst_35 = arith.constant dense<0.000000e+00> : vector<256x128xf32>
    %30 = tpu.matmul %27, %29, %cst_35 {dimension_numbers = #tpu.dot_dimension_numbers<[1], [0], [0], [1], [0, 0, 1, 1], [], []>} : vector<256x128xf32>, vector<128x128xf32>, vector<256x128xf32> -> vector<256x128xf32>
    %31 = arith.addf %25, %30 : vector<256x128xf32>
    %c0_36 = arith.constant 0 : index
    %c4 = arith.constant 4 : index
    %c0_37 = arith.constant 0 : index
    %32 = vector.load %arg8[%c0_36, %c4, %c0_37] : memref<20x20x128xf32, #tpu.memory_space<vmem>>, vector<16x16x128xf32>
    %33 = vector.shape_cast %32 : vector<16x16x128xf32> to vector<256x128xf32>
    %c2_38 = arith.constant 2 : index
    %c0_39 = arith.constant 0 : index
    %c0_40 = arith.constant 0 : index
    %34 = vector.load %arg4[%c2_38, %c0_39, %c0_40] : memref<9x128x128xf32, #tpu.memory_space<vmem>>, vector<1x128x128xf32>
    %35 = vector.shape_cast %34 : vector<1x128x128xf32> to vector<128x128xf32>
    %cst_41 = arith.constant dense<0.000000e+00> : vector<256x128xf32>
    %36 = tpu.matmul %33, %35, %cst_41 {dimension_numbers = #tpu.dot_dimension_numbers<[1], [0], [0], [1], [0, 0, 1, 1], [], []>} : vector<256x128xf32>, vector<128x128xf32>, vector<256x128xf32> -> vector<256x128xf32>
    %37 = arith.addf %31, %36 : vector<256x128xf32>
    %c2_42 = arith.constant 2 : index
    %c0_43 = arith.constant 0 : index
    %c0_44 = arith.constant 0 : index
    %38 = vector.load %arg8[%c2_42, %c0_43, %c0_44] : memref<20x20x128xf32, #tpu.memory_space<vmem>>, vector<16x16x128xf32>
    %39 = vector.shape_cast %38 : vector<16x16x128xf32> to vector<256x128xf32>
    %c3 = arith.constant 3 : index
    %c0_45 = arith.constant 0 : index
    %c0_46 = arith.constant 0 : index
    %40 = vector.load %arg4[%c3, %c0_45, %c0_46] : memref<9x128x128xf32, #tpu.memory_space<vmem>>, vector<1x128x128xf32>
    %41 = vector.shape_cast %40 : vector<1x128x128xf32> to vector<128x128xf32>
    %cst_47 = arith.constant dense<0.000000e+00> : vector<256x128xf32>
    %42 = tpu.matmul %39, %41, %cst_47 {dimension_numbers = #tpu.dot_dimension_numbers<[1], [0], [0], [1], [0, 0, 1, 1], [], []>} : vector<256x128xf32>, vector<128x128xf32>, vector<256x128xf32> -> vector<256x128xf32>
    %43 = arith.addf %37, %42 : vector<256x128xf32>
    %c2_48 = arith.constant 2 : index
    %c2_49 = arith.constant 2 : index
    %c0_50 = arith.constant 0 : index
    %44 = vector.load %arg8[%c2_48, %c2_49, %c0_50] : memref<20x20x128xf32, #tpu.memory_space<vmem>>, vector<16x16x128xf32>
    %45 = vector.shape_cast %44 : vector<16x16x128xf32> to vector<256x128xf32>
    %c4_51 = arith.constant 4 : index
    %c0_52 = arith.constant 0 : index
    %c0_53 = arith.constant 0 : index
    %46 = vector.load %arg4[%c4_51, %c0_52, %c0_53] : memref<9x128x128xf32, #tpu.memory_space<vmem>>, vector<1x128x128xf32>
    %47 = vector.shape_cast %46 : vector<1x128x128xf32> to vector<128x128xf32>
    %cst_54 = arith.constant dense<0.000000e+00> : vector<256x128xf32>
    %48 = tpu.matmul %45, %47, %cst_54 {dimension_numbers = #tpu.dot_dimension_numbers<[1], [0], [0], [1], [0, 0, 1, 1], [], []>} : vector<256x128xf32>, vector<128x128xf32>, vector<256x128xf32> -> vector<256x128xf32>
    %49 = arith.addf %43, %48 : vector<256x128xf32>
    %c2_55 = arith.constant 2 : index
    %c4_56 = arith.constant 4 : index
    %c0_57 = arith.constant 0 : index
    %50 = vector.load %arg8[%c2_55, %c4_56, %c0_57] : memref<20x20x128xf32, #tpu.memory_space<vmem>>, vector<16x16x128xf32>
    %51 = vector.shape_cast %50 : vector<16x16x128xf32> to vector<256x128xf32>
    %c5 = arith.constant 5 : index
    %c0_58 = arith.constant 0 : index
    %c0_59 = arith.constant 0 : index
    %52 = vector.load %arg4[%c5, %c0_58, %c0_59] : memref<9x128x128xf32, #tpu.memory_space<vmem>>, vector<1x128x128xf32>
    %53 = vector.shape_cast %52 : vector<1x128x128xf32> to vector<128x128xf32>
    %cst_60 = arith.constant dense<0.000000e+00> : vector<256x128xf32>
    %54 = tpu.matmul %51, %53, %cst_60 {dimension_numbers = #tpu.dot_dimension_numbers<[1], [0], [0], [1], [0, 0, 1, 1], [], []>} : vector<256x128xf32>, vector<128x128xf32>, vector<256x128xf32> -> vector<256x128xf32>
    %55 = arith.addf %49, %54 : vector<256x128xf32>
    %c4_61 = arith.constant 4 : index
    %c0_62 = arith.constant 0 : index
    %c0_63 = arith.constant 0 : index
    %56 = vector.load %arg8[%c4_61, %c0_62, %c0_63] : memref<20x20x128xf32, #tpu.memory_space<vmem>>, vector<16x16x128xf32>
    %57 = vector.shape_cast %56 : vector<16x16x128xf32> to vector<256x128xf32>
    %c6 = arith.constant 6 : index
    %c0_64 = arith.constant 0 : index
    %c0_65 = arith.constant 0 : index
    %58 = vector.load %arg4[%c6, %c0_64, %c0_65] : memref<9x128x128xf32, #tpu.memory_space<vmem>>, vector<1x128x128xf32>
    %59 = vector.shape_cast %58 : vector<1x128x128xf32> to vector<128x128xf32>
    %cst_66 = arith.constant dense<0.000000e+00> : vector<256x128xf32>
    %60 = tpu.matmul %57, %59, %cst_66 {dimension_numbers = #tpu.dot_dimension_numbers<[1], [0], [0], [1], [0, 0, 1, 1], [], []>} : vector<256x128xf32>, vector<128x128xf32>, vector<256x128xf32> -> vector<256x128xf32>
    %61 = arith.addf %55, %60 : vector<256x128xf32>
    %c4_67 = arith.constant 4 : index
    %c2_68 = arith.constant 2 : index
    %c0_69 = arith.constant 0 : index
    %62 = vector.load %arg8[%c4_67, %c2_68, %c0_69] : memref<20x20x128xf32, #tpu.memory_space<vmem>>, vector<16x16x128xf32>
    %63 = vector.shape_cast %62 : vector<16x16x128xf32> to vector<256x128xf32>
    %c7 = arith.constant 7 : index
    %c0_70 = arith.constant 0 : index
    %c0_71 = arith.constant 0 : index
    %64 = vector.load %arg4[%c7, %c0_70, %c0_71] : memref<9x128x128xf32, #tpu.memory_space<vmem>>, vector<1x128x128xf32>
    %65 = vector.shape_cast %64 : vector<1x128x128xf32> to vector<128x128xf32>
    %cst_72 = arith.constant dense<0.000000e+00> : vector<256x128xf32>
    %66 = tpu.matmul %63, %65, %cst_72 {dimension_numbers = #tpu.dot_dimension_numbers<[1], [0], [0], [1], [0, 0, 1, 1], [], []>} : vector<256x128xf32>, vector<128x128xf32>, vector<256x128xf32> -> vector<256x128xf32>
    %67 = arith.addf %61, %66 : vector<256x128xf32>
    %c4_73 = arith.constant 4 : index
    %c4_74 = arith.constant 4 : index
    %c0_75 = arith.constant 0 : index
    %68 = vector.load %arg8[%c4_73, %c4_74, %c0_75] : memref<20x20x128xf32, #tpu.memory_space<vmem>>, vector<16x16x128xf32>
    %69 = vector.shape_cast %68 : vector<16x16x128xf32> to vector<256x128xf32>
    %c8 = arith.constant 8 : index
    %c0_76 = arith.constant 0 : index
    %c0_77 = arith.constant 0 : index
    %70 = vector.load %arg4[%c8, %c0_76, %c0_77] : memref<9x128x128xf32, #tpu.memory_space<vmem>>, vector<1x128x128xf32>
    %71 = vector.shape_cast %70 : vector<1x128x128xf32> to vector<128x128xf32>
    %cst_78 = arith.constant dense<0.000000e+00> : vector<256x128xf32>
    %72 = tpu.matmul %69, %71, %cst_78 {dimension_numbers = #tpu.dot_dimension_numbers<[1], [0], [0], [1], [0, 0, 1, 1], [], []>} : vector<256x128xf32>, vector<128x128xf32>, vector<256x128xf32> -> vector<256x128xf32>
    %73 = arith.addf %67, %72 : vector<256x128xf32>
    %c0_79 = arith.constant 0 : index
    %c0_80 = arith.constant 0 : index
    %c0_81 = arith.constant 0 : index
    %74 = vector.load %arg5[%c0_79, %c0_80, %c0_81] : memref<1x256x128xf32, #tpu.memory_space<vmem>>, vector<1x256x128xf32>
    %75 = vector.shape_cast %74 : vector<1x256x128xf32> to vector<256x128xf32>
    %76 = vector.shape_cast %73 : vector<256x128xf32> to vector<1x256x128xf32>
    tpu.vector_store %arg5[%c0_79, %c0_80, %c0_81], %76 {strides = array<i32>} : memref<1x256x128xf32, #tpu.memory_space<vmem>>, vector<1x256x128xf32>,
    %cst_82 = arith.constant dense<0.000000e+00> : vector<128xf32>
    %77 = vector.multi_reduction <add>, %73, %cst_82 [0] : vector<256x128xf32> to vector<128xf32>
    %78 = vector.shape_cast %77 : vector<128xf32> to vector<1x128xf32>
    %79 = arith.mulf %73, %73 : vector<256x128xf32>
    %cst_83 = arith.constant dense<0.000000e+00> : vector<128xf32>
    %80 = vector.multi_reduction <add>, %79, %cst_83 [0] : vector<256x128xf32> to vector<128xf32>
    %81 = vector.shape_cast %80 : vector<128xf32> to vector<1x128xf32>
    %82 = vector.shape_cast %78 : vector<1x128xf32> to vector<1x128xf32>
    %83 = vector.broadcast %82 : vector<1x128xf32> to vector<8x128xf32>
    %c0_84 = arith.constant 0 : index
    %c0_85 = arith.constant 0 : index
    %84 = vector.load %arg6[%c0_84, %c0_85] : memref<8x128xf32, #tpu.memory_space<vmem>>, vector<8x128xf32>
    tpu.vector_store %arg6[%c0_84, %c0_85], %83 {strides = array<i32>} : memref<8x128xf32, #tpu.memory_space<vmem>>, vector<8x128xf32>,
    %85 = vector.shape_cast %81 : vector<1x128xf32> to vector<1x128xf32>
    %86 = vector.broadcast %85 : vector<1x128xf32> to vector<8x128xf32>
    %c0_86 = arith.constant 0 : index
    %c0_87 = arith.constant 0 : index
    %87 = vector.load %arg7[%c0_86, %c0_87] : memref<8x128xf32, #tpu.memory_space<vmem>>, vector<8x128xf32>
    tpu.vector_store %arg7[%c0_86, %c0_87], %86 {strides = array<i32>} : memref<8x128xf32, #tpu.memory_space<vmem>>, vector<8x128xf32>,
    return
  }
  func.func @transform_0(%arg0: i32) -> (i32, i32, i32, i32) {
    %c0_i32 = arith.constant 0 : i32
    %c0_i32_0 = arith.constant 0 : i32
    %c0_i32_1 = arith.constant 0 : i32
    %c0_i32_2 = arith.constant 0 : i32
    return %arg0, %c0_i32, %c0_i32_0, %c0_i32_1 : i32, i32, i32, i32
  }
  func.func @transform_1(%arg0: i32) -> (i32, i32) {
    %c0_i32 = arith.constant 0 : i32
    %c0_i32_0 = arith.constant 0 : i32
    %c0_i32_1 = arith.constant 0 : i32
    return %c0_i32, %c0_i32_0 : i32, i32
  }
  func.func @transform_2(%arg0: i32) -> (i32, i32) {
    %c0_i32 = arith.constant 0 : i32
    %c0_i32_0 = arith.constant 0 : i32
    %c0_i32_1 = arith.constant 0 : i32
    return %c0_i32, %c0_i32_0 : i32, i32
  }
  func.func @transform_3(%arg0: i32) -> (i32, i32, i32) {
    %c0_i32 = arith.constant 0 : i32
    %c0_i32_0 = arith.constant 0 : i32
    %c0_i32_1 = arith.constant 0 : i32
    %c0_i32_2 = arith.constant 0 : i32
    return %c0_i32, %c0_i32_0, %c0_i32_1 : i32, i32, i32
  }
  func.func @transform_4(%arg0: i32) -> (i32, i32, i32) {
    %c0_i32 = arith.constant 0 : i32
    %c0_i32_0 = arith.constant 0 : i32
    %c0_i32_1 = arith.constant 0 : i32
    return %arg0, %c0_i32, %c0_i32_0 : i32, i32, i32
  }
  func.func @transform_5(%arg0: i32) -> (i32, i32) {
    %c0_i32 = arith.constant 0 : i32
    %c0_i32_0 = arith.constant 0 : i32
    return %arg0, %c0_i32 : i32, i32
  }
  func.func @transform_6(%arg0: i32) -> (i32, i32) {
    %c0_i32 = arith.constant 0 : i32
    %c0_i32_0 = arith.constant 0 : i32
    return %arg0, %c0_i32 : i32, i32
  }
}

module attributes {stable_mosaic.version = 11 : i64} {
  func.func @_norm_relu_residual_kernel(%arg0: i32, %arg1: memref<128x128xf32, #tpu.memory_space<vmem>>, %arg2: memref<1x128xf32, #tpu.memory_space<vmem>>, %arg3: memref<1x128xf32, #tpu.memory_space<vmem>>, %arg4: memref<128x128xf32, #tpu.memory_space<vmem>>, %arg5: memref<1x128xf32, #tpu.memory_space<vmem>>, %arg6: memref<1x128xf32, #tpu.memory_space<vmem>>, %arg7: memref<128x128xf32, #tpu.memory_space<vmem>>) attributes {dimension_semantics = [#tpu.dimension_semantics<parallel>], iteration_bounds = array<i64: 4>, scalar_prefetch = 0 : i64, scratch_operands = 0 : i64, tpu.core_type = #tpu.core_type<tc>, window_params = [{transform_indices = @transform_0, window_bounds = array<i64: 128, 128>}, {pipeline_mode = #tpu.pipeline_mode<synchronous>, transform_indices = @transform_1, window_bounds = array<i64: 1, 128>}, {pipeline_mode = #tpu.pipeline_mode<synchronous>, transform_indices = @transform_2, window_bounds = array<i64: 1, 128>}, {transform_indices = @transform_3, window_bounds = array<i64: 128, 128>}, {pipeline_mode = #tpu.pipeline_mode<synchronous>, transform_indices = @transform_4, window_bounds = array<i64: 1, 128>}, {pipeline_mode = #tpu.pipeline_mode<synchronous>, transform_indices = @transform_5, window_bounds = array<i64: 1, 128>}, {transform_indices = @transform_6, window_bounds = array<i64: 128, 128>}]} {
    %c0 = arith.constant 0 : index
    %c0_0 = arith.constant 0 : index
    %0 = vector.load %arg1[%c0, %c0_0] : memref<128x128xf32, #tpu.memory_space<vmem>>, vector<128x128xf32>
    %c0_1 = arith.constant 0 : index
    %c0_2 = arith.constant 0 : index
    %1 = vector.load %arg2[%c0_1, %c0_2] : memref<1x128xf32, #tpu.memory_space<vmem>>, vector<1x128xf32>
    %2 = vector.broadcast %1 : vector<1x128xf32> to vector<128x128xf32>
    %3 = arith.mulf %0, %2 : vector<128x128xf32>
    %c0_3 = arith.constant 0 : index
    %c0_4 = arith.constant 0 : index
    %4 = vector.load %arg3[%c0_3, %c0_4] : memref<1x128xf32, #tpu.memory_space<vmem>>, vector<1x128xf32>
    %5 = vector.broadcast %4 : vector<1x128xf32> to vector<128x128xf32>
    %6 = arith.addf %3, %5 : vector<128x128xf32>
    %cst = arith.constant 0.000000e+00 : f32
    %7 = vector.broadcast %cst : f32 to vector<128x128xf32>
    %8 = arith.maximumf %6, %7 : vector<128x128xf32>
    %c0_5 = arith.constant 0 : index
    %c0_6 = arith.constant 0 : index
    %9 = vector.load %arg4[%c0_5, %c0_6] : memref<128x128xf32, #tpu.memory_space<vmem>>, vector<128x128xf32>
    %c0_7 = arith.constant 0 : index
    %c0_8 = arith.constant 0 : index
    %10 = vector.load %arg5[%c0_7, %c0_8] : memref<1x128xf32, #tpu.memory_space<vmem>>, vector<1x128xf32>
    %11 = vector.broadcast %10 : vector<1x128xf32> to vector<128x128xf32>
    %12 = arith.mulf %9, %11 : vector<128x128xf32>
    %c0_9 = arith.constant 0 : index
    %c0_10 = arith.constant 0 : index
    %13 = vector.load %arg6[%c0_9, %c0_10] : memref<1x128xf32, #tpu.memory_space<vmem>>, vector<1x128xf32>
    %14 = vector.broadcast %13 : vector<1x128xf32> to vector<128x128xf32>
    %15 = arith.addf %12, %14 : vector<128x128xf32>
    %cst_11 = arith.constant 0.000000e+00 : f32
    %16 = vector.broadcast %cst_11 : f32 to vector<128x128xf32>
    %17 = arith.maximumf %15, %16 : vector<128x128xf32>
    %18 = arith.addf %8, %17 : vector<128x128xf32>
    %c0_12 = arith.constant 0 : index
    %c0_13 = arith.constant 0 : index
    %19 = vector.load %arg7[%c0_12, %c0_13] : memref<128x128xf32, #tpu.memory_space<vmem>>, vector<128x128xf32>
    tpu.vector_store %arg7[%c0_12, %c0_13], %18 {strides = array<i32>} : memref<128x128xf32, #tpu.memory_space<vmem>>, vector<128x128xf32>,
    return
  }
  func.func @transform_0(%arg0: i32) -> (i32, i32) {
    %c0_i32 = arith.constant 0 : i32
    %c0_i32_0 = arith.constant 0 : i32
    return %arg0, %c0_i32 : i32, i32
  }
  func.func @transform_1(%arg0: i32) -> (i32, i32) {
    %c0_i32 = arith.constant 0 : i32
    %c0_i32_0 = arith.constant 0 : i32
    %c0_i32_1 = arith.constant 0 : i32
    return %c0_i32, %c0_i32_0 : i32, i32
  }
  func.func @transform_2(%arg0: i32) -> (i32, i32) {
    %c0_i32 = arith.constant 0 : i32
    %c0_i32_0 = arith.constant 0 : i32
    %c0_i32_1 = arith.constant 0 : i32
    return %c0_i32, %c0_i32_0 : i32, i32
  }
  func.func @transform_3(%arg0: i32) -> (i32, i32) {
    %c0_i32 = arith.constant 0 : i32
    %c0_i32_0 = arith.constant 0 : i32
    return %arg0, %c0_i32 : i32, i32
  }
  func.func @transform_4(%arg0: i32) -> (i32, i32) {
    %c0_i32 = arith.constant 0 : i32
    %c0_i32_0 = arith.constant 0 : i32
    %c0_i32_1 = arith.constant 0 : i32
    return %c0_i32, %c0_i32_0 : i32, i32
  }
  func.func @transform_5(%arg0: i32) -> (i32, i32) {
    %c0_i32 = arith.constant 0 : i32
    %c0_i32_0 = arith.constant 0 : i32
    %c0_i32_1 = arith.constant 0 : i32
    return %c0_i32, %c0_i32_0 : i32, i32
  }
  func.func @transform_6(%arg0: i32) -> (i32, i32) {
    %c0_i32 = arith.constant 0 : i32
    %c0_i32_0 = arith.constant 0 : i32
    return %arg0, %c0_i32 : i32, i32
  }
}

</mosaic_0001>

<bundles_post_ra>
// kernel: bottleneck_forward.6
= control target key start
LH: loop header
LB: loop body
LE: loop exit
PB: predicated region body
PF: predicated region fallthrough
CT: control target
= control target key end

     0   :  { %s615_s15 = smov 0   ;;  %s734_s0 = inlined_call_operand.vmem [shape: f32[512,128], index: 0, kind: input, shape index: {}]   ;;  %s735_s1 = inlined_call_operand.vmem [shape: f32[128,128], index: 1, kind: input, shape index: {}]   ;;  %s736_s2 = inlined_call_operand.vmem [shape: f32[512,128], index: 2, kind: output, shape index: {0}]   ;;  %s737_s3 = inlined_call_operand.vmem [shape: f32[32,128], index: 3, kind: output, shape index: {1}]   ;;  %s738_s4 = inlined_call_operand.vmem [shape: f32[32,128], index: 4, kind: output, shape index: {2}]  }
   0x1 LB: > { %s621_s16 = sadd.s32 4294967295, %s588_s15   ;;  %p517_p0 = scmp.ge.s32.totalorder %s588_s15, 1  ;;  %s588_s15 = sphi %s615_s15, %s15_s15  }
   0x2   : > { %p168_p1 = scmp.lt.s32.totalorder %s588_s15, 5 }
   0x4   : > { %p169_p2 = pnand %p517_p0, %p168_p1 }
   0x5   : > { %s518_s7 = sshll.u32 (!%p169_p2), %s621_s16, 4  ;;  %p214_p4 = scmp.lt.s32.totalorder (!%p169_p2), %s621_s16, 3 }
   0x6   : > { %172 = sbr.rel (%p169_p2) target bundleno = 234 (0xea), region = 28  ;;  %p203_p3 = scmp.lt.s32.totalorder (!%p169_p2), %s518_s7, 63 }
   0xb   : > { %v253_v0 = vld [vmem:[%s735_s1 + $0x78] sm:$0xff]  ;;  %v252_v1 = vld [vmem:[%s735_s1 + $0x70] sm:$0xff]  ;;  %v251_v2 = vld [vmem:[%s735_s1 + $0x68] sm:$0xff]  ;;  %s740_s7 = smov (!%p203_p3, %s518_s7), 63  ;;  %s742_s16 = smov (!%p214_p4, %s621_s16), 3 }
   0xc   : > { %254 = vmatpush.msra.mxu0 %v253_v0  ;;  %526 = vmatpush.msra.mxu1 %v253_v0  ;;  %v250_v3 = vld [vmem:[%s735_s1 + $0x60] sm:$0xff]  ;;  %v249_v4 = vld [vmem:[%s735_s1 + $0x58] sm:$0xff]  ;;  %v248_v5 = vld [vmem:[%s735_s1 + $0x50] sm:$0xff]  ;;  %s519_s20 = sshll.u32 %s740_s7, 3  ;;  %s522_s7 = sshll.u32 %s742_s16, 3 }
   0xd   : > { %527 = vmatpush.msra.mxu2 %v253_v0  ;;  %528 = vmatpush.msra.mxu3 %v253_v0  ;;  %v247_v6 = vld [vmem:[%s735_s1 + $0x48] sm:$0xff]  ;;  %v246_v7 = vld [vmem:[%s735_s1 + $0x40] sm:$0xff]  ;;  %v245_v8 = vld [vmem:[%s735_s1 + $0x38] sm:$0xff]  ;;  %s679_s27 = scalar_lea.vmem %s734_s0, %s519_s20  ;;  %s705_s6 = scalar_lea.vmem %s736_s2, %s519_s20 }
   0xe   : > { %255 = vmatpush.msra.mxu0 %v252_v1  ;;  %529 = vmatpush.msra.mxu1 %v252_v1  ;;  %v244_v9 = vld [vmem:[%s735_s1 + $0x30] sm:$0xff]  ;;  %v243_v10 = vld [vmem:[%s735_s1 + $0x28] sm:$0xff]  ;;  %v242_v11 = vld [vmem:[%s735_s1 + $0x20] sm:$0xff]  ;;  %s217_s10 = scalar_lea.vmem %s737_s3, %s522_s7  ;;  %s221_s13 = scalar_lea.vmem %s738_s4, %s522_s7 }
   0xf   : > { %530 = vmatpush.msra.mxu2 %v252_v1  ;;  %531 = vmatpush.msra.mxu3 %v252_v1  ;;  %v241_v12 = vld [vmem:[%s735_s1 + $0x18] sm:$0xff]  ;;  %v240_v13 = vld [vmem:[%s735_s1 + $0x10] sm:$0xff]  ;;  %v239_v14 = vld [vmem:[%s735_s1 + $0x8] sm:$0xff] }
  0x10   : > { %256 = vmatpush.msra.mxu0 %v251_v2  ;;  %532 = vmatpush.msra.mxu1 %v251_v2  ;;  %v238_v15 = vld [vmem:[%s735_s1] sm:$0xff]  ;;  %v223_v20 = vld [vmem:[%s679_s27 + $0x8] sm:$0xff]  ;;  %v224_v24 = vld [vmem:[%s679_s27 + $0x10] sm:$0xff] }
  0x11   : > { %533 = vmatpush.msra.mxu2 %v251_v2  ;;  %534 = vmatpush.msra.mxu3 %v251_v2  ;;  %v222_v16 = vld [vmem:[%s679_s27] sm:$0xff]  ;;  %v227_v21 = vld [vmem:[%s679_s27 + $0x28] sm:$0xff]  ;;  %v228_v25 = vld [vmem:[%s679_s27 + $0x30] sm:$0xff] }
  0x12   : > { %257 = vmatpush.msra.mxu0 %v250_v3  ;;  %535 = vmatpush.msra.mxu1 %v250_v3  ;;  %v226_v17 = vld [vmem:[%s679_s27 + $0x20] sm:$0xff]  ;;  %v231_v22 = vld [vmem:[%s679_s27 + $0x48] sm:$0xff]  ;;  %v232_v26 = vld [vmem:[%s679_s27 + $0x50] sm:$0xff] }
  0x13   : > { %536 = vmatpush.msra.mxu2 %v250_v3  ;;  %537 = vmatpush.msra.mxu3 %v250_v3  ;;  %v230_v18 = vld [vmem:[%s679_s27 + $0x40] sm:$0xff]  ;;  %v235_v23 = vld [vmem:[%s679_s27 + $0x68] sm:$0xff]  ;;  %v236_v27 = vld [vmem:[%s679_s27 + $0x70] sm:$0xff] }
  0x14   : > { %258 = vmatpush.msra.mxu0 %v249_v4  ;;  %538 = vmatpush.msra.mxu1 %v249_v4  ;;  %v234_v19 = vld [vmem:[%s679_s27 + $0x60] sm:$0xff]  ;;  %v225_v28 = vld [vmem:[%s679_s27 + $0x18] sm:$0xff] }
  0x15   : > { %539 = vmatpush.msra.mxu2 %v249_v4  ;;  %540 = vmatpush.msra.mxu3 %v249_v4  ;;  %v229_v29 = vld [vmem:[%s679_s27 + $0x38] sm:$0xff] }
  0x16   : > { %259 = vmatpush.msra.mxu0 %v248_v5  ;;  %541 = vmatpush.msra.mxu1 %v248_v5  ;;  %v233_v30 = vld [vmem:[%s679_s27 + $0x58] sm:$0xff] }
  0x17   : > { %542 = vmatpush.msra.mxu2 %v248_v5  ;;  %543 = vmatpush.msra.mxu3 %v248_v5  ;;  %v237_v31 = vld [vmem:[%s679_s27 + $0x78] sm:$0xff] }
  0x18   : > { %260 = vmatpush.msra.mxu0 %v247_v6  ;;  %544 = vmatpush.msra.mxu1 %v247_v6 }
  0x19   : > { %545 = vmatpush.msra.mxu2 %v247_v6  ;;  %546 = vmatpush.msra.mxu3 %v247_v6 }
  0x1a   : > { %261 = vmatpush.msra.mxu0 %v246_v7  ;;  %547 = vmatpush.msra.mxu1 %v246_v7 }
  0x1b   : > { %548 = vmatpush.msra.mxu2 %v246_v7  ;;  %549 = vmatpush.msra.mxu3 %v246_v7 }
  0x1c   : > { %262 = vmatpush.msra.mxu0 %v245_v8  ;;  %550 = vmatpush.msra.mxu1 %v245_v8 }
  0x1d   : > { %551 = vmatpush.msra.mxu2 %v245_v8  ;;  %552 = vmatpush.msra.mxu3 %v245_v8 }
  0x1e   : > { %263 = vmatpush.msra.mxu0 %v244_v9  ;;  %553 = vmatpush.msra.mxu1 %v244_v9 }
  0x1f   : > { %554 = vmatpush.msra.mxu2 %v244_v9  ;;  %555 = vmatpush.msra.mxu3 %v244_v9 }
  0x20   : > { %264 = vmatpush.msra.mxu0 %v243_v10  ;;  %556 = vmatpush.msra.mxu1 %v243_v10 }
  0x21   : > { %557 = vmatpush.msra.mxu2 %v243_v10  ;;  %558 = vmatpush.msra.mxu3 %v243_v10 }
  0x22   : > { %265 = vmatpush.msra.mxu0 %v242_v11  ;;  %559 = vmatpush.msra.mxu1 %v242_v11 }
  0x23   : > { %560 = vmatpush.msra.mxu2 %v242_v11  ;;  %561 = vmatpush.msra.mxu3 %v242_v11 }
  0x24   : > { %266 = vmatpush.msra.mxu0 %v241_v12  ;;  %562 = vmatpush.msra.mxu1 %v241_v12 }
  0x25   : > { %563 = vmatpush.msra.mxu2 %v241_v12  ;;  %564 = vmatpush.msra.mxu3 %v241_v12 }
  0x26   : > { %267 = vmatpush.msra.mxu0 %v240_v13  ;;  %565 = vmatpush.msra.mxu1 %v240_v13 }
  0x27   : > { %566 = vmatpush.msra.mxu2 %v240_v13  ;;  %567 = vmatpush.msra.mxu3 %v240_v13 }
  0x28   : > { %268 = vmatpush.msra.mxu0 %v239_v14  ;;  %568 = vmatpush.msra.mxu1 %v239_v14 }
  0x29   : > { %569 = vmatpush.msra.mxu2 %v239_v14  ;;  %570 = vmatpush.msra.mxu3 %v239_v14 }
  0x2a   : > { %269 = vmatpush.msra.mxu0 %v238_v15  ;;  %571 = vmatpush.msra.mxu1 %v238_v15 }
  0x2b   : > { %270 = vmatmul.f32.vlgmr.msra.gmra.mxu0 %v222_v16  ;;  %282 = vmatmul.f32.vlgmr.msra.gmra.mxu1 %v226_v17 }
  0x2c   : > { %572 = vmatpush.msra.mxu2 %v238_v15  ;;  %573 = vmatpush.msra.mxu3 %v238_v15 }
  0x2d   : > { %294 = vmatmul.f32.vlgmr.msra.gmra.mxu2 %v230_v18  ;;  %306 = vmatmul.f32.vlgmr.msra.gmra.mxu3 %v234_v19 }
  0x33   : > { %273 = vmatmul.f32.gmra.mxu0 %v223_v20  ;;  %285 = vmatmul.f32.gmra.mxu1 %v227_v21 }
  0x35   : > { %297 = vmatmul.f32.gmra.mxu2 %v231_v22  ;;  %309 = vmatmul.f32.gmra.mxu3 %v235_v23 }
  0x3b   : > { %276 = vmatmul.f32.gmra.mxu0 %v224_v24  ;;  %288 = vmatmul.f32.gmra.mxu1 %v228_v25 }
  0x3d   : > { %300 = vmatmul.f32.gmra.mxu2 %v232_v26  ;;  %312 = vmatmul.f32.gmra.mxu3 %v236_v27 }
  0x43   : > { %279 = vmatmul.f32.gmra.mxu0 %v225_v28  ;;  %291 = vmatmul.f32.gmra.mxu1 %v229_v29 }
  0x45   : > { %303 = vmatmul.f32.gmra.mxu2 %v233_v30  ;;  %315 = vmatmul.f32.gmra.mxu3 %v237_v31 }
  0xa8   : > { %v271_v32 = vpop.f32.mrf.mxu0  ;;  %v283_v33 = vpop.f32.mrf.mxu1 }
  0xa9   : > { %319 = vst [vmem:[%s705_s6] sm:$0xff] %v271_v32  ;;  %v356_v43 = vmul.f32 %v271_v32, %v271_v32  ;;  %v360_v55 = vmul.f32 %v283_v33, %v283_v33 }
  0xaa   : > { %323 = vst [vmem:[%s705_s6 + $0x20] sm:$0xff] %v283_v33 }
  0xb0   : > { %v274_v34 = vpop.f32.mrf.mxu0  ;;  %v286_v35 = vpop.f32.mrf.mxu1 }
  0xb1   : > { %320 = vst [vmem:[%s705_s6 + $0x8] sm:$0xff] %v274_v34  ;;  %v295_v36 = vpop.f32.mrf.mxu2  ;;  %v307_v37 = vpop.f32.mrf.mxu3  ;;  %v357_v42 = vmul.f32 %v274_v34, %v274_v34  ;;  %v335_v44 = vadd.f32 %v274_v34, %v271_v32  ;;  %v361_v58 = vmul.f32 %v286_v35, %v286_v35 }
  0xb2   : > { %324 = vst [vmem:[%s705_s6 + $0x28] sm:$0xff] %v286_v35  ;;  %v364_v5 = vmul.f32 %v295_v36, %v295_v36  ;;  %v368_v17 = vmul.f32 %v307_v37, %v307_v37 }
  0xb3   : > { %327 = vst [vmem:[%s705_s6 + $0x40] sm:$0xff] %v295_v36  ;;  %v372_v46 = vadd.f32 %v357_v42, %v356_v43 }
  0xb4   : > { %331 = vst [vmem:[%s705_s6 + $0x60] sm:$0xff] %v307_v37 }
  0xb8   : > { %v277_v38 = vpop.f32.mrf.mxu0  ;;  %v289_v39 = vpop.f32.mrf.mxu1 }
  0xb9   : > { %321 = vst [vmem:[%s705_s6 + $0x10] sm:$0xff] %v277_v38  ;;  %v298_v40 = vpop.f32.mrf.mxu2  ;;  %v310_v41 = vpop.f32.mrf.mxu3  ;;  %v358_v45 = vmul.f32 %v277_v38, %v277_v38  ;;  %v336_v47 = vadd.f32 %v335_v44, %v277_v38  ;;  %v362_v62 = vmul.f32 %v289_v39, %v289_v39 }
  0xba   : > { %325 = vst [vmem:[%s705_s6 + $0x30] sm:$0xff] %v289_v39  ;;  %v365_v8 = vmul.f32 %v298_v40, %v298_v40  ;;  %v369_v20 = vmul.f32 %v310_v41, %v310_v41 }
  0xbb   : > { %328 = vst [vmem:[%s705_s6 + $0x48] sm:$0xff] %v298_v40  ;;  %v373_v50 = vadd.f32 %v372_v46, %v358_v45 }
  0xbc   : > { %332 = vst [vmem:[%s705_s6 + $0x68] sm:$0xff] %v310_v41 }
  0xc0   : > { %v280_v48 = vpop.f32.mrf.mxu0  ;;  %v292_v49 = vpop.f32.mrf.mxu1 }
  0xc1   : > { %322 = vst [vmem:[%s705_s6 + $0x18] sm:$0xff] %v280_v48  ;;  %v337_v51 = vadd.f32 %v336_v47, %v280_v48  ;;  %v359_v52 = vmul.f32 %v280_v48, %v280_v48  ;;  %v301_v53 = vpop.f32.mrf.mxu2  ;;  %v313_v54 = vpop.f32.mrf.mxu3  ;;  %v363_v0 = vmul.f32 %v292_v49, %v292_v49 }
  0xc2   : > { %326 = vst [vmem:[%s705_s6 + $0x38] sm:$0xff] %v292_v49  ;;  %v366_v12 = vmul.f32 %v301_v53, %v301_v53  ;;  %v370_v24 = vmul.f32 %v313_v54, %v313_v54 }
  0xc3   : > { %v338_v56 = vadd.f32 %v337_v51, %v283_v33  ;;  %v374_v57 = vadd.f32 %v373_v50, %v359_v52  ;;  %329 = vst [vmem:[%s705_s6 + $0x50] sm:$0xff] %v301_v53 }
  0xc4   : > { %333 = vst [vmem:[%s705_s6 + $0x70] sm:$0xff] %v313_v54 }
  0xc5   : > { %v375_v59 = vadd.f32 %v374_v57, %v360_v55  ;;  %v339_v60 = vadd.f32 %v338_v56, %v286_v35 }
  0xc7   : > { %v340_v61 = vadd.f32 %v339_v60, %v289_v39  ;;  %v376_v63 = vadd.f32 %v375_v59, %v361_v58 }
  0xc9   : > { %v377_v1 = vadd.f32 %v376_v63, %v362_v62  ;;  %v341_v2 = vadd.f32 %v340_v61, %v292_v49  ;;  %v304_v3 = vpop.f32.mrf.mxu2  ;;  %v316_v4 = vpop.f32.mrf.mxu3 }
  0xca   : > { %330 = vst [vmem:[%s705_s6 + $0x58] sm:$0xff] %v304_v3  ;;  %v367_v14 = vmul.f32 %v304_v3, %v304_v3  ;;  %v371_v26 = vmul.f32 %v316_v4, %v316_v4 }
  0xcb   : > { %v342_v6 = vadd.f32 %v341_v2, %v295_v36  ;;  %v378_v7 = vadd.f32 %v377_v1, %v363_v0  ;;  %334 = vst [vmem:[%s705_s6 + $0x78] sm:$0xff] %v316_v4 }
  0xcd   : > { %v379_v9 = vadd.f32 %v378_v7, %v364_v5  ;;  %v343_v10 = vadd.f32 %v342_v6, %v298_v40 }
  0xcf   : > { %v344_v11 = vadd.f32 %v343_v10, %v301_v53  ;;  %v380_v13 = vadd.f32 %v379_v9, %v365_v8 }
  0xd1   : > { %v381_v15 = vadd.f32 %v380_v13, %v366_v12  ;;  %v345_v16 = vadd.f32 %v344_v11, %v304_v3 }
  0xd3   : > { %v346_v18 = vadd.f32 %v345_v16, %v307_v37  ;;  %v382_v19 = vadd.f32 %v381_v15, %v367_v14 }
  0xd5   : > { %v383_v21 = vadd.f32 %v382_v19, %v368_v17  ;;  %v347_v22 = vadd.f32 %v346_v18, %v310_v41 }
  0xd7   : > { %v348_v23 = vadd.f32 %v347_v22, %v313_v54  ;;  %v384_v25 = vadd.f32 %v383_v21, %v369_v20 }
  0xd9   : > { %v385_v27 = vadd.f32 %v384_v25, %v370_v24  ;;  %v349_v28 = vadd.f32 %v348_v23, %v316_v4 }
  0xdb   : > { %v350_v29 = vrot.slane %v349_v28, 4  ;;  %v386_v30 = vadd.f32 %v385_v27, %v371_v26 }
  0xdd   : > { %v351_v31 = vadd.f32 %v350_v29, %v349_v28  ;;  %v387_v32 = vrot.slane %v386_v30, 4 }
  0xdf   : > { %v352_v33 = vrot.slane %v351_v31, 2  ;;  %v388_v34 = vadd.f32 %v387_v32, %v386_v30 }
  0xe1   : > { %v353_v35 = vadd.f32 %v352_v33, %v351_v31  ;;  %v389_v36 = vrot.slane %v388_v34, 2 }
  0xe3   : > { %v354_v37 = vrot.slane %v353_v35, 1  ;;  %v390_v38 = vadd.f32 %v389_v36, %v388_v34 }
  0xe5   : > { %v355_v39 = vadd.f32 %v354_v37, %v353_v35  ;;  %v391_v40 = vrot.slane %v390_v38, 1 }
  0xe7   : > { %v392_v41 = vadd.f32 %v391_v40, %v390_v38  ;;  %393 = vst [vmem:[%s217_s10] sm:$0xff] %v355_v39 }
  0xe9   : > { %394 = vst [vmem:[%s221_s13] sm:$0xff] %v392_v41 }
  0xea PF: > { %s15_s15 = sadd.s32 1, %s588_s15  }
  0xeb   : > { %p12_p5 = scmp.ge.s32.totalorder %s15_s15, 6  }
  0xed   :  { %14 = sbr.rel (!%p12_p5) target bundleno = 1 (0x1), region = 82 }

// kernel: bottleneck_forward.8
= control target key start
LH: loop header
LB: loop body
LE: loop exit
PB: predicated region body
PF: predicated region fallthrough
CT: control target
= control target key end

     0   :  { %s737_s21 = smov 0   ;;  %s898_s0 = inlined_call_operand.vmem [shape: f32[512,128], index: 0, kind: input, shape index: {}]   ;;  %s899_s1 = inlined_call_operand.vmem [shape: f32[1,128], index: 1, kind: input, shape index: {}]   ;;  %s900_s2 = inlined_call_operand.vmem [shape: f32[1,128], index: 2, kind: input, shape index: {}]   ;;  %s901_s3 = inlined_call_operand.vmem [shape: f32[128,128], index: 3, kind: input, shape index: {}]   ;;  %s902_s4 = inlined_call_operand.vmem [shape: f32[512,128], index: 4, kind: output, shape index: {0}]   ;;  %s903_s5 = inlined_call_operand.vmem [shape: f32[32,128], index: 5, kind: output, shape index: {1}]   ;;  %s904_s6 = inlined_call_operand.vmem [shape: f32[32,128], index: 6, kind: output, shape index: {2}]  }
   0x1 LB: > { %s743_s22 = sadd.s32 4294967295, %s700_s21   ;;  %p627_p0 = scmp.ge.s32.totalorder %s700_s21, 1  ;;  %s700_s21 = sphi %s737_s21, %s17_s21  }
   0x2   : > { %p218_p1 = scmp.lt.s32.totalorder %s700_s21, 5 }
   0x4   : > { %p219_p2 = pnand %p627_p0, %p218_p1 }
   0x5   : > { %s628_s27 = sshll.u32 (!%p219_p2), %s743_s22, 4  ;;  %p268_p4 = scmp.lt.s32.totalorder (!%p219_p2), %s743_s22, 3 }
   0x6   : > { %222 = sbr.rel (%p219_p2) target bundleno = 234 (0xea), region = 36  ;;  %p257_p3 = scmp.lt.s32.totalorder (!%p219_p2), %s628_s27, 63 }
   0xb   : > { %v363_v0 = vld [vmem:[%s901_s3 + $0x78] sm:$0xff]  ;;  %v362_v1 = vld [vmem:[%s901_s3 + $0x70] sm:$0xff]  ;;  %v361_v2 = vld [vmem:[%s901_s3 + $0x68] sm:$0xff]  ;;  %s906_s27 = smov (!%p257_p3, %s628_s27), 63  ;;  %s908_s22 = smov (!%p268_p4, %s743_s22), 3 }
   0xc   : > { %364 = vmatpush.msra.mxu0 %v363_v0  ;;  %636 = vmatpush.msra.mxu1 %v363_v0  ;;  %v360_v3 = vld [vmem:[%s901_s3 + $0x60] sm:$0xff]  ;;  %v359_v4 = vld [vmem:[%s901_s3 + $0x58] sm:$0xff]  ;;  %v358_v5 = vld [vmem:[%s901_s3 + $0x50] sm:$0xff]  ;;  %s629_s14 = sshll.u32 %s906_s27, 3  ;;  %s632_s27 = sshll.u32 %s908_s22, 3 }
   0xd   : > { %637 = vmatpush.msra.mxu2 %v363_v0  ;;  %638 = vmatpush.msra.mxu3 %v363_v0  ;;  %v357_v6 = vld [vmem:[%s901_s3 + $0x48] sm:$0xff]  ;;  %v356_v7 = vld [vmem:[%s901_s3 + $0x40] sm:$0xff]  ;;  %v355_v8 = vld [vmem:[%s901_s3 + $0x38] sm:$0xff]  ;;  %s783_s23 = scalar_lea.vmem %s898_s0, %s629_s14  ;;  %s869_s24 = scalar_lea.vmem %s902_s4, %s629_s14 }
   0xe   : > { %365 = vmatpush.msra.mxu0 %v362_v1  ;;  %639 = vmatpush.msra.mxu1 %v362_v1  ;;  %v354_v9 = vld [vmem:[%s901_s3 + $0x30] sm:$0xff]  ;;  %v791_v10 = vld [vmem:[%s899_s1] ss:$0 sm:$0xff]  ;;  %v353_v13 = vld [vmem:[%s901_s3 + $0x28] sm:$0xff]  ;;  %s271_s26 = scalar_lea.vmem %s903_s5, %s632_s27  ;;  %s275_s30 = scalar_lea.vmem %s904_s6, %s632_s27 }
   0xf   : > { %640 = vmatpush.msra.mxu2 %v362_v1  ;;  %641 = vmatpush.msra.mxu3 %v362_v1  ;;  %v276_v11 = vld [vmem:[%s783_s23] sm:$0xff]  ;;  %v351_v20 = vld [vmem:[%s901_s3 + $0x18] sm:$0xff]  ;;  %v350_v23 = vld [vmem:[%s901_s3 + $0x10] sm:$0xff] }
  0x10   : > { %366 = vmatpush.msra.mxu0 %v361_v2  ;;  %642 = vmatpush.msra.mxu1 %v361_v2  ;;  %v280_v12 = vld [vmem:[%s783_s23 + $0x20] sm:$0xff]  ;;  %v296_v17 = vmul.f32 %v791_v10, %v276_v11  ;;  %v277_v26 = vld [vmem:[%s783_s23 + $0x8] sm:$0xff]  ;;  %v278_v44 = vld [vmem:[%s783_s23 + $0x10] sm:$0xff] }
  0x11   : > { %643 = vmatpush.msra.mxu2 %v361_v2  ;;  %644 = vmatpush.msra.mxu3 %v361_v2  ;;  %v284_v14 = vld [vmem:[%s783_s23 + $0x40] sm:$0xff]  ;;  %v300_v19 = vmul.f32 %v791_v10, %v280_v12  ;;  %v281_v27 = vld [vmem:[%s783_s23 + $0x28] sm:$0xff]  ;;  %v297_v35 = vmul.f32 %v791_v10, %v277_v26  ;;  %v282_v45 = vld [vmem:[%s783_s23 + $0x30] sm:$0xff]  ;;  %v298_v51 = vmul.f32 %v791_v10, %v278_v44 }
  0x12   : > { %367 = vmatpush.msra.mxu0 %v360_v3  ;;  %645 = vmatpush.msra.mxu1 %v360_v3  ;;  %v288_v15 = vld [vmem:[%s783_s23 + $0x60] sm:$0xff]  ;;  %v304_v21 = vmul.f32 %v791_v10, %v284_v14  ;;  %v349_v28 = vld [vmem:[%s901_s3 + $0x8] sm:$0xff]  ;;  %v301_v37 = vmul.f32 %v791_v10, %v281_v27  ;;  %v286_v48 = vld [vmem:[%s783_s23 + $0x50] sm:$0xff]  ;;  %v302_v53 = vmul.f32 %v791_v10, %v282_v45 }
  0x13   : > { %646 = vmatpush.msra.mxu2 %v360_v3  ;;  %647 = vmatpush.msra.mxu3 %v360_v3  ;;  %v352_v16 = vld [vmem:[%s901_s3 + $0x20] sm:$0xff]  ;;  %v308_v22 = vmul.f32 %v791_v10, %v288_v15  ;;  %v285_v31 = vld [vmem:[%s783_s23 + $0x48] sm:$0xff]  ;;  %v290_v49 = vld [vmem:[%s783_s23 + $0x70] sm:$0xff]  ;;  %v306_v55 = vmul.f32 %v791_v10, %v286_v48 }
  0x14   : > { %368 = vmatpush.msra.mxu0 %v359_v4  ;;  %648 = vmatpush.msra.mxu1 %v359_v4  ;;  %v807_v18 = vld [vmem:[%s900_s2] ss:$0 sm:$0xff]  ;;  %v289_v32 = vld [vmem:[%s783_s23 + $0x68] sm:$0xff]  ;;  %v305_v39 = vmul.f32 %v791_v10, %v285_v31  ;;  %v310_v57 = vmul.f32 %v791_v10, %v290_v49  ;;  %v279_v60 = vld [vmem:[%s783_s23 + $0x18] sm:$0xff] }
  0x15   : > { %649 = vmatpush.msra.mxu2 %v359_v4  ;;  %650 = vmatpush.msra.mxu3 %v359_v4  ;;  %v316_v24 = vadd.f32 %v807_v18, %v296_v17  ;;  %v320_v25 = vadd.f32 %v807_v18, %v300_v19  ;;  %v324_v29 = vadd.f32 %v807_v18, %v304_v21  ;;  %v348_v33 = vld [vmem:[%s901_s3] sm:$0xff]  ;;  %v283_v61 = vld [vmem:[%s783_s23 + $0x38] sm:$0xff] }
  0x16   : > { %369 = vmatpush.msra.mxu0 %v358_v5  ;;  %651 = vmatpush.msra.mxu1 %v358_v5  ;;  %v328_v30 = vadd.f32 %v807_v18, %v308_v22  ;;  %v309_v41 = vmul.f32 %v791_v10, %v289_v32  ;;  %v317_v42 = vadd.f32 %v807_v18, %v297_v35  ;;  %v287_v0 = vld [vmem:[%s783_s23 + $0x58] sm:$0xff] }
  0x17   : > { %652 = vmatpush.msra.mxu2 %v358_v5  ;;  %653 = vmatpush.msra.mxu3 %v358_v5  ;;  %v332_v34 = vmax.f32 %v316_v24, 0.0  ;;  %v336_v36 = vmax.f32 %v320_v25, 0.0  ;;  %v340_v38 = vmax.f32 %v324_v29, 0.0  ;;  %v321_v43 = vadd.f32 %v807_v18, %v301_v37  ;;  %v291_v1 = vld [vmem:[%s783_s23 + $0x78] sm:$0xff] }
  0x18   : > { %370 = vmatpush.msra.mxu0 %v357_v6  ;;  %654 = vmatpush.msra.mxu1 %v357_v6  ;;  %v344_v40 = vmax.f32 %v328_v30, 0.0  ;;  %v325_v46 = vadd.f32 %v807_v18, %v305_v39  ;;  %v329_v47 = vadd.f32 %v807_v18, %v309_v41  ;;  %v333_v50 = vmax.f32 %v317_v42, 0.0 }
  0x19   : > { %655 = vmatpush.msra.mxu2 %v357_v6  ;;  %656 = vmatpush.msra.mxu3 %v357_v6  ;;  %v337_v52 = vmax.f32 %v321_v43, 0.0  ;;  %v318_v58 = vadd.f32 %v807_v18, %v298_v51  ;;  %v322_v59 = vadd.f32 %v807_v18, %v302_v53  ;;  %v326_v62 = vadd.f32 %v807_v18, %v306_v55 }
  0x1a   : > { %371 = vmatpush.msra.mxu0 %v356_v7  ;;  %657 = vmatpush.msra.mxu1 %v356_v7  ;;  %v341_v54 = vmax.f32 %v325_v46, 0.0  ;;  %v345_v56 = vmax.f32 %v329_v47, 0.0  ;;  %v330_v63 = vadd.f32 %v807_v18, %v310_v57  ;;  %v299_v3 = vmul.f32 %v791_v10, %v279_v60 }
  0x1b   : > { %658 = vmatpush.msra.mxu2 %v356_v7  ;;  %659 = vmatpush.msra.mxu3 %v356_v7  ;;  %v334_v2 = vmax.f32 %v318_v58, 0.0  ;;  %v338_v4 = vmax.f32 %v322_v59, 0.0  ;;  %v303_v5 = vmul.f32 %v791_v10, %v283_v61  ;;  %v342_v6 = vmax.f32 %v326_v62, 0.0 }
  0x1c   : > { %372 = vmatpush.msra.mxu0 %v355_v8  ;;  %660 = vmatpush.msra.mxu1 %v355_v8  ;;  %v307_v7 = vmul.f32 %v791_v10, %v287_v0  ;;  %v319_v11 = vadd.f32 %v807_v18, %v299_v3 }
  0x1d   : > { %661 = vmatpush.msra.mxu2 %v355_v8  ;;  %662 = vmatpush.msra.mxu3 %v355_v8  ;;  %v346_v8 = vmax.f32 %v330_v63, 0.0  ;;  %v323_v12 = vadd.f32 %v807_v18, %v303_v5 }
  0x1e   : > { %373 = vmatpush.msra.mxu0 %v354_v9  ;;  %663 = vmatpush.msra.mxu1 %v354_v9  ;;  %v335_v15 = vmax.f32 %v319_v11, 0.0 }
  0x1f   : > { %664 = vmatpush.msra.mxu2 %v354_v9  ;;  %665 = vmatpush.msra.mxu3 %v354_v9  ;;  %v311_v9 = vmul.f32 %v791_v10, %v291_v1 }
  0x20   : > { %374 = vmatpush.msra.mxu0 %v353_v13  ;;  %666 = vmatpush.msra.mxu1 %v353_v13 }
  0x21   : > { %667 = vmatpush.msra.mxu2 %v353_v13  ;;  %668 = vmatpush.msra.mxu3 %v353_v13  ;;  %v327_v13 = vadd.f32 %v807_v18, %v307_v7  ;;  %v331_v14 = vadd.f32 %v807_v18, %v311_v9 }
  0x22   : > { %375 = vmatpush.msra.mxu0 %v352_v16  ;;  %669 = vmatpush.msra.mxu1 %v352_v16 }
  0x23   : > { %670 = vmatpush.msra.mxu2 %v352_v16  ;;  %671 = vmatpush.msra.mxu3 %v352_v16  ;;  %v339_v16 = vmax.f32 %v323_v12, 0.0  ;;  %v343_v17 = vmax.f32 %v327_v13, 0.0  ;;  %v347_v19 = vmax.f32 %v331_v14, 0.0 }
  0x24   : > { %376 = vmatpush.msra.mxu0 %v351_v20  ;;  %672 = vmatpush.msra.mxu1 %v351_v20 }
  0x25   : > { %673 = vmatpush.msra.mxu2 %v351_v20  ;;  %674 = vmatpush.msra.mxu3 %v351_v20 }
  0x26   : > { %377 = vmatpush.msra.mxu0 %v350_v23  ;;  %675 = vmatpush.msra.mxu1 %v350_v23 }
  0x27   : > { %676 = vmatpush.msra.mxu2 %v350_v23  ;;  %677 = vmatpush.msra.mxu3 %v350_v23 }
  0x28   : > { %378 = vmatpush.msra.mxu0 %v349_v28  ;;  %678 = vmatpush.msra.mxu1 %v349_v28 }
  0x29   : > { %679 = vmatpush.msra.mxu2 %v349_v28  ;;  %680 = vmatpush.msra.mxu3 %v349_v28 }
  0x2a   : > { %379 = vmatpush.msra.mxu0 %v348_v33  ;;  %681 = vmatpush.msra.mxu1 %v348_v33 }
  0x2b   : > { %380 = vmatmul.f32.vlgmr.msra.gmra.mxu0 %v332_v34  ;;  %392 = vmatmul.f32.vlgmr.msra.gmra.mxu1 %v336_v36 }
  0x2c   : > { %682 = vmatpush.msra.mxu2 %v348_v33  ;;  %683 = vmatpush.msra.mxu3 %v348_v33 }
  0x2d   : > { %404 = vmatmul.f32.vlgmr.msra.gmra.mxu2 %v340_v38  ;;  %416 = vmatmul.f32.vlgmr.msra.gmra.mxu3 %v344_v40 }
  0x33   : > { %383 = vmatmul.f32.gmra.mxu0 %v333_v50  ;;  %395 = vmatmul.f32.gmra.mxu1 %v337_v52 }
  0x35   : > { %407 = vmatmul.f32.gmra.mxu2 %v341_v54  ;;  %419 = vmatmul.f32.gmra.mxu3 %v345_v56 }
  0x3b   : > { %386 = vmatmul.f32.gmra.mxu0 %v334_v2  ;;  %398 = vmatmul.f32.gmra.mxu1 %v338_v4 }
  0x3d   : > { %410 = vmatmul.f32.gmra.mxu2 %v342_v6  ;;  %422 = vmatmul.f32.gmra.mxu3 %v346_v8 }
  0x43   : > { %389 = vmatmul.f32.gmra.mxu0 %v335_v15  ;;  %401 = vmatmul.f32.gmra.mxu1 %v339_v16 }
  0x45   : > { %413 = vmatmul.f32.gmra.mxu2 %v343_v17  ;;  %425 = vmatmul.f32.gmra.mxu3 %v347_v19 }
  0xa8   : > { %v381_v10 = vpop.f32.mrf.mxu0  ;;  %v393_v18 = vpop.f32.mrf.mxu1 }
  0xa9   : > { %429 = vst [vmem:[%s869_s24] sm:$0xff] %v381_v10  ;;  %v466_v29 = vmul.f32 %v381_v10, %v381_v10  ;;  %v470_v41 = vmul.f32 %v393_v18, %v393_v18 }
  0xaa   : > { %433 = vst [vmem:[%s869_s24 + $0x20] sm:$0xff] %v393_v18 }
  0xb0   : > { %v384_v20 = vpop.f32.mrf.mxu0  ;;  %v396_v21 = vpop.f32.mrf.mxu1 }
  0xb1   : > { %430 = vst [vmem:[%s869_s24 + $0x8] sm:$0xff] %v384_v20  ;;  %v405_v22 = vpop.f32.mrf.mxu2  ;;  %v417_v23 = vpop.f32.mrf.mxu3  ;;  %v467_v28 = vmul.f32 %v384_v20, %v384_v20  ;;  %v445_v30 = vadd.f32 %v384_v20, %v381_v10  ;;  %v471_v44 = vmul.f32 %v396_v21, %v396_v21 }
  0xb2   : > { %434 = vst [vmem:[%s869_s24 + $0x28] sm:$0xff] %v396_v21  ;;  %v474_v55 = vmul.f32 %v405_v22, %v405_v22  ;;  %v478_v3 = vmul.f32 %v417_v23, %v417_v23 }
  0xb3   : > { %437 = vst [vmem:[%s869_s24 + $0x40] sm:$0xff] %v405_v22  ;;  %v482_v32 = vadd.f32 %v467_v28, %v466_v29 }
  0xb4   : > { %441 = vst [vmem:[%s869_s24 + $0x60] sm:$0xff] %v417_v23 }
  0xb8   : > { %v387_v24 = vpop.f32.mrf.mxu0  ;;  %v399_v25 = vpop.f32.mrf.mxu1 }
  0xb9   : > { %431 = vst [vmem:[%s869_s24 + $0x10] sm:$0xff] %v387_v24  ;;  %v408_v26 = vpop.f32.mrf.mxu2  ;;  %v420_v27 = vpop.f32.mrf.mxu3  ;;  %v468_v31 = vmul.f32 %v387_v24, %v387_v24  ;;  %v446_v33 = vadd.f32 %v445_v30, %v387_v24  ;;  %v472_v48 = vmul.f32 %v399_v25, %v399_v25 }
  0xba   : > { %435 = vst [vmem:[%s869_s24 + $0x30] sm:$0xff] %v399_v25  ;;  %v475_v58 = vmul.f32 %v408_v26, %v408_v26  ;;  %v479_v6 = vmul.f32 %v420_v27, %v420_v27 }
  0xbb   : > { %438 = vst [vmem:[%s869_s24 + $0x48] sm:$0xff] %v408_v26  ;;  %v483_v36 = vadd.f32 %v482_v32, %v468_v31 }
  0xbc   : > { %442 = vst [vmem:[%s869_s24 + $0x68] sm:$0xff] %v420_v27 }
  0xc0   : > { %v390_v34 = vpop.f32.mrf.mxu0  ;;  %v402_v35 = vpop.f32.mrf.mxu1 }
  0xc1   : > { %432 = vst [vmem:[%s869_s24 + $0x18] sm:$0xff] %v390_v34  ;;  %v447_v37 = vadd.f32 %v446_v33, %v390_v34  ;;  %v469_v38 = vmul.f32 %v390_v34, %v390_v34  ;;  %v411_v39 = vpop.f32.mrf.mxu2  ;;  %v423_v40 = vpop.f32.mrf.mxu3  ;;  %v473_v50 = vmul.f32 %v402_v35, %v402_v35 }
  0xc2   : > { %436 = vst [vmem:[%s869_s24 + $0x38] sm:$0xff] %v402_v35  ;;  %v476_v62 = vmul.f32 %v411_v39, %v411_v39  ;;  %v480_v11 = vmul.f32 %v423_v40, %v423_v40 }
  0xc3   : > { %v448_v42 = vadd.f32 %v447_v37, %v393_v18  ;;  %v484_v43 = vadd.f32 %v483_v36, %v469_v38  ;;  %439 = vst [vmem:[%s869_s24 + $0x50] sm:$0xff] %v411_v39 }
  0xc4   : > { %443 = vst [vmem:[%s869_s24 + $0x70] sm:$0xff] %v423_v40 }
  0xc5   : > { %v485_v45 = vadd.f32 %v484_v43, %v470_v41  ;;  %v449_v46 = vadd.f32 %v448_v42, %v396_v21 }
  0xc7   : > { %v450_v47 = vadd.f32 %v449_v46, %v399_v25  ;;  %v486_v49 = vadd.f32 %v485_v45, %v471_v44 }
  0xc9   : > { %v487_v51 = vadd.f32 %v486_v49, %v472_v48  ;;  %v451_v52 = vadd.f32 %v450_v47, %v402_v35  ;;  %v414_v53 = vpop.f32.mrf.mxu2  ;;  %v426_v54 = vpop.f32.mrf.mxu3 }
  0xca   : > { %440 = vst [vmem:[%s869_s24 + $0x58] sm:$0xff] %v414_v53  ;;  %v477_v0 = vmul.f32 %v414_v53, %v414_v53  ;;  %v481_v13 = vmul.f32 %v426_v54, %v426_v54 }
  0xcb   : > { %v452_v56 = vadd.f32 %v451_v52, %v405_v22  ;;  %v488_v57 = vadd.f32 %v487_v51, %v473_v50  ;;  %444 = vst [vmem:[%s869_s24 + $0x78] sm:$0xff] %v426_v54 }
  0xcd   : > { %v489_v59 = vadd.f32 %v488_v57, %v474_v55  ;;  %v453_v60 = vadd.f32 %v452_v56, %v408_v26 }
  0xcf   : > { %v454_v61 = vadd.f32 %v453_v60, %v411_v39  ;;  %v490_v63 = vadd.f32 %v489_v59, %v475_v58 }
  0xd1   : > { %v491_v1 = vadd.f32 %v490_v63, %v476_v62  ;;  %v455_v2 = vadd.f32 %v454_v61, %v414_v53 }
  0xd3   : > { %v456_v4 = vadd.f32 %v455_v2, %v417_v23  ;;  %v492_v5 = vadd.f32 %v491_v1, %v477_v0 }
  0xd5   : > { %v493_v7 = vadd.f32 %v492_v5, %v478_v3  ;;  %v457_v8 = vadd.f32 %v456_v4, %v420_v27 }
  0xd7   : > { %v458_v9 = vadd.f32 %v457_v8, %v423_v40  ;;  %v494_v12 = vadd.f32 %v493_v7, %v479_v6 }
  0xd9   : > { %v495_v14 = vadd.f32 %v494_v12, %v480_v11  ;;  %v459_v15 = vadd.f32 %v458_v9, %v426_v54 }
  0xdb   : > { %v460_v16 = vrot.slane %v459_v15, 4  ;;  %v496_v17 = vadd.f32 %v495_v14, %v481_v13 }
  0xdd   : > { %v461_v19 = vadd.f32 %v460_v16, %v459_v15  ;;  %v497_v10 = vrot.slane %v496_v17, 4 }
  0xdf   : > { %v462_v18 = vrot.slane %v461_v19, 2  ;;  %v498_v20 = vadd.f32 %v497_v10, %v496_v17 }
  0xe1   : > { %v463_v21 = vadd.f32 %v462_v18, %v461_v19  ;;  %v499_v22 = vrot.slane %v498_v20, 2 }
  0xe3   : > { %v464_v23 = vrot.slane %v463_v21, 1  ;;  %v500_v24 = vadd.f32 %v499_v22, %v498_v20 }
  0xe5   : > { %v465_v25 = vadd.f32 %v464_v23, %v463_v21  ;;  %v501_v26 = vrot.slane %v500_v24, 1 }
  0xe7   : > { %v502_v27 = vadd.f32 %v501_v26, %v500_v24  ;;  %503 = vst [vmem:[%s271_s26] sm:$0xff] %v465_v25 }
  0xe9   : > { %504 = vst [vmem:[%s275_s30] sm:$0xff] %v502_v27 }
  0xea PF: > { %s17_s21 = sadd.s32 1, %s700_s21  }
  0xeb   : > { %p14_p5 = scmp.ge.s32.totalorder %s17_s21, 6  }
  0xed   :  { %16 = sbr.rel (!%p14_p5) target bundleno = 1 (0x1), region = 90 }

// kernel: bottleneck_forward.11
= control target key start
LH: loop header
LB: loop body
LE: loop exit
PB: predicated region body
PF: predicated region fallthrough
CT: control target
= control target key end

     0   :  { %s589_s21 = smov 0   ;;  %s752_s0 = inlined_call_operand.vmem [shape: f32[512,128], index: 0, kind: input, shape index: {}]   ;;  %s753_s1 = inlined_call_operand.vmem [shape: f32[1,128], index: 1, kind: input, shape index: {}]   ;;  %s754_s2 = inlined_call_operand.vmem [shape: f32[1,128], index: 2, kind: input, shape index: {}]   ;;  %s755_s3 = inlined_call_operand.vmem [shape: f32[512,128], index: 3, kind: input, shape index: {}]   ;;  %s756_s4 = inlined_call_operand.vmem [shape: f32[1,128], index: 4, kind: input, shape index: {}]   ;;  %s757_s5 = inlined_call_operand.vmem [shape: f32[1,128], index: 5, kind: input, shape index: {}]   ;;  %s758_s6 = inlined_call_operand.vmem [shape: f32[512,128], index: 6, kind: output, shape index: {}]  }
   0x1 LB: > { %s521_s22 = sadd.s32 4294967295, %s552_s21   ;;  %p525_p0 = scmp.ge.s32.totalorder %s552_s21, 1  ;;  %s552_s21 = sphi %s589_s21, %s16_s21  }
   0x2   : > { %p224_p1 = scmp.lt.s32.totalorder %s552_s21, 5 }
   0x4   : > { %p225_p2 = pnand %p525_p0, %p224_p1 }
   0x5   : > { %s526_s23 = sshll.u32 (!%p225_p2), %s521_s22, 4 }
   0x6   : > { %228 = sbr.rel (%p225_p2) target bundleno = 49 (0x31), region = 44  ;;  %p260_p3 = scmp.lt.s32.totalorder (!%p225_p2), %s526_s23, 63 }
   0xb   : > { %s760_s23 = smov (!%p260_p3, %s526_s23), 63  ;;  %v600_v0 = vld [vmem:[%s753_s1] ss:$0 sm:$0xff] }
   0xc   : > { %v605_v1 = vld [vmem:[%s756_s4] ss:$0 sm:$0xff]  ;;  %s607_s28 = sshll.u32 %s760_s23, 3 }
   0xd   : > { %s613_s7 = scalar_lea.vmem %s752_s0, %s607_s28  ;;  %s619_s10 = scalar_lea.vmem %s755_s3, %s607_s28  ;;  %v624_v2 = vld [vmem:[%s754_s2] ss:$0 sm:$0xff] }
   0xe   : > { %v629_v3 = vld [vmem:[%s757_s5] ss:$0 sm:$0xff]  ;;  %v278_v6 = vld [vmem:[%s613_s7 + $0x8] sm:$0xff]  ;;  %v279_v11 = vld [vmem:[%s613_s7 + $0x10] sm:$0xff]  ;;  %s661_s17 = scalar_lea.vmem %s758_s6, %s607_s28 }
   0xf   : > { %v277_v4 = vld [vmem:[%s613_s7] sm:$0xff]  ;;  %v298_v9 = vmul.f32 %v600_v0, %v278_v6  ;;  %v350_v10 = vld [vmem:[%s619_s10 + $0x8] sm:$0xff]  ;;  %v351_v12 = vld [vmem:[%s619_s10 + $0x10] sm:$0xff]  ;;  %v299_v14 = vmul.f32 %v600_v0, %v279_v11 }
  0x10   : > { %v349_v5 = vld [vmem:[%s619_s10] sm:$0xff]  ;;  %v297_v7 = vmul.f32 %v600_v0, %v277_v4  ;;  %v370_v13 = vmul.f32 %v605_v1, %v350_v10  ;;  %v371_v15 = vmul.f32 %v605_v1, %v351_v12  ;;  %v280_v16 = vld [vmem:[%s613_s7 + $0x18] sm:$0xff]  ;;  %v282_v32 = vld [vmem:[%s613_s7 + $0x28] sm:$0xff] }
  0x11   : > { %v369_v8 = vmul.f32 %v605_v1, %v349_v5  ;;  %v352_v17 = vld [vmem:[%s619_s10 + $0x18] sm:$0xff]  ;;  %v318_v20 = vadd.f32 %v624_v2, %v298_v9  ;;  %v300_v21 = vmul.f32 %v600_v0, %v280_v16  ;;  %v319_v23 = vadd.f32 %v624_v2, %v299_v14  ;;  %v281_v26 = vld [vmem:[%s613_s7 + $0x20] sm:$0xff]  ;;  %v354_v37 = vld [vmem:[%s619_s10 + $0x28] sm:$0xff] }
  0x12   : > { %v317_v18 = vadd.f32 %v624_v2, %v297_v7  ;;  %v390_v22 = vadd.f32 %v629_v3, %v370_v13  ;;  %v391_v24 = vadd.f32 %v629_v3, %v371_v15  ;;  %v372_v25 = vmul.f32 %v605_v1, %v352_v17  ;;  %v353_v27 = vld [vmem:[%s619_s10 + $0x20] sm:$0xff]  ;;  %v283_v38 = vld [vmem:[%s613_s7 + $0x30] sm:$0xff]  ;;  %v284_v44 = vld [vmem:[%s613_s7 + $0x38] sm:$0xff] }
  0x13   : > { %v389_v19 = vadd.f32 %v629_v3, %v369_v8  ;;  %v334_v30 = vmax.f32 %v318_v20, 0.0  ;;  %v320_v31 = vadd.f32 %v624_v2, %v300_v21  ;;  %v335_v34 = vmax.f32 %v319_v23, 0.0  ;;  %v355_v43 = vld [vmem:[%s619_s10 + $0x30] sm:$0xff]  ;;  %v356_v53 = vld [vmem:[%s619_s10 + $0x38] sm:$0xff]  ;;  %v285_v58 = vld [vmem:[%s613_s7 + $0x40] sm:$0xff] }
  0x14   : > { %v333_v28 = vmax.f32 %v317_v18, 0.0  ;;  %v406_v33 = vmax.f32 %v390_v22, 0.0  ;;  %v407_v35 = vmax.f32 %v391_v24, 0.0  ;;  %v392_v36 = vadd.f32 %v629_v3, %v372_v25  ;;  %v357_v63 = vld [vmem:[%s619_s10 + $0x40] sm:$0xff]  ;;  %v286_v8 = vld [vmem:[%s613_s7 + $0x48] sm:$0xff]  ;;  %v287_v14 = vld [vmem:[%s613_s7 + $0x50] sm:$0xff] }
  0x15   : > { %v405_v29 = vmax.f32 %v389_v19, 0.0  ;;  %v336_v40 = vmax.f32 %v320_v31, 0.0  ;;  %v301_v41 = vmul.f32 %v600_v0, %v281_v26  ;;  %v373_v42 = vmul.f32 %v605_v1, %v353_v27  ;;  %v358_v9 = vld [vmem:[%s619_s10 + $0x48] sm:$0xff]  ;;  %v359_v19 = vld [vmem:[%s619_s10 + $0x50] sm:$0xff]  ;;  %v288_v24 = vld [vmem:[%s613_s7 + $0x58] sm:$0xff] }
  0x16   : > { %v422_v45 = vadd.f32 %v406_v33, %v334_v30  ;;  %v423_v46 = vadd.f32 %v407_v35, %v335_v34  ;;  %v408_v47 = vmax.f32 %v392_v36, 0.0  ;;  %v302_v48 = vmul.f32 %v600_v0, %v282_v32  ;;  %v289_v34 = vld [vmem:[%s613_s7 + $0x60] sm:$0xff] }
  0x17   : > { %v421_v39 = vadd.f32 %v405_v29, %v333_v28  ;;  %v321_v49 = vadd.f32 %v624_v2, %v301_v41  ;;  %v393_v50 = vadd.f32 %v629_v3, %v373_v42  ;;  %v374_v51 = vmul.f32 %v605_v1, %v354_v37  ;;  %v360_v29 = vld [vmem:[%s619_s10 + $0x58] sm:$0xff] }
  0x18   : > { %v303_v52 = vmul.f32 %v600_v0, %v283_v38  ;;  %438 = vst [vmem:[%s661_s17 + $0x8] sm:$0xff] %v422_v45  ;;  %v424_v54 = vadd.f32 %v408_v47, %v336_v40  ;;  %v322_v55 = vadd.f32 %v624_v2, %v302_v48  ;;  %v375_v56 = vmul.f32 %v605_v1, %v355_v43  ;;  %v362_v45 = vld [vmem:[%s619_s10 + $0x68] sm:$0xff] }
  0x19   : > { %437 = vst [vmem:[%s661_s17] sm:$0xff] %v421_v39  ;;  %v304_v57 = vmul.f32 %v600_v0, %v284_v44  ;;  %v337_v59 = vmax.f32 %v321_v49, 0.0  ;;  %v409_v60 = vmax.f32 %v393_v50, 0.0  ;;  %v394_v61 = vadd.f32 %v629_v3, %v374_v51  ;;  %v361_v39 = vld [vmem:[%s619_s10 + $0x60] sm:$0xff]  ;;  %v290_v44 = vld [vmem:[%s613_s7 + $0x68] sm:$0xff]  ;;  %v291_v50 = vld [vmem:[%s613_s7 + $0x70] sm:$0xff] }
  0x1a   : > { %439 = vst [vmem:[%s661_s17 + $0x10] sm:$0xff] %v423_v46  ;;  %v323_v62 = vadd.f32 %v624_v2, %v303_v52  ;;  %v338_v4 = vmax.f32 %v322_v55, 0.0  ;;  %v395_v5 = vadd.f32 %v629_v3, %v375_v56  ;;  %v376_v7 = vmul.f32 %v605_v1, %v356_v53  ;;  %v363_v55 = vld [vmem:[%s619_s10 + $0x70] sm:$0xff] }
  0x1b   : > { %440 = vst [vmem:[%s661_s17 + $0x18] sm:$0xff] %v424_v54  ;;  %v324_v6 = vadd.f32 %v624_v2, %v304_v57  ;;  %v425_v10 = vadd.f32 %v409_v60, %v337_v59  ;;  %v410_v11 = vmax.f32 %v394_v61, 0.0  ;;  %v305_v13 = vmul.f32 %v600_v0, %v285_v58  ;;  %v292_v60 = vld [vmem:[%s613_s7 + $0x78] sm:$0xff] }
  0x1c   : > { %v339_v12 = vmax.f32 %v323_v62, 0.0  ;;  %v411_v15 = vmax.f32 %v395_v5, 0.0  ;;  %v396_v17 = vadd.f32 %v629_v3, %v376_v7  ;;  %v377_v18 = vmul.f32 %v605_v1, %v357_v63  ;;  %v364_v5 = vld [vmem:[%s619_s10 + $0x78] sm:$0xff] }
  0x1d   : > { %v340_v16 = vmax.f32 %v324_v6, 0.0  ;;  %441 = vst [vmem:[%s661_s17 + $0x20] sm:$0xff] %v425_v10  ;;  %v426_v20 = vadd.f32 %v410_v11, %v338_v4  ;;  %v325_v21 = vadd.f32 %v624_v2, %v305_v13  ;;  %v306_v22 = vmul.f32 %v600_v0, %v286_v8 }
  0x1e   : > { %v378_v23 = vmul.f32 %v605_v1, %v358_v9  ;;  %v427_v25 = vadd.f32 %v411_v15, %v339_v12  ;;  %v412_v26 = vmax.f32 %v396_v17, 0.0  ;;  %v397_v27 = vadd.f32 %v629_v3, %v377_v18 }
  0x1f   : > { %v307_v28 = vmul.f32 %v600_v0, %v287_v14  ;;  %442 = vst [vmem:[%s661_s17 + $0x28] sm:$0xff] %v426_v20  ;;  %v341_v30 = vmax.f32 %v325_v21, 0.0  ;;  %v326_v31 = vadd.f32 %v624_v2, %v306_v22  ;;  %v379_v33 = vmul.f32 %v605_v1, %v359_v19 }
  0x20   : > { %v398_v32 = vadd.f32 %v629_v3, %v378_v23  ;;  %443 = vst [vmem:[%s661_s17 + $0x30] sm:$0xff] %v427_v25  ;;  %v428_v35 = vadd.f32 %v412_v26, %v340_v16  ;;  %v413_v36 = vmax.f32 %v397_v27, 0.0  ;;  %v308_v38 = vmul.f32 %v600_v0, %v288_v24 }
  0x21   : > { %v327_v37 = vadd.f32 %v624_v2, %v307_v28  ;;  %v342_v40 = vmax.f32 %v326_v31, 0.0  ;;  %v399_v42 = vadd.f32 %v629_v3, %v379_v33  ;;  %v380_v43 = vmul.f32 %v605_v1, %v360_v29 }
  0x22   : > { %v414_v41 = vmax.f32 %v398_v32, 0.0  ;;  %444 = vst [vmem:[%s661_s17 + $0x38] sm:$0xff] %v428_v35  ;;  %v429_v46 = vadd.f32 %v413_v36, %v341_v30  ;;  %v328_v48 = vadd.f32 %v624_v2, %v308_v38  ;;  %v309_v49 = vmul.f32 %v600_v0, %v289_v34 }
  0x23   : > { %v343_v47 = vmax.f32 %v327_v37, 0.0  ;;  %v415_v52 = vmax.f32 %v399_v42, 0.0  ;;  %v400_v53 = vadd.f32 %v629_v3, %v380_v43  ;;  %v381_v54 = vmul.f32 %v605_v1, %v361_v39 }
  0x24   : > { %v430_v51 = vadd.f32 %v414_v41, %v342_v40  ;;  %445 = vst [vmem:[%s661_s17 + $0x40] sm:$0xff] %v429_v46  ;;  %v344_v56 = vmax.f32 %v328_v48, 0.0  ;;  %v329_v57 = vadd.f32 %v624_v2, %v309_v49  ;;  %v310_v58 = vmul.f32 %v600_v0, %v290_v44 }
  0x25   : > { %v382_v59 = vmul.f32 %v605_v1, %v362_v45  ;;  %v431_v61 = vadd.f32 %v415_v52, %v343_v47  ;;  %v416_v62 = vmax.f32 %v400_v53, 0.0  ;;  %v401_v63 = vadd.f32 %v629_v3, %v381_v54 }
  0x26   : > { %446 = vst [vmem:[%s661_s17 + $0x48] sm:$0xff] %v430_v51  ;;  %v311_v4 = vmul.f32 %v600_v0, %v291_v50  ;;  %v345_v6 = vmax.f32 %v329_v57, 0.0  ;;  %v330_v7 = vadd.f32 %v624_v2, %v310_v58  ;;  %v383_v9 = vmul.f32 %v605_v1, %v363_v55 }
  0x27   : > { %v402_v8 = vadd.f32 %v629_v3, %v382_v59  ;;  %447 = vst [vmem:[%s661_s17 + $0x50] sm:$0xff] %v431_v61  ;;  %v432_v10 = vadd.f32 %v416_v62, %v344_v56  ;;  %v417_v11 = vmax.f32 %v401_v63, 0.0  ;;  %v312_v13 = vmul.f32 %v600_v0, %v292_v60 }
  0x28   : > { %v331_v12 = vadd.f32 %v624_v2, %v311_v4  ;;  %v346_v14 = vmax.f32 %v330_v7, 0.0  ;;  %v403_v16 = vadd.f32 %v629_v3, %v383_v9  ;;  %v384_v17 = vmul.f32 %v605_v1, %v364_v5 }
  0x29   : > { %v418_v15 = vmax.f32 %v402_v8, 0.0  ;;  %448 = vst [vmem:[%s661_s17 + $0x58] sm:$0xff] %v432_v10  ;;  %v433_v18 = vadd.f32 %v417_v11, %v345_v6  ;;  %v332_v20 = vadd.f32 %v624_v2, %v312_v13 }
  0x2a   : > { %v347_v19 = vmax.f32 %v331_v12, 0.0  ;;  %v419_v22 = vmax.f32 %v403_v16, 0.0  ;;  %v404_v23 = vadd.f32 %v629_v3, %v384_v17 }
  0x2b   : > { %v434_v21 = vadd.f32 %v418_v15, %v346_v14  ;;  %449 = vst [vmem:[%s661_s17 + $0x60] sm:$0xff] %v433_v18  ;;  %v348_v24 = vmax.f32 %v332_v20, 0.0 }
  0x2c   : > { %v435_v0 = vadd.f32 %v419_v22, %v347_v19  ;;  %v420_v25 = vmax.f32 %v404_v23, 0.0 }
  0x2d   : > { %450 = vst [vmem:[%s661_s17 + $0x68] sm:$0xff] %v434_v21 }
  0x2e   : > { %451 = vst [vmem:[%s661_s17 + $0x70] sm:$0xff] %v435_v0  ;;  %v436_v26 = vadd.f32 %v420_v25, %v348_v24 }
  0x30   : > { %452 = vst [vmem:[%s661_s17 + $0x78] sm:$0xff] %v436_v26 }
  0x31 PF: > { %s16_s21 = sadd.s32 1, %s552_s21  }
  0x32   : > { %p13_p4 = scmp.ge.s32.totalorder %s16_s21, 6  }
  0x34   :  { %15 = sbr.rel (!%p13_p4) target bundleno = 1 (0x1), region = 77 }

// kernel: bottleneck_forward.7
= control target key start
LH: loop header
LB: loop body
LE: loop exit
PB: predicated region body
PF: predicated region fallthrough
CT: control target
= control target key end

     0   :  { %s2673_s21 = smov 0   ;;  %s3673_s0 = inlined_call_operand.vmem [shape: f32[2,16,16,128], index: 0, kind: input, shape index: {}]   ;;  %s3674_s1 = inlined_call_operand.vmem [shape: f32[1,128], index: 1, kind: input, shape index: {}]   ;;  %s3675_s2 = inlined_call_operand.vmem [shape: f32[1,128], index: 2, kind: input, shape index: {}]   ;;  %s3676_s3 = inlined_call_operand.vmem [shape: f32[9,128,128], index: 3, kind: input, shape index: {}]   ;;  %s3677_s4 = inlined_call_operand.vmem [shape: f32[2,256,128], index: 4, kind: output, shape index: {0}]   ;;  %s3678_s5 = inlined_call_operand.vmem [shape: f32[16,128], index: 5, kind: output, shape index: {1}]   ;;  %s3679_s6 = inlined_call_operand.vmem [shape: f32[16,128], index: 6, kind: output, shape index: {2}]  }
   0x1 LB: > { %s2424_s22 = sadd.s32 4294967295, %s2635_s21   ;;  %p2428_p0 = scmp.ge.s32.totalorder %s2635_s21, 1  ;;  %s2635_s21 = sphi %s2673_s21, %s17_s21  }
   0x2   : > { %p217_p1 = scmp.lt.s32.totalorder %s2635_s21, 3 }
   0x4   : > { %p218_p2 = pnand %p2428_p0, %p217_p1 }
   0x5   : > { %p255_p3 = scmp.lt.s32.totalorder (!%p218_p2), %s2424_s22, 1 }
   0x6   : > { %221 = sbr.rel (%p218_p2) target bundleno = 766 (0x2fe), region = 36 }
   0xb   : > { %v2450_v0 = vld [vmem:[%s3676_s3 + $0xf8] sm:$0xff]  ;;  %v2449_v1 = vld [vmem:[%s3676_s3 + $0xf0] sm:$0xff]  ;;  %v2448_v2 = vld [vmem:[%s3676_s3 + $0xe8] sm:$0xff]  ;;  %s3681_s22 = smov (!%p255_p3, %s2424_s22), 1  ;;  %v2637_v3 = vmov 0.0  }
   0xc   : > { %2567 = vmatpush.msra.mxu1 %v2450_v0  ;;  %2568 = vmatpush.msra.mxu2 %v2450_v0  ;;  %273 = vst [vmem:[#allocation2] sm:$0xff] %v2637_v3  ;;  %v2447_v4 = vld [vmem:[%s3676_s3 + $0xe0] sm:$0xff]  ;;  %s2565_s7 = sshll.u32 %s3681_s22, 8  ;;  %v2446_v5 = vld [vmem:[%s3676_s3 + $0xd8] sm:$0xff]  ;;  %v2445_v12 = vld [vmem:[%s3676_s3 + $0xd0] sm:$0xff] }
   0xd   : > { %2569 = vmatpush.msra.mxu3 %v2450_v0  ;;  %582 = vmatpush.msra.mxu0 %v2450_v0  ;;  %274 = vst [vmem:[#allocation2 + $0x8] sm:$0xff] %v2637_v3  ;;  %s2707_s12 = scalar_lea.vmem %s3673_s0, %s2565_s7  ;;  %v2712_v6 = vld [vmem:[%s3674_s1] ss:$0 sm:$0xff]  ;;  %v2444_v18 = vld [vmem:[%s3676_s3 + $0xc8] sm:$0xff]  ;;  %v2442_v29 = vld [vmem:[%s3676_s3 + $0xb8] sm:$0xff]  ;;  %s3598_s20 = scalar_lea.vmem %s3677_s4, %s2565_s7 }
   0xe   : > { %2570 = vmatpush.msra.mxu1 %v2449_v1  ;;  %2571 = vmatpush.msra.mxu2 %v2449_v1  ;;  %275 = vst [vmem:[#allocation2 + $0x10] sm:$0x3] %v2637_v3  ;;  %v322_v7 = vld [vmem:[%s2707_s12 + $0x30] sm:$0xff]  ;;  %v2719_v8 = vld [vmem:[%s3675_s2] ss:$0 sm:$0xff]  ;;  %v323_v16 = vld [vmem:[%s2707_s12 + $0x38] sm:$0xff] }
   0xf   : > { %2572 = vmatpush.msra.mxu3 %v2449_v1  ;;  %583 = vmatpush.msra.mxu0 %v2449_v1  ;;  %277 = vst [vmem:[#allocation2 + $0x198] sm:$0xff] %v2637_v3  ;;  %v358_v9 = vmul.f32 %v2712_v6, %v322_v7  ;;  %v330_v10 = vld [vmem:[%s2707_s12 + $0x70] sm:$0xff]  ;;  %v331_v17 = vld [vmem:[%s2707_s12 + $0x78] sm:$0xff]  ;;  %v359_v21 = vmul.f32 %v2712_v6, %v323_v16  ;;  %v2443_v24 = vld [vmem:[%s3676_s3 + $0xc0] sm:$0xff]  ;;  %s2433_s7 = sshll.u32 %s3681_s22, 3 }
  0x10   : > { %2573 = vmatpush.msra.mxu1 %v2448_v2  ;;  %2574 = vmatpush.msra.mxu2 %v2448_v2  ;;  %278 = vst [vmem:[#allocation2 + $0x1a0] sm:$0xff] %v2637_v3  ;;  %v338_v11 = vld [vmem:[%s2707_s12 + $0xb0] sm:$0xff]  ;;  %v366_v13 = vmul.f32 %v2712_v6, %v330_v10  ;;  %v367_v23 = vmul.f32 %v2712_v6, %v331_v17  ;;  %v2440_v33 = vld [vmem:[%s3676_s3 + $0xa8] sm:$0xff]  ;;  %v2439_v34 = vld [vmem:[%s3676_s3 + $0xa0] sm:$0xff]  ;;  %s268_s25 = scalar_lea.vmem %s3678_s5, %s2433_s7  ;;  %s272_s28 = scalar_lea.vmem %s3679_s6, %s2433_s7 }
  0x11   : > { %2575 = vmatpush.msra.mxu3 %v2448_v2  ;;  %584 = vmatpush.msra.mxu0 %v2448_v2  ;;  %279 = vst [vmem:[#allocation2 + $0x1a8] sm:$0x3] %v2637_v3  ;;  %v374_v14 = vmul.f32 %v2712_v6, %v338_v11  ;;  %v394_v15 = vadd.f32 %v2719_v8, %v358_v9  ;;  %v2441_v32 = vld [vmem:[%s3676_s3 + $0xb0] sm:$0xff]  ;;  %v2438_v35 = vld [vmem:[%s3676_s3 + $0x98] sm:$0xff]  ;;  %v2436_v37 = vld [vmem:[%s3676_s3 + $0x88] sm:$0xff] }
  0x12   : > { %2576 = vmatpush.msra.mxu1 %v2447_v4  ;;  %2577 = vmatpush.msra.mxu2 %v2447_v4  ;;  %280 = vst [vmem:[#allocation2] sm:$0x1] %v2637_v3  ;;  %v2740_v19 = vadd.f32 %v2719_v8, %v366_v13  ;;  %v395_v26 = vadd.f32 %v2719_v8, %v359_v21  ;;  %v2437_v36 = vld [vmem:[%s3676_s3 + $0x90] sm:$0xff]  ;;  %v339_v38 = vld [vmem:[%s2707_s12 + $0xb8] sm:$0xff]  ;;  %v2435_v39 = vld [vmem:[%s3676_s3 + $0x80] sm:$0xff] }
  0x13   : > { %2578 = vmatpush.msra.mxu3 %v2447_v4  ;;  %585 = vmatpush.msra.mxu0 %v2447_v4  ;;  %281 = vst [vmem:[#allocation2 + $0x18] sm:$0x1] %v2637_v3  ;;  %v2743_v20 = vadd.f32 %v2719_v8, %v374_v14  ;;  %v2747_v22 = vmax.f32 %v394_v15, 0.0  ;;  %v2760_v28 = vadd.f32 %v2719_v8, %v367_v23  ;;  %v2466_v40 = vld [vmem:[%s3676_s3 + $0x178] sm:$0xff]  ;;  %v2465_v44 = vld [vmem:[%s3676_s3 + $0x170] sm:$0xff]  ;;  %v324_v45 = vld [vmem:[%s2707_s12 + $0x40] sm:$0xff] }
  0x14   : > { %2579 = vmatpush.msra.mxu1 %v2446_v5  ;;  %2580 = vmatpush.msra.mxu2 %v2446_v5  ;;  %282 = vst [vmem:[#allocation2 + $0x30] sm:$0x1] %v2637_v3  ;;  %v434_v25 = vmax.f32 %v2740_v19, 0.0  ;;  %v2767_v30 = vmax.f32 %v395_v26, 0.0  ;;  %v375_v41 = vmul.f32 %v2712_v6, %v339_v38  ;;  %v532_v42 = vld [vmem:[%s3676_s3 + $0x78] sm:$0xff]  ;;  %v531_v46 = vld [vmem:[%s3676_s3 + $0x70] sm:$0xff]  ;;  %v360_v53 = vmul.f32 %v2712_v6, %v324_v45 }
  0x15   : > { %2581 = vmatpush.msra.mxu3 %v2446_v5  ;;  %586 = vmatpush.msra.mxu0 %v2446_v5  ;;  %283 = vst [vmem:[#allocation2 + $0x48] sm:$0x1] %v2637_v3  ;;  %v442_v27 = vmax.f32 %v2743_v20, 0.0  ;;  %v435_v31 = vmax.f32 %v2760_v28, 0.0  ;;  %v2482_v43 = vld [vmem:[%s3676_s3 + $0x1f8] sm:$0xff]  ;;  %v332_v47 = vld [vmem:[%s2707_s12 + $0x80] sm:$0xff] }
  0x16   : > { %2582 = vmatpush.msra.mxu1 %v2445_v12  ;;  %2583 = vmatpush.msra.mxu2 %v2445_v12  ;;  %284 = vst [vmem:[#allocation2 + $0x60] sm:$0x1] %v2637_v3  ;;  %v2481_v48 = vld [vmem:[%s3676_s3 + $0x1f0] sm:$0xff]  ;;  %v2464_v49 = vld [vmem:[%s3676_s3 + $0x168] sm:$0xff]  ;;  %v2844_v50 = vadd.f32 %v2719_v8, %v375_v41  ;;  %v340_v54 = vld [vmem:[%s2707_s12 + $0xc0] sm:$0xff]  ;;  %v368_v57 = vmul.f32 %v2712_v6, %v332_v47 }
  0x17   : > { %2584 = vmatpush.msra.mxu3 %v2445_v12  ;;  %587 = vmatpush.msra.mxu0 %v2445_v12  ;;  %459 = vst [vmem:[#allocation2 + $0x61] sm:$0xff] %v2747_v22  ;;  %v533_v51 = vld [vmem:[#allocation2 + $0x1] sm:$0xff]  ;;  %v2498_v56 = vld [vmem:[%s3676_s3 + $0x278] sm:$0xff]  ;;  %v376_v61 = vmul.f32 %v2712_v6, %v340_v54  ;;  %v2497_v62 = vld [vmem:[%s3676_s3 + $0x270] sm:$0xff]  ;;  %v396_v63 = vadd.f32 %v2719_v8, %v360_v53 }
  0x18   : > { %2585 = vmatpush.msra.mxu1 %v2444_v18  ;;  %2586 = vmatpush.msra.mxu2 %v2444_v18  ;;  %467 = vst [vmem:[#allocation2 + $0xc1] sm:$0xff] %v434_v25  ;;  %v530_v52 = vld [vmem:[%s3676_s3 + $0x68] sm:$0xff]  ;;  %v443_v58 = vmax.f32 %v2844_v50, 0.0  ;;  %v2463_v59 = vld [vmem:[%s3676_s3 + $0x160] sm:$0xff]  ;;  %v2881_v1 = vadd.f32 %v2719_v8, %v368_v57  ;;  %v2462_v4 = vld [vmem:[%s3676_s3 + $0x158] sm:$0xff] }
  0x19   : > { %2587 = vmatpush.msra.mxu3 %v2444_v18  ;;  %588 = vmatpush.msra.mxu0 %v2444_v18  ;;  %475 = vst [vmem:[#allocation2 + $0x121] sm:$0xff] %v442_v27  ;;  %v2480_v55 = vld [vmem:[%s3676_s3 + $0x1e8] sm:$0xff]  ;;  %v2479_v60 = vld [vmem:[%s3676_s3 + $0x1e0] sm:$0xff]  ;;  %v2478_v7 = vld [vmem:[%s3676_s3 + $0x1d8] sm:$0xff]  ;;  %v2900_v11 = vadd.f32 %v2719_v8, %v376_v61  ;;  %v2910_v15 = vmax.f32 %v396_v63, 0.0 }
  0x1a   : > { %2588 = vmatpush.msra.mxu1 %v2443_v24  ;;  %2589 = vmatpush.msra.mxu2 %v2443_v24  ;;  %460 = vst [vmem:[#allocation2 + $0x69] sm:$0xff] %v2767_v30  ;;  %v316_v0 = vld [vmem:[%s2707_s12] sm:$0xff]  ;;  %v325_v5 = vld [vmem:[%s2707_s12 + $0x48] sm:$0xff]  ;;  %v528_v12 = vld [vmem:[%s3676_s3 + $0x58] sm:$0xff]  ;;  %v436_v20 = vmax.f32 %v2881_v1, 0.0 }
  0x1b   : > { %2590 = vmatpush.msra.mxu3 %v2443_v24  ;;  %589 = vmatpush.msra.mxu0 %v2443_v24  ;;  %468 = vst [vmem:[#allocation2 + $0xc9] sm:$0xff] %v435_v31  ;;  %v529_v2 = vld [vmem:[%s3676_s3 + $0x60] sm:$0xff]  ;;  %v2496_v9 = vld [vmem:[%s3676_s3 + $0x268] sm:$0xff]  ;;  %v2461_v13 = vld [vmem:[%s3676_s3 + $0x150] sm:$0xff]  ;;  %v352_v14 = vmul.f32 %v2712_v6, %v316_v0  ;;  %v361_v18 = vmul.f32 %v2712_v6, %v325_v5 }
  0x1c   : > { %2591 = vmatpush.msra.mxu1 %v2442_v29  ;;  %2592 = vmatpush.msra.mxu2 %v2442_v29  ;;  %285 = vst [vmem:[#allocation2 + $0x78] sm:$0x1] %v2637_v3  ;;  %v333_v10 = vld [vmem:[%s2707_s12 + $0x88] sm:$0xff]  ;;  %v2477_v17 = vld [vmem:[%s3676_s3 + $0x1d0] sm:$0xff]  ;;  %v2495_v21 = vld [vmem:[%s3676_s3 + $0x260] sm:$0xff] }
  0x1d   : > { %2593 = vmatpush.msra.mxu3 %v2442_v29  ;;  %590 = vmatpush.msra.mxu0 %v2442_v29  ;;  %286 = vst [vmem:[#allocation2 + $0x90] sm:$0x1] %v2637_v3  ;;  %v534_v16 = vld [vmem:[#allocation2 + $0x9] sm:$0xff]  ;;  %v369_v23 = vmul.f32 %v2712_v6, %v333_v10  ;;  %v388_v29 = vadd.f32 %v2719_v8, %v352_v14  ;;  %v2458_v50 = vld [vmem:[%s3676_s3 + $0x138] sm:$0xff]  ;;  %v328_v63 = vld [vmem:[%s2707_s12 + $0x60] sm:$0xff] }
  0x1e   : > { %2594 = vmatpush.msra.mxu1 %v2441_v32  ;;  %2595 = vmatpush.msra.mxu2 %v2441_v32  ;;  %287 = vst [vmem:[#allocation2 + $0xa8] sm:$0x1] %v2637_v3  ;;  %v341_v19 = vld [vmem:[%s2707_s12 + $0xc8] sm:$0xff]  ;;  %v527_v24 = vld [vmem:[%s3676_s3 + $0x50] sm:$0xff]  ;;  %v343_v57 = vld [vmem:[%s2707_s12 + $0xd8] sm:$0xff] }
  0x1f   : > { %2596 = vmatpush.msra.mxu3 %v2441_v32  ;;  %591 = vmatpush.msra.mxu0 %v2441_v32  ;;  %288 = vst [vmem:[#allocation2 + $0xc0] sm:$0x1] %v2637_v3  ;;  %v334_v26 = vld [vmem:[%s2707_s12 + $0x90] sm:$0xff]  ;;  %v2460_v28 = vld [vmem:[%s3676_s3 + $0x148] sm:$0xff]  ;;  %v405_v38 = vadd.f32 %v2719_v8, %v369_v23  ;;  %v2967_v47 = vmax.f32 %v388_v29, 0.0  ;;  %v524_v61 = vld [vmem:[%s3676_s3 + $0x38] sm:$0xff]  ;;  %v379_v10 = vmul.f32 %v2712_v6, %v343_v57 }
  0x20   : > { %2597 = vmatpush.msra.mxu1 %v2440_v33  ;;  %2598 = vmatpush.msra.mxu2 %v2440_v33  ;;  %289 = vst [vmem:[#allocation2 + $0xd8] sm:$0x1] %v2637_v3  ;;  %v2476_v32 = vld [vmem:[%s3676_s3 + $0x1c8] sm:$0xff]  ;;  %v370_v41 = vmul.f32 %v2712_v6, %v334_v26  ;;  %v2470_v57 = vld [vmem:[%s3676_s3 + $0x198] sm:$0xff] }
  0x21   : > { %2599 = vmatpush.msra.mxu3 %v2440_v33  ;;  %592 = vmatpush.msra.mxu0 %v2440_v33  ;;  %290 = vst [vmem:[#allocation2 + $0xf0] sm:$0x1] %v2637_v3  ;;  %v317_v33 = vld [vmem:[%s2707_s12 + $0x8] sm:$0xff] }
  0x22   : > { %2600 = vmatpush.msra.mxu1 %v2439_v34  ;;  %2601 = vmatpush.msra.mxu2 %v2439_v34  ;;  %291 = vst [vmem:[#allocation2 + $0x108] sm:$0x1] %v2637_v3  ;;  %v353_v45 = vmul.f32 %v2712_v6, %v317_v33  ;;  %v3054_v33 = vadd.f32 %v2719_v8, %v379_v10 }
  0x23   : > { %2602 = vmatpush.msra.mxu3 %v2439_v34  ;;  %593 = vmatpush.msra.mxu0 %v2439_v34  ;;  %292 = vst [vmem:[#allocation2 + $0x120] sm:$0x1] %v2637_v3  ;;  %v397_v34 = vadd.f32 %v2719_v8, %v361_v18 }
  0x24   : > { %2603 = vmatpush.msra.mxu1 %v2438_v35  ;;  %2604 = vmatpush.msra.mxu2 %v2438_v35  ;;  %293 = vst [vmem:[#allocation2 + $0x138] sm:$0x1] %v2637_v3  ;;  %v389_v0 = vadd.f32 %v2719_v8, %v353_v45 }
  0x25   : > { %2605 = vmatpush.msra.mxu3 %v2438_v35  ;;  %594 = vmatpush.msra.mxu0 %v2438_v35  ;;  %294 = vst [vmem:[#allocation2 + $0x150] sm:$0x1] %v2637_v3  ;;  %v2494_v35 = vld [vmem:[%s3676_s3 + $0x258] sm:$0xff]  ;;  %v2980_v53 = vmax.f32 %v397_v34, 0.0  ;;  %v522_v34 = vld [vmem:[%s3676_s3 + $0x28] sm:$0xff] }
  0x26   : > { %2606 = vmatpush.msra.mxu1 %v2437_v36  ;;  %2607 = vmatpush.msra.mxu2 %v2437_v36  ;;  %295 = vst [vmem:[#allocation2 + $0x168] sm:$0x1] %v2637_v3 }
  0x27   : > { %2608 = vmatpush.msra.mxu3 %v2437_v36  ;;  %595 = vmatpush.msra.mxu0 %v2437_v36  ;;  %296 = vst [vmem:[#allocation2 + $0x180] sm:$0x1] %v2637_v3 }
  0x28   : > { %2609 = vmatpush.msra.mxu1 %v2436_v37  ;;  %2610 = vmatpush.msra.mxu2 %v2436_v37  ;;  %299 = vst [vmem:[#allocation2 + $0x29] sm:$0x1] %v2637_v3 }
  0x29   : > { %2611 = vmatpush.msra.mxu3 %v2436_v37  ;;  %596 = vmatpush.msra.mxu0 %v2436_v37  ;;  %300 = vst [vmem:[#allocation2 + $0x41] sm:$0x1] %v2637_v3  ;;  %v342_v37 = vld [vmem:[%s2707_s12 + $0xd0] sm:$0xff] }
  0x2a   : > { %2612 = vmatpush.msra.mxu1 %v2435_v39  ;;  %2613 = vmatpush.msra.mxu2 %v2435_v39  ;;  %301 = vst [vmem:[#allocation2 + $0x59] sm:$0x1] %v2637_v3 }
  0x2b   : > { %622 = vmatmul.f32.vlgmr.msra.gmra.mxu1 %v2747_v22  ;;  %646 = vmatmul.f32.vlgmr.msra.gmra.mxu2 %v434_v25  ;;  %302 = vst [vmem:[#allocation2 + $0x71] sm:$0x1] %v2637_v3  ;;  %v326_v25 = vld [vmem:[%s2707_s12 + $0x50] sm:$0xff] }
  0x2c   : > { %857 = vmatpush.msrb.mxu2 %v2466_v40  ;;  %2614 = vmatpush.msra.mxu3 %v2435_v39  ;;  %303 = vst [vmem:[#allocation2 + $0x89] sm:$0x1] %v2637_v3  ;;  %v362_v36 = vmul.f32 %v2712_v6, %v326_v25  ;;  %v2459_v40 = vld [vmem:[%s3676_s3 + $0x140] sm:$0xff]  ;;  %v3040_v25 = vmax.f32 %v389_v0, 0.0 }
  0x2d   : > { %670 = vmatmul.f32.vlgmr.msra.gmra.mxu3 %v442_v27  ;;  %695 = vmatpush.msrb.mxu1 %v532_v42  ;;  %304 = vst [vmem:[#allocation2 + $0xa1] sm:$0x1] %v2637_v3  ;;  %v444_v27 = vmax.f32 %v2900_v11, 0.0  ;;  %v327_v42 = vld [vmem:[%s2707_s12 + $0x58] sm:$0xff] }
  0x2e   : > { %1051 = vmatpush.msrb.mxu3 %v2482_v43  ;;  %858 = vmatpush.msrb.mxu2 %v2465_v44  ;;  %305 = vst [vmem:[#allocation2 + $0xb9] sm:$0x1] %v2637_v3  ;;  %v2475_v43 = vld [vmem:[%s3676_s3 + $0x1c0] sm:$0xff]  ;;  %v2493_v44 = vld [vmem:[%s3676_s3 + $0x250] sm:$0xff]  ;;  %v398_v54 = vadd.f32 %v2719_v8, %v362_v36  ;;  %v319_v11 = vld [vmem:[%s2707_s12 + $0x18] sm:$0xff] }
  0x2f   : > { %696 = vmatpush.msrb.mxu1 %v531_v46  ;;  %597 = vmatpush.msra.mxu0 %v2435_v39  ;;  %306 = vst [vmem:[#allocation2 + $0xd1] sm:$0x1] %v2637_v3  ;;  %v526_v39 = vld [vmem:[%s3676_s3 + $0x48] sm:$0xff]  ;;  %v335_v46 = vld [vmem:[%s2707_s12 + $0x98] sm:$0xff]  ;;  %v355_v29 = vmul.f32 %v2712_v6, %v319_v11  ;;  %v519_v11 = vld [vmem:[%s3676_s3 + $0x10] sm:$0xff] }
  0x30   : > { %1052 = vmatpush.msrb.mxu3 %v2481_v48  ;;  %859 = vmatpush.msrb.mxu2 %v2464_v49  ;;  %307 = vst [vmem:[#allocation2 + $0xe9] sm:$0x1] %v2637_v3  ;;  %v525_v49 = vld [vmem:[%s3676_s3 + $0x40] sm:$0xff] }
  0x31   : > { %598 = vmatmul.f32.vlgmr.msra.gmra.mxu0 %v533_v51  ;;  %697 = vmatpush.msrb.mxu1 %v530_v52  ;;  %308 = vst [vmem:[#allocation2 + $0x101] sm:$0x1] %v2637_v3  ;;  %v378_v51 = vmul.f32 %v2712_v6, %v342_v37  ;;  %v318_v52 = vld [vmem:[%s2707_s12 + $0x10] sm:$0xff]  ;;  %v320_v37 = vld [vmem:[%s2707_s12 + $0x20] sm:$0xff] }
  0x32   : > { %1053 = vmatpush.msrb.mxu3 %v2480_v55  ;;  %1245 = vmatpush.msrb.mxu0 %v2498_v56  ;;  %309 = vst [vmem:[#allocation2 + $0x119] sm:$0x1] %v2637_v3  ;;  %v2474_v55 = vld [vmem:[%s3676_s3 + $0x1b8] sm:$0xff]  ;;  %v363_v56 = vmul.f32 %v2712_v6, %v327_v42  ;;  %v354_v1 = vmul.f32 %v2712_v6, %v318_v52  ;;  %v345_v42 = vld [vmem:[%s2707_s12 + $0xe8] sm:$0xff] }
  0x33   : > { %625 = vmatmul.f32.gmra.mxu1 %v2767_v30  ;;  %649 = vmatmul.f32.gmra.mxu2 %v435_v31  ;;  %310 = vst [vmem:[#allocation2 + $0x131] sm:$0x1] %v2637_v3  ;;  %v377_v31 = vmul.f32 %v2712_v6, %v341_v19  ;;  %v3007_v5 = vadd.f32 %v2719_v8, %v378_v51 }
  0x34   : > { %860 = vmatpush.msrb.mxu2 %v2463_v59  ;;  %1054 = vmatpush.msrb.mxu3 %v2479_v60  ;;  %311 = vst [vmem:[#allocation2 + $0x149] sm:$0x1] %v2637_v3  ;;  %v406_v59 = vadd.f32 %v2719_v8, %v370_v41  ;;  %v2492_v60 = vld [vmem:[%s3676_s3 + $0x248] sm:$0xff]  ;;  %v399_v14 = vadd.f32 %v2719_v8, %v363_v56 }
  0x35   : > { %673 = vmatmul.f32.gmra.mxu3 %v443_v58  ;;  %1246 = vmatpush.msrb.mxu0 %v2497_v62  ;;  %312 = vst [vmem:[#allocation2 + $0x161] sm:$0x1] %v2637_v3  ;;  %v2970_v48 = vadd.f32 %v2719_v8, %v377_v31  ;;  %v371_v62 = vmul.f32 %v2712_v6, %v335_v46  ;;  %v337_v31 = vld [vmem:[%s2707_s12 + $0xa8] sm:$0xff]  ;;  %v521_v46 = vld [vmem:[%s3676_s3 + $0x20] sm:$0xff] }
  0x36   : > { %698 = vmatpush.msrb.mxu1 %v529_v2  ;;  %861 = vmatpush.msrb.mxu2 %v2462_v4  ;;  %313 = vst [vmem:[#allocation2 + $0x179] sm:$0x1] %v2637_v3  ;;  %v336_v2 = vld [vmem:[%s2707_s12 + $0xa0] sm:$0xff]  ;;  %v3028_v18 = vmax.f32 %v406_v59, 0.0  ;;  %v390_v26 = vadd.f32 %v2719_v8, %v354_v1  ;;  %v391_v51 = vadd.f32 %v2719_v8, %v355_v29  ;;  %v520_v1 = vld [vmem:[%s3676_s3 + $0x18] sm:$0xff] }
  0x37   : > { %1055 = vmatpush.msrb.mxu3 %v2478_v7  ;;  %1247 = vmatpush.msrb.mxu0 %v2496_v9  ;;  %314 = vst [vmem:[#allocation2 + $0x191] sm:$0x1] %v2637_v3  ;;  %v445_v4 = vmax.f32 %v2970_v48, 0.0  ;;  %v2457_v7 = vld [vmem:[%s3676_s3 + $0x130] sm:$0xff]  ;;  %v407_v19 = vadd.f32 %v2719_v8, %v371_v62  ;;  %v372_v23 = vmul.f32 %v2712_v6, %v336_v2 }
  0x38   : > { %699 = vmatpush.msrb.mxu1 %v528_v12  ;;  %862 = vmatpush.msrb.mxu2 %v2461_v13  ;;  %476 = vst [vmem:[#allocation2 + $0x129] sm:$0xff] %v443_v58  ;;  %v2988_v58 = vmax.f32 %v405_v38, 0.0  ;;  %v2473_v9 = vld [vmem:[%s3676_s3 + $0x1b0] sm:$0xff]  ;;  %v3018_v12 = vmax.f32 %v398_v54, 0.0  ;;  %v2491_v13 = vld [vmem:[%s3676_s3 + $0x240] sm:$0xff]  ;;  %v3065_v38 = vmax.f32 %v399_v14, 0.0  ;;  %v373_v48 = vmul.f32 %v2712_v6, %v337_v31 }
  0x39   : > { %601 = vmatmul.f32.gmra.mxu0 %v534_v16  ;;  %1056 = vmatpush.msrb.mxu3 %v2477_v17  ;;  %297 = vst [vmem:[#allocation2 + $0x198] sm:$0x1] %v2637_v3  ;;  %v364_v16 = vmul.f32 %v2712_v6, %v328_v63  ;;  %v344_v17 = vld [vmem:[%s2707_s12 + $0xe0] sm:$0xff]  ;;  %v408_v45 = vadd.f32 %v2719_v8, %v372_v23  ;;  %v447_v54 = vmax.f32 %v3054_v33, 0.0  ;;  %v2453_v2 = vld [vmem:[%s3676_s3 + $0x110] sm:$0xff]  ;;  %v518_v23 = vld [vmem:[%s3676_s3 + $0x8] sm:$0xff] }
  0x3a   : > { %1248 = vmatpush.msrb.mxu0 %v2495_v21  ;;  %700 = vmatpush.msrb.mxu1 %v527_v24  ;;  %298 = vst [vmem:[#allocation2 + $0x11] sm:$0x1] %v2637_v3  ;;  %v2456_v21 = vld [vmem:[%s3676_s3 + $0x128] sm:$0xff]  ;;  %v380_v36 = vmul.f32 %v2712_v6, %v344_v17  ;;  %v356_v52 = vmul.f32 %v2712_v6, %v320_v37  ;;  %v517_v31 = vld [vmem:[%s3676_s3] sm:$0xff]  ;;  %v2562_v33 = vld [vmem:[%s3676_s3 + $0x478] sm:$0xff] }
  0x3b   : > { %628 = vmatmul.f32.gmra.mxu1 %v2910_v15  ;;  %652 = vmatmul.f32.gmra.mxu2 %v436_v20  ;;  %315 = vst [vmem:[#allocation2 + $0x1a9] sm:$0x1] %v2637_v3  ;;  %v329_v24 = vld [vmem:[%s2707_s12 + $0x68] sm:$0xff]  ;;  %v381_v59 = vmul.f32 %v2712_v6, %v345_v42  ;;  %v3114_v0 = vmax.f32 %v408_v45, 0.0  ;;  %v2483_v37 = vld [vmem:[%s3676_s3 + $0x200] sm:$0xff]  ;;  %v2561_v42 = vld [vmem:[%s3676_s3 + $0x470] sm:$0xff] }
  0x3c   : > { %863 = vmatpush.msrb.mxu2 %v2460_v28  ;;  %1057 = vmatpush.msrb.mxu3 %v2476_v32  ;;  %461 = vst [vmem:[#allocation2 + $0x79] sm:$0xff] %v2910_v15  ;;  %v2490_v28 = vld [vmem:[%s3676_s3 + $0x238] sm:$0xff]  ;;  %v446_v32 = vmax.f32 %v3007_v5, 0.0  ;;  %v365_v41 = vmul.f32 %v2712_v6, %v329_v24  ;;  %v3096_v56 = vadd.f32 %v2719_v8, %v380_v36  ;;  %v2469_v5 = vld [vmem:[%s3676_s3 + $0x190] sm:$0xff]  ;;  %v2468_v17 = vld [vmem:[%s3676_s3 + $0x188] sm:$0xff] }
  0x3d   : > { %676 = vmatmul.f32.gmra.mxu3 %v444_v27  ;;  %1249 = vmatpush.msrb.mxu0 %v2494_v35  ;;  %469 = vst [vmem:[#allocation2 + $0xd9] sm:$0xff] %v436_v20  ;;  %v523_v20 = vld [vmem:[%s3676_s3 + $0x30] sm:$0xff]  ;;  %v2455_v35 = vld [vmem:[%s3676_s3 + $0x120] sm:$0xff]  ;;  %v3142_v14 = vadd.f32 %v2719_v8, %v381_v59  ;;  %v2514_v36 = vld [vmem:[%s3676_s3 + $0x2f8] sm:$0xff] }
  0x3e   : > { %701 = vmatpush.msrb.mxu1 %v526_v39  ;;  %864 = vmatpush.msrb.mxu2 %v2459_v40  ;;  %477 = vst [vmem:[#allocation2 + $0x139] sm:$0xff] %v444_v27  ;;  %v2472_v27 = vld [vmem:[%s3676_s3 + $0x1a8] sm:$0xff]  ;;  %v2471_v39 = vld [vmem:[%s3676_s3 + $0x1a0] sm:$0xff]  ;;  %v400_v40 = vadd.f32 %v2719_v8, %v364_v16  ;;  %v401_v62 = vadd.f32 %v2719_v8, %v365_v41  ;;  %v448_v10 = vmax.f32 %v3096_v56, 0.0  ;;  %v2513_v41 = vld [vmem:[%s3676_s3 + $0x2f0] sm:$0xff] }
  0x3f   : > { %1058 = vmatpush.msrb.mxu3 %v2475_v43  ;;  %1250 = vmatpush.msrb.mxu0 %v2493_v44  ;;  %462 = vst [vmem:[#allocation2 + $0x81] sm:$0xff] %v2980_v53  ;;  %v3073_v43 = vmax.f32 %v407_v19, 0.0  ;;  %v2489_v44 = vld [vmem:[%s3676_s3 + $0x230] sm:$0xff]  ;;  %v808_v45 = vld [vmem:[#allocation2 + $0x2] sm:$0xff] }
  0x40   : > { %702 = vmatpush.msrb.mxu1 %v525_v49  ;;  %865 = vmatpush.msrb.mxu2 %v2458_v50  ;;  %470 = vst [vmem:[#allocation2 + $0xe1] sm:$0xff] %v2988_v58  ;;  %v321_v49 = vld [vmem:[%s2707_s12 + $0x28] sm:$0xff]  ;;  %v3085_v50 = vmax.f32 %v390_v26, 0.0  ;;  %v3145_v16 = vmax.f32 %v401_v62, 0.0  ;;  %v2451_v26 = vld [vmem:[%s3676_s3 + $0x100] sm:$0xff] }
  0x41   : > { %604 = vmatmul.f32.gmra.mxu0 %v2967_v47  ;;  %1059 = vmatpush.msrb.mxu3 %v2474_v55  ;;  %453 = vst [vmem:[#allocation2 + $0x19] sm:$0xff] %v2967_v47  ;;  %v2454_v55 = vld [vmem:[%s3676_s3 + $0x118] sm:$0xff]  ;;  %v357_v63 = vmul.f32 %v2712_v6, %v321_v49  ;;  %v3124_v6 = vmax.f32 %v391_v51, 0.0  ;;  %v2544_v49 = vld [vmem:[%s3676_s3 + $0x3e8] sm:$0xff]  ;;  %v2511_v59 = vld [vmem:[%s3676_s3 + $0x2e0] sm:$0xff] }
  0x42   : > { %1251 = vmatpush.msrb.mxu0 %v2492_v60  ;;  %703 = vmatpush.msrb.mxu1 %v524_v61  ;;  %478 = vst [vmem:[#allocation2 + $0x141] sm:$0xff] %v445_v4  ;;  %v3103_v60 = vmax.f32 %v400_v40, 0.0  ;;  %v2488_v61 = vld [vmem:[%s3676_s3 + $0x228] sm:$0xff]  ;;  %v2545_v40 = vld [vmem:[%s3676_s3 + $0x3f0] sm:$0xff]  ;;  %v2559_v62 = vld [vmem:[%s3676_s3 + $0x460] sm:$0xff] }
  0x43   : > { %631 = vmatmul.f32.gmra.mxu1 %v2980_v53  ;;  %655 = vmatmul.f32.gmra.mxu2 %v2988_v58  ;;  %463 = vst [vmem:[#allocation2 + $0x91] sm:$0xff] %v3018_v12  ;;  %v393_v19 = vadd.f32 %v2719_v8, %v357_v63  ;;  %v2512_v51 = vld [vmem:[%s3676_s3 + $0x2e8] sm:$0xff] }
  0x44   : > { %866 = vmatpush.msrb.mxu2 %v2457_v7  ;;  %1060 = vmatpush.msrb.mxu3 %v2473_v9  ;;  %471 = vst [vmem:[#allocation2 + $0xf1] sm:$0xff] %v3028_v18  ;;  %v2487_v7 = vld [vmem:[%s3676_s3 + $0x220] sm:$0xff]  ;;  %v392_v9 = vadd.f32 %v2719_v8, %v356_v52  ;;  %v809_v52 = vld [vmem:[#allocation2 + $0xa] sm:$0xff] }
  0x45   : > { %679 = vmatmul.f32.gmra.mxu3 %v445_v4  ;;  %1252 = vmatpush.msrb.mxu0 %v2491_v13  ;;  %454 = vst [vmem:[#allocation2 + $0x21] sm:$0xff] %v3040_v25  ;;  %v409_v4 = vadd.f32 %v2719_v8, %v373_v48  ;;  %v2452_v13 = vld [vmem:[%s3676_s3 + $0x108] sm:$0xff]  ;;  %v449_v8 = vmax.f32 %v3142_v14, 0.0  ;;  %v3175_v29 = vmax.f32 %v393_v19, 0.0  ;;  %v2509_v14 = vld [vmem:[%s3676_s3 + $0x2d0] sm:$0xff] }
  0x46   : > { %704 = vmatpush.msrb.mxu1 %v523_v20  ;;  %867 = vmatpush.msrb.mxu2 %v2456_v21  ;;  %479 = vst [vmem:[#allocation2 + $0x151] sm:$0xff] %v446_v32  ;;  %v2486_v21 = vld [vmem:[%s3676_s3 + $0x218] sm:$0xff]  ;;  %v3160_v24 = vmax.f32 %v392_v9, 0.0  ;;  %v2528_v48 = vld [vmem:[%s3676_s3 + $0x368] sm:$0xff] }
  0x47   : > { %1061 = vmatpush.msrb.mxu3 %v2472_v27  ;;  %1253 = vmatpush.msrb.mxu0 %v2490_v28  ;;  %464 = vst [vmem:[#allocation2 + $0x99] sm:$0xff] %v3065_v38  ;;  %v3151_v20 = vmax.f32 %v409_v4, 0.0  ;;  %v2467_v27 = vld [vmem:[%s3676_s3 + $0x180] sm:$0xff]  ;;  %v2485_v28 = vld [vmem:[%s3676_s3 + $0x210] sm:$0xff]  ;;  %v2510_v4 = vld [vmem:[%s3676_s3 + $0x2d8] sm:$0xff] }
  0x48   : > { %705 = vmatpush.msrb.mxu1 %v522_v34  ;;  %868 = vmatpush.msrb.mxu2 %v2455_v35  ;;  %472 = vst [vmem:[#allocation2 + $0xf9] sm:$0xff] %v3073_v43  ;;  %v2484_v34 = vld [vmem:[%s3676_s3 + $0x208] sm:$0xff]  ;;  %v2546_v35 = vld [vmem:[%s3676_s3 + $0x3f8] sm:$0xff] }
  0x49   : > { %607 = vmatmul.f32.gmra.mxu0 %v3040_v25  ;;  %1062 = vmatpush.msrb.mxu3 %v2471_v39  ;;  %455 = vst [vmem:[#allocation2 + $0x31] sm:$0xff] %v3085_v50  ;;  %v2529_v39 = vld [vmem:[%s3676_s3 + $0x370] sm:$0xff]  ;;  %v1009_v19 = vld [vmem:[#allocation2 + $0x68] sm:$0xff] }
  0x4a   : > { %1254 = vmatpush.msrb.mxu0 %v2489_v44  ;;  %706 = vmatpush.msrb.mxu1 %v521_v46  ;;  %480 = vst [vmem:[#allocation2 + $0x159] sm:$0xff] %v447_v54  ;;  %v485_v44 = vld [vmem:[#allocation2] sm:$0xff]  ;;  %v1002_v46 = vld [vmem:[#allocation2 + $0x18] sm:$0xff] }
  0x4b   : > { %634 = vmatmul.f32.gmra.mxu1 %v3018_v12  ;;  %658 = vmatmul.f32.gmra.mxu2 %v3028_v18  ;;  %465 = vst [vmem:[#allocation2 + $0xa9] sm:$0xff] %v3103_v60 }
  0x4c   : > { %869 = vmatpush.msrb.mxu2 %v2454_v55  ;;  %1063 = vmatpush.msrb.mxu3 %v2470_v57  ;;  %473 = vst [vmem:[#allocation2 + $0x109] sm:$0xff] %v3114_v0  ;;  %v2560_v55 = vld [vmem:[%s3676_s3 + $0x468] sm:$0xff]  ;;  %v810_v56 = vld [vmem:[#allocation2 + $0x1a] sm:$0xff] }
  0x4d   : > { %682 = vmatmul.f32.gmra.mxu3 %v446_v32  ;;  %1255 = vmatpush.msrb.mxu0 %v2488_v61  ;;  %456 = vst [vmem:[#allocation2 + $0x39] sm:$0xff] %v3124_v6  ;;  %v2530_v32 = vld [vmem:[%s3676_s3 + $0x378] sm:$0xff] }
  0x4e   : > { %707 = vmatpush.msrb.mxu1 %v520_v1  ;;  %870 = vmatpush.msrb.mxu2 %v2453_v2  ;;  %481 = vst [vmem:[#allocation2 + $0x169] sm:$0xff] %v448_v10  ;;  %v2526_v2 = vld [vmem:[%s3676_s3 + $0x358] sm:$0xff] }
  0x4f   : > { %1064 = vmatpush.msrb.mxu3 %v2469_v5  ;;  %1256 = vmatpush.msrb.mxu0 %v2487_v7  ;;  %466 = vst [vmem:[#allocation2 + $0xb1] sm:$0xff] %v3145_v16  ;;  %v2558_v7 = vld [vmem:[%s3676_s3 + $0x458] sm:$0xff] }
  0x50   : > { %708 = vmatpush.msrb.mxu1 %v519_v11  ;;  %871 = vmatpush.msrb.mxu2 %v2452_v13  ;;  %474 = vst [vmem:[#allocation2 + $0x111] sm:$0xff] %v3151_v20  ;;  %v1004_v57 = vld [vmem:[#allocation2 + $0x30] sm:$0xff] }
  0x51   : > { %610 = vmatmul.f32.gmra.mxu0 %v3085_v50  ;;  %1065 = vmatpush.msrb.mxu3 %v2468_v17  ;;  %457 = vst [vmem:[#allocation2 + $0x49] sm:$0xff] %v3160_v24  ;;  %v2525_v11 = vld [vmem:[%s3676_s3 + $0x350] sm:$0xff] }
  0x52   : > { %1257 = vmatpush.msrb.mxu0 %v2486_v21  ;;  %709 = vmatpush.msrb.mxu1 %v518_v23  ;;  %482 = vst [vmem:[#allocation2 + $0x171] sm:$0xff] %v449_v8  ;;  %v2541_v13 = vld [vmem:[%s3676_s3 + $0x3d0] sm:$0xff] }
  0x53   : > { %637 = vmatmul.f32.gmra.mxu1 %v3065_v38  ;;  %661 = vmatmul.f32.gmra.mxu2 %v3073_v43  ;;  %458 = vst [vmem:[#allocation2 + $0x51] sm:$0xff] %v3175_v29  ;;  %v2557_v21 = vld [vmem:[%s3676_s3 + $0x450] sm:$0xff] }
  0x54   : > { %872 = vmatpush.msrb.mxu2 %v2451_v26  ;;  %1066 = vmatpush.msrb.mxu3 %v2467_v27  ;;  %v1005_v61 = vld [vmem:[#allocation2 + $0x38] sm:$0xff]  ;;  %v2540_v26 = vld [vmem:[%s3676_s3 + $0x3c8] sm:$0xff] }
  0x55   : > { %685 = vmatmul.f32.gmra.mxu3 %v447_v54  ;;  %1258 = vmatpush.msrb.mxu0 %v2485_v28  ;;  %v1003_v54 = vld [vmem:[#allocation2 + $0x20] sm:$0xff]  ;;  %v812_v63 = vld [vmem:[#allocation2 + $0x32] sm:$0xff] }
  0x56   : > { %710 = vmatpush.msrb.mxu1 %v517_v31  ;;  %1634 = vmatpush.msra.mxu2 %v2530_v32  ;;  %v817_v32 = vld [vmem:[#allocation2 + $0x6a] sm:$0xff] }
  0x57   : > { %1259 = vmatpush.msrb.mxu0 %v2484_v34  ;;  %1828 = vmatpush.msra.mxu3 %v2546_v35  ;;  %v1011_v34 = vld [vmem:[#allocation2 + $0x80] sm:$0xff]  ;;  %v2556_v35 = vld [vmem:[%s3676_s3 + $0x448] sm:$0xff] }
  0x58   : > { %1439 = vmatpush.msra.mxu1 %v2514_v36  ;;  %1635 = vmatpush.msra.mxu2 %v2529_v39  ;;  %v1006_v1 = vld [vmem:[#allocation2 + $0x48] sm:$0xff] }
  0x59   : > { %613 = vmatmul.f32.gmra.mxu0 %v3124_v6  ;;  %1829 = vmatpush.msra.mxu3 %v2545_v40  ;;  %v818_v40 = vld [vmem:[#allocation2 + $0x7a] sm:$0xff] }
  0x5a   : > { %1260 = vmatpush.msrb.mxu0 %v2483_v37  ;;  %1440 = vmatpush.msra.mxu1 %v2513_v41  ;;  %v1007_v5 = vld [vmem:[#allocation2 + $0x50] sm:$0xff]  ;;  %v2523_v41 = vld [vmem:[%s3676_s3 + $0x340] sm:$0xff] }
  0x5b   : > { %640 = vmatmul.f32.gmra.mxu1 %v3103_v60  ;;  %664 = vmatmul.f32.gmra.mxu2 %v3114_v0  ;;  %v814_v9 = vld [vmem:[#allocation2 + $0x4a] sm:$0xff]  ;;  %v815_v17 = vld [vmem:[#allocation2 + $0x52] sm:$0xff] }
  0x5c   : > { %2022 = vmatpush.msra.mxu0 %v2562_v33  ;;  %1636 = vmatpush.msra.mxu2 %v2528_v48 }
  0x5d   : > { %688 = vmatmul.f32.gmra.mxu3 %v448_v10  ;;  %1441 = vmatpush.msra.mxu1 %v2512_v51  ;;  %v1008_v10 = vld [vmem:[#allocation2 + $0x60] sm:$0xff]  ;;  %v1013_v51 = vld [vmem:[#allocation2 + $0x98] sm:$0xff] }
  0x5e   : > { %2023 = vmatpush.msra.mxu0 %v2561_v42  ;;  %1830 = vmatpush.msra.mxu3 %v2544_v49  ;;  %v2539_v42 = vld [vmem:[%s3676_s3 + $0x3c0] sm:$0xff] }
  0x5f   : > { %1442 = vmatpush.msra.mxu1 %v2511_v59  ;;  %v819_v49 = vld [vmem:[#allocation2 + $0x82] sm:$0xff]  ;;  %v2538_v59 = vld [vmem:[%s3676_s3 + $0x3b8] sm:$0xff] }
  0x60   : > { %2024 = vmatpush.msra.mxu0 %v2560_v55 }
  0x61   : > { %616 = vmatmul.f32.gmra.mxu0 %v3160_v24  ;;  %1443 = vmatpush.msra.mxu1 %v2510_v4 }
  0x62   : > { %2025 = vmatpush.msra.mxu0 %v2559_v62 }
  0x63   : > { %643 = vmatmul.f32.gmra.mxu1 %v3145_v16  ;;  %667 = vmatmul.f32.gmra.mxu2 %v3151_v20 }
  0x64   : > { %2026 = vmatpush.msra.mxu0 %v2558_v7  ;;  %1444 = vmatpush.msra.mxu1 %v2509_v14 }
  0x65   : > { %691 = vmatmul.f32.gmra.mxu3 %v449_v8  ;;  %v1010_v8 = vld [vmem:[#allocation2 + $0x78] sm:$0xff] }
  0x66   : > { %2027 = vmatpush.msra.mxu0 %v2557_v21 }
  0x68   : > { %2028 = vmatpush.msra.mxu0 %v2556_v35 }
  0x69   : > { %619 = vmatmul.f32.gmra.mxu0 %v3175_v29 }
  0x6b   : > { %711 = vmatmul.f32.vlgmr.msrb.gmra.mxu1 %v485_v44  ;;  %873 = vmatmul.f32.vlgmr.msrb.gmra.mxu2 %v808_v45 }
  0x6d   : > { %1067 = vmatmul.f32.vlgmr.msrb.gmra.mxu3 %v1002_v46 }
  0x71   : > { %1261 = vmatmul.f32.vlgmr.msrb.gmra.mxu0 %v2967_v47  ;;  %v2527_v47 = vld [vmem:[%s3676_s3 + $0x360] sm:$0xff] }
  0x72   : > { %1637 = vmatpush.msra.mxu2 %v2527_v47  ;;  %v820_v47 = vld [vmem:[#allocation2 + $0x92] sm:$0xff] }
  0x73   : > { %714 = vmatmul.f32.gmra.mxu1 %v2637_v3  ;;  %876 = vmatmul.f32.gmra.mxu2 %v809_v52  ;;  %v2543_v3 = vld [vmem:[%s3676_s3 + $0x3e0] sm:$0xff] }
  0x74   : > { %1831 = vmatpush.msra.mxu3 %v2543_v3  ;;  %1638 = vmatpush.msra.mxu2 %v2526_v2  ;;  %v2555_v52 = vld [vmem:[%s3676_s3 + $0x440] sm:$0xff]  ;;  %v2522_v3 = vld [vmem:[%s3676_s3 + $0x338] sm:$0xff]  ;;  %v1015_v2 = vld [vmem:[#allocation2 + $0xb0] sm:$0xff] }
  0x75   : > { %1070 = vmatmul.f32.gmra.mxu3 %v1003_v54  ;;  %2029 = vmatpush.msra.mxu0 %v2555_v52  ;;  %v1212_v52 = vld [vmem:[#allocation2 + $0xd9] sm:$0xff] }
  0x76   : > { %1639 = vmatpush.msra.mxu2 %v2525_v11  ;;  %v2537_v11 = vld [vmem:[%s3676_s3 + $0x3b0] sm:$0xff] }
  0x79   : > { %1264 = vmatmul.f32.gmra.mxu0 %v3040_v25  ;;  %v811_v25 = vld [vmem:[#allocation2 + $0x22] sm:$0xff] }
  0x7b   : > { %717 = vmatmul.f32.gmra.mxu1 %v1002_v46  ;;  %879 = vmatmul.f32.gmra.mxu2 %v810_v56 }
  0x7d   : > { %1073 = vmatmul.f32.gmra.mxu3 %v1004_v57 }
  0x81   : > { %1267 = vmatmul.f32.gmra.mxu0 %v3085_v50  ;;  %v2542_v50 = vld [vmem:[%s3676_s3 + $0x3d8] sm:$0xff] }
  0x82   : > { %1832 = vmatpush.msra.mxu3 %v2542_v50  ;;  %v2554_v50 = vld [vmem:[%s3676_s3 + $0x438] sm:$0xff] }
  0x83   : > { %720 = vmatmul.f32.gmra.mxu1 %v1003_v54  ;;  %882 = vmatmul.f32.gmra.mxu2 %v811_v25 }
  0x84   : > { %1833 = vmatpush.msra.mxu3 %v2541_v13  ;;  %2030 = vmatpush.msra.mxu0 %v2554_v50 }
  0x85   : > { %1076 = vmatmul.f32.gmra.mxu3 %v1005_v61 }
  0x86   : > { %1834 = vmatpush.msra.mxu3 %v2540_v26 }
  0x88   : > { %1835 = vmatpush.msra.mxu3 %v2539_v42 }
  0x89   : > { %1270 = vmatmul.f32.gmra.mxu0 %v3124_v6  ;;  %v813_v6 = vld [vmem:[#allocation2 + $0x3a] sm:$0xff] }
  0x8a   : > { %1836 = vmatpush.msra.mxu3 %v2538_v59 }
  0x8b   : > { %723 = vmatmul.f32.gmra.mxu1 %v1004_v57  ;;  %885 = vmatmul.f32.gmra.mxu2 %v812_v63 }
  0x8c   : > { %1837 = vmatpush.msra.mxu3 %v2537_v11 }
  0x8d   : > { %1079 = vmatmul.f32.gmra.mxu3 %v1006_v1 }
  0x91   : > { %1273 = vmatmul.f32.gmra.mxu0 %v3160_v24  ;;  %v816_v24 = vld [vmem:[#allocation2 + $0x62] sm:$0xff] }
  0x93   : > { %726 = vmatmul.f32.gmra.mxu1 %v1005_v61  ;;  %888 = vmatmul.f32.gmra.mxu2 %v813_v6 }
  0x95   : > { %1082 = vmatmul.f32.gmra.mxu3 %v1007_v5 }
  0x99   : > { %1276 = vmatmul.f32.gmra.mxu0 %v3175_v29 }
  0x9b   : > { %729 = vmatmul.f32.gmra.mxu1 %v1006_v1  ;;  %891 = vmatmul.f32.gmra.mxu2 %v814_v9  ;;  %v821_v1 = vld [vmem:[#allocation2 + $0x9a] sm:$0xff]  ;;  %v822_v9 = vld [vmem:[#allocation2 + $0xaa] sm:$0xff] }
  0x9d   : > { %1085 = vmatmul.f32.gmra.mxu3 %v1008_v10 }
  0xa1   : > { %1279 = vmatmul.f32.gmra.mxu0 %v2747_v22  ;;  %v2524_v22 = vld [vmem:[%s3676_s3 + $0x348] sm:$0xff] }
  0xa2   : > { %1640 = vmatpush.msra.mxu2 %v2524_v22  ;;  %v2553_v22 = vld [vmem:[%s3676_s3 + $0x430] sm:$0xff] }
  0xa3   : > { %732 = vmatmul.f32.gmra.mxu1 %v1007_v5  ;;  %894 = vmatmul.f32.gmra.mxu2 %v815_v17  ;;  %v1210_v17 = vld [vmem:[#allocation2 + $0xc1] sm:$0xff] }
  0xa4   : > { %1641 = vmatpush.msra.mxu2 %v2523_v41  ;;  %2031 = vmatpush.msra.mxu0 %v2553_v22  ;;  %v2520_v41 = vld [vmem:[%s3676_s3 + $0x328] sm:$0xff] }
  0xa5   : > { %1088 = vmatmul.f32.gmra.mxu3 %v1009_v19 }
  0xa6   : > { %1642 = vmatpush.msra.mxu2 %v2522_v3 }
  0xa8   : > { %v3278_v23 = vpop.f32.mrf.mxu1 }
  0xa9   : > { %1282 = vmatmul.f32.gmra.mxu0 %v2767_v30  ;;  %v2508_v30 = vld [vmem:[%s3676_s3 + $0x2c8] sm:$0xff] }
  0xaa   : > { %1445 = vmatpush.msra.mxu1 %v2508_v30 }
  0xab   : > { %735 = vmatmul.f32.gmra.mxu1 %v1008_v10  ;;  %897 = vmatmul.f32.gmra.mxu2 %v816_v24  ;;  %v2521_v10 = vld [vmem:[%s3676_s3 + $0x330] sm:$0xff] }
  0xac   : > { %1643 = vmatpush.msra.mxu2 %v2521_v10  ;;  %v823_v24 = vld [vmem:[#allocation2 + $0xb2] sm:$0xff] }
  0xad   : > { %1091 = vmatmul.f32.gmra.mxu3 %v1010_v8 }
  0xae   : > { %v3287_v27 = vpop.f32.mrf.mxu2  ;;  %v3289_v28 = vpop.f32.mrf.mxu0  ;;  %1644 = vmatpush.msra.mxu2 %v2520_v41 }
  0xb0   : > { %v3294_v29 = vpop.f32.mrf.mxu1  ;;  %v3296_v31 = vpop.f32.mrf.mxu3 }
  0xb1   : > { %1285 = vmatmul.f32.gmra.mxu0 %v2910_v15  ;;  %v1012_v15 = vld [vmem:[#allocation2 + $0x90] sm:$0xff] }
  0xb3   : > { %738 = vmatmul.f32.gmra.mxu1 %v1009_v19  ;;  %900 = vmatmul.f32.gmra.mxu2 %v817_v32  ;;  %v1211_v32 = vld [vmem:[#allocation2 + $0xc9] sm:$0xff] }
  0xb5   : > { %1094 = vmatmul.f32.gmra.mxu3 %v1011_v34 }
  0xb6   : > { %v3302_v36 = vpop.f32.mrf.mxu2  ;;  %v3304_v37 = vpop.f32.mrf.mxu0 }
  0xb8   : > { %v3306_v33 = vpop.f32.mrf.mxu1  ;;  %v3308_v39 = vpop.f32.mrf.mxu3 }
  0xb9   : > { %1288 = vmatmul.f32.gmra.mxu0 %v2980_v53  ;;  %v2507_v53 = vld [vmem:[%s3676_s3 + $0x2c0] sm:$0xff] }
  0xba   : > { %1446 = vmatpush.msra.mxu1 %v2507_v53  ;;  %v2536_v53 = vld [vmem:[%s3676_s3 + $0x3a8] sm:$0xff] }
  0xbb   : > { %741 = vmatmul.f32.gmra.mxu1 %v1010_v8  ;;  %903 = vmatmul.f32.gmra.mxu2 %v818_v40  ;;  %v1017_v8 = vld [vmem:[#allocation2 + $0xc8] sm:$0xff] }
  0xbc   : > { %v824_v40 = vld [vmem:[#allocation2 + $0xc2] sm:$0xff]  ;;  %1838 = vmatpush.msra.mxu3 %v2536_v53 }
  0xbd   : > { %1097 = vmatmul.f32.gmra.mxu3 %v1012_v15 }
  0xbe   : > { %v3317_v44 = vpop.f32.mrf.mxu2  ;;  %v3319_v45 = vpop.f32.mrf.mxu0 }
  0xc0   : > { %v3324_v46 = vpop.f32.mrf.mxu1  ;;  %v3326_v48 = vpop.f32.mrf.mxu3 }
  0xc1   : > { %1291 = vmatmul.f32.gmra.mxu0 %v3018_v12  ;;  %v1014_v12 = vld [vmem:[#allocation2 + $0xa8] sm:$0xff] }
  0xc3   : > { %744 = vmatmul.f32.gmra.mxu1 %v1011_v34  ;;  %906 = vmatmul.f32.gmra.mxu2 %v819_v49 }
  0xc5   : > { %1100 = vmatmul.f32.gmra.mxu3 %v1013_v51 }
  0xc6   : > { %v3332_v54 = vpop.f32.mrf.mxu2  ;;  %v3334_v55 = vpop.f32.mrf.mxu0 }
  0xc8   : > { %v3336_v56 = vpop.f32.mrf.mxu1  ;;  %v3338_v57 = vpop.f32.mrf.mxu3 }
  0xc9   : > { %1294 = vmatmul.f32.gmra.mxu0 %v3065_v38  ;;  %v2506_v38 = vld [vmem:[%s3676_s3 + $0x2b8] sm:$0xff] }
  0xca   : > { %1447 = vmatpush.msra.mxu1 %v2506_v38  ;;  %v825_v38 = vld [vmem:[#allocation2 + $0xca] sm:$0xff] }
  0xcb   : > { %747 = vmatmul.f32.gmra.mxu1 %v1012_v15  ;;  %909 = vmatmul.f32.gmra.mxu2 %v820_v47  ;;  %v1018_v15 = vld [vmem:[#allocation2 + $0xd8] sm:$0xff] }
  0xcd   : > { %1103 = vmatmul.f32.gmra.mxu3 %v1014_v12 }
  0xce   : > { %v3347_v25 = vpop.f32.mrf.mxu2  ;;  %v3349_v61 = vpop.f32.mrf.mxu0 }
  0xd0   : > { %v3354_v62 = vpop.f32.mrf.mxu1  ;;  %v3356_v63 = vpop.f32.mrf.mxu3 }
  0xd1   : > { %1297 = vmatmul.f32.gmra.mxu0 %v3103_v60  ;;  %v1016_v60 = vld [vmem:[#allocation2 + $0xc0] sm:$0xff] }
  0xd3   : > { %750 = vmatmul.f32.gmra.mxu1 %v1013_v51  ;;  %912 = vmatmul.f32.gmra.mxu2 %v821_v1 }
  0xd5   : > { %1106 = vmatmul.f32.gmra.mxu3 %v1015_v2 }
  0xd6   : > { %v3362_v4 = vpop.f32.mrf.mxu2  ;;  %v3364_v6 = vpop.f32.mrf.mxu0 }
  0xd8   : > { %v3366_v5 = vpop.f32.mrf.mxu1  ;;  %v3368_v7 = vpop.f32.mrf.mxu3 }
  0xd9   : > { %1300 = vmatmul.f32.gmra.mxu0 %v3145_v16  ;;  %v2505_v16 = vld [vmem:[%s3676_s3 + $0x2b0] sm:$0xff] }
  0xda   : > { %1448 = vmatpush.msra.mxu1 %v2505_v16 }
  0xdb   : > { %753 = vmatmul.f32.gmra.mxu1 %v1014_v12  ;;  %915 = vmatmul.f32.gmra.mxu2 %v822_v9  ;;  %v2504_v12 = vld [vmem:[%s3676_s3 + $0x2a8] sm:$0xff] }
  0xdc   : > { %1449 = vmatpush.msra.mxu1 %v2504_v12  ;;  %v2552_v9 = vld [vmem:[%s3676_s3 + $0x428] sm:$0xff] }
  0xdd   : > { %1109 = vmatmul.f32.gmra.mxu3 %v1016_v60  ;;  %2032 = vmatpush.msra.mxu0 %v2552_v9 }
  0xde   : > { %v3377_v13 = vpop.f32.mrf.mxu2  ;;  %v3379_v14 = vpop.f32.mrf.mxu0 }
  0xe0   : > { %v3384_v19 = vpop.f32.mrf.mxu1  ;;  %v3386_v21 = vpop.f32.mrf.mxu3 }
  0xe1   : > { %1303 = vmatmul.f32.gmra.mxu0 %v1210_v17 }
  0xe3   : > { %756 = vmatmul.f32.gmra.mxu1 %v1015_v2  ;;  %918 = vmatmul.f32.gmra.mxu2 %v823_v24  ;;  %v826_v24 = vld [vmem:[#allocation2 + $0xda] sm:$0xff] }
  0xe5   : > { %1112 = vmatmul.f32.gmra.mxu3 %v1017_v8 }
  0xe6   : > { %v3391_v26 = vpop.f32.mrf.mxu2  ;;  %v3393_v30 = vpop.f32.mrf.mxu0 }
  0xe8   : > { %v3395_v34 = vpop.f32.mrf.mxu3  ;;  %v712_v35 = vpop.f32.mrf.mxu1 }
  0xe9   : > { %1306 = vmatmul.f32.gmra.mxu0 %v1211_v32  ;;  %v713_v42 = vadd.f32 %v712_v35, %v3289_v28  ;;  %v1019_v28 = vld [vmem:[#allocation2 + $0xe0] sm:$0xff]  ;;  %v1020_v32 = vld [vmem:[#allocation2 + $0xf0] sm:$0xff] }
  0xeb   : > { %759 = vmatmul.f32.gmra.mxu1 %v1016_v60  ;;  %921 = vmatmul.f32.gmra.mxu2 %v824_v40  ;;  %v2535_v40 = vld [vmem:[%s3676_s3 + $0x3a0] sm:$0xff] }
  0xec   : > { %1839 = vmatpush.msra.mxu3 %v2535_v40 }
  0xed   : > { %1115 = vmatmul.f32.gmra.mxu3 %v1018_v15 }
  0xee   : > { %v874_v49 = vpop.f32.mrf.mxu2  ;;  %v1262_v51 = vpop.f32.mrf.mxu0 }
  0xef   : > { %v970_v47 = vadd.f32 %v874_v49, %v713_v42 }
  0xf0   : > { %v715_v3 = vpop.f32.mrf.mxu1  ;;  %v1068_v59 = vpop.f32.mrf.mxu3 }
  0xf1   : > { %v1164_v1 = vadd.f32 %v1068_v59, %v970_v47  ;;  %1309 = vmatmul.f32.gmra.mxu0 %v1212_v52  ;;  %v716_v50 = vadd.f32 %v715_v3, %v3304_v37  ;;  %v2519_v37 = vld [vmem:[%s3676_s3 + $0x320] sm:$0xff] }
  0xf2   : > { %1645 = vmatpush.msra.mxu2 %v2519_v37  ;;  %v2551_v3 = vld [vmem:[%s3676_s3 + $0x420] sm:$0xff] }
  0xf3   : > { %v3407_v2 = vadd.f32 %v1262_v51, %v1164_v1  ;;  %762 = vmatmul.f32.gmra.mxu1 %v1017_v8  ;;  %924 = vmatmul.f32.gmra.mxu2 %v825_v38  ;;  %v827_v51 = vld [vmem:[#allocation2 + $0xe2] sm:$0xff] }
  0xf4   : > { %2033 = vmatpush.msra.mxu0 %v2551_v3  ;;  %v1024_v3 = vld [vmem:[#allocation2 + $0x120] sm:$0xff] }
  0xf5   : > { %1118 = vmatmul.f32.gmra.mxu3 %v1019_v28 }
  0xf6   : > { %v877_v60 = vpop.f32.mrf.mxu2  ;;  %v1265_v10 = vpop.f32.mrf.mxu0 }
  0xf7   : > { %v971_v11 = vadd.f32 %v877_v60, %v716_v50  ;;  %v828_v60 = vld [vmem:[#allocation2 + $0xf2] sm:$0xff] }
  0xf8   : > { %v718_v17 = vpop.f32.mrf.mxu1  ;;  %v1071_v16 = vpop.f32.mrf.mxu3 }
  0xf9   : > { %v1165_v22 = vadd.f32 %v1071_v16, %v971_v11  ;;  %1312 = vmatmul.f32.gmra.mxu0 %v2988_v58  ;;  %v719_v35 = vadd.f32 %v718_v17, %v3319_v45  ;;  %v1021_v45 = vld [vmem:[#allocation2 + $0xf8] sm:$0xff] }
  0xfa   : > { %v2534_v17 = vld [vmem:[%s3676_s3 + $0x398] sm:$0xff] }
  0xfb   : > { %v3414_v8 = vadd.f32 %v1265_v10, %v1165_v22  ;;  %765 = vmatmul.f32.gmra.mxu1 %v1018_v15  ;;  %927 = vmatmul.f32.gmra.mxu2 %v826_v24  ;;  %v2503_v15 = vld [vmem:[%s3676_s3 + $0x2a0] sm:$0xff]  ;;  %v1022_v10 = vld [vmem:[#allocation2 + $0x108] sm:$0xff]  ;;  %v2502_v22 = vld [vmem:[%s3676_s3 + $0x298] sm:$0xff] }
  0xfc   : > { %1450 = vmatpush.msra.mxu1 %v2503_v15  ;;  %1840 = vmatpush.msra.mxu3 %v2534_v17 }
  0xfd   : > { %1121 = vmatmul.f32.gmra.mxu3 %v1020_v32 }
  0xfe   : > { %v880_v41 = vpop.f32.mrf.mxu2  ;;  %v1268_v42 = vpop.f32.mrf.mxu0  ;;  %1451 = vmatpush.msra.mxu1 %v2502_v22 }
  0xff   : > { %v972_v58 = vadd.f32 %v880_v41, %v719_v35  ;;  %v829_v35 = vld [vmem:[#allocation2 + $0xfa] sm:$0xff] }
 0x100   : > { %v721_v53 = vpop.f32.mrf.mxu1  ;;  %v1074_v49 = vpop.f32.mrf.mxu3 }
 0x101   : > { %v1166_v52 = vadd.f32 %v1074_v49, %v972_v58  ;;  %1315 = vmatmul.f32.gmra.mxu0 %v3028_v18  ;;  %v722_v12 = vadd.f32 %v721_v53, %v3334_v55  ;;  %v2518_v55 = vld [vmem:[%s3676_s3 + $0x318] sm:$0xff] }
 0x102   : > { %1646 = vmatpush.msra.mxu2 %v2518_v55  ;;  %v2550_v58 = vld [vmem:[%s3676_s3 + $0x418] sm:$0xff] }
 0x103   : > { %v3427_v47 = vadd.f32 %v1268_v42, %v1166_v52  ;;  %768 = vmatmul.f32.gmra.mxu1 %v1019_v28  ;;  %930 = vmatmul.f32.gmra.mxu2 %v827_v51  ;;  %v831_v55 = vld [vmem:[#allocation2 + $0x112] sm:$0xff] }
 0x104   : > { %2034 = vmatpush.msra.mxu0 %v2550_v58 }
 0x105   : > { %1124 = vmatmul.f32.gmra.mxu3 %v1021_v45 }
 0x106   : > { %v883_v59 = vpop.f32.mrf.mxu2  ;;  %v1271_v38 = vpop.f32.mrf.mxu0 }
 0x107   : > { %v973_v1 = vadd.f32 %v883_v59, %v722_v12  ;;  %v830_v12 = vld [vmem:[#allocation2 + $0x10a] sm:$0xff] }
 0x108   : > { %v724_v50 = vpop.f32.mrf.mxu1  ;;  %v1077_v9 = vpop.f32.mrf.mxu3 }
 0x109   : > { %v1167_v18 = vadd.f32 %v1077_v9, %v973_v1  ;;  %1318 = vmatmul.f32.gmra.mxu0 %v3073_v43  ;;  %v725_v11 = vadd.f32 %v724_v50, %v3349_v61  ;;  %v1023_v61 = vld [vmem:[#allocation2 + $0x110] sm:$0xff] }
 0x10b   : > { %v3434_v28 = vadd.f32 %v1271_v38, %v1167_v18  ;;  %771 = vmatmul.f32.gmra.mxu1 %v1020_v32  ;;  %933 = vmatmul.f32.gmra.mxu2 %v828_v60  ;;  %v2533_v38 = vld [vmem:[%s3676_s3 + $0x390] sm:$0xff] }
 0x10c   : > { %1841 = vmatpush.msra.mxu3 %v2533_v38  ;;  %v2501_v60 = vld [vmem:[%s3676_s3 + $0x290] sm:$0xff] }
 0x10d   : > { %1127 = vmatmul.f32.gmra.mxu3 %v1022_v10  ;;  %1452 = vmatpush.msra.mxu1 %v2501_v60 }
 0x10e   : > { %v886_v16 = vpop.f32.mrf.mxu2  ;;  %v1274_v24 = vpop.f32.mrf.mxu0 }
 0x10f   : > { %v974_v43 = vadd.f32 %v886_v16, %v725_v11 }
 0x110   : > { %v727_v32 = vpop.f32.mrf.mxu1  ;;  %v1080_v37 = vpop.f32.mrf.mxu3 }
 0x111   : > { %v1168_v40 = vadd.f32 %v1080_v37, %v974_v43  ;;  %1321 = vmatmul.f32.gmra.mxu0 %v3114_v0  ;;  %v728_v42 = vadd.f32 %v727_v32, %v3364_v6  ;;  %v2517_v6 = vld [vmem:[%s3676_s3 + $0x310] sm:$0xff] }
 0x112   : > { %1647 = vmatpush.msra.mxu2 %v2517_v6  ;;  %v1219_v32 = vld [vmem:[#allocation2 + $0x129] sm:$0xff] }
 0x113   : > { %v3447_v41 = vadd.f32 %v1274_v24, %v1168_v40  ;;  %774 = vmatmul.f32.gmra.mxu1 %v1021_v45  ;;  %936 = vmatmul.f32.gmra.mxu2 %v829_v35  ;;  %v2549_v24 = vld [vmem:[%s3676_s3 + $0x410] sm:$0xff] }
 0x114   : > { %2035 = vmatpush.msra.mxu0 %v2549_v24 }
 0x115   : > { %1130 = vmatmul.f32.gmra.mxu3 %v1023_v61 }
 0x116   : > { %v889_v15 = vpop.f32.mrf.mxu2  ;;  %v1277_v53 = vpop.f32.mrf.mxu0 }
 0x117   : > { %v975_v49 = vadd.f32 %v889_v15, %v728_v42  ;;  %v832_v42 = vld [vmem:[#allocation2 + $0x122] sm:$0xff] }
 0x118   : > { %v730_v51 = vpop.f32.mrf.mxu1  ;;  %v1083_v52 = vpop.f32.mrf.mxu3 }
 0x119   : > { %v1169_v0 = vadd.f32 %v1083_v52, %v975_v49  ;;  %1324 = vmatmul.f32.gmra.mxu0 %v3151_v20  ;;  %v731_v59 = vadd.f32 %v730_v51, %v3379_v14  ;;  %v1218_v20 = vld [vmem:[#allocation2 + $0x121] sm:$0xff] }
 0x11a   : > { %v1025_v14 = vld [vmem:[#allocation2 + $0x128] sm:$0xff] }
 0x11b   : > { %v3454_v45 = vadd.f32 %v1277_v53, %v1169_v0  ;;  %777 = vmatmul.f32.gmra.mxu1 %v1022_v10  ;;  %939 = vmatmul.f32.gmra.mxu2 %v830_v12  ;;  %v2532_v49 = vld [vmem:[%s3676_s3 + $0x388] sm:$0xff]  ;;  %v1220_v12 = vld [vmem:[#allocation2 + $0x139] sm:$0xff]  ;;  %v346_v0 = vld [vmem:[%s2707_s12 + $0xf0] sm:$0xff] }
 0x11c   : > { %1842 = vmatpush.msra.mxu3 %v2532_v49  ;;  %v2515_v49 = vld [vmem:[%s3676_s3 + $0x300] sm:$0xff] }
 0x11d   : > { %1133 = vmatmul.f32.gmra.mxu3 %v1024_v3 }
 0x11e   : > { %v892_v1 = vpop.f32.mrf.mxu2  ;;  %v1280_v50 = vpop.f32.mrf.mxu0 }
 0x11f   : > { %v976_v9 = vadd.f32 %v892_v1, %v731_v59  ;;  %v2626_v59 = vld [vmem:[%s3674_s1] ss:$0 sm:$0xff] }
 0x120   : > { %v733_v18 = vpop.f32.mrf.mxu1  ;;  %v1086_v10 = vpop.f32.mrf.mxu3 }
 0x121   : > { %v1170_v11 = vadd.f32 %v1086_v10, %v976_v9  ;;  %1327 = vmatmul.f32.gmra.mxu0 %v1218_v20  ;;  %v734_v16 = vadd.f32 %v733_v18, %v3393_v30  ;;  %v2516_v30 = vld [vmem:[%s3676_s3 + $0x308] sm:$0xff]  ;;  %v2627_v9 = vld [vmem:[%s3675_s2] ss:$0 sm:$0xff] }
 0x122   : > { %1648 = vmatpush.msra.mxu2 %v2516_v30  ;;  %v1027_v18 = vld [vmem:[#allocation2 + $0x140] sm:$0xff]  ;;  %v1028_v30 = vld [vmem:[#allocation2 + $0x150] sm:$0xff] }
 0x123   : > { %v3466_v17 = vadd.f32 %v1280_v50, %v1170_v11  ;;  %780 = vmatmul.f32.gmra.mxu1 %v1023_v61  ;;  %942 = vmatmul.f32.gmra.mxu2 %v831_v55  ;;  %v1026_v61 = vld [vmem:[#allocation2 + $0x138] sm:$0xff]  ;;  %v833_v50 = vld [vmem:[#allocation2 + $0x12a] sm:$0xff] }
 0x124   : > { %1649 = vmatpush.msra.mxu2 %v2515_v49  ;;  %v1224_v49 = vld [vmem:[#allocation2 + $0x169] sm:$0xff] }
 0x125   : > { %1136 = vmatmul.f32.gmra.mxu3 %v1025_v14 }
 0x126   : > { %v895_v43 = vpop.f32.mrf.mxu2  ;;  %v1283_v22 = vpop.f32.mrf.mxu0 }
 0x127   : > { %v977_v37 = vadd.f32 %v895_v43, %v734_v16  ;;  %v2548_v16 = vld [vmem:[%s3676_s3 + $0x408] sm:$0xff] }
 0x128   : > { %v736_v35 = vpop.f32.mrf.mxu1  ;;  %v1089_v40 = vpop.f32.mrf.mxu3  ;;  %2036 = vmatpush.msra.mxu0 %v2548_v16 }
 0x129   : > { %v1171_v58 = vadd.f32 %v1089_v40, %v977_v37  ;;  %1330 = vmatmul.f32.gmra.mxu0 %v1219_v32  ;;  %v737_v53 = vadd.f32 %v736_v35, %v3278_v23  ;;  %v382_v23 = vmul.f32 %v2626_v59, %v346_v0  ;;  %v347_v32 = vld [vmem:[%s2707_s12 + $0xf8] sm:$0xff] }
 0x12b   : > { %v3472_v15 = vadd.f32 %v1283_v22, %v1171_v58  ;;  %783 = vmatmul.f32.gmra.mxu1 %v1024_v3  ;;  %945 = vmatmul.f32.gmra.mxu2 %v832_v42  ;;  %v2500_v3 = vld [vmem:[%s3676_s3 + $0x288] sm:$0xff]  ;;  %v3491_v60 = vadd.f32 %v2627_v9, %v382_v23  ;;  %v834_v42 = vld [vmem:[#allocation2 + $0x13a] sm:$0xff] }
 0x12c   : > { %1453 = vmatpush.msra.mxu1 %v2500_v3  ;;  %v1221_v22 = vld [vmem:[#allocation2 + $0x141] sm:$0xff] }
 0x12d   : > { %1139 = vmatmul.f32.gmra.mxu3 %v1026_v61  ;;  %v450_v55 = vmax.f32 %v3491_v60, 0.0  ;;  %v1779_v60 = vld [vmem:[#allocation2 + $0x31] sm:$0xff] }
 0x12e   : > { %v898_v51 = vpop.f32.mrf.mxu2  ;;  %v1286_v52 = vpop.f32.mrf.mxu0 }
 0x12f   : > { %v978_v6 = vadd.f32 %v898_v51, %v737_v53  ;;  %483 = vst [vmem:[#allocation2 + $0x181] sm:$0xff] %v450_v55 }
 0x130   : > { %v739_v38 = vpop.f32.mrf.mxu1  ;;  %v1092_v1 = vpop.f32.mrf.mxu3 }
 0x131   : > { %v1172_v20 = vadd.f32 %v1092_v1, %v978_v6  ;;  %1333 = vmatmul.f32.gmra.mxu0 %v1220_v12  ;;  %v740_v11 = vadd.f32 %v739_v38, %v3294_v29  ;;  %v2531_v12 = vld [vmem:[%s3676_s3 + $0x380] sm:$0xff]  ;;  %v1222_v6 = vld [vmem:[#allocation2 + $0x151] sm:$0xff] }
 0x132   : > { %1843 = vmatpush.msra.mxu3 %v2531_v12 }
 0x133   : > { %v3493_v10 = vadd.f32 %v1286_v52, %v1172_v20  ;;  %786 = vmatmul.f32.gmra.mxu1 %v1025_v14  ;;  %948 = vmatmul.f32.gmra.mxu2 %v833_v50  ;;  %v383_v14 = vmul.f32 %v2626_v59, %v347_v32  ;;  %v2499_v59 = vld [vmem:[%s3676_s3 + $0x280] sm:$0xff]  ;;  %v1029_v50 = vld [vmem:[#allocation2 + $0x158] sm:$0xff] }
 0x134   : > { %1454 = vmatpush.msra.mxu1 %v2499_v59 }
 0x135   : > { %1142 = vmatmul.f32.gmra.mxu3 %v1027_v18  ;;  %v3503_v29 = vadd.f32 %v2627_v9, %v383_v14  ;;  %v836_v14 = vld [vmem:[#allocation2 + $0x152] sm:$0xff] }
 0x136   : > { %v901_v24 = vpop.f32.mrf.mxu2  ;;  %v1289_v43 = vpop.f32.mrf.mxu0 }
 0x137   : > { %v979_v37 = vadd.f32 %v901_v24, %v740_v11  ;;  %v451_v51 = vmax.f32 %v3503_v29, 0.0  ;;  %v2547_v11 = vld [vmem:[%s3676_s3 + $0x400] sm:$0xff] }
 0x138   : > { %v742_v35 = vpop.f32.mrf.mxu1  ;;  %v1095_v40 = vpop.f32.mrf.mxu3  ;;  %2037 = vmatpush.msra.mxu0 %v2547_v11  ;;  %v838_v11 = vld [vmem:[#allocation2 + $0x16a] sm:$0xff]  ;;  %v1780_v29 = vld [vmem:[#allocation2 + $0x39] sm:$0xff] }
 0x139   : > { %v1173_v58 = vadd.f32 %v1095_v40, %v979_v37  ;;  %1336 = vmatmul.f32.gmra.mxu0 %v1221_v22  ;;  %v743_v52 = vadd.f32 %v742_v35, %v3306_v33  ;;  %484 = vst [vmem:[#allocation2 + $0x189] sm:$0xff] %v451_v51  ;;  %v835_v33 = vld [vmem:[#allocation2 + $0x142] sm:$0xff] }
 0x13a   : > { %v1030_v40 = vld [vmem:[#allocation2 + $0x168] sm:$0xff] }
 0x13b   : > { %v3505_v53 = vadd.f32 %v1289_v43, %v1173_v58  ;;  %789 = vmatmul.f32.gmra.mxu1 %v1026_v61  ;;  %951 = vmatmul.f32.gmra.mxu2 %v834_v42  ;;  %v1223_v43 = vld [vmem:[#allocation2 + $0x159] sm:$0xff] }
 0x13d   : > { %1145 = vmatmul.f32.gmra.mxu3 %v1028_v30 }
 0x13e   : > { %v904_v0 = vpop.f32.mrf.mxu2  ;;  %v1292_v61 = vpop.f32.mrf.mxu0 }
 0x13f   : > { %v980_v3 = vadd.f32 %v904_v0, %v743_v52 }
 0x140   : > { %v745_v23 = vpop.f32.mrf.mxu1  ;;  %v1098_v38 = vpop.f32.mrf.mxu3 }
 0x141   : > { %v1174_v1 = vadd.f32 %v1098_v38, %v980_v3  ;;  %1339 = vmatmul.f32.gmra.mxu0 %v1222_v6  ;;  %v746_v9 = vadd.f32 %v745_v23, %v3324_v46  ;;  %v1031_v3 = vld [vmem:[#allocation2 + $0x170] sm:$0xff] }
 0x142   : > { %v1225_v38 = vld [vmem:[#allocation2 + $0x171] sm:$0xff] }
 0x143   : > { %v3520_v20 = vadd.f32 %v1292_v61, %v1174_v1  ;;  %792 = vmatmul.f32.gmra.mxu1 %v1027_v18  ;;  %954 = vmatmul.f32.gmra.mxu2 %v835_v33  ;;  %v837_v61 = vld [vmem:[#allocation2 + $0x15a] sm:$0xff] }
 0x145   : > { %1148 = vmatmul.f32.gmra.mxu3 %v1029_v50 }
 0x146   : > { %v907_v16 = vpop.f32.mrf.mxu2  ;;  %v1295_v24 = vpop.f32.mrf.mxu0 }
 0x147   : > { %v981_v22 = vadd.f32 %v907_v16, %v746_v9 }
 0x148   : > { %v748_v32 = vpop.f32.mrf.mxu1  ;;  %v1101_v37 = vpop.f32.mrf.mxu3 }
 0x149   : > { %v1175_v35 = vadd.f32 %v1101_v37, %v981_v22  ;;  %1342 = vmatmul.f32.gmra.mxu0 %v1223_v43  ;;  %v749_v46 = vadd.f32 %v748_v32, %v3336_v56 }
 0x14b   : > { %v3526_v18 = vadd.f32 %v1295_v24, %v1175_v35  ;;  %795 = vmatmul.f32.gmra.mxu1 %v1028_v30  ;;  %957 = vmatmul.f32.gmra.mxu2 %v836_v14  ;;  %v1032_v24 = vld [vmem:[#allocation2 + $0x180] sm:$0xff]  ;;  %v839_v35 = vld [vmem:[#allocation2 + $0x172] sm:$0xff] }
 0x14d   : > { %1151 = vmatmul.f32.gmra.mxu3 %v1030_v40 }
 0x14e   : > { %v910_v42 = vpop.f32.mrf.mxu2  ;;  %v1298_v58 = vpop.f32.mrf.mxu0 }
 0x14f   : > { %v982_v52 = vadd.f32 %v910_v42, %v749_v46  ;;  %v1033_v42 = vld [vmem:[#allocation2 + $0x188] sm:$0xff] }
 0x150   : > { %v751_v12 = vpop.f32.mrf.mxu1  ;;  %v1104_v0 = vpop.f32.mrf.mxu3 }
 0x151   : > { %v1176_v6 = vadd.f32 %v1104_v0, %v982_v52  ;;  %1345 = vmatmul.f32.gmra.mxu0 %v1224_v49  ;;  %v752_v30 = vadd.f32 %v751_v12, %v3354_v62 }
 0x153   : > { %v3529_v59 = vadd.f32 %v1298_v58, %v1176_v6  ;;  %798 = vmatmul.f32.gmra.mxu1 %v1029_v50  ;;  %960 = vmatmul.f32.gmra.mxu2 %v837_v61  ;;  %v1390_v61 = vld [vmem:[#allocation2 + $0x1a] sm:$0xff]  ;;  %v1585_v6 = vld [vmem:[#allocation2 + $0x30] sm:$0xff] }
 0x155   : > { %1154 = vmatmul.f32.gmra.mxu3 %v1031_v3 }
 0x156   : > { %v913_v23 = vpop.f32.mrf.mxu2  ;;  %v1301_v56 = vpop.f32.mrf.mxu0 }
 0x157   : > { %v983_v33 = vadd.f32 %v913_v23, %v752_v30 }
 0x158   : > { %v754_v1 = vpop.f32.mrf.mxu1  ;;  %v1107_v9 = vpop.f32.mrf.mxu3 }
 0x159   : > { %v1177_v16 = vadd.f32 %v1107_v9, %v983_v33  ;;  %1348 = vmatmul.f32.gmra.mxu0 %v1225_v38  ;;  %v755_v50 = vadd.f32 %v754_v1, %v3366_v5  ;;  %v1391_v9 = vld [vmem:[#allocation2 + $0x22] sm:$0xff] }
 0x15b   : > { %v3532_v43 = vadd.f32 %v1301_v56, %v1177_v16  ;;  %801 = vmatmul.f32.gmra.mxu1 %v1030_v40  ;;  %963 = vmatmul.f32.gmra.mxu2 %v838_v11  ;;  %v1973_v56 = vld [vmem:[#allocation2 + $0x32] sm:$0xff] }
 0x15c   : > { %v1586_v11 = vld [vmem:[#allocation2 + $0x38] sm:$0xff] }
 0x15d   : > { %1157 = vmatmul.f32.gmra.mxu3 %v1032_v24 }
 0x15e   : > { %v916_v22 = vpop.f32.mrf.mxu2  ;;  %v1304_v62 = vpop.f32.mrf.mxu0 }
 0x15f   : > { %v984_v32 = vadd.f32 %v916_v22, %v755_v50  ;;  %v1974_v22 = vld [vmem:[#allocation2 + $0x3a] sm:$0xff] }
 0x160   : > { %v757_v37 = vpop.f32.mrf.mxu1  ;;  %v1110_v14 = vpop.f32.mrf.mxu3 }
 0x161   : > { %v1178_v46 = vadd.f32 %v1110_v14, %v984_v32  ;;  %1351 = vmatmul.f32.gmra.mxu0 %v450_v55  ;;  %v758_v40 = vadd.f32 %v757_v37, %v3384_v19  ;;  %v1587_v14 = vld [vmem:[#allocation2 + $0x48] sm:$0xff] }
 0x163   : > { %v3537_v58 = vadd.f32 %v1304_v62, %v1178_v46  ;;  %804 = vmatmul.f32.gmra.mxu1 %v1031_v3  ;;  %966 = vmatmul.f32.gmra.mxu2 %v839_v35  ;;  %v1781_v46 = vld [vmem:[#allocation2 + $0x49] sm:$0xff] }
 0x165   : > { %1160 = vmatmul.f32.gmra.mxu3 %v1033_v42 }
 0x166   : > { %v919_v5 = vpop.f32.mrf.mxu2  ;;  %v1307_v49 = vpop.f32.mrf.mxu0 }
 0x167   : > { %v985_v52 = vadd.f32 %v919_v5, %v758_v40 }
 0x168   : > { %v760_v12 = vpop.f32.mrf.mxu1  ;;  %v1113_v0 = vpop.f32.mrf.mxu3 }
 0x169   : > { %v1179_v30 = vadd.f32 %v1113_v0, %v985_v52  ;;  %1354 = vmatmul.f32.gmra.mxu0 %v451_v51  ;;  %v761_v3 = vadd.f32 %v760_v12, %v3287_v27 }
 0x16b   : > { %v3542_v55 = vadd.f32 %v1307_v49, %v1179_v30  ;;  %1455 = vmatmul.f32.vlgmr.msra.gmra.mxu1 %v1390_v61  ;;  %1650 = vmatmul.f32.vlgmr.msra.gmra.mxu2 %v1585_v6  ;;  %v1975_v49 = vld [vmem:[#allocation2 + $0x4a] sm:$0xff] }
 0x16c   : > { %v1588_v61 = vld [vmem:[#allocation2 + $0x50] sm:$0xff] }
 0x16d   : > { %1844 = vmatmul.f32.vlgmr.msra.gmra.mxu3 %v1779_v60  ;;  %v1782_v30 = vld [vmem:[#allocation2 + $0x51] sm:$0xff] }
 0x16e   : > { %v922_v19 = vpop.f32.mrf.mxu2  ;;  %v1310_v23 = vpop.f32.mrf.mxu0 }
 0x16f   : > { %v986_v38 = vadd.f32 %v922_v19, %v761_v3 }
 0x170   : > { %v763_v33 = vpop.f32.mrf.mxu1  ;;  %v1116_v1 = vpop.f32.mrf.mxu3 }
 0x171   : > { %v1180_v16 = vadd.f32 %v1116_v1, %v986_v38  ;;  %2038 = vmatmul.f32.vlgmr.msra.gmra.mxu0 %v1973_v56  ;;  %v764_v24 = vadd.f32 %v763_v33, %v3302_v36  ;;  %v1589_v1 = vld [vmem:[#allocation2 + $0x60] sm:$0xff] }
 0x173   : > { %v3545_v51 = vadd.f32 %v1310_v23, %v1180_v16  ;;  %1458 = vmatmul.f32.gmra.mxu1 %v1391_v9  ;;  %1653 = vmatmul.f32.gmra.mxu2 %v1586_v11  ;;  %v1976_v23 = vld [vmem:[#allocation2 + $0x52] sm:$0xff]  ;;  %v1783_v11 = vld [vmem:[#allocation2 + $0x61] sm:$0xff] }
 0x175   : > { %1847 = vmatmul.f32.gmra.mxu3 %v1780_v29 }
 0x176   : > { %v925_v27 = vpop.f32.mrf.mxu2  ;;  %v1313_v50 = vpop.f32.mrf.mxu0 }
 0x177   : > { %v987_v62 = vadd.f32 %v925_v27, %v764_v24  ;;  %v1977_v27 = vld [vmem:[#allocation2 + $0x62] sm:$0xff] }
 0x178   : > { %v766_v32 = vpop.f32.mrf.mxu1  ;;  %v1119_v37 = vpop.f32.mrf.mxu3 }
 0x179   : > { %v1181_v35 = vadd.f32 %v1119_v37, %v987_v62  ;;  %2041 = vmatmul.f32.gmra.mxu0 %v1974_v22  ;;  %v767_v40 = vadd.f32 %v766_v32, %v3317_v44  ;;  %v1590_v32 = vld [vmem:[#allocation2 + $0x68] sm:$0xff] }
 0x17b   : > { %v3548_v42 = vadd.f32 %v1313_v50, %v1181_v35  ;;  %1461 = vmatmul.f32.gmra.mxu1 %v1973_v56  ;;  %1656 = vmatmul.f32.gmra.mxu2 %v1587_v14  ;;  %v1784_v14 = vld [vmem:[#allocation2 + $0x69] sm:$0xff] }
 0x17d   : > { %1850 = vmatmul.f32.gmra.mxu3 %v1781_v46 }
 0x17e   : > { %v928_v5 = vpop.f32.mrf.mxu2  ;;  %v1316_v36 = vpop.f32.mrf.mxu0 }
 0x17f   : > { %v988_v52 = vadd.f32 %v928_v5, %v767_v40  ;;  %v1978_v5 = vld [vmem:[#allocation2 + $0x6a] sm:$0xff] }
 0x180   : > { %v769_v12 = vpop.f32.mrf.mxu1  ;;  %v1122_v0 = vpop.f32.mrf.mxu3 }
 0x181   : > { %v1182_v6 = vadd.f32 %v1122_v0, %v988_v52  ;;  %2044 = vmatmul.f32.gmra.mxu0 %v1975_v49  ;;  %v770_v3 = vadd.f32 %v769_v12, %v3332_v54  ;;  %v1591_v12 = vld [vmem:[#allocation2 + $0x78] sm:$0xff] }
 0x183   : > { %v3551_v60 = vadd.f32 %v1316_v36, %v1182_v6  ;;  %1464 = vmatmul.f32.gmra.mxu1 %v1974_v22  ;;  %1659 = vmatmul.f32.gmra.mxu2 %v1588_v61  ;;  %v1785_v61 = vld [vmem:[#allocation2 + $0x79] sm:$0xff] }
 0x185   : > { %1853 = vmatmul.f32.gmra.mxu3 %v1782_v30 }
 0x186   : > { %v931_v19 = vpop.f32.mrf.mxu2  ;;  %v1319_v44 = vpop.f32.mrf.mxu0 }
 0x187   : > { %v989_v56 = vadd.f32 %v931_v19, %v770_v3  ;;  %v1979_v19 = vld [vmem:[#allocation2 + $0x7a] sm:$0xff] }
 0x188   : > { %v772_v38 = vpop.f32.mrf.mxu1  ;;  %v1125_v33 = vpop.f32.mrf.mxu3 }
 0x189   : > { %v1183_v9 = vadd.f32 %v1125_v33, %v989_v56  ;;  %2047 = vmatmul.f32.gmra.mxu0 %v1976_v23  ;;  %v773_v29 = vadd.f32 %v772_v38, %v3347_v25  ;;  %v1592_v38 = vld [vmem:[#allocation2 + $0x80] sm:$0xff] }
 0x18b   : > { %v3554_v16 = vadd.f32 %v1319_v44, %v1183_v9  ;;  %1467 = vmatmul.f32.gmra.mxu1 %v1975_v49  ;;  %1662 = vmatmul.f32.gmra.mxu2 %v1589_v1  ;;  %v1786_v1 = vld [vmem:[#allocation2 + $0x81] sm:$0xff] }
 0x18d   : > { %1856 = vmatmul.f32.gmra.mxu3 %v1783_v11 }
 0x18e   : > { %v934_v24 = vpop.f32.mrf.mxu2  ;;  %v1322_v54 = vpop.f32.mrf.mxu0 }
 0x18f   : > { %v990_v50 = vadd.f32 %v934_v24, %v773_v29  ;;  %v1980_v24 = vld [vmem:[#allocation2 + $0x82] sm:$0xff] }
 0x190   : > { %v775_v22 = vpop.f32.mrf.mxu1  ;;  %v1128_v62 = vpop.f32.mrf.mxu3 }
 0x191   : > { %v1184_v37 = vadd.f32 %v1128_v62, %v990_v50  ;;  %2050 = vmatmul.f32.gmra.mxu0 %v1977_v27  ;;  %v776_v46 = vadd.f32 %v775_v22, %v3362_v4  ;;  %v1593_v22 = vld [vmem:[#allocation2 + $0x90] sm:$0xff] }
 0x193   : > { %v3557_v35 = vadd.f32 %v1322_v54, %v1184_v37  ;;  %1470 = vmatmul.f32.gmra.mxu1 %v1976_v23  ;;  %1665 = vmatmul.f32.gmra.mxu2 %v1590_v32  ;;  %v1787_v32 = vld [vmem:[#allocation2 + $0x91] sm:$0xff] }
 0x195   : > { %1859 = vmatmul.f32.gmra.mxu3 %v1784_v14 }
 0x196   : > { %v937_v40 = vpop.f32.mrf.mxu2  ;;  %v1325_v25 = vpop.f32.mrf.mxu0 }
 0x197   : > { %v991_v36 = vadd.f32 %v937_v40, %v776_v46  ;;  %v1981_v40 = vld [vmem:[#allocation2 + $0x92] sm:$0xff] }
 0x198   : > { %v778_v49 = vpop.f32.mrf.mxu1  ;;  %v1131_v52 = vpop.f32.mrf.mxu3 }
 0x199   : > { %v1185_v0 = vadd.f32 %v1131_v52, %v991_v36  ;;  %2053 = vmatmul.f32.gmra.mxu0 %v1978_v5  ;;  %v779_v30 = vadd.f32 %v778_v49, %v3377_v13  ;;  %v1594_v49 = vld [vmem:[#allocation2 + $0x98] sm:$0xff] }
 0x19b   : > { %v3560_v6 = vadd.f32 %v1325_v25, %v1185_v0  ;;  %1473 = vmatmul.f32.gmra.mxu1 %v1977_v27  ;;  %1668 = vmatmul.f32.gmra.mxu2 %v1591_v12  ;;  %v1788_v12 = vld [vmem:[#allocation2 + $0x99] sm:$0xff] }
 0x19d   : > { %1862 = vmatmul.f32.gmra.mxu3 %v1785_v61 }
 0x19e   : > { %v940_v3 = vpop.f32.mrf.mxu2  ;;  %v1328_v4 = vpop.f32.mrf.mxu0 }
 0x19f   : > { %v992_v44 = vadd.f32 %v940_v3, %v779_v30  ;;  %v1982_v3 = vld [vmem:[#allocation2 + $0x9a] sm:$0xff] }
 0x1a0   : > { %v781_v23 = vpop.f32.mrf.mxu1  ;;  %v1134_v56 = vpop.f32.mrf.mxu3 }
 0x1a1   : > { %v1186_v33 = vadd.f32 %v1134_v56, %v992_v44  ;;  %2056 = vmatmul.f32.gmra.mxu0 %v1979_v19  ;;  %v782_v11 = vadd.f32 %v781_v23, %v3391_v26  ;;  %v1595_v23 = vld [vmem:[#allocation2 + $0xa8] sm:$0xff] }
 0x1a3   : > { %v3563_v9 = vadd.f32 %v1328_v4, %v1186_v33  ;;  %1476 = vmatmul.f32.gmra.mxu1 %v1978_v5  ;;  %1671 = vmatmul.f32.gmra.mxu2 %v1592_v38  ;;  %v1789_v38 = vld [vmem:[#allocation2 + $0xa9] sm:$0xff] }
 0x1a5   : > { %1865 = vmatmul.f32.gmra.mxu3 %v1786_v1 }
 0x1a6   : > { %v943_v29 = vpop.f32.mrf.mxu2  ;;  %v1331_v13 = vpop.f32.mrf.mxu0 }
 0x1a7   : > { %v993_v54 = vadd.f32 %v943_v29, %v782_v11  ;;  %v1983_v29 = vld [vmem:[#allocation2 + $0xaa] sm:$0xff] }
 0x1a8   : > { %v784_v27 = vpop.f32.mrf.mxu1  ;;  %v1137_v50 = vpop.f32.mrf.mxu3 }
 0x1a9   : > { %v1187_v62 = vadd.f32 %v1137_v50, %v993_v54  ;;  %2059 = vmatmul.f32.gmra.mxu0 %v1980_v24  ;;  %v785_v14 = vadd.f32 %v784_v27, %v3296_v31  ;;  %v1596_v27 = vld [vmem:[#allocation2 + $0xb0] sm:$0xff] }
 0x1ab   : > { %v3566_v37 = vadd.f32 %v1331_v13, %v1187_v62  ;;  %1479 = vmatmul.f32.gmra.mxu1 %v1979_v19  ;;  %1674 = vmatmul.f32.gmra.mxu2 %v1593_v22  ;;  %v1790_v22 = vld [vmem:[#allocation2 + $0xb1] sm:$0xff] }
 0x1ad   : > { %1868 = vmatmul.f32.gmra.mxu3 %v1787_v32 }
 0x1ae   : > { %v946_v46 = vpop.f32.mrf.mxu2  ;;  %v1334_v26 = vpop.f32.mrf.mxu0 }
 0x1af   : > { %v994_v25 = vadd.f32 %v946_v46, %v785_v14  ;;  %v1984_v46 = vld [vmem:[#allocation2 + $0xb2] sm:$0xff] }
 0x1b0   : > { %v787_v5 = vpop.f32.mrf.mxu1  ;;  %v1140_v36 = vpop.f32.mrf.mxu3 }
 0x1b1   : > { %v1188_v52 = vadd.f32 %v1140_v36, %v994_v25  ;;  %2062 = vmatmul.f32.gmra.mxu0 %v1981_v40  ;;  %v788_v61 = vadd.f32 %v787_v5, %v3308_v39  ;;  %v1597_v5 = vld [vmem:[#allocation2 + $0xc0] sm:$0xff] }
 0x1b3   : > { %v3569_v0 = vadd.f32 %v1334_v26, %v1188_v52  ;;  %1482 = vmatmul.f32.gmra.mxu1 %v1980_v24  ;;  %1677 = vmatmul.f32.gmra.mxu2 %v1594_v49  ;;  %v1791_v49 = vld [vmem:[#allocation2 + $0xc1] sm:$0xff] }
 0x1b5   : > { %1871 = vmatmul.f32.gmra.mxu3 %v1788_v12 }
 0x1b6   : > { %v949_v30 = vpop.f32.mrf.mxu2  ;;  %v1337_v31 = vpop.f32.mrf.mxu0 }
 0x1b7   : > { %v995_v4 = vadd.f32 %v949_v30, %v788_v61  ;;  %v1985_v30 = vld [vmem:[#allocation2 + $0xc2] sm:$0xff] }
 0x1b8   : > { %v790_v19 = vpop.f32.mrf.mxu1  ;;  %v1143_v44 = vpop.f32.mrf.mxu3 }
 0x1b9   : > { %v1189_v56 = vadd.f32 %v1143_v44, %v995_v4  ;;  %2065 = vmatmul.f32.gmra.mxu0 %v1982_v3  ;;  %v791_v1 = vadd.f32 %v790_v19, %v3326_v48  ;;  %v1598_v19 = vld [vmem:[#allocation2 + $0xc8] sm:$0xff] }
 0x1bb   : > { %v3572_v33 = vadd.f32 %v1337_v31, %v1189_v56  ;;  %1485 = vmatmul.f32.gmra.mxu1 %v1981_v40  ;;  %1680 = vmatmul.f32.gmra.mxu2 %v1595_v23  ;;  %v1792_v23 = vld [vmem:[#allocation2 + $0xc9] sm:$0xff] }
 0x1bd   : > { %1874 = vmatmul.f32.gmra.mxu3 %v1789_v38 }
 0x1be   : > { %v952_v11 = vpop.f32.mrf.mxu2  ;;  %v1340_v39 = vpop.f32.mrf.mxu0 }
 0x1bf   : > { %v996_v13 = vadd.f32 %v952_v11, %v791_v1  ;;  %v1986_v11 = vld [vmem:[#allocation2 + $0xca] sm:$0xff] }
 0x1c0   : > { %v793_v24 = vpop.f32.mrf.mxu1  ;;  %v1146_v54 = vpop.f32.mrf.mxu3 }
 0x1c1   : > { %v1190_v50 = vadd.f32 %v1146_v54, %v996_v13  ;;  %2068 = vmatmul.f32.gmra.mxu0 %v1983_v29  ;;  %v794_v32 = vadd.f32 %v793_v24, %v3338_v57  ;;  %v1599_v24 = vld [vmem:[#allocation2 + $0xd8] sm:$0xff] }
 0x1c3   : > { %v3575_v62 = vadd.f32 %v1340_v39, %v1190_v50  ;;  %1488 = vmatmul.f32.gmra.mxu1 %v1982_v3  ;;  %1683 = vmatmul.f32.gmra.mxu2 %v1596_v27  ;;  %v1793_v27 = vld [vmem:[#allocation2 + $0xd9] sm:$0xff] }
 0x1c5   : > { %1877 = vmatmul.f32.gmra.mxu3 %v1790_v22 }
 0x1c6   : > { %v955_v14 = vpop.f32.mrf.mxu2  ;;  %v1343_v48 = vpop.f32.mrf.mxu0 }
 0x1c7   : > { %v997_v26 = vadd.f32 %v955_v14, %v794_v32  ;;  %v1987_v14 = vld [vmem:[#allocation2 + $0xda] sm:$0xff] }
 0x1c8   : > { %v796_v40 = vpop.f32.mrf.mxu1  ;;  %v1149_v25 = vpop.f32.mrf.mxu3 }
 0x1c9   : > { %v1191_v36 = vadd.f32 %v1149_v25, %v997_v26  ;;  %2071 = vmatmul.f32.gmra.mxu0 %v1984_v46  ;;  %v797_v12 = vadd.f32 %v796_v40, %v3356_v63  ;;  %v1600_v40 = vld [vmem:[#allocation2 + $0xe0] sm:$0xff] }
 0x1cb   : > { %v3578_v52 = vadd.f32 %v1343_v48, %v1191_v36  ;;  %1491 = vmatmul.f32.gmra.mxu1 %v1983_v29  ;;  %1686 = vmatmul.f32.gmra.mxu2 %v1597_v5  ;;  %v1794_v5 = vld [vmem:[#allocation2 + $0xe1] sm:$0xff] }
 0x1cd   : > { %1880 = vmatmul.f32.gmra.mxu3 %v1791_v49 }
 0x1ce   : > { %v958_v61 = vpop.f32.mrf.mxu2  ;;  %v1346_v57 = vpop.f32.mrf.mxu0 }
 0x1cf   : > { %v998_v31 = vadd.f32 %v958_v61, %v797_v12  ;;  %v1988_v61 = vld [vmem:[#allocation2 + $0xe2] sm:$0xff] }
 0x1d0   : > { %v799_v3 = vpop.f32.mrf.mxu1  ;;  %v1152_v4 = vpop.f32.mrf.mxu3 }
 0x1d1   : > { %v1192_v44 = vadd.f32 %v1152_v4, %v998_v31  ;;  %2074 = vmatmul.f32.gmra.mxu0 %v1985_v30  ;;  %v800_v38 = vadd.f32 %v799_v3, %v3368_v7  ;;  %v1601_v3 = vld [vmem:[#allocation2 + $0xf0] sm:$0xff] }
 0x1d3   : > { %v3581_v56 = vadd.f32 %v1346_v57, %v1192_v44  ;;  %1494 = vmatmul.f32.gmra.mxu1 %v1984_v46  ;;  %1689 = vmatmul.f32.gmra.mxu2 %v1598_v19  ;;  %v1795_v19 = vld [vmem:[#allocation2 + $0xf1] sm:$0xff] }
 0x1d5   : > { %1883 = vmatmul.f32.gmra.mxu3 %v1792_v23 }
 0x1d6   : > { %v961_v1 = vpop.f32.mrf.mxu2  ;;  %v1349_v63 = vpop.f32.mrf.mxu0 }
 0x1d7   : > { %v999_v39 = vadd.f32 %v961_v1, %v800_v38  ;;  %v1989_v1 = vld [vmem:[#allocation2 + $0xf2] sm:$0xff] }
 0x1d8   : > { %v802_v29 = vpop.f32.mrf.mxu1  ;;  %v1155_v13 = vpop.f32.mrf.mxu3 }
 0x1d9   : > { %v1193_v54 = vadd.f32 %v1155_v13, %v999_v39  ;;  %2077 = vmatmul.f32.gmra.mxu0 %v1986_v11  ;;  %v803_v22 = vadd.f32 %v802_v29, %v3386_v21  ;;  %v1602_v29 = vld [vmem:[#allocation2 + $0xf8] sm:$0xff] }
 0x1db   : > { %v3584_v50 = vadd.f32 %v1349_v63, %v1193_v54  ;;  %1497 = vmatmul.f32.gmra.mxu1 %v1985_v30  ;;  %1692 = vmatmul.f32.gmra.mxu2 %v1599_v24  ;;  %v1796_v24 = vld [vmem:[#allocation2 + $0xf9] sm:$0xff] }
 0x1dd   : > { %1886 = vmatmul.f32.gmra.mxu3 %v1793_v27 }
 0x1de   : > { %v964_v32 = vpop.f32.mrf.mxu2  ;;  %v1352_v7 = vpop.f32.mrf.mxu0 }
 0x1df   : > { %v1000_v48 = vadd.f32 %v964_v32, %v803_v22  ;;  %v1990_v32 = vld [vmem:[#allocation2 + $0xfa] sm:$0xff] }
 0x1e0   : > { %v805_v46 = vpop.f32.mrf.mxu1  ;;  %v1158_v26 = vpop.f32.mrf.mxu3 }
 0x1e1   : > { %v1194_v25 = vadd.f32 %v1158_v26, %v1000_v48  ;;  %2080 = vmatmul.f32.gmra.mxu0 %v1987_v14  ;;  %v806_v49 = vadd.f32 %v805_v46, %v3395_v34  ;;  %v1603_v46 = vld [vmem:[#allocation2 + $0x108] sm:$0xff] }
 0x1e3   : > { %v3587_v36 = vadd.f32 %v1352_v7, %v1194_v25  ;;  %1500 = vmatmul.f32.gmra.mxu1 %v1986_v11  ;;  %1695 = vmatmul.f32.gmra.mxu2 %v1600_v40  ;;  %v1797_v40 = vld [vmem:[#allocation2 + $0x109] sm:$0xff] }
 0x1e5   : > { %1889 = vmatmul.f32.gmra.mxu3 %v1794_v5 }
 0x1e6   : > { %v967_v12 = vpop.f32.mrf.mxu2  ;;  %v1355_v21 = vpop.f32.mrf.mxu0 }
 0x1e7   : > { %v1001_v57 = vadd.f32 %v967_v12, %v806_v49 }
 0x1e8   : > { %v1161_v30 = vpop.f32.mrf.mxu3  ;;  %v1456_v31 = vpop.f32.mrf.mxu1 }
 0x1e9   : > { %v1195_v4 = vadd.f32 %v1161_v30, %v1001_v57  ;;  %2083 = vmatmul.f32.gmra.mxu0 %v1988_v61  ;;  %v1552_v23 = vadd.f32 %v1456_v31, %v3407_v2  ;;  %v1991_v57 = vld [vmem:[#allocation2 + $0x10a] sm:$0xff] }
 0x1eb   : > { %v3590_v44 = vadd.f32 %v1355_v21, %v1195_v4  ;;  %1503 = vmatmul.f32.gmra.mxu1 %v1987_v14  ;;  %1698 = vmatmul.f32.gmra.mxu2 %v1601_v3 }
 0x1ed   : > { %1892 = vmatmul.f32.gmra.mxu3 %v1795_v19  ;;  %v1604_v19 = vld [vmem:[#allocation2 + $0x110] sm:$0xff] }
 0x1ee   : > { %v1651_v34 = vpop.f32.mrf.mxu2  ;;  %v2039_v38 = vpop.f32.mrf.mxu0 }
 0x1ef   : > { %v1747_v63 = vadd.f32 %v1651_v34, %v1552_v23  ;;  %v1798_v34 = vld [vmem:[#allocation2 + $0x111] sm:$0xff] }
 0x1f0   : > { %v1459_v11 = vpop.f32.mrf.mxu1  ;;  %v1845_v39 = vpop.f32.mrf.mxu3 }
 0x1f1   : > { %v1941_v13 = vadd.f32 %v1845_v39, %v1747_v63  ;;  %2086 = vmatmul.f32.gmra.mxu0 %v1989_v1  ;;  %v1553_v2 = vadd.f32 %v1459_v11, %v3414_v8 }
 0x1f3   : > { %v2135_v54 = vadd.f32 %v2039_v38, %v1941_v13  ;;  %1506 = vmatmul.f32.gmra.mxu1 %v1988_v61  ;;  %1701 = vmatmul.f32.gmra.mxu2 %v1602_v29  ;;  %v1992_v29 = vld [vmem:[#allocation2 + $0x112] sm:$0xff] }
 0x1f5   : > { %2167 = vst [vmem:[%s3598_s20] sm:$0xff] %v2135_v54  ;;  %1895 = vmatmul.f32.gmra.mxu3 %v1796_v24  ;;  %v2236_v5 = vmul.f32 %v2135_v54, %v2135_v54 }
 0x1f6   : > { %v1654_v27 = vpop.f32.mrf.mxu2  ;;  %v2042_v22 = vpop.f32.mrf.mxu0 }
 0x1f7   : > { %v1748_v7 = vadd.f32 %v1654_v27, %v1553_v2  ;;  %v1605_v27 = vld [vmem:[#allocation2 + $0x120] sm:$0xff] }
 0x1f8   : > { %v1462_v14 = vpop.f32.mrf.mxu1  ;;  %v1848_v48 = vpop.f32.mrf.mxu3 }
 0x1f9   : > { %v1942_v26 = vadd.f32 %v1848_v48, %v1748_v7  ;;  %2089 = vmatmul.f32.gmra.mxu0 %v1990_v32  ;;  %v1554_v49 = vadd.f32 %v1462_v14, %v3427_v47  ;;  %v1799_v7 = vld [vmem:[#allocation2 + $0x121] sm:$0xff] }
 0x1fb   : > { %v2136_v25 = vadd.f32 %v2042_v22, %v1942_v26  ;;  %1509 = vmatmul.f32.gmra.mxu1 %v1989_v1  ;;  %1704 = vmatmul.f32.gmra.mxu2 %v1603_v46 }
 0x1fd   : > { %2168 = vst [vmem:[%s3598_s20 + $0x8] sm:$0xff] %v2136_v25  ;;  %v2199_v8 = vadd.f32 %v2136_v25, %v2135_v54  ;;  %v2237_v12 = vmul.f32 %v2136_v25, %v2136_v25  ;;  %1898 = vmatmul.f32.gmra.mxu3 %v1797_v40  ;;  %v1993_v40 = vld [vmem:[#allocation2 + $0x122] sm:$0xff] }
 0x1fe   : > { %v1657_v21 = vpop.f32.mrf.mxu2  ;;  %v2045_v61 = vpop.f32.mrf.mxu0 }
 0x1ff   : > { %v2268_v30 = vadd.f32 %v2237_v12, %v2236_v5  ;;  %v1749_v31 = vadd.f32 %v1657_v21, %v1554_v49  ;;  %v1606_v12 = vld [vmem:[#allocation2 + $0x128] sm:$0xff] }
 0x200   : > { %v1465_v3 = vpop.f32.mrf.mxu1  ;;  %v1851_v4 = vpop.f32.mrf.mxu3 }
 0x201   : > { %v1943_v23 = vadd.f32 %v1851_v4, %v1749_v31  ;;  %2092 = vmatmul.f32.gmra.mxu0 %v1991_v57  ;;  %v1555_v47 = vadd.f32 %v1465_v3, %v3434_v28 }
 0x203   : > { %v2137_v38 = vadd.f32 %v2045_v61, %v1943_v23  ;;  %1512 = vmatmul.f32.gmra.mxu1 %v1990_v32  ;;  %1707 = vmatmul.f32.gmra.mxu2 %v1604_v19  ;;  %v1800_v61 = vld [vmem:[#allocation2 + $0x129] sm:$0xff] }
 0x204   : > { %v1994_v19 = vld [vmem:[#allocation2 + $0x12a] sm:$0xff] }
 0x205   : > { %2169 = vst [vmem:[%s3598_s20 + $0x10] sm:$0xff] %v2137_v38  ;;  %v2200_v1 = vadd.f32 %v2199_v8, %v2137_v38  ;;  %v2238_v63 = vmul.f32 %v2137_v38, %v2137_v38  ;;  %1901 = vmatmul.f32.gmra.mxu3 %v1798_v34 }
 0x206   : > { %v1660_v11 = vpop.f32.mrf.mxu2  ;;  %v2048_v39 = vpop.f32.mrf.mxu0 }
 0x207   : > { %v2269_v13 = vadd.f32 %v2268_v30, %v2238_v63  ;;  %v1750_v24 = vadd.f32 %v1660_v11, %v1555_v47  ;;  %v1801_v11 = vld [vmem:[#allocation2 + $0x139] sm:$0xff] }
 0x208   : > { %v1468_v54 = vpop.f32.mrf.mxu1  ;;  %v1854_v2 = vpop.f32.mrf.mxu3 }
 0x209   : > { %v1944_v22 = vadd.f32 %v1854_v2, %v1750_v24  ;;  %2095 = vmatmul.f32.gmra.mxu0 %v1992_v29  ;;  %v1556_v28 = vadd.f32 %v1468_v54, %v3447_v41  ;;  %v1995_v2 = vld [vmem:[#allocation2 + $0x13a] sm:$0xff] }
 0x20b   : > { %v2138_v32 = vadd.f32 %v2048_v39, %v1944_v22  ;;  %1515 = vmatmul.f32.gmra.mxu1 %v1991_v57  ;;  %1710 = vmatmul.f32.gmra.mxu2 %v1605_v27 }
 0x20d   : > { %2170 = vst [vmem:[%s3598_s20 + $0x18] sm:$0xff] %v2138_v32  ;;  %v2201_v14 = vadd.f32 %v2200_v1, %v2138_v32  ;;  %v2239_v48 = vmul.f32 %v2138_v32, %v2138_v32  ;;  %1904 = vmatmul.f32.gmra.mxu3 %v1799_v7  ;;  %v1607_v1 = vld [vmem:[#allocation2 + $0x138] sm:$0xff] }
 0x20e   : > { %v1663_v46 = vpop.f32.mrf.mxu2  ;;  %v2051_v26 = vpop.f32.mrf.mxu0 }
 0x20f   : > { %v2270_v25 = vadd.f32 %v2269_v13, %v2239_v48  ;;  %v1751_v5 = vadd.f32 %v1663_v46, %v1556_v28  ;;  %v1608_v28 = vld [vmem:[#allocation2 + $0x140] sm:$0xff] }
 0x210   : > { %v1471_v49 = vpop.f32.mrf.mxu1  ;;  %v1857_v8 = vpop.f32.mrf.mxu3  ;;  %v1802_v48 = vld [vmem:[#allocation2 + $0x141] sm:$0xff] }
 0x211   : > { %v1945_v21 = vadd.f32 %v1857_v8, %v1751_v5  ;;  %2098 = vmatmul.f32.gmra.mxu0 %v1993_v40  ;;  %v1557_v41 = vadd.f32 %v1471_v49, %v3454_v45  ;;  %v1996_v49 = vld [vmem:[#allocation2 + $0x142] sm:$0xff] }
 0x213   : > { %v2139_v57 = vadd.f32 %v2051_v26, %v1945_v21  ;;  %1518 = vmatmul.f32.gmra.mxu1 %v1992_v29  ;;  %1713 = vmatmul.f32.gmra.mxu2 %v1606_v12 }
 0x215   : > { %2171 = vst [vmem:[%s3598_s20 + $0x20] sm:$0xff] %v2139_v57  ;;  %v2202_v30 = vadd.f32 %v2201_v14, %v2139_v57  ;;  %v2240_v31 = vmul.f32 %v2139_v57, %v2139_v57  ;;  %1907 = vmatmul.f32.gmra.mxu3 %v1800_v61  ;;  %v1609_v57 = vld [vmem:[#allocation2 + $0x150] sm:$0xff] }
 0x216   : > { %v1666_v3 = vpop.f32.mrf.mxu2  ;;  %v2054_v4 = vpop.f32.mrf.mxu0 }
 0x217   : > { %v2271_v23 = vadd.f32 %v2270_v25, %v2240_v31  ;;  %v1752_v34 = vadd.f32 %v1666_v3, %v1557_v41 }
 0x218   : > { %v1474_v38 = vpop.f32.mrf.mxu1  ;;  %v1860_v47 = vpop.f32.mrf.mxu3 }
 0x219   : > { %v1946_v63 = vadd.f32 %v1860_v47, %v1752_v34  ;;  %2101 = vmatmul.f32.gmra.mxu0 %v1994_v19  ;;  %v1558_v45 = vadd.f32 %v1474_v38, %v3466_v17  ;;  %v1997_v34 = vld [vmem:[#allocation2 + $0x152] sm:$0xff] }
 0x21b   : > { %v2140_v39 = vadd.f32 %v2054_v4, %v1946_v63  ;;  %1521 = vmatmul.f32.gmra.mxu1 %v1993_v40  ;;  %1716 = vmatmul.f32.gmra.mxu2 %v1607_v1 }
 0x21d   : > { %2172 = vst [vmem:[%s3598_s20 + $0x28] sm:$0xff] %v2140_v39  ;;  %v2203_v29 = vadd.f32 %v2202_v30, %v2140_v39  ;;  %v2241_v13 = vmul.f32 %v2140_v39, %v2140_v39  ;;  %1910 = vmatmul.f32.gmra.mxu3 %v1801_v11  ;;  %v1803_v30 = vld [vmem:[#allocation2 + $0x151] sm:$0xff] }
 0x21e   : > { %v1669_v24 = vpop.f32.mrf.mxu2  ;;  %v2057_v54 = vpop.f32.mrf.mxu0  ;;  %v1610_v11 = vld [vmem:[#allocation2 + $0x158] sm:$0xff] }
 0x21f   : > { %v2272_v27 = vadd.f32 %v2271_v23, %v2241_v13  ;;  %v1753_v22 = vadd.f32 %v1669_v24, %v1558_v45  ;;  %v1804_v45 = vld [vmem:[#allocation2 + $0x159] sm:$0xff] }
 0x220   : > { %v1477_v7 = vpop.f32.mrf.mxu1  ;;  %v1863_v32 = vpop.f32.mrf.mxu3 }
 0x221   : > { %v1947_v14 = vadd.f32 %v1863_v32, %v1753_v22  ;;  %2104 = vmatmul.f32.gmra.mxu0 %v1995_v2  ;;  %v1559_v17 = vadd.f32 %v1477_v7, %v3472_v15 }
 0x223   : > { %v2141_v46 = vadd.f32 %v2057_v54, %v1947_v14  ;;  %1524 = vmatmul.f32.gmra.mxu1 %v1994_v19  ;;  %1719 = vmatmul.f32.gmra.mxu2 %v1608_v28  ;;  %v1611_v14 = vld [vmem:[#allocation2 + $0x168] sm:$0xff] }
 0x225   : > { %2173 = vst [vmem:[%s3598_s20 + $0x30] sm:$0xff] %v2141_v46  ;;  %v2204_v26 = vadd.f32 %v2203_v29, %v2141_v46  ;;  %v2242_v40 = vmul.f32 %v2141_v46, %v2141_v46  ;;  %1913 = vmatmul.f32.gmra.mxu3 %v1802_v48  ;;  %v1805_v46 = vld [vmem:[#allocation2 + $0x169] sm:$0xff] }
 0x226   : > { %v1672_v25 = vpop.f32.mrf.mxu2  ;;  %v2060_v5 = vpop.f32.mrf.mxu0 }
 0x227   : > { %v2273_v8 = vadd.f32 %v2272_v27, %v2242_v40  ;;  %v1754_v12 = vadd.f32 %v1672_v25, %v1559_v17  ;;  %v1998_v27 = vld [vmem:[#allocation2 + $0x15a] sm:$0xff] }
 0x228   : > { %v1480_v21 = vpop.f32.mrf.mxu1  ;;  %v1866_v61 = vpop.f32.mrf.mxu3 }
 0x229   : > { %v1948_v41 = vadd.f32 %v1866_v61, %v1754_v12  ;;  %2107 = vmatmul.f32.gmra.mxu0 %v1996_v49  ;;  %v1560_v15 = vadd.f32 %v1480_v21, %v3493_v10 }
 0x22b   : > { %v2142_v31 = vadd.f32 %v2060_v5, %v1948_v41  ;;  %1527 = vmatmul.f32.gmra.mxu1 %v1995_v2  ;;  %1722 = vmatmul.f32.gmra.mxu2 %v1609_v57  ;;  %v1612_v57 = vld [vmem:[#allocation2 + $0x170] sm:$0xff] }
 0x22d   : > { %2174 = vst [vmem:[%s3598_s20 + $0x38] sm:$0xff] %v2142_v31  ;;  %v2205_v3 = vadd.f32 %v2204_v26, %v2142_v31  ;;  %v2243_v4 = vmul.f32 %v2142_v31, %v2142_v31  ;;  %1916 = vmatmul.f32.gmra.mxu3 %v1803_v30  ;;  %v1806_v30 = vld [vmem:[#allocation2 + $0x171] sm:$0xff] }
 0x22e   : > { %v1675_v19 = vpop.f32.mrf.mxu2  ;;  %v2063_v23 = vpop.f32.mrf.mxu0 }
 0x22f   : > { %v2274_v38 = vadd.f32 %v2273_v8, %v2243_v4  ;;  %v1755_v47 = vadd.f32 %v1675_v19, %v1560_v15 }
 0x230   : > { %v1483_v1 = vpop.f32.mrf.mxu1  ;;  %v1869_v63 = vpop.f32.mrf.mxu3 }
 0x231   : > { %v1949_v39 = vadd.f32 %v1869_v63, %v1755_v47  ;;  %2110 = vmatmul.f32.gmra.mxu0 %v1997_v34  ;;  %v1561_v10 = vadd.f32 %v1483_v1, %v3505_v53  ;;  %v1613_v63 = vld [vmem:[#allocation2 + $0x180] sm:$0xff] }
 0x233   : > { %v2143_v29 = vadd.f32 %v2063_v23, %v1949_v39  ;;  %1530 = vmatmul.f32.gmra.mxu1 %v1996_v49  ;;  %1725 = vmatmul.f32.gmra.mxu2 %v1610_v11  ;;  %v1999_v49 = vld [vmem:[#allocation2 + $0x16a] sm:$0xff]  ;;  %v2000_v23 = vld [vmem:[#allocation2 + $0x172] sm:$0xff]  ;;  %v1807_v39 = vld [vmem:[#allocation2 + $0x181] sm:$0xff] }
 0x235   : > { %2175 = vst [vmem:[%s3598_s20 + $0x40] sm:$0xff] %v2143_v29  ;;  %v2206_v13 = vadd.f32 %v2205_v3, %v2143_v29  ;;  %v2244_v24 = vmul.f32 %v2143_v29, %v2143_v29  ;;  %1919 = vmatmul.f32.gmra.mxu3 %v1804_v45 }
 0x236   : > { %v1678_v54 = vpop.f32.mrf.mxu2  ;;  %v2066_v2 = vpop.f32.mrf.mxu0 }
 0x237   : > { %v2275_v22 = vadd.f32 %v2274_v38, %v2244_v24  ;;  %v1756_v7 = vadd.f32 %v1678_v54, %v1561_v10  ;;  %v2001_v54 = vld [vmem:[#allocation2 + $0x182] sm:$0xff] }
 0x238   : > { %v1486_v32 = vpop.f32.mrf.mxu1  ;;  %v1872_v28 = vpop.f32.mrf.mxu3 }
 0x239   : > { %v1950_v48 = vadd.f32 %v1872_v28, %v1756_v7  ;;  %2113 = vmatmul.f32.gmra.mxu0 %v1998_v27  ;;  %v1562_v53 = vadd.f32 %v1486_v32, %v3520_v20  ;;  %v1614_v32 = vld [vmem:[#allocation2 + $0x188] sm:$0xff] }
 0x23b   : > { %v2144_v17 = vadd.f32 %v2066_v2, %v1950_v48  ;;  %1533 = vmatmul.f32.gmra.mxu1 %v1997_v34  ;;  %1728 = vmatmul.f32.gmra.mxu2 %v1611_v14  ;;  %v1808_v14 = vld [vmem:[#allocation2 + $0x189] sm:$0xff] }
 0x23d   : > { %2176 = vst [vmem:[%s3598_s20 + $0x48] sm:$0xff] %v2144_v17  ;;  %v2207_v26 = vadd.f32 %v2206_v13, %v2144_v17  ;;  %v2245_v40 = vmul.f32 %v2144_v17, %v2144_v17  ;;  %1922 = vmatmul.f32.gmra.mxu3 %v1805_v46 }
 0x23e   : > { %v1681_v25 = vpop.f32.mrf.mxu2  ;;  %v2069_v5 = vpop.f32.mrf.mxu0 }
 0x23f   : > { %v2276_v8 = vadd.f32 %v2275_v22, %v2245_v40  ;;  %v1757_v12 = vadd.f32 %v1681_v25, %v1562_v53  ;;  %v2002_v40 = vld [vmem:[#allocation2 + $0x18a] sm:$0xff] }
 0x240   : > { %v1489_v21 = vpop.f32.mrf.mxu1  ;;  %v1875_v61 = vpop.f32.mrf.mxu3 }
 0x241   : > { %v1951_v41 = vadd.f32 %v1875_v61, %v1757_v12  ;;  %2116 = vmatmul.f32.gmra.mxu0 %v1999_v49  ;;  %v1563_v20 = vadd.f32 %v1489_v21, %v3526_v18  ;;  %v1615_v12 = vld [vmem:[#allocation2 + $0x198] sm:$0xff] }
 0x242   : > { %v1809_v61 = vld [vmem:[#allocation2 + $0x199] sm:$0xff] }
 0x243   : > { %v2145_v31 = vadd.f32 %v2069_v5, %v1951_v41  ;;  %1536 = vmatmul.f32.gmra.mxu1 %v1998_v27  ;;  %1731 = vmatmul.f32.gmra.mxu2 %v1612_v57 }
 0x245   : > { %2177 = vst [vmem:[%s3598_s20 + $0x50] sm:$0xff] %v2145_v31  ;;  %v2208_v15 = vadd.f32 %v2207_v26, %v2145_v31  ;;  %v2246_v3 = vmul.f32 %v2145_v31, %v2145_v31  ;;  %1925 = vmatmul.f32.gmra.mxu3 %v1806_v30 }
 0x246   : > { %v1684_v4 = vpop.f32.mrf.mxu2  ;;  %v2072_v19 = vpop.f32.mrf.mxu0 }
 0x247   : > { %v2277_v34 = vadd.f32 %v2276_v8, %v2246_v3  ;;  %v1758_v38 = vadd.f32 %v1684_v4, %v1563_v20 }
 0x248   : > { %v1492_v47 = vpop.f32.mrf.mxu1  ;;  %v1878_v1 = vpop.f32.mrf.mxu3 }
 0x249   : > { %v1952_v11 = vadd.f32 %v1878_v1, %v1758_v38  ;;  %2119 = vmatmul.f32.gmra.mxu0 %v2000_v23  ;;  %v1564_v18 = vadd.f32 %v1492_v47, %v3529_v59  ;;  %v1810_v38 = vld [vmem:[#allocation2 + $0x1a1] sm:$0xff] }
 0x24a   : > { %v2628_v1 = vld [vmem:[#allocation2 + $0x8] sm:$0xff] }
 0x24b   : > { %v2146_v45 = vadd.f32 %v2072_v19, %v1952_v11  ;;  %1539 = vmatmul.f32.gmra.mxu1 %v1999_v49  ;;  %1734 = vmatmul.f32.gmra.mxu2 %v1613_v63 }
 0x24d   : > { %2178 = vst [vmem:[%s3598_s20 + $0x58] sm:$0xff] %v2146_v45  ;;  %v2209_v29 = vadd.f32 %v2208_v15, %v2146_v45  ;;  %v2247_v10 = vmul.f32 %v2146_v45, %v2146_v45  ;;  %1928 = vmatmul.f32.gmra.mxu3 %v1807_v39  ;;  %v2003_v15 = vld [vmem:[#allocation2 + $0x19a] sm:$0xff] }
 0x24e   : > { %v1687_v13 = vpop.f32.mrf.mxu2  ;;  %v2075_v24 = vpop.f32.mrf.mxu0 }
 0x24f   : > { %v2278_v2 = vadd.f32 %v2277_v34, %v2247_v10  ;;  %v1759_v27 = vadd.f32 %v1687_v13, %v1564_v18  ;;  %v2004_v18 = vld [vmem:[#allocation2 + $0x1a2] sm:$0xff] }
 0x250   : > { %v1495_v22 = vpop.f32.mrf.mxu1  ;;  %v1881_v7 = vpop.f32.mrf.mxu3 }
 0x251   : > { %v1953_v28 = vadd.f32 %v1881_v7, %v1759_v27  ;;  %2122 = vmatmul.f32.gmra.mxu0 %v2001_v54  ;;  %v1565_v59 = vadd.f32 %v1495_v22, %v3532_v43 }
 0x253   : > { %v2147_v48 = vadd.f32 %v2075_v24, %v1953_v28  ;;  %1542 = vmatmul.f32.gmra.mxu1 %v2000_v23  ;;  %1737 = vmatmul.f32.gmra.mxu2 %v1614_v32 }
 0x255   : > { %2179 = vst [vmem:[%s3598_s20 + $0x60] sm:$0xff] %v2147_v48  ;;  %v2210_v46 = vadd.f32 %v2209_v29, %v2147_v48  ;;  %v2248_v17 = vmul.f32 %v2147_v48, %v2147_v48  ;;  %1931 = vmatmul.f32.gmra.mxu3 %v1808_v14 }
 0x256   : > { %v1690_v53 = vpop.f32.mrf.mxu2  ;;  %v2078_v26 = vpop.f32.mrf.mxu0 }
 0x257   : > { %v2279_v25 = vadd.f32 %v2278_v2, %v2248_v17  ;;  %v1760_v5 = vadd.f32 %v1690_v53, %v1565_v59 }
 0x258   : > { %v1498_v49 = vpop.f32.mrf.mxu1  ;;  %v1884_v8 = vpop.f32.mrf.mxu3 }
 0x259   : > { %v1954_v21 = vadd.f32 %v1884_v8, %v1760_v5  ;;  %2125 = vmatmul.f32.gmra.mxu0 %v2002_v40  ;;  %v1566_v43 = vadd.f32 %v1498_v49, %v3537_v58 }
 0x25b   : > { %v2148_v57 = vadd.f32 %v2078_v26, %v1954_v21  ;;  %1545 = vmatmul.f32.gmra.mxu1 %v2001_v54  ;;  %1740 = vmatmul.f32.gmra.mxu2 %v1615_v12 }
 0x25d   : > { %2180 = vst [vmem:[%s3598_s20 + $0x68] sm:$0xff] %v2148_v57  ;;  %v2211_v41 = vadd.f32 %v2210_v46, %v2148_v57  ;;  %v2249_v30 = vmul.f32 %v2148_v57, %v2148_v57  ;;  %1934 = vmatmul.f32.gmra.mxu3 %v1809_v61 }
 0x25e   : > { %v1693_v31 = vpop.f32.mrf.mxu2  ;;  %v2081_v20 = vpop.f32.mrf.mxu0 }
 0x25f   : > { %v2280_v3 = vadd.f32 %v2279_v25, %v2249_v30  ;;  %v1761_v4 = vadd.f32 %v1693_v31, %v1566_v43 }
 0x260   : > { %v1501_v19 = vpop.f32.mrf.mxu1  ;;  %v1887_v23 = vpop.f32.mrf.mxu3 }
 0x261   : > { %v1955_v34 = vadd.f32 %v1887_v23, %v1761_v4  ;;  %2128 = vmatmul.f32.gmra.mxu0 %v2003_v15  ;;  %v1567_v58 = vadd.f32 %v1501_v19, %v3542_v55 }
 0x263   : > { %v2149_v47 = vadd.f32 %v2081_v20, %v1955_v34  ;;  %1548 = vmatmul.f32.gmra.mxu1 %v2002_v40  ;;  %1743 = vmatmul.f32.gmra.mxu2 %v2628_v1 }
 0x265   : > { %2181 = vst [vmem:[%s3598_s20 + $0x70] sm:$0xff] %v2149_v47  ;;  %v2212_v63 = vadd.f32 %v2211_v41, %v2149_v47  ;;  %v2250_v11 = vmul.f32 %v2149_v47, %v2149_v47  ;;  %1937 = vmatmul.f32.gmra.mxu3 %v1810_v38 }
 0x266   : > { %v1696_v39 = vpop.f32.mrf.mxu2  ;;  %v2084_v45 = vpop.f32.mrf.mxu0 }
 0x267   : > { %v2281_v29 = vadd.f32 %v2280_v3, %v2250_v11  ;;  %v1762_v10 = vadd.f32 %v1696_v39, %v1567_v58 }
 0x268   : > { %v1504_v13 = vpop.f32.mrf.mxu1  ;;  %v1890_v24 = vpop.f32.mrf.mxu3 }
 0x269   : > { %v1956_v54 = vadd.f32 %v1890_v24, %v1762_v10  ;;  %2131 = vmatmul.f32.gmra.mxu0 %v2004_v18  ;;  %v1568_v27 = vadd.f32 %v1504_v13, %v3545_v51 }
 0x26b   : > { %v2150_v2 = vadd.f32 %v2084_v45, %v1956_v54 }
 0x26d   : > { %2182 = vst [vmem:[%s3598_s20 + $0x78] sm:$0xff] %v2150_v2  ;;  %v2213_v55 = vadd.f32 %v2212_v63, %v2150_v2  ;;  %v2251_v22 = vmul.f32 %v2150_v2, %v2150_v2 }
 0x26e   : > { %v1699_v7 = vpop.f32.mrf.mxu2  ;;  %v2087_v32 = vpop.f32.mrf.mxu0 }
 0x26f   : > { %v2282_v28 = vadd.f32 %v2281_v29, %v2251_v22  ;;  %v1763_v14 = vadd.f32 %v1699_v7, %v1568_v27 }
 0x270   : > { %v1507_v48 = vpop.f32.mrf.mxu1  ;;  %v1893_v59 = vpop.f32.mrf.mxu3 }
 0x271   : > { %v1957_v46 = vadd.f32 %v1893_v59, %v1763_v14  ;;  %v1569_v53 = vadd.f32 %v1507_v48, %v3548_v42 }
 0x273   : > { %v2151_v17 = vadd.f32 %v2087_v32, %v1957_v46 }
 0x275   : > { %2183 = vst [vmem:[%s3598_s20 + $0x80] sm:$0xff] %v2151_v17  ;;  %v2214_v26 = vadd.f32 %v2213_v55, %v2151_v17  ;;  %v2252_v40 = vmul.f32 %v2151_v17, %v2151_v17 }
 0x276   : > { %v1702_v25 = vpop.f32.mrf.mxu2  ;;  %v2090_v5 = vpop.f32.mrf.mxu0 }
 0x277   : > { %v2283_v51 = vadd.f32 %v2282_v28, %v2252_v40  ;;  %v1764_v49 = vadd.f32 %v1702_v25, %v1569_v53 }
 0x278   : > { %v1510_v8 = vpop.f32.mrf.mxu1  ;;  %v1896_v12 = vpop.f32.mrf.mxu3 }
 0x279   : > { %v1958_v21 = vadd.f32 %v1896_v12, %v1764_v49  ;;  %v1570_v57 = vadd.f32 %v1510_v8, %v3551_v60 }
 0x27b   : > { %v2152_v61 = vadd.f32 %v2090_v5, %v1958_v21 }
 0x27d   : > { %2184 = vst [vmem:[%s3598_s20 + $0x88] sm:$0xff] %v2152_v61  ;;  %v2215_v43 = vadd.f32 %v2214_v26, %v2152_v61  ;;  %v2253_v41 = vmul.f32 %v2152_v61, %v2152_v61 }
 0x27e   : > { %v1705_v30 = vpop.f32.mrf.mxu2  ;;  %v2093_v31 = vpop.f32.mrf.mxu0 }
 0x27f   : > { %v2284_v42 = vadd.f32 %v2283_v51, %v2253_v41  ;;  %v1765_v20 = vadd.f32 %v1705_v30, %v1570_v57 }
 0x280   : > { %v1513_v15 = vpop.f32.mrf.mxu1  ;;  %v1899_v3 = vpop.f32.mrf.mxu3 }
 0x281   : > { %v1959_v4 = vadd.f32 %v1899_v3, %v1765_v20  ;;  %v1571_v23 = vadd.f32 %v1513_v15, %v3554_v16 }
 0x283   : > { %v2153_v19 = vadd.f32 %v2093_v31, %v1959_v4 }
 0x285   : > { %2185 = vst [vmem:[%s3598_s20 + $0x90] sm:$0xff] %v2153_v19  ;;  %v2216_v34 = vadd.f32 %v2215_v43, %v2153_v19  ;;  %v2254_v38 = vmul.f32 %v2153_v19, %v2153_v19 }
 0x286   : > { %v1708_v47 = vpop.f32.mrf.mxu2  ;;  %v2096_v1 = vpop.f32.mrf.mxu0 }
 0x287   : > { %v2285_v60 = vadd.f32 %v2284_v42, %v2254_v38  ;;  %v1766_v58 = vadd.f32 %v1708_v47, %v1571_v23 }
 0x288   : > { %v1516_v63 = vpop.f32.mrf.mxu1  ;;  %v1902_v11 = vpop.f32.mrf.mxu3 }
 0x289   : > { %v1960_v39 = vadd.f32 %v1902_v11, %v1766_v58  ;;  %v1572_v18 = vadd.f32 %v1516_v63, %v3557_v35 }
 0x28b   : > { %v2154_v45 = vadd.f32 %v2096_v1, %v1960_v39 }
 0x28d   : > { %2186 = vst [vmem:[%s3598_s20 + $0x98] sm:$0xff] %v2154_v45  ;;  %v2217_v29 = vadd.f32 %v2216_v34, %v2154_v45  ;;  %v2255_v10 = vmul.f32 %v2154_v45, %v2154_v45 }
 0x28e   : > { %v1711_v13 = vpop.f32.mrf.mxu2  ;;  %v2099_v24 = vpop.f32.mrf.mxu0 }
 0x28f   : > { %v2286_v16 = vadd.f32 %v2285_v60, %v2255_v10  ;;  %v1767_v54 = vadd.f32 %v1711_v13, %v1572_v18 }
 0x290   : > { %v1519_v2 = vpop.f32.mrf.mxu1  ;;  %v1905_v27 = vpop.f32.mrf.mxu3 }
 0x291   : > { %v1961_v55 = vadd.f32 %v1905_v27, %v1767_v54  ;;  %v1573_v7 = vadd.f32 %v1519_v2, %v3560_v6 }
 0x293   : > { %v2155_v22 = vadd.f32 %v2099_v24, %v1961_v55 }
 0x295   : > { %2187 = vst [vmem:[%s3598_s20 + $0xa0] sm:$0xff] %v2155_v22  ;;  %v2218_v32 = vadd.f32 %v2217_v29, %v2155_v22  ;;  %v2256_v28 = vmul.f32 %v2155_v22, %v2155_v22 }
 0x296   : > { %v1714_v14 = vpop.f32.mrf.mxu2  ;;  %v2102_v48 = vpop.f32.mrf.mxu0 }
 0x297   : > { %v2287_v35 = vadd.f32 %v2286_v16, %v2256_v28  ;;  %v1768_v59 = vadd.f32 %v1714_v14, %v1573_v7 }
 0x298   : > { %v1522_v46 = vpop.f32.mrf.mxu1  ;;  %v1908_v17 = vpop.f32.mrf.mxu3 }
 0x299   : > { %v1962_v53 = vadd.f32 %v1908_v17, %v1768_v59  ;;  %v1574_v40 = vadd.f32 %v1522_v46, %v3563_v9 }
 0x29b   : > { %v2156_v26 = vadd.f32 %v2102_v48, %v1962_v53 }
 0x29d   : > { %2188 = vst [vmem:[%s3598_s20 + $0xa8] sm:$0xff] %v2156_v26  ;;  %v2219_v25 = vadd.f32 %v2218_v32, %v2156_v26  ;;  %v2257_v5 = vmul.f32 %v2156_v26, %v2156_v26 }
 0x29e   : > { %v1717_v51 = vpop.f32.mrf.mxu2  ;;  %v2105_v49 = vpop.f32.mrf.mxu0 }
 0x29f   : > { %v2288_v6 = vadd.f32 %v2287_v35, %v2257_v5  ;;  %v1769_v8 = vadd.f32 %v1717_v51, %v1574_v40 }
 0x2a0   : > { %v1525_v12 = vpop.f32.mrf.mxu1  ;;  %v1911_v21 = vpop.f32.mrf.mxu3 }
 0x2a1   : > { %v1963_v61 = vadd.f32 %v1911_v21, %v1769_v8  ;;  %v1575_v43 = vadd.f32 %v1525_v12, %v3566_v37 }
 0x2a3   : > { %v2157_v57 = vadd.f32 %v2105_v49, %v1963_v61 }
 0x2a5   : > { %2189 = vst [vmem:[%s3598_s20 + $0xb0] sm:$0xff] %v2157_v57  ;;  %v2220_v41 = vadd.f32 %v2219_v25, %v2157_v57  ;;  %v2258_v30 = vmul.f32 %v2157_v57, %v2157_v57 }
 0x2a6   : > { %v1720_v31 = vpop.f32.mrf.mxu2  ;;  %v2108_v42 = vpop.f32.mrf.mxu0 }
 0x2a7   : > { %v2289_v9 = vadd.f32 %v2288_v6, %v2258_v30  ;;  %v1770_v20 = vadd.f32 %v1720_v31, %v1575_v43 }
 0x2a8   : > { %v1528_v15 = vpop.f32.mrf.mxu1  ;;  %v1914_v3 = vpop.f32.mrf.mxu3 }
 0x2a9   : > { %v1964_v4 = vadd.f32 %v1914_v3, %v1770_v20  ;;  %v1576_v23 = vadd.f32 %v1528_v15, %v3569_v0 }
 0x2ab   : > { %v2158_v19 = vadd.f32 %v2108_v42, %v1964_v4 }
 0x2ad   : > { %2190 = vst [vmem:[%s3598_s20 + $0xb8] sm:$0xff] %v2158_v19  ;;  %v2221_v34 = vadd.f32 %v2220_v41, %v2158_v19  ;;  %v2259_v38 = vmul.f32 %v2158_v19, %v2158_v19 }
 0x2ae   : > { %v1723_v47 = vpop.f32.mrf.mxu2  ;;  %v2111_v1 = vpop.f32.mrf.mxu0 }
 0x2af   : > { %v2290_v37 = vadd.f32 %v2289_v9, %v2259_v38  ;;  %v1771_v60 = vadd.f32 %v1723_v47, %v1576_v23 }
 0x2b0   : > { %v1531_v58 = vpop.f32.mrf.mxu1  ;;  %v1917_v63 = vpop.f32.mrf.mxu3 }
 0x2b1   : > { %v1965_v11 = vadd.f32 %v1917_v63, %v1771_v60  ;;  %v1577_v45 = vadd.f32 %v1531_v58, %v3572_v33 }
 0x2b3   : > { %v2159_v39 = vadd.f32 %v2111_v1, %v1965_v11 }
 0x2b5   : > { %2191 = vst [vmem:[%s3598_s20 + $0xc0] sm:$0xff] %v2159_v39  ;;  %v2222_v18 = vadd.f32 %v2221_v34, %v2159_v39  ;;  %v2260_v29 = vmul.f32 %v2159_v39, %v2159_v39 }
 0x2b6   : > { %v1726_v10 = vpop.f32.mrf.mxu2  ;;  %v2114_v13 = vpop.f32.mrf.mxu0 }
 0x2b7   : > { %v2291_v0 = vadd.f32 %v2290_v37, %v2260_v29  ;;  %v1772_v24 = vadd.f32 %v1726_v10, %v1577_v45 }
 0x2b8   : > { %v1534_v16 = vpop.f32.mrf.mxu1  ;;  %v1920_v54 = vpop.f32.mrf.mxu3 }
 0x2b9   : > { %v1966_v2 = vadd.f32 %v1920_v54, %v1772_v24  ;;  %v1578_v55 = vadd.f32 %v1534_v16, %v3575_v62 }
 0x2bb   : > { %v2160_v27 = vadd.f32 %v2114_v13, %v1966_v2 }
 0x2bd   : > { %2192 = vst [vmem:[%s3598_s20 + $0xc8] sm:$0xff] %v2160_v27  ;;  %v2223_v22 = vadd.f32 %v2222_v18, %v2160_v27  ;;  %v2261_v7 = vmul.f32 %v2160_v27, %v2160_v27 }
 0x2be   : > { %v1729_v32 = vpop.f32.mrf.mxu2  ;;  %v2117_v28 = vpop.f32.mrf.mxu0 }
 0x2bf   : > { %v2292_v33 = vadd.f32 %v2291_v0, %v2261_v7  ;;  %v1773_v14 = vadd.f32 %v1729_v32, %v1578_v55 }
 0x2c0   : > { %v1537_v48 = vpop.f32.mrf.mxu1  ;;  %v1923_v35 = vpop.f32.mrf.mxu3 }
 0x2c1   : > { %v1967_v59 = vadd.f32 %v1923_v35, %v1773_v14  ;;  %v1579_v17 = vadd.f32 %v1537_v48, %v3578_v52 }
 0x2c3   : > { %v2161_v46 = vadd.f32 %v2117_v28, %v1967_v59 }
 0x2c5   : > { %2193 = vst [vmem:[%s3598_s20 + $0xd0] sm:$0xff] %v2161_v46  ;;  %v2224_v53 = vadd.f32 %v2223_v22, %v2161_v46  ;;  %v2262_v26 = vmul.f32 %v2161_v46, %v2161_v46 }
 0x2c6   : > { %v1732_v40 = vpop.f32.mrf.mxu2  ;;  %v2120_v25 = vpop.f32.mrf.mxu0 }
 0x2c7   : > { %v2293_v62 = vadd.f32 %v2292_v33, %v2262_v26  ;;  %v1774_v5 = vadd.f32 %v1732_v40, %v1579_v17 }
 0x2c8   : > { %v1540_v51 = vpop.f32.mrf.mxu1  ;;  %v1926_v49 = vpop.f32.mrf.mxu3 }
 0x2c9   : > { %v1968_v6 = vadd.f32 %v1926_v49, %v1774_v5  ;;  %v1580_v12 = vadd.f32 %v1540_v51, %v3581_v56 }
 0x2cb   : > { %v2162_v8 = vadd.f32 %v2120_v25, %v1968_v6 }
 0x2cd   : > { %2194 = vst [vmem:[%s3598_s20 + $0xd8] sm:$0xff] %v2162_v8  ;;  %v2225_v21 = vadd.f32 %v2224_v53, %v2162_v8  ;;  %v2263_v61 = vmul.f32 %v2162_v8, %v2162_v8 }
 0x2ce   : > { %v1735_v57 = vpop.f32.mrf.mxu2  ;;  %v2123_v43 = vpop.f32.mrf.mxu0 }
 0x2cf   : > { %v2294_v52 = vadd.f32 %v2293_v62, %v2263_v61  ;;  %v1775_v41 = vadd.f32 %v1735_v57, %v1580_v12 }
 0x2d0   : > { %v1543_v30 = vpop.f32.mrf.mxu1  ;;  %v1929_v31 = vpop.f32.mrf.mxu3 }
 0x2d1   : > { %v1969_v42 = vadd.f32 %v1929_v31, %v1775_v41  ;;  %v1581_v20 = vadd.f32 %v1543_v30, %v3584_v50 }
 0x2d3   : > { %v2163_v9 = vadd.f32 %v2123_v43, %v1969_v42 }
 0x2d5   : > { %2195 = vst [vmem:[%s3598_s20 + $0xe0] sm:$0xff] %v2163_v9  ;;  %v2226_v15 = vadd.f32 %v2225_v21, %v2163_v9  ;;  %v2264_v3 = vmul.f32 %v2163_v9, %v2163_v9 }
 0x2d6   : > { %v1738_v4 = vpop.f32.mrf.mxu2  ;;  %v2126_v19 = vpop.f32.mrf.mxu0 }
 0x2d7   : > { %v2295_v56 = vadd.f32 %v2294_v52, %v2264_v3  ;;  %v1776_v23 = vadd.f32 %v1738_v4, %v1581_v20 }
 0x2d8   : > { %v1546_v34 = vpop.f32.mrf.mxu1  ;;  %v1932_v38 = vpop.f32.mrf.mxu3 }
 0x2d9   : > { %v1970_v47 = vadd.f32 %v1932_v38, %v1776_v23  ;;  %v1582_v37 = vadd.f32 %v1546_v34, %v3587_v36 }
 0x2db   : > { %v2164_v1 = vadd.f32 %v2126_v19, %v1970_v47 }
 0x2dd   : > { %2196 = vst [vmem:[%s3598_s20 + $0xe8] sm:$0xff] %v2164_v1  ;;  %v2227_v60 = vadd.f32 %v2226_v15, %v2164_v1  ;;  %v2265_v58 = vmul.f32 %v2164_v1, %v2164_v1 }
 0x2de   : > { %v1741_v63 = vpop.f32.mrf.mxu2  ;;  %v2129_v11 = vpop.f32.mrf.mxu0 }
 0x2df   : > { %v2296_v50 = vadd.f32 %v2295_v56, %v2265_v58  ;;  %v1777_v39 = vadd.f32 %v1741_v63, %v1582_v37 }
 0x2e0   : > { %v1935_v45 = vpop.f32.mrf.mxu3  ;;  %v1549_v29 = vpop.f32.mrf.mxu1 }
 0x2e1   : > { %v1971_v18 = vadd.f32 %v1935_v45, %v1777_v39  ;;  %v1583_v13 = vadd.f32 %v1549_v29, %v3590_v44 }
 0x2e3   : > { %v2165_v10 = vadd.f32 %v2129_v11, %v1971_v18 }
 0x2e5   : > { %2197 = vst [vmem:[%s3598_s20 + $0xf0] sm:$0xff] %v2165_v10  ;;  %v2228_v0 = vadd.f32 %v2227_v60, %v2165_v10  ;;  %v2266_v24 = vmul.f32 %v2165_v10, %v2165_v10 }
 0x2e6   : > { %v1744_v16 = vpop.f32.mrf.mxu2  ;;  %v2132_v27 = vpop.f32.mrf.mxu0 }
 0x2e7   : > { %v2297_v36 = vadd.f32 %v2296_v50, %v2266_v24  ;;  %v1778_v54 = vadd.f32 %v1744_v16, %v1583_v13 }
 0x2e8   : > { %v1938_v2 = vpop.f32.mrf.mxu3 }
 0x2e9   : > { %v1972_v55 = vadd.f32 %v1938_v2, %v1778_v54 }
 0x2eb   : > { %v2166_v22 = vadd.f32 %v2132_v27, %v1972_v55 }
 0x2ed   : > { %2198 = vst [vmem:[%s3598_s20 + $0xf8] sm:$0xff] %v2166_v22  ;;  %v2229_v7 = vadd.f32 %v2228_v0, %v2166_v22  ;;  %v2267_v32 = vmul.f32 %v2166_v22, %v2166_v22 }
 0x2ef   : > { %v2230_v28 = vrot.slane %v2229_v7, 4  ;;  %v2298_v33 = vadd.f32 %v2297_v36, %v2267_v32 }
 0x2f1   : > { %v2231_v14 = vadd.f32 %v2230_v28, %v2229_v7  ;;  %v2299_v48 = vrot.slane %v2298_v33, 4 }
 0x2f3   : > { %v2232_v35 = vrot.slane %v2231_v14, 2  ;;  %v2300_v44 = vadd.f32 %v2299_v48, %v2298_v33 }
 0x2f5   : > { %v2233_v59 = vadd.f32 %v2232_v35, %v2231_v14  ;;  %v2301_v46 = vrot.slane %v2300_v44, 2 }
 0x2f7   : > { %v2234_v17 = vrot.slane %v2233_v59, 1  ;;  %v2302_v53 = vadd.f32 %v2301_v46, %v2300_v44 }
 0x2f9   : > { %v2235_v26 = vadd.f32 %v2234_v17, %v2233_v59  ;;  %v2303_v40 = vrot.slane %v2302_v53, 1 }
 0x2fb   : > { %v2304_v25 = vadd.f32 %v2303_v40, %v2302_v53  ;;  %2305 = vst [vmem:[%s268_s25] sm:$0xff] %v2235_v26 }
 0x2fd   : > { %2306 = vst [vmem:[%s272_s28] sm:$0xff] %v2304_v25 }
 0x2fe PF: > { %s17_s21 = sadd.s32 1, %s2635_s21  }
 0x2ff   : > { %p14_p4 = scmp.ge.s32.totalorder %s17_s21, 4  }
 0x301   :  { %16 = sbr.rel (!%p14_p4) target bundleno = 1 (0x1), region = 101 }

// kernel: bottleneck_forward.9
= control target key start
LH: loop header
LB: loop body
LE: loop exit
PB: predicated region body
PF: predicated region fallthrough
CT: control target
= control target key end

     0   :  { %s2686_s21 = smov 0   ;;  %s3930_s0 = inlined_call_operand.vmem [shape: f32[2,16,16,128], index: 0, kind: input, shape index: {}]   ;;  %s3931_s1 = inlined_call_operand.vmem [shape: f32[1,128], index: 1, kind: input, shape index: {}]   ;;  %s3932_s2 = inlined_call_operand.vmem [shape: f32[1,128], index: 2, kind: input, shape index: {}]   ;;  %s3933_s3 = inlined_call_operand.vmem [shape: f32[9,128,128], index: 3, kind: input, shape index: {}]   ;;  %s3934_s4 = inlined_call_operand.vmem [shape: f32[2,256,128], index: 4, kind: output, shape index: {0}]   ;;  %s3935_s5 = inlined_call_operand.vmem [shape: f32[16,128], index: 5, kind: output, shape index: {1}]   ;;  %s3936_s6 = inlined_call_operand.vmem [shape: f32[16,128], index: 6, kind: output, shape index: {2}]  }
   0x1 LB: > { %s2434_s22 = sadd.s32 4294967295, %s2648_s21   ;;  %p2438_p0 = scmp.ge.s32.totalorder %s2648_s21, 1  ;;  %s2648_s21 = sphi %s2686_s21, %s17_s21  }
   0x2   : > { %p217_p1 = scmp.lt.s32.totalorder %s2648_s21, 3 }
   0x4   : > { %p218_p2 = pnand %p2438_p0, %p217_p1 }
   0x6   : > { %221 = sbr.rel (%p218_p2) target bundleno = 766 (0x2fe), region = 36 }
   0xb   : > { %v2460_v0 = vld [vmem:[%s3933_s3 + $0xf8] sm:$0xff]  ;;  %v2459_v1 = vld [vmem:[%s3933_s3 + $0xf0] sm:$0xff]  ;;  %p255_p3 = scmp.lt.s32.totalorder %s2434_s22, 1  ;;  %v2458_v2 = vld [vmem:[%s3933_s3 + $0xe8] sm:$0xff]  ;;  %v2650_v3 = vmov 0.0  }
   0xc   : > { %2577 = vmatpush.msra.mxu1 %v2460_v0  ;;  %2578 = vmatpush.msra.mxu2 %v2460_v0  ;;  %273 = vst [vmem:[#allocation2] sm:$0xff] %v2650_v3  ;;  %v2457_v4 = vld [vmem:[%s3933_s3 + $0xe0] sm:$0xff]  ;;  %v2456_v5 = vld [vmem:[%s3933_s3 + $0xd8] sm:$0xff]  ;;  %v2455_v12 = vld [vmem:[%s3933_s3 + $0xd0] sm:$0xff] }
   0xd   : > { %2579 = vmatpush.msra.mxu3 %v2460_v0  ;;  %592 = vmatpush.msra.mxu0 %v2460_v0  ;;  %s4017_s22 = smov (!%p255_p3, %s2434_s22), 1  ;;  %274 = vst [vmem:[#allocation2 + $0x8] sm:$0xff] %v2650_v3  ;;  %v2725_v6 = vld [vmem:[%s3931_s1] ss:$0 sm:$0xff]  ;;  %v2454_v18 = vld [vmem:[%s3933_s3 + $0xc8] sm:$0xff]  ;;  %v2452_v29 = vld [vmem:[%s3933_s3 + $0xb8] sm:$0xff] }
   0xe   : > { %2580 = vmatpush.msra.mxu1 %v2459_v1  ;;  %2581 = vmatpush.msra.mxu2 %v2459_v1  ;;  %s2575_s7 = sshll.u32 %s4017_s22, 8  ;;  %275 = vst [vmem:[#allocation2 + $0x10] sm:$0xf] %v2650_v3  ;;  %v2732_v8 = vld [vmem:[%s3932_s2] ss:$0 sm:$0xff]  ;;  %v2451_v32 = vld [vmem:[%s3933_s3 + $0xb0] sm:$0xff] }
   0xf   : > { %2582 = vmatpush.msra.mxu3 %v2459_v1  ;;  %593 = vmatpush.msra.mxu0 %v2459_v1  ;;  %s2720_s12 = scalar_lea.vmem %s3930_s0, %s2575_s7  ;;  %276 = vst [vmem:[#allocation2 + $0x18] sm:$0xff] %v2650_v3  ;;  %v2453_v24 = vld [vmem:[%s3933_s3 + $0xc0] sm:$0xff]  ;;  %v2450_v33 = vld [vmem:[%s3933_s3 + $0xa8] sm:$0xff]  ;;  %v2448_v35 = vld [vmem:[%s3933_s3 + $0x98] sm:$0xff]  ;;  %s3807_s20 = scalar_lea.vmem %s3934_s4, %s2575_s7 }
  0x10   : > { %2583 = vmatpush.msra.mxu1 %v2458_v2  ;;  %2584 = vmatpush.msra.mxu2 %v2458_v2  ;;  %v330_v7 = vld [vmem:[%s2720_s12 + $0x20] sm:$0xff]  ;;  %277 = vst [vmem:[#allocation2 + $0x20] sm:$0xff] %v2650_v3  ;;  %v331_v16 = vld [vmem:[%s2720_s12 + $0x28] sm:$0xff]  ;;  %v2447_v36 = vld [vmem:[%s3933_s3 + $0x90] sm:$0xff]  ;;  %s2443_s7 = sshll.u32 %s4017_s22, 3 }
  0x11   : > { %2585 = vmatpush.msra.mxu3 %v2458_v2  ;;  %594 = vmatpush.msra.mxu0 %v2458_v2  ;;  %v366_v9 = vmul.f32 %v2725_v6, %v330_v7  ;;  %v338_v10 = vld [vmem:[%s2720_s12 + $0x60] sm:$0xff]  ;;  %278 = vst [vmem:[#allocation2 + $0x28] sm:$0xf] %v2650_v3  ;;  %v339_v17 = vld [vmem:[%s2720_s12 + $0x68] sm:$0xff]  ;;  %v367_v21 = vmul.f32 %v2725_v6, %v331_v16  ;;  %v2476_v40 = vld [vmem:[%s3933_s3 + $0x178] sm:$0xff]  ;;  %s268_s25 = scalar_lea.vmem %s3935_s5, %s2443_s7  ;;  %s272_s28 = scalar_lea.vmem %s3936_s6, %s2443_s7 }
  0x12   : > { %2586 = vmatpush.msra.mxu1 %v2457_v4  ;;  %2587 = vmatpush.msra.mxu2 %v2457_v4  ;;  %v346_v11 = vld [vmem:[%s2720_s12 + $0xa0] sm:$0xff]  ;;  %v374_v13 = vmul.f32 %v2725_v6, %v338_v10  ;;  %280 = vst [vmem:[#allocation2 + $0x1b0] sm:$0xff] %v2650_v3  ;;  %v375_v23 = vmul.f32 %v2725_v6, %v339_v17  ;;  %v2446_v37 = vld [vmem:[%s3933_s3 + $0x88] sm:$0xff]  ;;  %v542_v42 = vld [vmem:[%s3933_s3 + $0x78] sm:$0xff] }
  0x13   : > { %2588 = vmatpush.msra.mxu3 %v2457_v4  ;;  %595 = vmatpush.msra.mxu0 %v2457_v4  ;;  %v382_v14 = vmul.f32 %v2725_v6, %v346_v11  ;;  %v402_v15 = vadd.f32 %v2732_v8, %v366_v9  ;;  %281 = vst [vmem:[#allocation2 + $0x1b8] sm:$0xff] %v2650_v3  ;;  %v2449_v34 = vld [vmem:[%s3933_s3 + $0xa0] sm:$0xff]  ;;  %v347_v38 = vld [vmem:[%s2720_s12 + $0xa8] sm:$0xff]  ;;  %v2492_v43 = vld [vmem:[%s3933_s3 + $0x1f8] sm:$0xff] }
  0x14   : > { %2589 = vmatpush.msra.mxu1 %v2456_v5  ;;  %2590 = vmatpush.msra.mxu2 %v2456_v5  ;;  %v2753_v19 = vadd.f32 %v2732_v8, %v374_v13  ;;  %282 = vst [vmem:[#allocation2 + $0x1c0] sm:$0xf] %v2650_v3  ;;  %v403_v26 = vadd.f32 %v2732_v8, %v367_v21  ;;  %v2445_v39 = vld [vmem:[%s3933_s3 + $0x80] sm:$0xff]  ;;  %v2475_v44 = vld [vmem:[%s3933_s3 + $0x170] sm:$0xff]  ;;  %v2474_v49 = vld [vmem:[%s3933_s3 + $0x168] sm:$0xff] }
  0x15   : > { %2591 = vmatpush.msra.mxu3 %v2456_v5  ;;  %596 = vmatpush.msra.mxu0 %v2456_v5  ;;  %v2756_v20 = vadd.f32 %v2732_v8, %v382_v14  ;;  %v2760_v22 = vmax.f32 %v402_v15, 0.0  ;;  %283 = vst [vmem:[#allocation2 + $0x1c8] sm:$0xff] %v2650_v3  ;;  %v2773_v28 = vadd.f32 %v2732_v8, %v375_v23  ;;  %v541_v45 = vld [vmem:[%s3933_s3 + $0x70] sm:$0xff]  ;;  %v543_v51 = vld [vmem:[#allocation2 + $0x2] sm:$0xff]  ;;  %v2508_v55 = vld [vmem:[%s3933_s3 + $0x278] sm:$0xff] }
  0x16   : > { %2592 = vmatpush.msra.mxu1 %v2455_v12  ;;  %2593 = vmatpush.msra.mxu2 %v2455_v12  ;;  %v442_v25 = vmax.f32 %v2753_v19, 0.0  ;;  %284 = vst [vmem:[#allocation2 + $0x1d0] sm:$0xff] %v2650_v3  ;;  %v2780_v30 = vmax.f32 %v403_v26, 0.0  ;;  %v383_v41 = vmul.f32 %v2725_v6, %v347_v38  ;;  %v332_v46 = vld [vmem:[%s2720_s12 + $0x30] sm:$0xff]  ;;  %v540_v52 = vld [vmem:[%s3933_s3 + $0x68] sm:$0xff]  ;;  %v2473_v59 = vld [vmem:[%s3933_s3 + $0x160] sm:$0xff] }
  0x17   : > { %2594 = vmatpush.msra.mxu3 %v2455_v12  ;;  %597 = vmatpush.msra.mxu0 %v2455_v12  ;;  %467 = vst [vmem:[#allocation2 + $0x62] sm:$0xff] %v2760_v22  ;;  %v450_v27 = vmax.f32 %v2756_v20, 0.0  ;;  %v443_v31 = vmax.f32 %v2773_v28, 0.0  ;;  %v340_v47 = vld [vmem:[%s2720_s12 + $0x70] sm:$0xff]  ;;  %v2490_v54 = vld [vmem:[%s3933_s3 + $0x1e8] sm:$0xff]  ;;  %v368_v56 = vmul.f32 %v2725_v6, %v332_v46  ;;  %v2489_v60 = vld [vmem:[%s3933_s3 + $0x1e0] sm:$0xff] }
  0x18   : > { %2595 = vmatpush.msra.mxu1 %v2454_v18  ;;  %2596 = vmatpush.msra.mxu2 %v2454_v18  ;;  %475 = vst [vmem:[#allocation2 + $0xc2] sm:$0xff] %v442_v25  ;;  %v2491_v48 = vld [vmem:[%s3933_s3 + $0x1f0] sm:$0xff]  ;;  %v2857_v50 = vadd.f32 %v2732_v8, %v383_v41  ;;  %v376_v57 = vmul.f32 %v2725_v6, %v340_v47  ;;  %v539_v1 = vld [vmem:[%s3933_s3 + $0x60] sm:$0xff]  ;;  %v2472_v2 = vld [vmem:[%s3933_s3 + $0x158] sm:$0xff] }
  0x19   : > { %2597 = vmatpush.msra.mxu3 %v2454_v18  ;;  %598 = vmatpush.msra.mxu0 %v2454_v18  ;;  %483 = vst [vmem:[#allocation2 + $0x122] sm:$0xff] %v450_v27  ;;  %v348_v53 = vld [vmem:[%s2720_s12 + $0xb0] sm:$0xff]  ;;  %v404_v63 = vadd.f32 %v2732_v8, %v368_v56  ;;  %v333_v4 = vld [vmem:[%s2720_s12 + $0x38] sm:$0xff]  ;;  %v2506_v7 = vld [vmem:[%s3933_s3 + $0x268] sm:$0xff] }
  0x1a   : > { %2598 = vmatpush.msra.mxu1 %v2453_v24  ;;  %2599 = vmatpush.msra.mxu2 %v2453_v24  ;;  %468 = vst [vmem:[#allocation2 + $0x6a] sm:$0xff] %v2780_v30  ;;  %v451_v58 = vmax.f32 %v2857_v50, 0.0  ;;  %v384_v61 = vmul.f32 %v2725_v6, %v348_v53  ;;  %v2507_v62 = vld [vmem:[%s3933_s3 + $0x270] sm:$0xff]  ;;  %v412_v0 = vadd.f32 %v2732_v8, %v376_v57  ;;  %v2488_v5 = vld [vmem:[%s3933_s3 + $0x1d8] sm:$0xff]  ;;  %v2505_v18 = vld [vmem:[%s3933_s3 + $0x260] sm:$0xff] }
  0x1b   : > { %2600 = vmatpush.msra.mxu3 %v2453_v24  ;;  %599 = vmatpush.msra.mxu0 %v2453_v24  ;;  %476 = vst [vmem:[#allocation2 + $0xca] sm:$0xff] %v443_v31  ;;  %v341_v9 = vld [vmem:[%s2720_s12 + $0x78] sm:$0xff]  ;;  %v2471_v12 = vld [vmem:[%s3933_s3 + $0x150] sm:$0xff]  ;;  %v2926_v16 = vmax.f32 %v404_v63, 0.0  ;;  %v369_v19 = vmul.f32 %v2725_v6, %v333_v4  ;;  %v2470_v24 = vld [vmem:[%s3933_s3 + $0x148] sm:$0xff] }
  0x1c   : > { %2601 = vmatpush.msra.mxu1 %v2452_v29  ;;  %2602 = vmatpush.msra.mxu2 %v2452_v29  ;;  %285 = vst [vmem:[#allocation2 + $0x1d8] sm:$0xf] %v2650_v3  ;;  %v2912_v10 = vadd.f32 %v2732_v8, %v384_v61  ;;  %v538_v11 = vld [vmem:[%s3933_s3 + $0x58] sm:$0xff]  ;;  %v544_v13 = vld [vmem:[#allocation2 + $0xa] sm:$0xff]  ;;  %v2928_v17 = vmax.f32 %v412_v0, 0.0  ;;  %v377_v20 = vmul.f32 %v2725_v6, %v341_v9  ;;  %v535_v38 = vld [vmem:[%s3933_s3 + $0x40] sm:$0xff] }
  0x1d   : > { %2603 = vmatpush.msra.mxu3 %v2452_v29  ;;  %600 = vmatpush.msra.mxu0 %v2452_v29  ;;  %286 = vst [vmem:[#allocation2] sm:$0x3] %v2650_v3  ;;  %v2487_v14 = vld [vmem:[%s3933_s3 + $0x1d0] sm:$0xff]  ;;  %v349_v15 = vld [vmem:[%s2720_s12 + $0xb8] sm:$0xff]  ;;  %v2486_v26 = vld [vmem:[%s3933_s3 + $0x1c8] sm:$0xff]  ;;  %v405_v28 = vadd.f32 %v2732_v8, %v369_v19 }
  0x1e   : > { %2604 = vmatpush.msra.mxu1 %v2451_v32  ;;  %2605 = vmatpush.msra.mxu2 %v2451_v32  ;;  %288 = vst [vmem:[#allocation2 + $0x30] sm:$0x3] %v2650_v3  ;;  %v537_v21 = vld [vmem:[%s3933_s3 + $0x50] sm:$0xff]  ;;  %v452_v23 = vmax.f32 %v2912_v10, 0.0  ;;  %v413_v29 = vadd.f32 %v2732_v8, %v377_v20  ;;  %v350_v41 = vld [vmem:[%s2720_s12 + $0xc0] sm:$0xff]  ;;  %v2502_v47 = vld [vmem:[%s3933_s3 + $0x248] sm:$0xff] }
  0x1f   : > { %2606 = vmatpush.msra.mxu3 %v2451_v32  ;;  %601 = vmatpush.msra.mxu0 %v2451_v32  ;;  %289 = vst [vmem:[#allocation2 + $0x48] sm:$0x3] %v2650_v3  ;;  %v2469_v32 = vld [vmem:[%s3933_s3 + $0x140] sm:$0xff]  ;;  %v386_v50 = vmul.f32 %v2725_v6, %v350_v41  ;;  %v335_v57 = vld [vmem:[%s2720_s12 + $0x48] sm:$0xff]  ;;  %v344_v19 = vld [vmem:[%s2720_s12 + $0x90] sm:$0xff] }
  0x20   : > { %2607 = vmatpush.msra.mxu1 %v2450_v33  ;;  %2608 = vmatpush.msra.mxu2 %v2450_v33  ;;  %290 = vst [vmem:[#allocation2 + $0x60] sm:$0x3] %v2650_v3  ;;  %v2501_v53 = vld [vmem:[%s3933_s3 + $0x240] sm:$0xff]  ;;  %v2482_v61 = vld [vmem:[%s3933_s3 + $0x1a8] sm:$0xff] }
  0x21   : > { %2609 = vmatpush.msra.mxu3 %v2450_v33  ;;  %602 = vmatpush.msra.mxu0 %v2450_v33  ;;  %291 = vst [vmem:[#allocation2 + $0x78] sm:$0x3] %v2650_v3  ;;  %v334_v33 = vld [vmem:[%s2720_s12 + $0x40] sm:$0xff]  ;;  %v3042_v63 = vadd.f32 %v2732_v8, %v386_v50 }
  0x22   : > { %2610 = vmatpush.msra.mxu1 %v2449_v34  ;;  %2611 = vmatpush.msra.mxu2 %v2449_v34  ;;  %292 = vst [vmem:[#allocation2 + $0x90] sm:$0x3] %v2650_v3  ;;  %v546_v4 = vld [vmem:[#allocation2 + $0x22] sm:$0xff] }
  0x23   : > { %2612 = vmatpush.msra.mxu3 %v2449_v34  ;;  %603 = vmatpush.msra.mxu0 %v2449_v34  ;;  %293 = vst [vmem:[#allocation2 + $0xa8] sm:$0x3] %v2650_v3  ;;  %v2485_v34 = vld [vmem:[%s3933_s3 + $0x1c0] sm:$0xff]  ;;  %v454_v20 = vmax.f32 %v3042_v63, 0.0 }
  0x24   : > { %2613 = vmatpush.msra.mxu1 %v2448_v35  ;;  %2614 = vmatpush.msra.mxu2 %v2448_v35  ;;  %294 = vst [vmem:[#allocation2 + $0xc0] sm:$0x3] %v2650_v3  ;;  %v2481_v9 = vld [vmem:[%s3933_s3 + $0x1a0] sm:$0xff] }
  0x25   : > { %2615 = vmatpush.msra.mxu3 %v2448_v35  ;;  %604 = vmatpush.msra.mxu0 %v2448_v35  ;;  %295 = vst [vmem:[#allocation2 + $0xd8] sm:$0x3] %v2650_v3  ;;  %v2503_v35 = vld [vmem:[%s3933_s3 + $0x250] sm:$0xff] }
  0x26   : > { %2616 = vmatpush.msra.mxu1 %v2447_v36  ;;  %2617 = vmatpush.msra.mxu2 %v2447_v36  ;;  %296 = vst [vmem:[#allocation2 + $0xf0] sm:$0x3] %v2650_v3 }
  0x27   : > { %2618 = vmatpush.msra.mxu3 %v2447_v36  ;;  %605 = vmatpush.msra.mxu0 %v2447_v36  ;;  %297 = vst [vmem:[#allocation2 + $0x108] sm:$0x3] %v2650_v3  ;;  %v342_v36 = vld [vmem:[%s2720_s12 + $0x80] sm:$0xff] }
  0x28   : > { %2619 = vmatpush.msra.mxu1 %v2446_v37  ;;  %2620 = vmatpush.msra.mxu2 %v2446_v37  ;;  %298 = vst [vmem:[#allocation2 + $0x120] sm:$0x3] %v2650_v3  ;;  %v378_v46 = vmul.f32 %v2725_v6, %v342_v36 }
  0x29   : > { %2621 = vmatpush.msra.mxu3 %v2446_v37  ;;  %606 = vmatpush.msra.mxu0 %v2446_v37  ;;  %299 = vst [vmem:[#allocation2 + $0x138] sm:$0x3] %v2650_v3 }
  0x2a   : > { %2622 = vmatpush.msra.mxu1 %v2445_v39  ;;  %2623 = vmatpush.msra.mxu2 %v2445_v39  ;;  %300 = vst [vmem:[#allocation2 + $0x150] sm:$0x3] %v2650_v3  ;;  %v414_v56 = vadd.f32 %v2732_v8, %v378_v46  ;;  %v2462_v46 = vld [vmem:[%s3933_s3 + $0x108] sm:$0xff] }
  0x2b   : > { %632 = vmatmul.f32.vlgmr.msra.gmra.mxu1 %v2760_v22  ;;  %656 = vmatmul.f32.vlgmr.msra.gmra.mxu2 %v442_v25  ;;  %301 = vst [vmem:[#allocation2 + $0x168] sm:$0x3] %v2650_v3  ;;  %v385_v25 = vmul.f32 %v2725_v6, %v349_v15  ;;  %v336_v15 = vld [vmem:[%s2720_s12 + $0x50] sm:$0xff] }
  0x2c   : > { %867 = vmatpush.msrb.mxu2 %v2476_v40  ;;  %2624 = vmatpush.msra.mxu3 %v2445_v39  ;;  %302 = vst [vmem:[#allocation2 + $0x180] sm:$0x3] %v2650_v3  ;;  %v545_v40 = vld [vmem:[#allocation2 + $0x1a] sm:$0xff] }
  0x2d   : > { %680 = vmatmul.f32.vlgmr.msra.gmra.mxu3 %v450_v27  ;;  %705 = vmatpush.msrb.mxu1 %v542_v42  ;;  %303 = vst [vmem:[#allocation2 + $0x198] sm:$0x3] %v2650_v3  ;;  %v2504_v27 = vld [vmem:[%s3933_s3 + $0x258] sm:$0xff]  ;;  %v2976_v37 = vadd.f32 %v2732_v8, %v385_v25 }
  0x2e   : > { %1061 = vmatpush.msrb.mxu3 %v2492_v43  ;;  %868 = vmatpush.msrb.mxu2 %v2475_v44  ;;  %308 = vst [vmem:[#allocation2 + $0x42] sm:$0x3] %v2650_v3  ;;  %v2484_v42 = vld [vmem:[%s3933_s3 + $0x1b8] sm:$0xff]  ;;  %v2991_v43 = vmax.f32 %v405_v28, 0.0  ;;  %v2993_v44 = vmax.f32 %v413_v29, 0.0  ;;  %v352_v28 = vld [vmem:[%s2720_s12 + $0xd0] sm:$0xff] }
  0x2f   : > { %706 = vmatpush.msrb.mxu1 %v541_v45  ;;  %607 = vmatpush.msra.mxu0 %v2445_v39  ;;  %309 = vst [vmem:[#allocation2 + $0x5a] sm:$0x3] %v2650_v3  ;;  %v2468_v39 = vld [vmem:[%s3933_s3 + $0x138] sm:$0xff]  ;;  %v370_v45 = vmul.f32 %v2725_v6, %v334_v33  ;;  %v2498_v29 = vld [vmem:[%s3933_s3 + $0x228] sm:$0xff] }
  0x30   : > { %1062 = vmatpush.msrb.mxu3 %v2491_v48  ;;  %869 = vmatpush.msrb.mxu2 %v2474_v49  ;;  %310 = vst [vmem:[#allocation2 + $0x72] sm:$0x3] %v2650_v3  ;;  %v534_v48 = vld [vmem:[%s3933_s3 + $0x38] sm:$0xff]  ;;  %v453_v49 = vmax.f32 %v2976_v37, 0.0 }
  0x31   : > { %608 = vmatmul.f32.vlgmr.msra.gmra.mxu0 %v543_v51  ;;  %707 = vmatpush.msrb.mxu1 %v540_v52  ;;  %311 = vst [vmem:[#allocation2 + $0x8a] sm:$0x3] %v2650_v3  ;;  %v2467_v51 = vld [vmem:[%s3933_s3 + $0x130] sm:$0xff]  ;;  %v2464_v25 = vld [vmem:[%s3933_s3 + $0x118] sm:$0xff] }
  0x32   : > { %1063 = vmatpush.msrb.mxu3 %v2490_v54  ;;  %1255 = vmatpush.msrb.mxu0 %v2508_v55  ;;  %312 = vst [vmem:[#allocation2 + $0xa2] sm:$0x3] %v2650_v3  ;;  %v2483_v52 = vld [vmem:[%s3933_s3 + $0x1b0] sm:$0xff]  ;;  %v326_v54 = vld [vmem:[%s2720_s12] sm:$0xff]  ;;  %v406_v55 = vadd.f32 %v2732_v8, %v370_v45  ;;  %v530_v33 = vld [vmem:[%s3933_s3 + $0x18] sm:$0xff] }
  0x33   : > { %635 = vmatmul.f32.gmra.mxu1 %v2780_v30  ;;  %659 = vmatmul.f32.gmra.mxu2 %v443_v31  ;;  %313 = vst [vmem:[#allocation2 + $0xba] sm:$0x3] %v2650_v3  ;;  %v536_v31 = vld [vmem:[%s3933_s3 + $0x48] sm:$0xff]  ;;  %v362_v0 = vmul.f32 %v2725_v6, %v326_v54  ;;  %v529_v45 = vld [vmem:[%s3933_s3 + $0x10] sm:$0xff] }
  0x34   : > { %870 = vmatpush.msrb.mxu2 %v2473_v59  ;;  %1064 = vmatpush.msrb.mxu3 %v2489_v60  ;;  %314 = vst [vmem:[#allocation2 + $0xd2] sm:$0x3] %v2650_v3  ;;  %v2466_v59 = vld [vmem:[%s3933_s3 + $0x128] sm:$0xff] }
  0x35   : > { %683 = vmatmul.f32.gmra.mxu3 %v451_v58  ;;  %1256 = vmatpush.msrb.mxu0 %v2507_v62  ;;  %315 = vst [vmem:[#allocation2 + $0xea] sm:$0x3] %v2650_v3  ;;  %v343_v60 = vld [vmem:[%s2720_s12 + $0x88] sm:$0xff]  ;;  %v2500_v62 = vld [vmem:[%s3933_s3 + $0x238] sm:$0xff] }
  0x36   : > { %708 = vmatpush.msrb.mxu1 %v539_v1  ;;  %871 = vmatpush.msrb.mxu2 %v2472_v2  ;;  %316 = vst [vmem:[#allocation2 + $0x102] sm:$0x3] %v2650_v3  ;;  %v532_v1 = vld [vmem:[%s3933_s3 + $0x28] sm:$0xff]  ;;  %v2465_v2 = vld [vmem:[%s3933_s3 + $0x120] sm:$0xff] }
  0x37   : > { %1065 = vmatpush.msrb.mxu3 %v2488_v5  ;;  %1257 = vmatpush.msrb.mxu0 %v2506_v7  ;;  %317 = vst [vmem:[#allocation2 + $0x11a] sm:$0x3] %v2650_v3  ;;  %v371_v5 = vmul.f32 %v2725_v6, %v335_v57  ;;  %v351_v7 = vld [vmem:[%s2720_s12 + $0xc8] sm:$0xff] }
  0x38   : > { %709 = vmatpush.msrb.mxu1 %v538_v11  ;;  %872 = vmatpush.msrb.mxu2 %v2471_v12  ;;  %318 = vst [vmem:[#allocation2 + $0x132] sm:$0x3] %v2650_v3  ;;  %v3058_v11 = vmax.f32 %v406_v55, 0.0  ;;  %v3060_v12 = vmax.f32 %v414_v56, 0.0  ;;  %v2496_v56 = vld [vmem:[%s3933_s3 + $0x218] sm:$0xff]  ;;  %v528_v57 = vld [vmem:[%s3933_s3 + $0x8] sm:$0xff] }
  0x39   : > { %611 = vmatmul.f32.gmra.mxu0 %v544_v13  ;;  %1066 = vmatpush.msrb.mxu3 %v2487_v14  ;;  %319 = vst [vmem:[#allocation2 + $0x14a] sm:$0x3] %v2650_v3  ;;  %v379_v13 = vmul.f32 %v2725_v6, %v343_v60  ;;  %v2499_v14 = vld [vmem:[%s3933_s3 + $0x230] sm:$0xff]  ;;  %v407_v10 = vadd.f32 %v2732_v8, %v371_v5 }
  0x3a   : > { %1258 = vmatpush.msrb.mxu0 %v2505_v18  ;;  %710 = vmatpush.msrb.mxu1 %v537_v21  ;;  %320 = vst [vmem:[#allocation2 + $0x162] sm:$0x3] %v2650_v3  ;;  %v531_v18 = vld [vmem:[%s3933_s3 + $0x20] sm:$0xff]  ;;  %v398_v21 = vadd.f32 %v2732_v8, %v362_v0  ;;  %v2495_v5 = vld [vmem:[%s3933_s3 + $0x210] sm:$0xff] }
  0x3b   : > { %638 = vmatmul.f32.gmra.mxu1 %v2926_v16  ;;  %662 = vmatmul.f32.gmra.mxu2 %v2928_v17  ;;  %321 = vst [vmem:[#allocation2 + $0x17a] sm:$0x3] %v2650_v3  ;;  %v2461_v0 = vld [vmem:[%s3933_s3 + $0x100] sm:$0xff] }
  0x3c   : > { %873 = vmatpush.msrb.mxu2 %v2470_v24  ;;  %1067 = vmatpush.msrb.mxu3 %v2486_v26  ;;  %322 = vst [vmem:[#allocation2 + $0x192] sm:$0x3] %v2650_v3  ;;  %v387_v24 = vmul.f32 %v2725_v6, %v351_v7  ;;  %v327_v26 = vld [vmem:[%s2720_s12 + $0x8] sm:$0xff]  ;;  %v3114_v37 = vmax.f32 %v398_v21, 0.0 }
  0x3d   : > { %686 = vmatmul.f32.gmra.mxu3 %v452_v23  ;;  %1259 = vmatpush.msrb.mxu0 %v2504_v27  ;;  %323 = vst [vmem:[#allocation2 + $0x1aa] sm:$0x3] %v2650_v3  ;;  %v2480_v27 = vld [vmem:[%s3933_s3 + $0x198] sm:$0xff]  ;;  %v363_v36 = vmul.f32 %v2725_v6, %v327_v26 }
  0x3e   : > { %711 = vmatpush.msrb.mxu1 %v536_v31  ;;  %874 = vmatpush.msrb.mxu2 %v2469_v32  ;;  %484 = vst [vmem:[#allocation2 + $0x12a] sm:$0xff] %v451_v58  ;;  %v533_v58 = vld [vmem:[%s3933_s3 + $0x30] sm:$0xff]  ;;  %v415_v31 = vadd.f32 %v2732_v8, %v379_v13  ;;  %v380_v32 = vmul.f32 %v2725_v6, %v344_v19  ;;  %v2494_v19 = vld [vmem:[%s3933_s3 + $0x208] sm:$0xff] }
  0x3f   : > { %1068 = vmatpush.msrb.mxu3 %v2485_v34  ;;  %1260 = vmatpush.msrb.mxu0 %v2503_v35  ;;  %287 = vst [vmem:[#allocation2 + $0x18] sm:$0x3] %v2650_v3  ;;  %v2463_v34 = vld [vmem:[%s3933_s3 + $0x110] sm:$0xff]  ;;  %v337_v35 = vld [vmem:[%s2720_s12 + $0x58] sm:$0xff]  ;;  %v423_v41 = vadd.f32 %v2732_v8, %v387_v24 }
  0x40   : > { %712 = vmatpush.msrb.mxu1 %v535_v38  ;;  %875 = vmatpush.msrb.mxu2 %v2468_v39  ;;  %304 = vst [vmem:[#allocation2 + $0x1b0] sm:$0x3] %v2650_v3  ;;  %v2479_v38 = vld [vmem:[%s3933_s3 + $0x190] sm:$0xff]  ;;  %v2497_v39 = vld [vmem:[%s3933_s3 + $0x220] sm:$0xff]  ;;  %v373_v50 = vmul.f32 %v2725_v6, %v337_v35  ;;  %v416_v54 = vadd.f32 %v2732_v8, %v380_v32 }
  0x41   : > { %614 = vmatmul.f32.gmra.mxu0 %v545_v40  ;;  %1069 = vmatpush.msrb.mxu3 %v2484_v42  ;;  %305 = vst [vmem:[#allocation2 + $0x1c8] sm:$0x3] %v2650_v3  ;;  %v345_v40 = vld [vmem:[%s2720_s12 + $0x98] sm:$0xff]  ;;  %v388_v42 = vmul.f32 %v2725_v6, %v352_v28  ;;  %v2539_v32 = vld [vmem:[%s3933_s3 + $0x370] sm:$0xff] }
  0x42   : > { %1261 = vmatpush.msrb.mxu0 %v2502_v47  ;;  %713 = vmatpush.msrb.mxu1 %v534_v48  ;;  %306 = vst [vmem:[#allocation2 + $0x12] sm:$0x3] %v2650_v3  ;;  %v328_v47 = vld [vmem:[%s2720_s12 + $0x10] sm:$0xff]  ;;  %v3126_v48 = vmax.f32 %v407_v10, 0.0  ;;  %v381_v55 = vmul.f32 %v2725_v6, %v345_v40  ;;  %v2538_v40 = vld [vmem:[%s3933_s3 + $0x368] sm:$0xff] }
  0x43   : > { %641 = vmatmul.f32.gmra.mxu1 %v2991_v43  ;;  %665 = vmatmul.f32.gmra.mxu2 %v2993_v44  ;;  %307 = vst [vmem:[#allocation2 + $0x2a] sm:$0x3] %v2650_v3  ;;  %v364_v60 = vmul.f32 %v2725_v6, %v328_v47  ;;  %v2571_v35 = vld [vmem:[%s3933_s3 + $0x470] sm:$0xff]  ;;  %v2570_v47 = vld [vmem:[%s3933_s3 + $0x468] sm:$0xff] }
  0x44   : > { %876 = vmatpush.msrb.mxu2 %v2467_v51  ;;  %1070 = vmatpush.msrb.mxu3 %v2483_v52  ;;  %324 = vst [vmem:[#allocation2 + $0x1c2] sm:$0x3] %v2650_v3  ;;  %v353_v51 = vld [vmem:[%s2720_s12 + $0xd8] sm:$0xff]  ;;  %v2478_v52 = vld [vmem:[%s3933_s3 + $0x188] sm:$0xff]  ;;  %v417_v13 = vadd.f32 %v2732_v8, %v381_v55 }
  0x45   : > { %689 = vmatmul.f32.gmra.mxu3 %v453_v49  ;;  %1262 = vmatpush.msrb.mxu0 %v2501_v53  ;;  %325 = vst [vmem:[#allocation2 + $0x1da] sm:$0x3] %v2650_v3  ;;  %v3134_v53 = vmax.f32 %v415_v31, 0.0  ;;  %v389_v63 = vmul.f32 %v2725_v6, %v353_v51 }
  0x46   : > { %714 = vmatpush.msrb.mxu1 %v533_v58  ;;  %877 = vmatpush.msrb.mxu2 %v2466_v59  ;;  %469 = vst [vmem:[#allocation2 + $0x7a] sm:$0xff] %v2926_v16  ;;  %v329_v58 = vld [vmem:[%s2720_s12 + $0x18] sm:$0xff]  ;;  %v399_v59 = vadd.f32 %v2732_v8, %v363_v36  ;;  %v3196_v10 = vmax.f32 %v417_v13, 0.0  ;;  %v495_v36 = vld [vmem:[#allocation2] sm:$0xff] }
  0x47   : > { %1071 = vmatpush.msrb.mxu3 %v2482_v61  ;;  %1263 = vmatpush.msrb.mxu0 %v2500_v62  ;;  %477 = vst [vmem:[#allocation2 + $0xda] sm:$0xff] %v2928_v17  ;;  %v455_v61 = vmax.f32 %v423_v41, 0.0  ;;  %v424_v62 = vadd.f32 %v2732_v8, %v388_v42  ;;  %v365_v7 = vmul.f32 %v2725_v6, %v329_v58  ;;  %v2554_v41 = vld [vmem:[%s3933_s3 + $0x3e8] sm:$0xff] }
  0x48   : > { %715 = vmatpush.msrb.mxu1 %v532_v1  ;;  %878 = vmatpush.msrb.mxu2 %v2465_v2  ;;  %485 = vst [vmem:[#allocation2 + $0x13a] sm:$0xff] %v452_v23  ;;  %v372_v23 = vmul.f32 %v2725_v6, %v336_v15  ;;  %v2477_v1 = vld [vmem:[%s3933_s3 + $0x180] sm:$0xff]  ;;  %v2540_v15 = vld [vmem:[%s3933_s3 + $0x378] sm:$0xff]  ;;  %v3178_v6 = vmax.f32 %v399_v59, 0.0  ;;  %v425_v24 = vadd.f32 %v2732_v8, %v389_v63  ;;  %v2522_v42 = vld [vmem:[%s3933_s3 + $0x2e8] sm:$0xff] }
  0x49   : > { %617 = vmatmul.f32.gmra.mxu0 %v546_v4  ;;  %1072 = vmatpush.msrb.mxu3 %v2481_v9  ;;  %470 = vst [vmem:[#allocation2 + $0x82] sm:$0xff] %v2991_v43  ;;  %v409_v4 = vadd.f32 %v2732_v8, %v373_v50  ;;  %v3168_v9 = vmax.f32 %v416_v54, 0.0  ;;  %v456_v21 = vmax.f32 %v424_v62, 0.0  ;;  %v820_v50 = vld [vmem:[#allocation2 + $0x1c] sm:$0xff]  ;;  %v1017_v63 = vld [vmem:[#allocation2 + $0x68] sm:$0xff] }
  0x4a   : > { %1264 = vmatpush.msrb.mxu0 %v2499_v14  ;;  %716 = vmatpush.msrb.mxu1 %v531_v18  ;;  %478 = vst [vmem:[#allocation2 + $0xe2] sm:$0xff] %v2993_v44  ;;  %v527_v14 = vld [vmem:[%s3933_s3] sm:$0xff]  ;;  %v400_v18 = vadd.f32 %v2732_v8, %v364_v60  ;;  %v2536_v60 = vld [vmem:[%s3933_s3 + $0x358] sm:$0xff] }
  0x4b   : > { %644 = vmatmul.f32.gmra.mxu1 %v3058_v11  ;;  %668 = vmatmul.f32.gmra.mxu2 %v3060_v12  ;;  %486 = vst [vmem:[#allocation2 + $0x142] sm:$0xff] %v453_v49  ;;  %v408_v49 = vadd.f32 %v2732_v8, %v372_v23  ;;  %v3193_v26 = vmax.f32 %v409_v4, 0.0  ;;  %v2493_v23 = vld [vmem:[%s3933_s3 + $0x200] sm:$0xff] }
  0x4c   : > { %879 = vmatpush.msrb.mxu2 %v2464_v25  ;;  %1073 = vmatpush.msrb.mxu3 %v2480_v27  ;;  %471 = vst [vmem:[#allocation2 + $0x92] sm:$0xff] %v3058_v11  ;;  %v2524_v25 = vld [vmem:[%s3933_s3 + $0x2f8] sm:$0xff]  ;;  %v401_v27 = vadd.f32 %v2732_v8, %v365_v7  ;;  %v432_v28 = vmax.f32 %v400_v18, 0.0  ;;  %v2521_v54 = vld [vmem:[%s3933_s3 + $0x2e0] sm:$0xff]  ;;  %v2519_v7 = vld [vmem:[%s3933_s3 + $0x2d0] sm:$0xff] }
  0x4d   : > { %692 = vmatmul.f32.gmra.mxu3 %v454_v20  ;;  %1265 = vmatpush.msrb.mxu0 %v2498_v29  ;;  %479 = vst [vmem:[#allocation2 + $0xf2] sm:$0xff] %v3060_v12  ;;  %v3159_v2 = vmax.f32 %v408_v49, 0.0  ;;  %v3204_v29 = vmax.f32 %v425_v24, 0.0  ;;  %v2572_v8 = vld [vmem:[%s3933_s3 + $0x478] sm:$0xff]  ;;  %v821_v55 = vld [vmem:[#allocation2 + $0x24] sm:$0xff] }
  0x4e   : > { %717 = vmatpush.msrb.mxu1 %v530_v33  ;;  %880 = vmatpush.msrb.mxu2 %v2463_v34  ;;  %487 = vst [vmem:[#allocation2 + $0x152] sm:$0xff] %v454_v20  ;;  %v2556_v20 = vld [vmem:[%s3933_s3 + $0x3f8] sm:$0xff]  ;;  %v433_v31 = vmax.f32 %v401_v27, 0.0  ;;  %v2555_v33 = vld [vmem:[%s3933_s3 + $0x3f0] sm:$0xff]  ;;  %v1016_v59 = vld [vmem:[#allocation2 + $0x60] sm:$0xff] }
  0x4f   : > { %1074 = vmatpush.msrb.mxu3 %v2479_v38  ;;  %1266 = vmatpush.msrb.mxu0 %v2497_v39  ;;  %472 = vst [vmem:[#allocation2 + $0x9a] sm:$0xff] %v3126_v48  ;;  %v2523_v34 = vld [vmem:[%s3933_s3 + $0x2f0] sm:$0xff]  ;;  %v818_v38 = vld [vmem:[#allocation2 + $0x4] sm:$0xff]  ;;  %v497_v49 = vld [vmem:[#allocation2 + $0x18] sm:$0xff] }
  0x50   : > { %718 = vmatpush.msrb.mxu1 %v529_v45  ;;  %881 = vmatpush.msrb.mxu2 %v2462_v46  ;;  %480 = vst [vmem:[#allocation2 + $0xfa] sm:$0xff] %v3134_v53  ;;  %v819_v45 = vld [vmem:[#allocation2 + $0xc] sm:$0xff]  ;;  %v1018_v4 = vld [vmem:[#allocation2 + $0x78] sm:$0xff]  ;;  %v1019_v13 = vld [vmem:[#allocation2 + $0x80] sm:$0xff] }
  0x51   : > { %620 = vmatmul.f32.gmra.mxu0 %v3114_v37  ;;  %1075 = vmatpush.msrb.mxu3 %v2478_v52  ;;  %463 = vst [vmem:[#allocation2 + $0x32] sm:$0xff] %v3114_v37  ;;  %v2553_v52 = vld [vmem:[%s3933_s3 + $0x3e0] sm:$0xff]  ;;  %v3305_v27 = vld [vmem:[#allocation2 + $0x6c] sm:$0xff] }
  0x52   : > { %1267 = vmatpush.msrb.mxu0 %v2496_v56  ;;  %719 = vmatpush.msrb.mxu1 %v528_v57  ;;  %488 = vst [vmem:[#allocation2 + $0x15a] sm:$0xff] %v455_v61  ;;  %v2569_v57 = vld [vmem:[%s3933_s3 + $0x460] sm:$0xff] }
  0x53   : > { %647 = vmatmul.f32.gmra.mxu1 %v3126_v48  ;;  %671 = vmatmul.f32.gmra.mxu2 %v3134_v53  ;;  %473 = vst [vmem:[#allocation2 + $0xaa] sm:$0xff] %v3159_v2  ;;  %v1020_v18 = vld [vmem:[#allocation2 + $0x90] sm:$0xff] }
  0x54   : > { %882 = vmatpush.msrb.mxu2 %v2461_v0  ;;  %1076 = vmatpush.msrb.mxu3 %v2477_v1  ;;  %481 = vst [vmem:[#allocation2 + $0x10a] sm:$0xff] %v3168_v9  ;;  %v2568_v0 = vld [vmem:[%s3933_s3 + $0x458] sm:$0xff] }
  0x55   : > { %695 = vmatmul.f32.gmra.mxu3 %v455_v61  ;;  %1268 = vmatpush.msrb.mxu0 %v2495_v5  ;;  %464 = vst [vmem:[#allocation2 + $0x3a] sm:$0xff] %v3178_v6  ;;  %v2520_v61 = vld [vmem:[%s3933_s3 + $0x2d8] sm:$0xff]  ;;  %v2535_v5 = vld [vmem:[%s3933_s3 + $0x350] sm:$0xff] }
  0x56   : > { %720 = vmatpush.msrb.mxu1 %v527_v14  ;;  %1644 = vmatpush.msra.mxu2 %v2540_v15  ;;  %489 = vst [vmem:[#allocation2 + $0x16a] sm:$0xff] %v456_v21  ;;  %v2567_v14 = vld [vmem:[%s3933_s3 + $0x450] sm:$0xff] }
  0x57   : > { %1269 = vmatpush.msrb.mxu0 %v2494_v19  ;;  %1838 = vmatpush.msra.mxu3 %v2556_v20  ;;  %474 = vst [vmem:[#allocation2 + $0xb2] sm:$0xff] %v3193_v26  ;;  %v2550_v19 = vld [vmem:[%s3933_s3 + $0x3c8] sm:$0xff] }
  0x58   : > { %1449 = vmatpush.msra.mxu1 %v2524_v25  ;;  %482 = vst [vmem:[#allocation2 + $0x112] sm:$0xff] %v3196_v10  ;;  %1645 = vmatpush.msra.mxu2 %v2539_v32  ;;  %v1012_v39 = vld [vmem:[#allocation2 + $0x30] sm:$0xff] }
  0x59   : > { %623 = vmatmul.f32.gmra.mxu0 %v3178_v6  ;;  %465 = vst [vmem:[#allocation2 + $0x4a] sm:$0xff] %v432_v28  ;;  %1839 = vmatpush.msra.mxu3 %v2555_v33 }
  0x5a   : > { %1270 = vmatpush.msrb.mxu0 %v2493_v23  ;;  %490 = vst [vmem:[#allocation2 + $0x172] sm:$0xff] %v3204_v29  ;;  %1450 = vmatpush.msra.mxu1 %v2523_v34  ;;  %v1021_v23 = vld [vmem:[#allocation2 + $0x98] sm:$0xff] }
  0x5b   : > { %650 = vmatmul.f32.gmra.mxu1 %v3159_v2  ;;  %674 = vmatmul.f32.gmra.mxu2 %v3168_v9  ;;  %466 = vst [vmem:[#allocation2 + $0x52] sm:$0xff] %v433_v31  ;;  %v3320_v34 = vld [vmem:[#allocation2 + $0x7c] sm:$0xff] }
  0x5c   : > { %2032 = vmatpush.msra.mxu0 %v2572_v8  ;;  %1646 = vmatpush.msra.mxu2 %v2538_v40  ;;  %v1013_v46 = vld [vmem:[#allocation2 + $0x38] sm:$0xff] }
  0x5d   : > { %698 = vmatmul.f32.gmra.mxu3 %v456_v21  ;;  %1451 = vmatpush.msra.mxu1 %v2522_v42  ;;  %v822_v58 = vld [vmem:[#allocation2 + $0x34] sm:$0xff]  ;;  %v823_v62 = vld [vmem:[#allocation2 + $0x3c] sm:$0xff]  ;;  %v3341_v42 = vld [vmem:[#allocation2 + $0x84] sm:$0xff] }
  0x5e   : > { %2033 = vmatpush.msra.mxu0 %v2571_v35  ;;  %1840 = vmatpush.msra.mxu3 %v2554_v41  ;;  %v2533_v35 = vld [vmem:[%s3933_s3 + $0x340] sm:$0xff] }
  0x5f   : > { %1452 = vmatpush.msra.mxu1 %v2521_v54  ;;  %v2548_v54 = vld [vmem:[%s3933_s3 + $0x3b8] sm:$0xff] }
  0x60   : > { %2034 = vmatpush.msra.mxu0 %v2570_v47  ;;  %v1014_v51 = vld [vmem:[#allocation2 + $0x48] sm:$0xff]  ;;  %1841 = vmatpush.msra.mxu3 %v2553_v52  ;;  %v2532_v52 = vld [vmem:[%s3933_s3 + $0x338] sm:$0xff] }
  0x61   : > { %626 = vmatmul.f32.gmra.mxu0 %v432_v28  ;;  %1453 = vmatpush.msra.mxu1 %v2520_v61  ;;  %v2564_v61 = vld [vmem:[%s3933_s3 + $0x438] sm:$0xff] }
  0x62   : > { %v1015_v56 = vld [vmem:[#allocation2 + $0x50] sm:$0xff]  ;;  %2035 = vmatpush.msra.mxu0 %v2569_v57  ;;  %v1218_v57 = vld [vmem:[#allocation2 + $0xc2] sm:$0xff] }
  0x63   : > { %653 = vmatmul.f32.gmra.mxu1 %v3193_v26  ;;  %677 = vmatmul.f32.gmra.mxu2 %v3196_v10  ;;  %v824_v1 = vld [vmem:[#allocation2 + $0x4c] sm:$0xff] }
  0x64   : > { %2036 = vmatpush.msra.mxu0 %v2568_v0  ;;  %1454 = vmatpush.msra.mxu1 %v2519_v7  ;;  %v1219_v0 = vld [vmem:[#allocation2 + $0xca] sm:$0xff] }
  0x65   : > { %701 = vmatmul.f32.gmra.mxu3 %v3204_v29  ;;  %v2531_v7 = vld [vmem:[%s3933_s3 + $0x330] sm:$0xff] }
  0x66   : > { %2037 = vmatpush.msra.mxu0 %v2567_v14 }
  0x69   : > { %629 = vmatmul.f32.gmra.mxu0 %v433_v31 }
  0x6b   : > { %721 = vmatmul.f32.vlgmr.msrb.gmra.mxu1 %v495_v36  ;;  %883 = vmatmul.f32.vlgmr.msrb.gmra.mxu2 %v818_v38  ;;  %v2549_v36 = vld [vmem:[%s3933_s3 + $0x3c0] sm:$0xff] }
  0x6d   : > { %1077 = vmatmul.f32.vlgmr.msrb.gmra.mxu3 %v1012_v39 }
  0x71   : > { %1271 = vmatmul.f32.vlgmr.msrb.gmra.mxu0 %v3114_v37  ;;  %v2537_v37 = vld [vmem:[%s3933_s3 + $0x360] sm:$0xff] }
  0x72   : > { %1647 = vmatpush.msra.mxu2 %v2537_v37  ;;  %v3356_v37 = vld [vmem:[#allocation2 + $0x94] sm:$0xff] }
  0x73   : > { %724 = vmatmul.f32.gmra.mxu1 %v2650_v3  ;;  %886 = vmatmul.f32.gmra.mxu2 %v819_v45  ;;  %v1023_v45 = vld [vmem:[#allocation2 + $0xb0] sm:$0xff] }
  0x74   : > { %1648 = vmatpush.msra.mxu2 %v2536_v60  ;;  %v3377_v60 = vld [vmem:[#allocation2 + $0x9c] sm:$0xff] }
  0x75   : > { %1080 = vmatmul.f32.gmra.mxu3 %v1013_v46 }
  0x76   : > { %1649 = vmatpush.msra.mxu2 %v2535_v5  ;;  %v3391_v5 = vld [vmem:[#allocation2 + $0xac] sm:$0xff] }
  0x79   : > { %1274 = vmatmul.f32.gmra.mxu0 %v3178_v6  ;;  %v3284_v6 = vld [vmem:[#allocation2 + $0x64] sm:$0xff] }
  0x7b   : > { %727 = vmatmul.f32.gmra.mxu1 %v497_v49  ;;  %889 = vmatmul.f32.gmra.mxu2 %v820_v50 }
  0x7d   : > { %1083 = vmatmul.f32.gmra.mxu3 %v1014_v51 }
  0x81   : > { %1277 = vmatmul.f32.gmra.mxu0 %v432_v28  ;;  %v2566_v28 = vld [vmem:[%s3933_s3 + $0x448] sm:$0xff] }
  0x82   : > { %2038 = vmatpush.msra.mxu0 %v2566_v28  ;;  %v2563_v28 = vld [vmem:[%s3933_s3 + $0x430] sm:$0xff] }
  0x83   : > { %730 = vmatmul.f32.gmra.mxu1 %v2650_v3  ;;  %892 = vmatmul.f32.gmra.mxu2 %v821_v55  ;;  %v2552_v3 = vld [vmem:[%s3933_s3 + $0x3d8] sm:$0xff] }
  0x84   : > { %1842 = vmatpush.msra.mxu3 %v2552_v3  ;;  %v1025_v3 = vld [vmem:[#allocation2 + $0xc8] sm:$0xff] }
  0x85   : > { %1086 = vmatmul.f32.gmra.mxu3 %v1015_v56 }
  0x89   : > { %1280 = vmatmul.f32.gmra.mxu0 %v433_v31 }
  0x8b   : > { %733 = vmatmul.f32.gmra.mxu1 %v1012_v39  ;;  %895 = vmatmul.f32.gmra.mxu2 %v822_v58 }
  0x8d   : > { %1089 = vmatmul.f32.gmra.mxu3 %v1016_v59 }
  0x91   : > { %1283 = vmatmul.f32.gmra.mxu0 %v2760_v22  ;;  %v2551_v22 = vld [vmem:[%s3933_s3 + $0x3d0] sm:$0xff] }
  0x92   : > { %1843 = vmatpush.msra.mxu3 %v2551_v22  ;;  %v3393_v22 = vld [vmem:[#allocation2 + $0xd8] sm:$0xff] }
  0x93   : > { %736 = vmatmul.f32.gmra.mxu1 %v1013_v46  ;;  %898 = vmatmul.f32.gmra.mxu2 %v823_v62  ;;  %v2565_v46 = vld [vmem:[%s3933_s3 + $0x440] sm:$0xff] }
  0x94   : > { %1844 = vmatpush.msra.mxu3 %v2550_v19  ;;  %2039 = vmatpush.msra.mxu0 %v2565_v46  ;;  %v2530_v46 = vld [vmem:[%s3933_s3 + $0x328] sm:$0xff] }
  0x95   : > { %1092 = vmatmul.f32.gmra.mxu3 %v1017_v63 }
  0x96   : > { %1845 = vmatpush.msra.mxu3 %v2549_v36  ;;  %2040 = vmatpush.msra.mxu0 %v2564_v61 }
  0x98   : > { %1846 = vmatpush.msra.mxu3 %v2548_v54  ;;  %2041 = vmatpush.msra.mxu0 %v2563_v28  ;;  %v2546_v54 = vld [vmem:[%s3933_s3 + $0x3a8] sm:$0xff] }
  0x99   : > { %1286 = vmatmul.f32.gmra.mxu0 %v2780_v30  ;;  %v825_v30 = vld [vmem:[#allocation2 + $0x54] sm:$0xff] }
  0x9b   : > { %739 = vmatmul.f32.gmra.mxu1 %v1014_v51  ;;  %901 = vmatmul.f32.gmra.mxu2 %v824_v1 }
  0x9d   : > { %1095 = vmatmul.f32.gmra.mxu3 %v1018_v4 }
  0xa1   : > { %1289 = vmatmul.f32.gmra.mxu0 %v2926_v16  ;;  %v2534_v16 = vld [vmem:[%s3933_s3 + $0x348] sm:$0xff] }
  0xa2   : > { %1650 = vmatpush.msra.mxu2 %v2534_v16 }
  0xa3   : > { %742 = vmatmul.f32.gmra.mxu1 %v1015_v56  ;;  %904 = vmatmul.f32.gmra.mxu2 %v825_v30  ;;  %v2547_v30 = vld [vmem:[%s3933_s3 + $0x3b0] sm:$0xff] }
  0xa4   : > { %1651 = vmatpush.msra.mxu2 %v2533_v35  ;;  %1847 = vmatpush.msra.mxu3 %v2547_v30  ;;  %v3450_v30 = vld [vmem:[#allocation2 + $0xf8] sm:$0xff] }
  0xa5   : > { %1098 = vmatmul.f32.gmra.mxu3 %v1019_v13 }
  0xa6   : > { %1652 = vmatpush.msra.mxu2 %v2532_v52  ;;  %1848 = vmatpush.msra.mxu3 %v2546_v54 }
  0xa8   : > { %v3282_v15 = vpop.f32.mrf.mxu1  ;;  %1653 = vmatpush.msra.mxu2 %v2531_v7  ;;  %v3447_v7 = vld [vmem:[#allocation2 + $0xcc] sm:$0xff] }
  0xa9   : > { %1292 = vmatmul.f32.gmra.mxu0 %v2991_v43  ;;  %v2518_v43 = vld [vmem:[%s3933_s3 + $0x2c8] sm:$0xff] }
  0xaa   : > { %1455 = vmatpush.msra.mxu1 %v2518_v43  ;;  %v3414_v43 = vld [vmem:[#allocation2 + $0xb4] sm:$0xff]  ;;  %1654 = vmatpush.msra.mxu2 %v2530_v46 }
  0xab   : > { %745 = vmatmul.f32.gmra.mxu1 %v1016_v59  ;;  %907 = vmatmul.f32.gmra.mxu2 %v3284_v6 }
  0xad   : > { %1101 = vmatmul.f32.gmra.mxu3 %v1020_v18 }
  0xae   : > { %v3294_v20 = vpop.f32.mrf.mxu2  ;;  %v3296_v21 = vpop.f32.mrf.mxu0 }
  0xb0   : > { %v3301_v24 = vpop.f32.mrf.mxu1  ;;  %v3303_v25 = vpop.f32.mrf.mxu3 }
  0xb1   : > { %1295 = vmatmul.f32.gmra.mxu0 %v3058_v11  ;;  %v1022_v11 = vld [vmem:[#allocation2 + $0xa8] sm:$0xff] }
  0xb3   : > { %748 = vmatmul.f32.gmra.mxu1 %v1017_v63  ;;  %910 = vmatmul.f32.gmra.mxu2 %v3305_v27 }
  0xb5   : > { %1104 = vmatmul.f32.gmra.mxu3 %v1021_v23 }
  0xb6   : > { %v3312_v8 = vpop.f32.mrf.mxu2  ;;  %v3314_v31 = vpop.f32.mrf.mxu0 }
  0xb8   : > { %v3316_v32 = vpop.f32.mrf.mxu1  ;;  %v3318_v33 = vpop.f32.mrf.mxu3 }
  0xb9   : > { %1298 = vmatmul.f32.gmra.mxu0 %v3126_v48  ;;  %v2517_v48 = vld [vmem:[%s3933_s3 + $0x2c0] sm:$0xff] }
  0xba   : > { %1456 = vmatpush.msra.mxu1 %v2517_v48 }
  0xbb   : > { %751 = vmatmul.f32.gmra.mxu1 %v1018_v4  ;;  %913 = vmatmul.f32.gmra.mxu2 %v3320_v34 }
  0xbd   : > { %1107 = vmatmul.f32.gmra.mxu3 %v1022_v11 }
  0xbe   : > { %v3330_v38 = vpop.f32.mrf.mxu2  ;;  %v3332_v39 = vpop.f32.mrf.mxu0 }
  0xc0   : > { %v3337_v40 = vpop.f32.mrf.mxu1  ;;  %v3339_v41 = vpop.f32.mrf.mxu3 }
  0xc1   : > { %1301 = vmatmul.f32.gmra.mxu0 %v3159_v2  ;;  %v1024_v2 = vld [vmem:[#allocation2 + $0xc0] sm:$0xff] }
  0xc3   : > { %754 = vmatmul.f32.gmra.mxu1 %v1019_v13  ;;  %916 = vmatmul.f32.gmra.mxu2 %v3341_v42 }
  0xc5   : > { %1110 = vmatmul.f32.gmra.mxu3 %v1023_v45 }
  0xc6   : > { %v3348_v47 = vpop.f32.mrf.mxu2  ;;  %v3350_v49 = vpop.f32.mrf.mxu0 }
  0xc8   : > { %v3352_v50 = vpop.f32.mrf.mxu1  ;;  %v3354_v51 = vpop.f32.mrf.mxu3 }
  0xc9   : > { %1304 = vmatmul.f32.gmra.mxu0 %v3193_v26  ;;  %v2516_v26 = vld [vmem:[%s3933_s3 + $0x2b8] sm:$0xff] }
  0xca   : > { %1457 = vmatpush.msra.mxu1 %v2516_v26 }
  0xcb   : > { %757 = vmatmul.f32.gmra.mxu1 %v1020_v18  ;;  %919 = vmatmul.f32.gmra.mxu2 %v3356_v37  ;;  %v2515_v18 = vld [vmem:[%s3933_s3 + $0x2b0] sm:$0xff] }
  0xcc   : > { %1458 = vmatpush.msra.mxu1 %v2515_v18 }
  0xcd   : > { %1113 = vmatmul.f32.gmra.mxu3 %v1024_v2 }
  0xce   : > { %v3366_v55 = vpop.f32.mrf.mxu2  ;;  %v3368_v56 = vpop.f32.mrf.mxu0 }
  0xd0   : > { %v3373_v58 = vpop.f32.mrf.mxu1  ;;  %v3375_v59 = vpop.f32.mrf.mxu3 }
  0xd1   : > { %1307 = vmatmul.f32.gmra.mxu0 %v1218_v57 }
  0xd3   : > { %760 = vmatmul.f32.gmra.mxu1 %v1021_v23  ;;  %922 = vmatmul.f32.gmra.mxu2 %v3377_v60  ;;  %v3417_v23 = vld [vmem:[#allocation2 + $0xe0] sm:$0xff] }
  0xd5   : > { %1116 = vmatmul.f32.gmra.mxu3 %v1025_v3 }
  0xd6   : > { %v3383_v62 = vpop.f32.mrf.mxu2  ;;  %v3385_v63 = vpop.f32.mrf.mxu0 }
  0xd8   : > { %v3387_v1 = vpop.f32.mrf.mxu1  ;;  %v3389_v4 = vpop.f32.mrf.mxu3 }
  0xd9   : > { %1310 = vmatmul.f32.gmra.mxu0 %v1219_v0 }
  0xdb   : > { %763 = vmatmul.f32.gmra.mxu1 %v1022_v11  ;;  %925 = vmatmul.f32.gmra.mxu2 %v3391_v5 }
  0xdd   : > { %1119 = vmatmul.f32.gmra.mxu3 %v3393_v22 }
  0xde   : > { %v3403_v13 = vpop.f32.mrf.mxu2  ;;  %v3405_v14 = vpop.f32.mrf.mxu0 }
  0xe0   : > { %v3410_v16 = vpop.f32.mrf.mxu1  ;;  %v3412_v19 = vpop.f32.mrf.mxu3 }
  0xe1   : > { %1313 = vmatmul.f32.gmra.mxu0 %v2928_v17  ;;  %v3430_v17 = vld [vmem:[#allocation2 + $0xc4] sm:$0xff] }
  0xe3   : > { %766 = vmatmul.f32.gmra.mxu1 %v1023_v45  ;;  %928 = vmatmul.f32.gmra.mxu2 %v3414_v43  ;;  %v3433_v45 = vld [vmem:[#allocation2 + $0xf0] sm:$0xff] }
  0xe5   : > { %1122 = vmatmul.f32.gmra.mxu3 %v3417_v23 }
  0xe6   : > { %v3424_v11 = vpop.f32.mrf.mxu2  ;;  %v3426_v35 = vpop.f32.mrf.mxu0 }
  0xe8   : > { %v3428_v36 = vpop.f32.mrf.mxu3  ;;  %v722_v48 = vpop.f32.mrf.mxu1 }
  0xe9   : > { %1316 = vmatmul.f32.gmra.mxu0 %v2993_v44  ;;  %v723_v52 = vadd.f32 %v722_v48, %v3296_v21  ;;  %v2562_v48 = vld [vmem:[%s3933_s3 + $0x428] sm:$0xff] }
  0xea   : > { %2042 = vmatpush.msra.mxu0 %v2562_v48 }
  0xeb   : > { %769 = vmatmul.f32.gmra.mxu1 %v1024_v2  ;;  %931 = vmatmul.f32.gmra.mxu2 %v3430_v17  ;;  %v2514_v2 = vld [vmem:[%s3933_s3 + $0x2a8] sm:$0xff] }
  0xec   : > { %1459 = vmatpush.msra.mxu1 %v2514_v2  ;;  %v2529_v2 = vld [vmem:[%s3933_s3 + $0x320] sm:$0xff] }
  0xed   : > { %1125 = vmatmul.f32.gmra.mxu3 %v3433_v45  ;;  %1655 = vmatpush.msra.mxu2 %v2529_v2 }
  0xee   : > { %v884_v57 = vpop.f32.mrf.mxu2  ;;  %v1272_v44 = vpop.f32.mrf.mxu0 }
  0xef   : > { %v980_v26 = vadd.f32 %v884_v57, %v723_v52 }
  0xf0   : > { %v725_v61 = vpop.f32.mrf.mxu1  ;;  %v1078_v0 = vpop.f32.mrf.mxu3 }
  0xf1   : > { %v1174_v21 = vadd.f32 %v1078_v0, %v980_v26  ;;  %1319 = vmatmul.f32.gmra.mxu0 %v3060_v12  ;;  %v726_v28 = vadd.f32 %v725_v61, %v3314_v31  ;;  %v3460_v26 = vld [vmem:[#allocation2 + $0xdc] sm:$0xff] }
  0xf3   : > { %v3452_v18 = vadd.f32 %v1272_v44, %v1174_v21  ;;  %772 = vmatmul.f32.gmra.mxu1 %v1025_v3  ;;  %934 = vmatmul.f32.gmra.mxu2 %v3447_v7  ;;  %v3463_v3 = vld [vmem:[#allocation2 + $0x108] sm:$0xff] }
  0xf5   : > { %3955 = vst [vmem:[#allocation3_spill] sm:$0xff] %v3452_v18  ;;  %1128 = vmatmul.f32.gmra.mxu3 %v3450_v30  ;;  %v3648_v18 = vld [vmem:[#allocation2 + $0x168] sm:$0xff] }
  0xf6   : > { %v887_v46 = vpop.f32.mrf.mxu2  ;;  %v1275_v52 = vpop.f32.mrf.mxu0 }
  0xf7   : > { %v981_v54 = vadd.f32 %v887_v46, %v726_v28 }
  0xf8   : > { %v728_v12 = vpop.f32.mrf.mxu1  ;;  %v1081_v57 = vpop.f32.mrf.mxu3 }
  0xf9   : > { %v1175_v44 = vadd.f32 %v1081_v57, %v981_v54  ;;  %1322 = vmatmul.f32.gmra.mxu0 %v3134_v53  ;;  %v729_v61 = vadd.f32 %v728_v12, %v3332_v39  ;;  %v2545_v53 = vld [vmem:[%s3933_s3 + $0x3a0] sm:$0xff]  ;;  %v3483_v54 = vld [vmem:[#allocation2 + $0x110] sm:$0xff] }
  0xfa   : > { %1849 = vmatpush.msra.mxu3 %v2545_v53 }
  0xfb   : > { %v3465_v31 = vadd.f32 %v1275_v52, %v1175_v44  ;;  %775 = vmatmul.f32.gmra.mxu1 %v3393_v22  ;;  %937 = vmatmul.f32.gmra.mxu2 %v3460_v26  ;;  %v2513_v22 = vld [vmem:[%s3933_s3 + $0x2a0] sm:$0xff] }
  0xfc   : > { %v3480_v52 = vld [vmem:[#allocation2 + $0xe4] sm:$0xff]  ;;  %1460 = vmatpush.msra.mxu1 %v2513_v22  ;;  %v2528_v22 = vld [vmem:[%s3933_s3 + $0x318] sm:$0xff] }
  0xfd   : > { %3956 = vst [vmem:[#allocation4_spill] sm:$0xff] %v3465_v31  ;;  %1131 = vmatmul.f32.gmra.mxu3 %v3463_v3  ;;  %v2561_v44 = vld [vmem:[%s3933_s3 + $0x420] sm:$0xff]  ;;  %1656 = vmatpush.msra.mxu2 %v2528_v22  ;;  %v2560_v22 = vld [vmem:[%s3933_s3 + $0x418] sm:$0xff] }
  0xfe   : > { %v890_v0 = vpop.f32.mrf.mxu2  ;;  %v1278_v21 = vpop.f32.mrf.mxu0  ;;  %2043 = vmatpush.msra.mxu0 %v2561_v44  ;;  %v2512_v44 = vld [vmem:[%s3933_s3 + $0x298] sm:$0xff] }
  0xff   : > { %v982_v28 = vadd.f32 %v890_v0, %v729_v61  ;;  %1461 = vmatpush.msra.mxu1 %v2512_v44 }
 0x100   : > { %v731_v48 = vpop.f32.mrf.mxu1  ;;  %v1084_v46 = vpop.f32.mrf.mxu3  ;;  %2044 = vmatpush.msra.mxu0 %v2560_v22  ;;  %v2543_v22 = vld [vmem:[%s3933_s3 + $0x390] sm:$0xff] }
 0x101   : > { %v1176_v39 = vadd.f32 %v1084_v46, %v982_v28  ;;  %1325 = vmatmul.f32.gmra.mxu0 %v3168_v9  ;;  %v732_v57 = vadd.f32 %v731_v48, %v3350_v49 }
 0x103   : > { %v3485_v12 = vadd.f32 %v1278_v21, %v1176_v39  ;;  %778 = vmatmul.f32.gmra.mxu1 %v3417_v23  ;;  %940 = vmatmul.f32.gmra.mxu2 %v3480_v52  ;;  %v3494_v21 = vld [vmem:[#allocation2 + $0xf4] sm:$0xff]  ;;  %v3497_v23 = vld [vmem:[#allocation2 + $0x120] sm:$0xff] }
 0x105   : > { %3957 = vst [vmem:[#allocation5_spill] sm:$0xff] %v3485_v12  ;;  %1134 = vmatmul.f32.gmra.mxu3 %v3483_v54 }
 0x106   : > { %v893_v2 = vpop.f32.mrf.mxu2  ;;  %v1281_v61 = vpop.f32.mrf.mxu0 }
 0x107   : > { %v983_v9 = vadd.f32 %v893_v2, %v732_v57  ;;  %v3511_v57 = vld [vmem:[#allocation2 + $0x122] sm:$0xff] }
 0x108   : > { %v734_v53 = vpop.f32.mrf.mxu1  ;;  %v1087_v0 = vpop.f32.mrf.mxu3  ;;  %3959 = vst [vmem:[#allocation7_spill] sm:$0xff] %v3511_v57 }
 0x109   : > { %v1177_v28 = vadd.f32 %v1087_v0, %v983_v9  ;;  %1328 = vmatmul.f32.gmra.mxu0 %v3196_v10  ;;  %v735_v48 = vadd.f32 %v734_v53, %v3368_v56  ;;  %v2544_v10 = vld [vmem:[%s3933_s3 + $0x398] sm:$0xff]  ;;  %v3519_v53 = vld [vmem:[#allocation2 + $0x128] sm:$0xff] }
 0x10a   : > { %1850 = vmatpush.msra.mxu3 %v2544_v10  ;;  %v3516_v9 = vld [vmem:[#allocation2 + $0xfc] sm:$0xff]  ;;  %3960 = vst [vmem:[#allocation8_spill] sm:$0xff] %v3519_v53 }
 0x10b   : > { %v3499_v49 = vadd.f32 %v1281_v61, %v1177_v28  ;;  %781 = vmatmul.f32.gmra.mxu1 %v3433_v45  ;;  %943 = vmatmul.f32.gmra.mxu2 %v3494_v21 }
 0x10c   : > { %1851 = vmatpush.msra.mxu3 %v2543_v22 }
 0x10d   : > { %3958 = vst [vmem:[#allocation6_spill] sm:$0xff] %v3499_v49  ;;  %1137 = vmatmul.f32.gmra.mxu3 %v3497_v23 }
 0x10e   : > { %v896_v46 = vpop.f32.mrf.mxu2  ;;  %v1284_v39 = vpop.f32.mrf.mxu0 }
 0x10f   : > { %v984_v45 = vadd.f32 %v896_v46, %v735_v48  ;;  %v3530_v46 = vld [vmem:[#allocation2 + $0x12a] sm:$0xff] }
 0x110   : > { %v737_v2 = vpop.f32.mrf.mxu1  ;;  %v1090_v61 = vpop.f32.mrf.mxu3  ;;  %3962 = vst [vmem:[#allocation10_spill] sm:$0xff] %v3530_v46 }
 0x111   : > { %v1178_v56 = vadd.f32 %v1090_v61, %v984_v45  ;;  %1331 = vmatmul.f32.gmra.mxu0 %v3511_v57  ;;  %v738_v28 = vadd.f32 %v737_v2, %v3385_v63  ;;  %v3532_v61 = vld [vmem:[#allocation2 + $0x10c] sm:$0xff]  ;;  %v3535_v63 = vld [vmem:[#allocation2 + $0x138] sm:$0xff] }
 0x113   : > { %v3521_v0 = vadd.f32 %v1284_v39, %v1178_v56  ;;  %784 = vmatmul.f32.gmra.mxu1 %v3450_v30  ;;  %946 = vmatmul.f32.gmra.mxu2 %v3516_v9  ;;  %v2527_v56 = vld [vmem:[%s3933_s3 + $0x310] sm:$0xff] }
 0x114   : > { %1657 = vmatpush.msra.mxu2 %v2527_v56 }
 0x115   : > { %3961 = vst [vmem:[#allocation9_spill] sm:$0xff] %v3521_v0  ;;  %1140 = vmatmul.f32.gmra.mxu3 %v3519_v53  ;;  %v3561_v0 = vld [vmem:[#allocation2 + $0x114] sm:$0xff] }
 0x116   : > { %v899_v48 = vpop.f32.mrf.mxu2  ;;  %v1287_v10 = vpop.f32.mrf.mxu0 }
 0x117   : > { %v985_v45 = vadd.f32 %v899_v48, %v738_v28 }
 0x118   : > { %v740_v39 = vpop.f32.mrf.mxu1  ;;  %v1093_v44 = vpop.f32.mrf.mxu3 }
 0x119   : > { %v1179_v30 = vadd.f32 %v1093_v44, %v985_v45  ;;  %1334 = vmatmul.f32.gmra.mxu0 %v3530_v46  ;;  %v741_v28 = vadd.f32 %v740_v39, %v3405_v14  ;;  %v3549_v45 = vld [vmem:[#allocation2 + $0x13a] sm:$0xff] }
 0x11a   : > { %3964 = vst [vmem:[#allocation12_spill] sm:$0xff] %v3549_v45  ;;  %v3558_v14 = vld [vmem:[%s3931_s1] ss:$0 sm:$0xff] }
 0x11b   : > { %v3537_v2 = vadd.f32 %v1287_v10, %v1179_v30  ;;  %787 = vmatmul.f32.gmra.mxu1 %v3463_v3  ;;  %949 = vmatmul.f32.gmra.mxu2 %v3532_v61  ;;  %v354_v3 = vld [vmem:[%s2720_s12 + $0xe0] sm:$0xff]  ;;  %v2511_v30 = vld [vmem:[%s3933_s3 + $0x290] sm:$0xff] }
 0x11c   : > { %v390_v39 = vmul.f32 %v3558_v14, %v354_v3  ;;  %1462 = vmatpush.msra.mxu1 %v2511_v30  ;;  %v2559_v30 = vld [vmem:[%s3933_s3 + $0x410] sm:$0xff] }
 0x11d   : > { %3963 = vst [vmem:[#allocation11_spill] sm:$0xff] %v3537_v2  ;;  %1143 = vmatmul.f32.gmra.mxu3 %v3535_v63  ;;  %2045 = vmatpush.msra.mxu0 %v2559_v30 }
 0x11e   : > { %v902_v48 = vpop.f32.mrf.mxu2  ;;  %v1290_v10 = vpop.f32.mrf.mxu0 }
 0x11f   : > { %v986_v44 = vadd.f32 %v902_v48, %v741_v28  ;;  %v3567_v28 = vld [vmem:[%s3932_s2] ss:$0 sm:$0xff] }
 0x120   : > { %v743_v56 = vpop.f32.mrf.mxu1  ;;  %v1096_v2 = vpop.f32.mrf.mxu3  ;;  %v3570_v22 = vadd.f32 %v3567_v28, %v390_v39  ;;  %v3572_v48 = vld [vmem:[#allocation2 + $0x140] sm:$0xff] }
 0x121   : > { %v1180_v49 = vadd.f32 %v1096_v2, %v986_v44  ;;  %1337 = vmatmul.f32.gmra.mxu0 %v3549_v45  ;;  %v744_v44 = vadd.f32 %v743_v56, %v3426_v35  ;;  %v3590_v56 = vld [vmem:[#allocation2 + $0x124] sm:$0xff] }
 0x122   : > { %v3939_v2 = vmax.f32 %v3570_v22, 0.0  ;;  %3967 = vst [vmem:[#allocation15_spill] sm:$0xff] %v3590_v56 }
 0x123   : > { %v3574_v3 = vadd.f32 %v1290_v10, %v1180_v49  ;;  %790 = vmatmul.f32.gmra.mxu1 %v3483_v54  ;;  %952 = vmatmul.f32.gmra.mxu2 %v3561_v0  ;;  %v3586_v10 = vld [vmem:[#allocation2 + $0x142] sm:$0xff] }
 0x124   : > { %491 = vst [vmem:[#allocation2 + $0x182] sm:$0xff] %v3939_v2  ;;  %v355_v54 = vld [vmem:[%s2720_s12 + $0xe8] sm:$0xff]  ;;  %v3596_v2 = vld [vmem:[#allocation2 + $0x150] sm:$0xff] }
 0x125   : > { %3965 = vst [vmem:[#allocation13_spill] sm:$0xff] %v3574_v3  ;;  %1146 = vmatmul.f32.gmra.mxu3 %v3572_v48  ;;  %v391_v45 = vmul.f32 %v3558_v14, %v355_v54  ;;  %v356_v54 = vld [vmem:[%s2720_s12 + $0xf0] sm:$0xff] }
 0x126   : > { %v905_v39 = vpop.f32.mrf.mxu2  ;;  %v1293_v49 = vpop.f32.mrf.mxu0  ;;  %3966 = vst [vmem:[#allocation14_spill] sm:$0xff] %v3586_v10 }
 0x127   : > { %v987_v3 = vadd.f32 %v905_v39, %v744_v44  ;;  %v3594_v31 = vadd.f32 %v3567_v28, %v391_v45  ;;  %v2526_v44 = vld [vmem:[%s3933_s3 + $0x308] sm:$0xff] }
 0x128   : > { %v746_v12 = vpop.f32.mrf.mxu1  ;;  %v1099_v35 = vpop.f32.mrf.mxu3  ;;  %1658 = vmatpush.msra.mxu2 %v2526_v44 }
 0x129   : > { %v1181_v46 = vadd.f32 %v1099_v35, %v987_v3  ;;  %1340 = vmatmul.f32.gmra.mxu0 %v3586_v10  ;;  %v3943_v3 = vmax.f32 %v3594_v31, 0.0  ;;  %v747_v30 = vadd.f32 %v746_v12, %v3282_v15  ;;  %v2510_v15 = vld [vmem:[%s3933_s3 + $0x288] sm:$0xff]  ;;  %v392_v12 = vmul.f32 %v3558_v14, %v356_v54 }
 0x12a   : > { %v3620_v10 = vld [vmem:[#allocation2 + $0x12c] sm:$0xff]  ;;  %1463 = vmatpush.msra.mxu1 %v2510_v15  ;;  %v357_v15 = vld [vmem:[%s2720_s12 + $0xf8] sm:$0xff] }
 0x12b   : > { %v3598_v57 = vadd.f32 %v1293_v49, %v1181_v46  ;;  %793 = vmatmul.f32.gmra.mxu1 %v3497_v23  ;;  %955 = vmatmul.f32.gmra.mxu2 %v3590_v56  ;;  %v2542_v46 = vld [vmem:[%s3933_s3 + $0x388] sm:$0xff]  ;;  %492 = vst [vmem:[#allocation2 + $0x18a] sm:$0xff] %v3943_v3  ;;  %v3613_v49 = vld [vmem:[#allocation2 + $0x152] sm:$0xff]  ;;  %v3624_v3 = vadd.f32 %v3567_v28, %v392_v12 }
 0x12c   : > { %3969 = vst [vmem:[#allocation17_spill] sm:$0xff] %v3613_v49  ;;  %1852 = vmatpush.msra.mxu3 %v2542_v46  ;;  %v3626_v46 = vld [vmem:[#allocation2 + $0x158] sm:$0xff] }
 0x12d   : > { %3968 = vst [vmem:[#allocation16_spill] sm:$0xff] %v3598_v57  ;;  %1149 = vmatmul.f32.gmra.mxu3 %v3596_v2 }
 0x12e   : > { %v908_v45 = vpop.f32.mrf.mxu2  ;;  %v1296_v39 = vpop.f32.mrf.mxu0  ;;  %3970 = vst [vmem:[#allocation18_spill] sm:$0xff] %v3620_v10 }
 0x12f   : > { %v988_v35 = vadd.f32 %v908_v45, %v747_v30  ;;  %v3948_v45 = vmax.f32 %v3624_v3, 0.0 }
 0x130   : > { %v749_v44 = vpop.f32.mrf.mxu1  ;;  %v1102_v57 = vpop.f32.mrf.mxu3 }
 0x131   : > { %v1182_v56 = vadd.f32 %v1102_v57, %v988_v35  ;;  %1343 = vmatmul.f32.gmra.mxu0 %v3613_v49  ;;  %v750_v54 = vadd.f32 %v749_v44, %v3301_v24  ;;  %v2558_v57 = vld [vmem:[%s3933_s3 + $0x408] sm:$0xff]  ;;  %493 = vst [vmem:[#allocation2 + $0x19a] sm:$0xff] %v3948_v45  ;;  %v3644_v44 = vld [vmem:[#allocation2 + $0x13c] sm:$0xff] }
 0x132   : > { %2046 = vmatpush.msra.mxu0 %v2558_v57 }
 0x133   : > { %v3628_v30 = vadd.f32 %v1296_v39, %v1182_v56  ;;  %796 = vmatmul.f32.gmra.mxu1 %v3519_v53  ;;  %958 = vmatmul.f32.gmra.mxu2 %v3620_v10  ;;  %v3640_v39 = vld [vmem:[#allocation2 + $0x15a] sm:$0xff] }
 0x134   : > { %3972 = vst [vmem:[#allocation20_spill] sm:$0xff] %v3640_v39 }
 0x135   : > { %3971 = vst [vmem:[#allocation19_spill] sm:$0xff] %v3628_v30  ;;  %1152 = vmatmul.f32.gmra.mxu3 %v3626_v46  ;;  %v393_v30 = vmul.f32 %v3558_v14, %v357_v15  ;;  %v2525_v14 = vld [vmem:[%s3933_s3 + $0x300] sm:$0xff] }
 0x136   : > { %v911_v35 = vpop.f32.mrf.mxu2  ;;  %v1299_v56 = vpop.f32.mrf.mxu0  ;;  %1659 = vmatpush.msra.mxu2 %v2525_v14 }
 0x137   : > { %v989_v12 = vadd.f32 %v911_v35, %v750_v54  ;;  %v429_v53 = vadd.f32 %v3567_v28, %v393_v30  ;;  %v2541_v28 = vld [vmem:[%s3933_s3 + $0x380] sm:$0xff]  ;;  %v3665_v35 = vld [vmem:[#allocation2 + $0x16a] sm:$0xff] }
 0x138   : > { %v752_v49 = vpop.f32.mrf.mxu1  ;;  %v1105_v24 = vpop.f32.mrf.mxu3  ;;  %3974 = vst [vmem:[#allocation22_spill] sm:$0xff] %v3665_v35  ;;  %1853 = vmatpush.msra.mxu3 %v2541_v28  ;;  %v2557_v28 = vld [vmem:[%s3933_s3 + $0x400] sm:$0xff] }
 0x139   : > { %v1183_v10 = vadd.f32 %v1105_v24, %v989_v12  ;;  %1346 = vmatmul.f32.gmra.mxu0 %v3640_v39  ;;  %v3657_v54 = vmax.f32 %v429_v53, 0.0  ;;  %v753_v57 = vadd.f32 %v752_v49, %v3316_v32  ;;  %v2509_v53 = vld [vmem:[%s3933_s3 + $0x280] sm:$0xff]  ;;  %v3673_v24 = vld [vmem:[#allocation2 + $0x170] sm:$0xff] }
 0x13a   : > { %v3670_v49 = vld [vmem:[#allocation2 + $0x144] sm:$0xff]  ;;  %1464 = vmatpush.msra.mxu1 %v2509_v53  ;;  %2047 = vmatpush.msra.mxu0 %v2557_v28 }
 0x13b   : > { %v3650_v45 = vadd.f32 %v1299_v56, %v1183_v10  ;;  %799 = vmatmul.f32.gmra.mxu1 %v3535_v63  ;;  %961 = vmatmul.f32.gmra.mxu2 %v3644_v44  ;;  %494 = vst [vmem:[#allocation2 + $0x1a2] sm:$0xff] %v3657_v54 }
 0x13d   : > { %3973 = vst [vmem:[#allocation21_spill] sm:$0xff] %v3650_v45  ;;  %1155 = vmatmul.f32.gmra.mxu3 %v3648_v18 }
 0x13e   : > { %v914_v10 = vpop.f32.mrf.mxu2  ;;  %v1302_v30 = vpop.f32.mrf.mxu0 }
 0x13f   : > { %v990_v56 = vadd.f32 %v914_v10, %v753_v57 }
 0x140   : > { %v755_v15 = vpop.f32.mrf.mxu1  ;;  %v1108_v32 = vpop.f32.mrf.mxu3 }
 0x141   : > { %v1184_v12 = vadd.f32 %v1108_v32, %v990_v56  ;;  %1349 = vmatmul.f32.gmra.mxu0 %v3665_v35  ;;  %v756_v57 = vadd.f32 %v755_v15, %v3337_v40 }
 0x143   : > { %v3675_v14 = vadd.f32 %v1302_v30, %v1184_v12  ;;  %802 = vmatmul.f32.gmra.mxu1 %v3572_v48  ;;  %964 = vmatmul.f32.gmra.mxu2 %v3670_v49  ;;  %v3684_v30 = vld [vmem:[#allocation2 + $0x154] sm:$0xff] }
 0x145   : > { %3975 = vst [vmem:[#allocation23_spill] sm:$0xff] %v3675_v14  ;;  %1158 = vmatmul.f32.gmra.mxu3 %v3673_v24  ;;  %v3687_v14 = vld [vmem:[#allocation2 + $0x180] sm:$0xff] }
 0x146   : > { %v917_v10 = vpop.f32.mrf.mxu2  ;;  %v1305_v56 = vpop.f32.mrf.mxu0  ;;  %3976 = vst [vmem:[#allocation24_spill] sm:$0xff] %v3687_v14 }
 0x147   : > { %v991_v53 = vadd.f32 %v917_v10, %v756_v57 }
 0x148   : > { %v758_v32 = vpop.f32.mrf.mxu1  ;;  %v1111_v45 = vpop.f32.mrf.mxu3 }
 0x149   : > { %v1185_v12 = vadd.f32 %v1111_v45, %v991_v53  ;;  %1352 = vmatmul.f32.gmra.mxu0 %v3204_v29  ;;  %v759_v15 = vadd.f32 %v758_v32, %v3352_v50  ;;  %v3695_v45 = vld [vmem:[#allocation2 + $0x15c] sm:$0xff]  ;;  %v3978_v53 = vmax.f32 %v3570_v22, 0.0 }
 0x14b   : > { %v3689_v40 = vadd.f32 %v1305_v56, %v1185_v12  ;;  %805 = vmatmul.f32.gmra.mxu1 %v3596_v2  ;;  %967 = vmatmul.f32.gmra.mxu2 %v3684_v30  ;;  %v3699_v56 = vld [vmem:[#allocation2 + $0x188] sm:$0xff] }
 0x14c   : > { %3979 = vst [vmem:[#allocation26_spill] sm:$0xff] %v3699_v56 }
 0x14d   : > { %3977 = vst [vmem:[#allocation25_spill] sm:$0xff] %v3689_v40  ;;  %1161 = vmatmul.f32.gmra.mxu3 %v3687_v14 }
 0x14e   : > { %v920_v57 = vpop.f32.mrf.mxu2  ;;  %v1308_v28 = vpop.f32.mrf.mxu0 }
 0x14f   : > { %v992_v10 = vadd.f32 %v920_v57, %v759_v15 }
 0x150   : > { %v761_v35 = vpop.f32.mrf.mxu1  ;;  %v1114_v39 = vpop.f32.mrf.mxu3 }
 0x151   : > { %v1186_v29 = vadd.f32 %v1114_v39, %v992_v10  ;;  %1355 = vmatmul.f32.gmra.mxu0 %v3978_v53  ;;  %v762_v50 = vadd.f32 %v761_v35, %v3373_v58  ;;  %v3707_v10 = vld [vmem:[#allocation2 + $0x16c] sm:$0xff]  ;;  %v3981_v53 = vmax.f32 %v3594_v31, 0.0 }
 0x153   : > { %v3701_v12 = vadd.f32 %v1308_v28, %v1186_v29  ;;  %808 = vmatmul.f32.gmra.mxu1 %v3626_v46  ;;  %970 = vmatmul.f32.gmra.mxu2 %v3695_v45  ;;  %v3711_v28 = vld [vmem:[#allocation2 + $0x198] sm:$0xff] }
 0x154   : > { %3982 = vst [vmem:[#allocation28_spill] sm:$0xff] %v3711_v28 }
 0x155   : > { %3980 = vst [vmem:[#allocation27_spill] sm:$0xff] %v3701_v12  ;;  %1164 = vmatmul.f32.gmra.mxu3 %v3699_v56  ;;  %v1596_v56 = vld [vmem:[#allocation2 + $0x68] sm:$0xff] }
 0x156   : > { %v923_v32 = vpop.f32.mrf.mxu2  ;;  %v1311_v15 = vpop.f32.mrf.mxu0 }
 0x157   : > { %v993_v57 = vadd.f32 %v923_v32, %v762_v50 }
 0x158   : > { %v764_v40 = vpop.f32.mrf.mxu1  ;;  %v1117_v39 = vpop.f32.mrf.mxu3 }
 0x159   : > { %v1187_v22 = vadd.f32 %v1117_v39, %v993_v57  ;;  %1358 = vmatmul.f32.gmra.mxu0 %v3981_v53  ;;  %v765_v58 = vadd.f32 %v764_v40, %v3387_v1  ;;  %v3719_v39 = vld [vmem:[#allocation2 + $0x174] sm:$0xff]  ;;  %v3984_v53 = vmax.f32 %v3624_v3, 0.0  ;;  %v1595_v3 = vld [vmem:[#allocation2 + $0x60] sm:$0xff] }
 0x15b   : > { %v3713_v29 = vadd.f32 %v1311_v15, %v1187_v22  ;;  %811 = vmatmul.f32.gmra.mxu1 %v3648_v18  ;;  %973 = vmatmul.f32.gmra.mxu2 %v3707_v10  ;;  %v3723_v15 = vld [vmem:[#allocation2 + $0x1a0] sm:$0xff] }
 0x15c   : > { %3985 = vst [vmem:[#allocation30_spill] sm:$0xff] %v3723_v15 }
 0x15d   : > { %3983 = vst [vmem:[#allocation29_spill] sm:$0xff] %v3713_v29  ;;  %1167 = vmatmul.f32.gmra.mxu3 %v3711_v28 }
 0x15e   : > { %v926_v35 = vpop.f32.mrf.mxu2  ;;  %v1314_v50 = vpop.f32.mrf.mxu0 }
 0x15f   : > { %v994_v32 = vadd.f32 %v926_v35, %v765_v58 }
 0x160   : > { %v767_v12 = vpop.f32.mrf.mxu1  ;;  %v1120_v57 = vpop.f32.mrf.mxu3 }
 0x161   : > { %v1188_v31 = vadd.f32 %v1120_v57, %v994_v32  ;;  %1361 = vmatmul.f32.gmra.mxu0 %v3984_v53  ;;  %v768_v1 = vadd.f32 %v767_v12, %v3410_v16  ;;  %v1400_v57 = vld [vmem:[#allocation2 + $0x34] sm:$0xff] }
 0x163   : > { %v3725_v22 = vadd.f32 %v1314_v50, %v1188_v31  ;;  %814 = vmatmul.f32.gmra.mxu1 %v3673_v24  ;;  %976 = vmatmul.f32.gmra.mxu2 %v3719_v39  ;;  %v1789_v50 = vld [vmem:[#allocation2 + $0x62] sm:$0xff] }
 0x165   : > { %3986 = vst [vmem:[#allocation31_spill] sm:$0xff] %v3725_v22  ;;  %1170 = vmatmul.f32.gmra.mxu3 %v3723_v15 }
 0x166   : > { %v929_v40 = vpop.f32.mrf.mxu2  ;;  %v1317_v58 = vpop.f32.mrf.mxu0 }
 0x167   : > { %v995_v35 = vadd.f32 %v929_v40, %v768_v1  ;;  %v1401_v40 = vld [vmem:[#allocation2 + $0x3c] sm:$0xff] }
 0x168   : > { %v770_v29 = vpop.f32.mrf.mxu1  ;;  %v1123_v32 = vpop.f32.mrf.mxu3 }
 0x169   : > { %v1189_v53 = vadd.f32 %v1123_v32, %v995_v35  ;;  %1364 = vmatmul.f32.gmra.mxu0 %v3657_v54  ;;  %v771_v22 = vadd.f32 %v770_v29, %v3294_v20  ;;  %v1790_v35 = vld [vmem:[#allocation2 + $0x6a] sm:$0xff] }
 0x16b   : > { %v3732_v31 = vadd.f32 %v1317_v58, %v1189_v53  ;;  %1465 = vmatmul.f32.vlgmr.msra.gmra.mxu1 %v1400_v57  ;;  %1660 = vmatmul.f32.vlgmr.msra.gmra.mxu2 %v1595_v3  ;;  %v1402_v53 = vld [vmem:[#allocation2 + $0x4c] sm:$0xff] }
 0x16d   : > { %1854 = vmatmul.f32.vlgmr.msra.gmra.mxu3 %v1789_v50  ;;  %v1597_v50 = vld [vmem:[#allocation2 + $0x78] sm:$0xff] }
 0x16e   : > { %v932_v16 = vpop.f32.mrf.mxu2  ;;  %v1320_v12 = vpop.f32.mrf.mxu0 }
 0x16f   : > { %v996_v15 = vadd.f32 %v932_v16, %v771_v22 }
 0x170   : > { %v773_v28 = vpop.f32.mrf.mxu1  ;;  %v1126_v1 = vpop.f32.mrf.mxu3 }
 0x171   : > { %v1190_v14 = vadd.f32 %v1126_v1, %v996_v15  ;;  %2048 = vmatmul.f32.vlgmr.msra.gmra.mxu0 %v3284_v6  ;;  %v774_v58 = vadd.f32 %v773_v28, %v3312_v8  ;;  %v1791_v15 = vld [vmem:[#allocation2 + $0x7a] sm:$0xff] }
 0x173   : > { %v3736_v32 = vadd.f32 %v1320_v12, %v1190_v14  ;;  %1468 = vmatmul.f32.gmra.mxu1 %v1401_v40  ;;  %1663 = vmatmul.f32.gmra.mxu2 %v1596_v56  ;;  %v1403_v40 = vld [vmem:[#allocation2 + $0x54] sm:$0xff] }
 0x175   : > { %1857 = vmatmul.f32.gmra.mxu3 %v1790_v35  ;;  %v1598_v35 = vld [vmem:[#allocation2 + $0x80] sm:$0xff] }
 0x176   : > { %v935_v20 = vpop.f32.mrf.mxu2  ;;  %v1323_v29 = vpop.f32.mrf.mxu0 }
 0x177   : > { %v997_v57 = vadd.f32 %v935_v20, %v774_v58  ;;  %v1792_v20 = vld [vmem:[#allocation2 + $0x82] sm:$0xff] }
 0x178   : > { %v776_v3 = vpop.f32.mrf.mxu1  ;;  %v1129_v22 = vpop.f32.mrf.mxu3 }
 0x179   : > { %v1191_v16 = vadd.f32 %v1129_v22, %v997_v57  ;;  %2051 = vmatmul.f32.gmra.mxu0 %v3305_v27  ;;  %v777_v14 = vadd.f32 %v776_v3, %v3330_v38 }
 0x17b   : > { %v3740_v6 = vadd.f32 %v1323_v29, %v1191_v16  ;;  %1471 = vmatmul.f32.gmra.mxu1 %v1402_v53  ;;  %1666 = vmatmul.f32.gmra.mxu2 %v1597_v50  ;;  %v1404_v50 = vld [vmem:[#allocation2 + $0x64] sm:$0xff]  ;;  %v1599_v16 = vld [vmem:[#allocation2 + $0x90] sm:$0xff] }
 0x17d   : > { %1860 = vmatmul.f32.gmra.mxu3 %v1791_v15 }
 0x17e   : > { %v938_v8 = vpop.f32.mrf.mxu2  ;;  %v1326_v56 = vpop.f32.mrf.mxu0 }
 0x17f   : > { %v998_v28 = vadd.f32 %v938_v8, %v777_v14  ;;  %v1793_v14 = vld [vmem:[#allocation2 + $0x92] sm:$0xff] }
 0x180   : > { %v779_v12 = vpop.f32.mrf.mxu1  ;;  %v1132_v1 = vpop.f32.mrf.mxu3 }
 0x181   : > { %v1192_v58 = vadd.f32 %v1132_v1, %v998_v28  ;;  %2054 = vmatmul.f32.gmra.mxu0 %v3320_v34  ;;  %v780_v29 = vadd.f32 %v779_v12, %v3348_v47 }
 0x183   : > { %v3744_v27 = vadd.f32 %v1326_v56, %v1192_v58  ;;  %1474 = vmatmul.f32.gmra.mxu1 %v1403_v40  ;;  %1669 = vmatmul.f32.gmra.mxu2 %v1598_v35  ;;  %v1405_v40 = vld [vmem:[#allocation2 + $0x6c] sm:$0xff]  ;;  %v1600_v35 = vld [vmem:[#allocation2 + $0x98] sm:$0xff] }
 0x185   : > { %1863 = vmatmul.f32.gmra.mxu3 %v1792_v20  ;;  %v1794_v20 = vld [vmem:[#allocation2 + $0x9a] sm:$0xff] }
 0x186   : > { %v941_v38 = vpop.f32.mrf.mxu2  ;;  %v1329_v57 = vpop.f32.mrf.mxu0 }
 0x187   : > { %v999_v3 = vadd.f32 %v941_v38, %v780_v29 }
 0x188   : > { %v782_v22 = vpop.f32.mrf.mxu1  ;;  %v1135_v53 = vpop.f32.mrf.mxu3 }
 0x189   : > { %v1193_v15 = vadd.f32 %v1135_v53, %v999_v3  ;;  %2057 = vmatmul.f32.gmra.mxu0 %v3341_v42  ;;  %v783_v8 = vadd.f32 %v782_v22, %v3366_v55  ;;  %v1406_v53 = vld [vmem:[#allocation2 + $0x7c] sm:$0xff] }
 0x18b   : > { %v3748_v34 = vadd.f32 %v1329_v57, %v1193_v15  ;;  %1477 = vmatmul.f32.gmra.mxu1 %v1404_v50  ;;  %1672 = vmatmul.f32.gmra.mxu2 %v1599_v16  ;;  %v1601_v50 = vld [vmem:[#allocation2 + $0xa8] sm:$0xff] }
 0x18c   : > { %v1795_v15 = vld [vmem:[#allocation2 + $0xaa] sm:$0xff] }
 0x18d   : > { %1866 = vmatmul.f32.gmra.mxu3 %v1793_v14 }
 0x18e   : > { %v944_v47 = vpop.f32.mrf.mxu2  ;;  %v1332_v56 = vpop.f32.mrf.mxu0 }
 0x18f   : > { %v1000_v28 = vadd.f32 %v944_v47, %v783_v8 }
 0x190   : > { %v785_v12 = vpop.f32.mrf.mxu1  ;;  %v1138_v1 = vpop.f32.mrf.mxu3 }
 0x191   : > { %v1194_v58 = vadd.f32 %v1138_v1, %v1000_v28  ;;  %2060 = vmatmul.f32.gmra.mxu0 %v3356_v37  ;;  %v786_v29 = vadd.f32 %v785_v12, %v3383_v62  ;;  %v1407_v12 = vld [vmem:[#allocation2 + $0x84] sm:$0xff]  ;;  %v1602_v1 = vld [vmem:[#allocation2 + $0xb0] sm:$0xff] }
 0x193   : > { %v3752_v42 = vadd.f32 %v1332_v56, %v1194_v58  ;;  %1480 = vmatmul.f32.gmra.mxu1 %v1405_v40  ;;  %1675 = vmatmul.f32.gmra.mxu2 %v1600_v35  ;;  %v1796_v35 = vld [vmem:[#allocation2 + $0xb2] sm:$0xff] }
 0x195   : > { %1869 = vmatmul.f32.gmra.mxu3 %v1794_v20 }
 0x196   : > { %v947_v55 = vpop.f32.mrf.mxu2  ;;  %v1335_v38 = vpop.f32.mrf.mxu0 }
 0x197   : > { %v1001_v57 = vadd.f32 %v947_v55, %v786_v29 }
 0x198   : > { %v788_v3 = vpop.f32.mrf.mxu1  ;;  %v1141_v22 = vpop.f32.mrf.mxu3 }
 0x199   : > { %v1195_v16 = vadd.f32 %v1141_v22, %v1001_v57  ;;  %2063 = vmatmul.f32.gmra.mxu0 %v3377_v60  ;;  %v789_v14 = vadd.f32 %v788_v3, %v3403_v13  ;;  %v1408_v57 = vld [vmem:[#allocation2 + $0x94] sm:$0xff]  ;;  %v1603_v3 = vld [vmem:[#allocation2 + $0xc0] sm:$0xff] }
 0x19b   : > { %v3756_v37 = vadd.f32 %v1335_v38, %v1195_v16  ;;  %1483 = vmatmul.f32.gmra.mxu1 %v1406_v53  ;;  %1678 = vmatmul.f32.gmra.mxu2 %v1601_v50  ;;  %v1797_v53 = vld [vmem:[#allocation2 + $0xc2] sm:$0xff] }
 0x19d   : > { %1872 = vmatmul.f32.gmra.mxu3 %v1795_v15 }
 0x19e   : > { %v950_v62 = vpop.f32.mrf.mxu2  ;;  %v1338_v8 = vpop.f32.mrf.mxu0 }
 0x19f   : > { %v1002_v47 = vadd.f32 %v950_v62, %v789_v14 }
 0x1a0   : > { %v791_v56 = vpop.f32.mrf.mxu1  ;;  %v1144_v28 = vpop.f32.mrf.mxu3 }
 0x1a1   : > { %v1196_v40 = vadd.f32 %v1144_v28, %v1002_v47  ;;  %2066 = vmatmul.f32.gmra.mxu0 %v3391_v5  ;;  %v792_v58 = vadd.f32 %v791_v56, %v3424_v11  ;;  %v1604_v47 = vld [vmem:[#allocation2 + $0xc8] sm:$0xff] }
 0x1a2   : > { %v1798_v28 = vld [vmem:[#allocation2 + $0xca] sm:$0xff] }
 0x1a3   : > { %v3760_v60 = vadd.f32 %v1338_v8, %v1196_v40  ;;  %1486 = vmatmul.f32.gmra.mxu1 %v1407_v12  ;;  %1681 = vmatmul.f32.gmra.mxu2 %v1602_v1  ;;  %v1409_v8 = vld [vmem:[#allocation2 + $0x9c] sm:$0xff] }
 0x1a5   : > { %1875 = vmatmul.f32.gmra.mxu3 %v1796_v35 }
 0x1a6   : > { %v953_v13 = vpop.f32.mrf.mxu2  ;;  %v1341_v20 = vpop.f32.mrf.mxu0 }
 0x1a7   : > { %v1003_v29 = vadd.f32 %v953_v13, %v792_v58  ;;  %v1410_v13 = vld [vmem:[#allocation2 + $0xac] sm:$0xff] }
 0x1a8   : > { %v794_v55 = vpop.f32.mrf.mxu1  ;;  %v1147_v38 = vpop.f32.mrf.mxu3 }
 0x1a9   : > { %v1197_v22 = vadd.f32 %v1147_v38, %v1003_v29  ;;  %2069 = vmatmul.f32.gmra.mxu0 %v3414_v43  ;;  %v795_v50 = vadd.f32 %v794_v55, %v3303_v25  ;;  %v1799_v55 = vld [vmem:[#allocation2 + $0xda] sm:$0xff] }
 0x1ab   : > { %v3764_v5 = vadd.f32 %v1341_v20, %v1197_v22  ;;  %1489 = vmatmul.f32.gmra.mxu1 %v1408_v57  ;;  %1684 = vmatmul.f32.gmra.mxu2 %v1603_v3  ;;  %v1605_v20 = vld [vmem:[#allocation2 + $0xd8] sm:$0xff] }
 0x1ad   : > { %1878 = vmatmul.f32.gmra.mxu3 %v1797_v53 }
 0x1ae   : > { %v956_v11 = vpop.f32.mrf.mxu2  ;;  %v1344_v16 = vpop.f32.mrf.mxu0 }
 0x1af   : > { %v1004_v15 = vadd.f32 %v956_v11, %v795_v50  ;;  %v1411_v50 = vld [vmem:[#allocation2 + $0xb4] sm:$0xff]  ;;  %v1606_v11 = vld [vmem:[#allocation2 + $0xe0] sm:$0xff] }
 0x1b0   : > { %v797_v14 = vpop.f32.mrf.mxu1  ;;  %v1150_v62 = vpop.f32.mrf.mxu3 }
 0x1b1   : > { %v1198_v56 = vadd.f32 %v1150_v62, %v1004_v15  ;;  %2072 = vmatmul.f32.gmra.mxu0 %v3430_v17  ;;  %v798_v12 = vadd.f32 %v797_v14, %v3318_v33  ;;  %v1800_v15 = vld [vmem:[#allocation2 + $0xe2] sm:$0xff] }
 0x1b3   : > { %v3768_v43 = vadd.f32 %v1344_v16, %v1198_v56  ;;  %1492 = vmatmul.f32.gmra.mxu1 %v1409_v8  ;;  %1687 = vmatmul.f32.gmra.mxu2 %v1604_v47 }
 0x1b5   : > { %1881 = vmatmul.f32.gmra.mxu3 %v1798_v28  ;;  %v1412_v28 = vld [vmem:[#allocation2 + $0xc4] sm:$0xff] }
 0x1b6   : > { %v959_v25 = vpop.f32.mrf.mxu2  ;;  %v1347_v1 = vpop.f32.mrf.mxu0 }
 0x1b7   : > { %v1005_v40 = vadd.f32 %v959_v25, %v798_v12  ;;  %v1607_v12 = vld [vmem:[#allocation2 + $0xf0] sm:$0xff] }
 0x1b8   : > { %v800_v35 = vpop.f32.mrf.mxu1  ;;  %v1153_v58 = vpop.f32.mrf.mxu3 }
 0x1b9   : > { %v1199_v29 = vadd.f32 %v1153_v58, %v1005_v40  ;;  %2075 = vmatmul.f32.gmra.mxu0 %v3447_v7  ;;  %v801_v38 = vadd.f32 %v800_v35, %v3339_v41 }
 0x1bb   : > { %v3772_v17 = vadd.f32 %v1347_v1, %v1199_v29  ;;  %1495 = vmatmul.f32.gmra.mxu1 %v1410_v13  ;;  %1690 = vmatmul.f32.gmra.mxu2 %v1605_v20  ;;  %v1801_v1 = vld [vmem:[#allocation2 + $0xf2] sm:$0xff] }
 0x1bc   : > { %v1413_v29 = vld [vmem:[#allocation2 + $0xcc] sm:$0xff] }
 0x1bd   : > { %1884 = vmatmul.f32.gmra.mxu3 %v1799_v55  ;;  %v1608_v55 = vld [vmem:[#allocation2 + $0xf8] sm:$0xff] }
 0x1be   : > { %v962_v33 = vpop.f32.mrf.mxu2  ;;  %v1350_v57 = vpop.f32.mrf.mxu0 }
 0x1bf   : > { %v1006_v3 = vadd.f32 %v962_v33, %v801_v38  ;;  %v1802_v33 = vld [vmem:[#allocation2 + $0xfa] sm:$0xff] }
 0x1c0   : > { %v803_v22 = vpop.f32.mrf.mxu1  ;;  %v1156_v53 = vpop.f32.mrf.mxu3 }
 0x1c1   : > { %v1200_v16 = vadd.f32 %v1156_v53, %v1006_v3  ;;  %2078 = vmatmul.f32.gmra.mxu0 %v3460_v26  ;;  %v804_v14 = vadd.f32 %v803_v22, %v3354_v51 }
 0x1c3   : > { %v3776_v7 = vadd.f32 %v1350_v57, %v1200_v16  ;;  %1498 = vmatmul.f32.gmra.mxu1 %v1411_v50  ;;  %1693 = vmatmul.f32.gmra.mxu2 %v1606_v11  ;;  %v1414_v11 = vld [vmem:[#allocation2 + $0xdc] sm:$0xff]  ;;  %v1609_v16 = vld [vmem:[#allocation2 + $0x108] sm:$0xff] }
 0x1c5   : > { %1887 = vmatmul.f32.gmra.mxu3 %v1800_v15 }
 0x1c6   : > { %v965_v41 = vpop.f32.mrf.mxu2  ;;  %v1353_v62 = vpop.f32.mrf.mxu0 }
 0x1c7   : > { %v1007_v8 = vadd.f32 %v965_v41, %v804_v14  ;;  %v1803_v14 = vld [vmem:[#allocation2 + $0x10a] sm:$0xff] }
 0x1c8   : > { %v806_v47 = vpop.f32.mrf.mxu1  ;;  %v1159_v56 = vpop.f32.mrf.mxu3 }
 0x1c9   : > { %v1201_v25 = vadd.f32 %v1159_v56, %v1007_v8  ;;  %2081 = vmatmul.f32.gmra.mxu0 %v3480_v52  ;;  %v807_v40 = vadd.f32 %v806_v47, %v3375_v59 }
 0x1cb   : > { %v3780_v26 = vadd.f32 %v1353_v62, %v1201_v25  ;;  %1501 = vmatmul.f32.gmra.mxu1 %v1412_v28  ;;  %1696 = vmatmul.f32.gmra.mxu2 %v1607_v12  ;;  %v1415_v28 = vld [vmem:[#allocation2 + $0xe4] sm:$0xff]  ;;  %v1610_v12 = vld [vmem:[#allocation2 + $0x110] sm:$0xff] }
 0x1cd   : > { %1890 = vmatmul.f32.gmra.mxu3 %v1801_v1  ;;  %v1804_v1 = vld [vmem:[#allocation2 + $0x112] sm:$0xff] }
 0x1ce   : > { %v968_v51 = vpop.f32.mrf.mxu2  ;;  %v1356_v35 = vpop.f32.mrf.mxu0 }
 0x1cf   : > { %v1008_v58 = vadd.f32 %v968_v51, %v807_v40 }
 0x1d0   : > { %v809_v13 = vpop.f32.mrf.mxu1  ;;  %v1162_v20 = vpop.f32.mrf.mxu3 }
 0x1d1   : > { %v1202_v38 = vadd.f32 %v1162_v20, %v1008_v58  ;;  %2084 = vmatmul.f32.gmra.mxu0 %v3494_v21  ;;  %v810_v57 = vadd.f32 %v809_v13, %v3389_v4 }
 0x1d3   : > { %v3784_v52 = vadd.f32 %v1356_v35, %v1202_v38  ;;  %1504 = vmatmul.f32.gmra.mxu1 %v1413_v29  ;;  %1699 = vmatmul.f32.gmra.mxu2 %v1608_v55  ;;  %v1416_v29 = vld [vmem:[#allocation2 + $0xf4] sm:$0xff] }
 0x1d5   : > { %1893 = vmatmul.f32.gmra.mxu3 %v1802_v33 }
 0x1d6   : > { %v971_v59 = vpop.f32.mrf.mxu2  ;;  %v1359_v3 = vpop.f32.mrf.mxu0 }
 0x1d7   : > { %v1009_v22 = vadd.f32 %v971_v59, %v810_v57  ;;  %v3988_v57 = vld [vmem:[#allocation7_spill] sm:$0xff] }
 0x1d8   : > { %v812_v53 = vpop.f32.mrf.mxu1  ;;  %v1165_v50 = vpop.f32.mrf.mxu3 }
 0x1d9   : > { %v1203_v15 = vadd.f32 %v1165_v50, %v1009_v22  ;;  %2087 = vmatmul.f32.gmra.mxu0 %v3516_v9  ;;  %v813_v41 = vadd.f32 %v812_v53, %v3412_v19 }
 0x1db   : > { %v3788_v21 = vadd.f32 %v1359_v3, %v1203_v15  ;;  %1507 = vmatmul.f32.gmra.mxu1 %v1414_v11  ;;  %1702 = vmatmul.f32.gmra.mxu2 %v1609_v16  ;;  %v3989_v11 = vld [vmem:[#allocation15_spill] sm:$0xff]  ;;  %v3990_v16 = vld [vmem:[#allocation8_spill] sm:$0xff] }
 0x1dc   : > { %v3991_v15 = vld [vmem:[#allocation4_spill] sm:$0xff] }
 0x1dd   : > { %1896 = vmatmul.f32.gmra.mxu3 %v1803_v14 }
 0x1de   : > { %v974_v4 = vpop.f32.mrf.mxu2  ;;  %v1362_v62 = vpop.f32.mrf.mxu0 }
 0x1df   : > { %v1010_v8 = vadd.f32 %v974_v4, %v813_v41  ;;  %v3992_v41 = vld [vmem:[#allocation10_spill] sm:$0xff] }
 0x1e0   : > { %v815_v47 = vpop.f32.mrf.mxu1  ;;  %v1168_v56 = vpop.f32.mrf.mxu3 }
 0x1e1   : > { %v1204_v25 = vadd.f32 %v1168_v56, %v1010_v8  ;;  %2090 = vmatmul.f32.gmra.mxu0 %v3532_v61  ;;  %v816_v51 = vadd.f32 %v815_v47, %v3428_v36  ;;  %v3987_v61 = vld [vmem:[#allocation3_spill] sm:$0xff] }
 0x1e3   : > { %v3792_v40 = vadd.f32 %v1362_v62, %v1204_v25  ;;  %1510 = vmatmul.f32.gmra.mxu1 %v1415_v28  ;;  %1705 = vmatmul.f32.gmra.mxu2 %v1610_v12  ;;  %v1418_v28 = vld [vmem:[#allocation2 + $0x10c] sm:$0xff]  ;;  %v3993_v25 = vld [vmem:[#allocation18_spill] sm:$0xff] }
 0x1e5   : > { %1899 = vmatmul.f32.gmra.mxu3 %v1804_v1 }
 0x1e6   : > { %v977_v19 = vpop.f32.mrf.mxu2  ;;  %v1365_v35 = vpop.f32.mrf.mxu0 }
 0x1e7   : > { %v1011_v58 = vadd.f32 %v977_v19, %v816_v51  ;;  %v3994_v51 = vld [vmem:[#allocation5_spill] sm:$0xff] }
 0x1e8   : > { %v1171_v13 = vpop.f32.mrf.mxu3  ;;  %v1466_v20 = vpop.f32.mrf.mxu1 }
 0x1e9   : > { %v1205_v55 = vadd.f32 %v1171_v13, %v1011_v58  ;;  %2093 = vmatmul.f32.gmra.mxu0 %v3561_v0  ;;  %v1562_v33 = vadd.f32 %v1466_v20, %v3987_v61  ;;  %v3995_v13 = vld [vmem:[#allocation12_spill] sm:$0xff] }
 0x1eb   : > { %v3796_v38 = vadd.f32 %v1365_v35, %v1205_v55  ;;  %1513 = vmatmul.f32.gmra.mxu1 %v1416_v29  ;;  %1708 = vmatmul.f32.gmra.mxu2 %v3497_v23 }
 0x1ed   : > { %1902 = vmatmul.f32.gmra.mxu3 %v3988_v57 }
 0x1ee   : > { %v1661_v36 = vpop.f32.mrf.mxu2  ;;  %v2049_v59 = vpop.f32.mrf.mxu0 }
 0x1ef   : > { %v1757_v3 = vadd.f32 %v1661_v36, %v1562_v33 }
 0x1f0   : > { %v1469_v22 = vpop.f32.mrf.mxu1  ;;  %v1855_v53 = vpop.f32.mrf.mxu3 }
 0x1f1   : > { %v1951_v50 = vadd.f32 %v1855_v53, %v1757_v3  ;;  %2096 = vmatmul.f32.gmra.mxu0 %v3989_v11  ;;  %v1563_v14 = vadd.f32 %v1469_v22, %v3991_v15 }
 0x1f3   : > { %v2145_v23 = vadd.f32 %v2049_v59, %v1951_v50  ;;  %1516 = vmatmul.f32.gmra.mxu1 %v3516_v9  ;;  %1711 = vmatmul.f32.gmra.mxu2 %v3990_v16  ;;  %v3997_v50 = vld [vmem:[#allocation14_spill] sm:$0xff] }
 0x1f5   : > { %2177 = vst [vmem:[%s3807_s20] sm:$0xff] %v2145_v23  ;;  %1905 = vmatmul.f32.gmra.mxu3 %v3992_v41  ;;  %v2246_v9 = vmul.f32 %v2145_v23, %v2145_v23 }
 0x1f6   : > { %v1664_v4 = vpop.f32.mrf.mxu2  ;;  %v2052_v62 = vpop.f32.mrf.mxu0 }
 0x1f7   : > { %v1758_v8 = vadd.f32 %v1664_v4, %v1563_v14 }
 0x1f8   : > { %v1472_v47 = vpop.f32.mrf.mxu1  ;;  %v1858_v56 = vpop.f32.mrf.mxu3 }
 0x1f9   : > { %v1952_v12 = vadd.f32 %v1858_v56, %v1758_v8  ;;  %2099 = vmatmul.f32.gmra.mxu0 %v3993_v25  ;;  %v1564_v19 = vadd.f32 %v1472_v47, %v3994_v51  ;;  %v3999_v56 = vld [vmem:[#allocation17_spill] sm:$0xff] }
 0x1fb   : > { %v2146_v1 = vadd.f32 %v2052_v62, %v1952_v12  ;;  %1519 = vmatmul.f32.gmra.mxu1 %v1418_v28  ;;  %1714 = vmatmul.f32.gmra.mxu2 %v3535_v63  ;;  %v3996_v63 = vld [vmem:[#allocation6_spill] sm:$0xff] }
 0x1fd   : > { %2178 = vst [vmem:[%s3807_s20 + $0x8] sm:$0xff] %v2146_v1  ;;  %v2209_v35 = vadd.f32 %v2146_v1, %v2145_v23  ;;  %v2247_v58 = vmul.f32 %v2146_v1, %v2146_v1  ;;  %1908 = vmatmul.f32.gmra.mxu3 %v3995_v13 }
 0x1fe   : > { %v1667_v20 = vpop.f32.mrf.mxu2  ;;  %v2055_v29 = vpop.f32.mrf.mxu0 }
 0x1ff   : > { %v2278_v55 = vadd.f32 %v2247_v58, %v2246_v9  ;;  %v1759_v61 = vadd.f32 %v1667_v20, %v1564_v19 }
 0x200   : > { %v1475_v33 = vpop.f32.mrf.mxu1  ;;  %v1861_v57 = vpop.f32.mrf.mxu3 }
 0x201   : > { %v1953_v36 = vadd.f32 %v1861_v57, %v1759_v61  ;;  %2102 = vmatmul.f32.gmra.mxu0 %v3644_v44  ;;  %v1565_v3 = vadd.f32 %v1475_v33, %v3996_v63  ;;  %v1420_v44 = vld [vmem:[#allocation2 + $0x124] sm:$0xff] }
 0x203   : > { %v2147_v59 = vadd.f32 %v2055_v29, %v1953_v36  ;;  %1522 = vmatmul.f32.gmra.mxu1 %v3561_v0  ;;  %1717 = vmatmul.f32.gmra.mxu2 %v3572_v48  ;;  %v3998_v48 = vld [vmem:[#allocation9_spill] sm:$0xff] }
 0x205   : > { %2179 = vst [vmem:[%s3807_s20 + $0x10] sm:$0xff] %v2147_v59  ;;  %v2210_v22 = vadd.f32 %v2209_v35, %v2147_v59  ;;  %v2248_v53 = vmul.f32 %v2147_v59, %v2147_v59  ;;  %1911 = vmatmul.f32.gmra.mxu3 %v3997_v50 }
 0x206   : > { %v1670_v11 = vpop.f32.mrf.mxu2  ;;  %v2058_v23 = vpop.f32.mrf.mxu0 }
 0x207   : > { %v2279_v16 = vadd.f32 %v2278_v55, %v2248_v53  ;;  %v1760_v15 = vadd.f32 %v1670_v11, %v1565_v3  ;;  %v4001_v55 = vld [vmem:[#allocation20_spill] sm:$0xff]  ;;  %v4003_v11 = vld [vmem:[#allocation22_spill] sm:$0xff] }
 0x208   : > { %v1478_v14 = vpop.f32.mrf.mxu1  ;;  %v1864_v41 = vpop.f32.mrf.mxu3 }
 0x209   : > { %v1954_v4 = vadd.f32 %v1864_v41, %v1760_v15  ;;  %2105 = vmatmul.f32.gmra.mxu0 %v3670_v49  ;;  %v1566_v62 = vadd.f32 %v1478_v14, %v3998_v48 }
 0x20b   : > { %v2148_v0 = vadd.f32 %v2058_v23, %v1954_v4  ;;  %1525 = vmatmul.f32.gmra.mxu1 %v1420_v44  ;;  %1720 = vmatmul.f32.gmra.mxu2 %v3596_v2  ;;  %v4000_v2 = vld [vmem:[#allocation11_spill] sm:$0xff] }
 0x20d   : > { %2180 = vst [vmem:[%s3807_s20 + $0x18] sm:$0xff] %v2148_v0  ;;  %v2211_v8 = vadd.f32 %v2210_v22, %v2148_v0  ;;  %v2249_v47 = vmul.f32 %v2148_v0, %v2148_v0  ;;  %1914 = vmatmul.f32.gmra.mxu3 %v3999_v56  ;;  %v1812_v0 = vld [vmem:[#allocation2 + $0x172] sm:$0xff] }
 0x20e   : > { %v1673_v28 = vpop.f32.mrf.mxu2  ;;  %v2061_v12 = vpop.f32.mrf.mxu0 }
 0x20f   : > { %v2280_v1 = vadd.f32 %v2279_v16, %v2249_v47  ;;  %v1761_v9 = vadd.f32 %v1673_v28, %v1566_v62 }
 0x210   : > { %v1481_v51 = vpop.f32.mrf.mxu1  ;;  %v1867_v19 = vpop.f32.mrf.mxu3 }
 0x211   : > { %v1955_v35 = vadd.f32 %v1867_v19, %v1761_v9  ;;  %2108 = vmatmul.f32.gmra.mxu0 %v3684_v30  ;;  %v1567_v13 = vadd.f32 %v1481_v51, %v4000_v2  ;;  %v1422_v30 = vld [vmem:[#allocation2 + $0x13c] sm:$0xff]  ;;  %v1424_v19 = vld [vmem:[#allocation2 + $0x154] sm:$0xff] }
 0x213   : > { %v2149_v58 = vadd.f32 %v2061_v12, %v1955_v35  ;;  %1528 = vmatmul.f32.gmra.mxu1 %v3993_v25  ;;  %1723 = vmatmul.f32.gmra.mxu2 %v3626_v46  ;;  %v4002_v46 = vld [vmem:[#allocation13_spill] sm:$0xff] }
 0x215   : > { %2181 = vst [vmem:[%s3807_s20 + $0x20] sm:$0xff] %v2149_v58  ;;  %v2212_v20 = vadd.f32 %v2211_v8, %v2149_v58  ;;  %v2250_v29 = vmul.f32 %v2149_v58, %v2149_v58  ;;  %1917 = vmatmul.f32.gmra.mxu3 %v4001_v55  ;;  %v4006_v58 = vld [vmem:[#allocation19_spill] sm:$0xff] }
 0x216   : > { %v1676_v61 = vpop.f32.mrf.mxu2  ;;  %v2064_v33 = vpop.f32.mrf.mxu0 }
 0x217   : > { %v2281_v57 = vadd.f32 %v2280_v1, %v2250_v29  ;;  %v1762_v36 = vadd.f32 %v1676_v61, %v1567_v13  ;;  %v2638_v29 = vld [vmem:[#allocation2 + $0x182] sm:$0xff] }
 0x218   : > { %v1484_v59 = vpop.f32.mrf.mxu1  ;;  %v1870_v63 = vpop.f32.mrf.mxu3 }
 0x219   : > { %v1956_v3 = vadd.f32 %v1870_v63, %v1762_v36  ;;  %2111 = vmatmul.f32.gmra.mxu0 %v3695_v45  ;;  %v1568_v22 = vadd.f32 %v1484_v59, %v4002_v46  ;;  %v4008_v46 = vld [vmem:[#allocation21_spill] sm:$0xff] }
 0x21b   : > { %v2150_v25 = vadd.f32 %v2064_v33, %v1956_v3  ;;  %1531 = vmatmul.f32.gmra.mxu1 %v1422_v30  ;;  %1726 = vmatmul.f32.gmra.mxu2 %v3648_v18  ;;  %v4004_v18 = vld [vmem:[#allocation16_spill] sm:$0xff] }
 0x21c   : > { %v3850_v33 = vld [vmem:[#allocation2 + $0x184] sm:$0xff] }
 0x21d   : > { %2182 = vst [vmem:[%s3807_s20 + $0x28] sm:$0xff] %v2150_v25  ;;  %v2213_v53 = vadd.f32 %v2212_v20, %v2150_v25  ;;  %v2251_v50 = vmul.f32 %v2150_v25, %v2150_v25  ;;  %1920 = vmatmul.f32.gmra.mxu3 %v4003_v11  ;;  %v4007_v25 = vld [vmem:[#allocation26_spill] sm:$0xff]  ;;  %v2639_v11 = vld [vmem:[#allocation2 + $0x18a] sm:$0xff] }
 0x21e   : > { %v1679_v23 = vpop.f32.mrf.mxu2  ;;  %v2067_v16 = vpop.f32.mrf.mxu0 }
 0x21f   : > { %v2282_v15 = vadd.f32 %v2281_v57, %v2251_v50  ;;  %v1763_v14 = vadd.f32 %v1679_v23, %v1568_v22 }
 0x220   : > { %v1487_v41 = vpop.f32.mrf.mxu1  ;;  %v1873_v44 = vpop.f32.mrf.mxu3 }
 0x221   : > { %v1957_v4 = vadd.f32 %v1873_v44, %v1763_v14  ;;  %2114 = vmatmul.f32.gmra.mxu0 %v3707_v10  ;;  %v1569_v62 = vadd.f32 %v1487_v41, %v4004_v18  ;;  %v4010_v18 = vld [vmem:[#allocation23_spill] sm:$0xff] }
 0x223   : > { %v2151_v48 = vadd.f32 %v2067_v16, %v1957_v4  ;;  %1534 = vmatmul.f32.gmra.mxu1 %v3670_v49  ;;  %1729 = vmatmul.f32.gmra.mxu2 %v3673_v24  ;;  %v4005_v24 = vld [vmem:[#allocation24_spill] sm:$0xff] }
 0x225   : > { %2183 = vst [vmem:[%s3807_s20 + $0x30] sm:$0xff] %v2151_v48  ;;  %v2214_v8 = vadd.f32 %v2213_v53, %v2151_v48  ;;  %v2252_v47 = vmul.f32 %v2151_v48, %v2151_v48  ;;  %1923 = vmatmul.f32.gmra.mxu3 %v1812_v0  ;;  %v4009_v48 = vld [vmem:[#allocation28_spill] sm:$0xff] }
 0x226   : > { %v1682_v56 = vpop.f32.mrf.mxu2  ;;  %v2070_v28 = vpop.f32.mrf.mxu0 }
 0x227   : > { %v2283_v12 = vadd.f32 %v2282_v15, %v2252_v47  ;;  %v1764_v1 = vadd.f32 %v1682_v56, %v1569_v62  ;;  %v3857_v15 = vld [vmem:[#allocation2 + $0x18c] sm:$0xff]  ;;  %v2640_v56 = vld [vmem:[#allocation2 + $0x19a] sm:$0xff] }
 0x228   : > { %v1490_v9 = vpop.f32.mrf.mxu1  ;;  %v1876_v51 = vpop.f32.mrf.mxu3 }
 0x229   : > { %v1958_v35 = vadd.f32 %v1876_v51, %v1764_v1  ;;  %2117 = vmatmul.f32.gmra.mxu0 %v3719_v39  ;;  %v1570_v2 = vadd.f32 %v1490_v9, %v4006_v58  ;;  %v3864_v1 = vld [vmem:[#allocation2 + $0x19c] sm:$0xff]  ;;  %v4012_v58 = vld [vmem:[#allocation25_spill] sm:$0xff] }
 0x22b   : > { %v2152_v49 = vadd.f32 %v2070_v28, %v1958_v35  ;;  %1537 = vmatmul.f32.gmra.mxu1 %v1424_v19  ;;  %1732 = vmatmul.f32.gmra.mxu2 %v4005_v24  ;;  %v4011_v24 = vld [vmem:[#allocation30_spill] sm:$0xff] }
 0x22d   : > { %2184 = vst [vmem:[%s3807_s20 + $0x38] sm:$0xff] %v2152_v49  ;;  %v2215_v13 = vadd.f32 %v2214_v8, %v2152_v49  ;;  %v2253_v20 = vmul.f32 %v2152_v49, %v2152_v49  ;;  %1926 = vmatmul.f32.gmra.mxu3 %v2638_v29 }
 0x22e   : > { %v1685_v55 = vpop.f32.mrf.mxu2  ;;  %v2073_v61 = vpop.f32.mrf.mxu0 }
 0x22f   : > { %v2284_v57 = vadd.f32 %v2283_v12, %v2253_v20  ;;  %v1765_v36 = vadd.f32 %v1685_v55, %v1570_v2 }
 0x230   : > { %v1493_v59 = vpop.f32.mrf.mxu1  ;;  %v1879_v63 = vpop.f32.mrf.mxu3 }
 0x231   : > { %v1959_v30 = vadd.f32 %v1879_v63, %v1765_v36  ;;  %2120 = vmatmul.f32.gmra.mxu0 %v3850_v33  ;;  %v1571_v22 = vadd.f32 %v1493_v59, %v4008_v46  ;;  %v4013_v46 = vld [vmem:[#allocation27_spill] sm:$0xff] }
 0x233   : > { %v2153_v3 = vadd.f32 %v2073_v61, %v1959_v30  ;;  %1540 = vmatmul.f32.gmra.mxu1 %v3695_v45  ;;  %1735 = vmatmul.f32.gmra.mxu2 %v4007_v25  ;;  %v3872_v61 = vld [vmem:[#allocation2 + $0x1a4] sm:$0xff]  ;;  %v1623_v30 = vld [vmem:[#allocation2 + $0x1b0] sm:$0xff] }
 0x235   : > { %2185 = vst [vmem:[%s3807_s20 + $0x40] sm:$0xff] %v2153_v3  ;;  %v2216_v53 = vadd.f32 %v2215_v13, %v2153_v3  ;;  %v2254_v50 = vmul.f32 %v2153_v3, %v2153_v3  ;;  %1929 = vmatmul.f32.gmra.mxu3 %v2639_v11  ;;  %v1817_v3 = vld [vmem:[#allocation2 + $0x1b2] sm:$0xff] }
 0x236   : > { %v1688_v23 = vpop.f32.mrf.mxu2  ;;  %v2076_v16 = vpop.f32.mrf.mxu0 }
 0x237   : > { %v2285_v14 = vadd.f32 %v2284_v57, %v2254_v50  ;;  %v1766_v41 = vadd.f32 %v1688_v23, %v1571_v22  ;;  %v2011_v23 = vld [vmem:[#allocation2 + $0x1b4] sm:$0xff] }
 0x238   : > { %v1496_v44 = vpop.f32.mrf.mxu1  ;;  %v1882_v4 = vpop.f32.mrf.mxu3 }
 0x239   : > { %v1960_v0 = vadd.f32 %v1882_v4, %v1766_v41  ;;  %2123 = vmatmul.f32.gmra.mxu0 %v3857_v15  ;;  %v1572_v62 = vadd.f32 %v1496_v44, %v4010_v18 }
 0x23b   : > { %v2154_v45 = vadd.f32 %v2076_v16, %v1960_v0  ;;  %1543 = vmatmul.f32.gmra.mxu1 %v3707_v10  ;;  %1738 = vmatmul.f32.gmra.mxu2 %v4009_v48  ;;  %v1818_v0 = vld [vmem:[#allocation2 + $0x1ba] sm:$0xff]  ;;  %v4014_v48 = vld [vmem:[#allocation29_spill] sm:$0xff] }
 0x23d   : > { %2186 = vst [vmem:[%s3807_s20 + $0x48] sm:$0xff] %v2154_v45  ;;  %v2217_v8 = vadd.f32 %v2216_v53, %v2154_v45  ;;  %v2255_v47 = vmul.f32 %v2154_v45, %v2154_v45  ;;  %1932 = vmatmul.f32.gmra.mxu3 %v2640_v56 }
 0x23e   : > { %v1691_v28 = vpop.f32.mrf.mxu2  ;;  %v2079_v12 = vpop.f32.mrf.mxu0 }
 0x23f   : > { %v2286_v9 = vadd.f32 %v2285_v14, %v2255_v47  ;;  %v1767_v51 = vadd.f32 %v1691_v28, %v1572_v62  ;;  %v2012_v28 = vld [vmem:[#allocation2 + $0x1bc] sm:$0xff] }
 0x240   : > { %v1499_v19 = vpop.f32.mrf.mxu1  ;;  %v1885_v35 = vpop.f32.mrf.mxu3 }
 0x241   : > { %v1961_v49 = vadd.f32 %v1885_v35, %v1767_v51  ;;  %2126 = vmatmul.f32.gmra.mxu0 %v3864_v1  ;;  %v1573_v2 = vadd.f32 %v1499_v19, %v4012_v58  ;;  %v1625_v35 = vld [vmem:[#allocation2 + $0x1c8] sm:$0xff] }
 0x243   : > { %v2155_v10 = vadd.f32 %v2079_v12, %v1961_v49  ;;  %1546 = vmatmul.f32.gmra.mxu1 %v3719_v39  ;;  %1741 = vmatmul.f32.gmra.mxu2 %v4011_v24  ;;  %v4015_v24 = vld [vmem:[#allocation31_spill] sm:$0xff] }
 0x245   : > { %2187 = vst [vmem:[%s3807_s20 + $0x50] sm:$0xff] %v2155_v10  ;;  %v2218_v13 = vadd.f32 %v2217_v8, %v2155_v10  ;;  %v2256_v20 = vmul.f32 %v2155_v10, %v2155_v10  ;;  %1935 = vmatmul.f32.gmra.mxu3 %v3657_v54 }
 0x246   : > { %v1694_v29 = vpop.f32.mrf.mxu2  ;;  %v2082_v55 = vpop.f32.mrf.mxu0 }
 0x247   : > { %v2287_v57 = vadd.f32 %v2286_v9, %v2256_v20  ;;  %v1768_v36 = vadd.f32 %v1694_v29, %v1573_v2 }
 0x248   : > { %v1502_v59 = vpop.f32.mrf.mxu1  ;;  %v1888_v63 = vpop.f32.mrf.mxu3 }
 0x249   : > { %v1962_v39 = vadd.f32 %v1888_v63, %v1768_v36  ;;  %2129 = vmatmul.f32.gmra.mxu0 %v3872_v61  ;;  %v1574_v54 = vadd.f32 %v1502_v59, %v4013_v46 }
 0x24b   : > { %v2156_v25 = vadd.f32 %v2082_v55, %v1962_v39  ;;  %1549 = vmatmul.f32.gmra.mxu1 %v3850_v33  ;;  %1744 = vmatmul.f32.gmra.mxu2 %v1623_v30  ;;  %v2641_v33 = vld [vmem:[#allocation2 + $0x8] sm:$0xff]  ;;  %v1820_v39 = vld [vmem:[#allocation2 + $0x1d2] sm:$0xff] }
 0x24c   : > { %v2013_v55 = vld [vmem:[#allocation2 + $0x1cc] sm:$0xff] }
 0x24d   : > { %2188 = vst [vmem:[%s3807_s20 + $0x58] sm:$0xff] %v2156_v25  ;;  %v2219_v22 = vadd.f32 %v2218_v13, %v2156_v25  ;;  %v2257_v53 = vmul.f32 %v2156_v25, %v2156_v25  ;;  %1938 = vmatmul.f32.gmra.mxu3 %v1817_v3 }
 0x24e   : > { %v1697_v50 = vpop.f32.mrf.mxu2  ;;  %v2085_v11 = vpop.f32.mrf.mxu0 }
 0x24f   : > { %v2288_v16 = vadd.f32 %v2287_v57, %v2257_v53  ;;  %v1769_v14 = vadd.f32 %v1697_v50, %v1574_v54  ;;  %v2014_v53 = vld [vmem:[#allocation2 + $0x1d4] sm:$0xff] }
 0x250   : > { %v1505_v41 = vpop.f32.mrf.mxu1  ;;  %v1891_v44 = vpop.f32.mrf.mxu3 }
 0x251   : > { %v1963_v4 = vadd.f32 %v1891_v44, %v1769_v14  ;;  %2132 = vmatmul.f32.gmra.mxu0 %v2011_v23  ;;  %v1575_v18 = vadd.f32 %v1505_v41, %v4014_v48 }
 0x253   : > { %v2157_v45 = vadd.f32 %v2085_v11, %v1963_v4  ;;  %1552 = vmatmul.f32.gmra.mxu1 %v3857_v15  ;;  %1747 = vmatmul.f32.gmra.mxu2 %v2641_v33  ;;  %v1819_v15 = vld [vmem:[#allocation2 + $0x1ca] sm:$0xff] }
 0x255   : > { %2189 = vst [vmem:[%s3807_s20 + $0x60] sm:$0xff] %v2157_v45  ;;  %v2220_v62 = vadd.f32 %v2219_v22, %v2157_v45  ;;  %v2258_v8 = vmul.f32 %v2157_v45, %v2157_v45  ;;  %1941 = vmatmul.f32.gmra.mxu3 %v1818_v0 }
 0x256   : > { %v1700_v47 = vpop.f32.mrf.mxu2  ;;  %v2088_v56 = vpop.f32.mrf.mxu0 }
 0x257   : > { %v2289_v12 = vadd.f32 %v2288_v16, %v2258_v8  ;;  %v1770_v9 = vadd.f32 %v1700_v47, %v1575_v18 }
 0x258   : > { %v1508_v51 = vpop.f32.mrf.mxu1  ;;  %v1894_v19 = vpop.f32.mrf.mxu3 }
 0x259   : > { %v1964_v49 = vadd.f32 %v1894_v19, %v1770_v9  ;;  %2135 = vmatmul.f32.gmra.mxu0 %v2012_v28  ;;  %v1576_v58 = vadd.f32 %v1508_v51, %v4015_v24 }
 0x25b   : > { %v2158_v10 = vadd.f32 %v2088_v56, %v1964_v49  ;;  %1555 = vmatmul.f32.gmra.mxu1 %v3864_v1  ;;  %1750 = vmatmul.f32.gmra.mxu2 %v1625_v35 }
 0x25d   : > { %2190 = vst [vmem:[%s3807_s20 + $0x68] sm:$0xff] %v2158_v10  ;;  %v2221_v2 = vadd.f32 %v2220_v62, %v2158_v10  ;;  %v2259_v13 = vmul.f32 %v2158_v10, %v2158_v10  ;;  %1944 = vmatmul.f32.gmra.mxu3 %v1819_v15 }
 0x25e   : > { %v1703_v20 = vpop.f32.mrf.mxu2  ;;  %v2091_v29 = vpop.f32.mrf.mxu0 }
 0x25f   : > { %v2290_v57 = vadd.f32 %v2289_v12, %v2259_v13  ;;  %v1771_v36 = vadd.f32 %v1703_v20, %v1576_v58 }
 0x260   : > { %v1511_v59 = vpop.f32.mrf.mxu1  ;;  %v1897_v63 = vpop.f32.mrf.mxu3 }
 0x261   : > { %v1965_v30 = vadd.f32 %v1897_v63, %v1771_v36  ;;  %2138 = vmatmul.f32.gmra.mxu0 %v2013_v55  ;;  %v1577_v1 = vadd.f32 %v1511_v59, %v3732_v31 }
 0x263   : > { %v2159_v3 = vadd.f32 %v2091_v29, %v1965_v30  ;;  %1558 = vmatmul.f32.gmra.mxu1 %v3872_v61  ;;  %1753 = vmatmul.f32.gmra.mxu2 %v2641_v33 }
 0x265   : > { %2191 = vst [vmem:[%s3807_s20 + $0x70] sm:$0xff] %v2159_v3  ;;  %v2222_v25 = vadd.f32 %v2221_v2, %v2159_v3  ;;  %v2260_v46 = vmul.f32 %v2159_v3, %v2159_v3  ;;  %1947 = vmatmul.f32.gmra.mxu3 %v1820_v39 }
 0x266   : > { %v1706_v54 = vpop.f32.mrf.mxu2  ;;  %v2094_v22 = vpop.f32.mrf.mxu0 }
 0x267   : > { %v2291_v50 = vadd.f32 %v2290_v57, %v2260_v46  ;;  %v1772_v11 = vadd.f32 %v1706_v54, %v1577_v1 }
 0x268   : > { %v1514_v23 = vpop.f32.mrf.mxu1  ;;  %v1900_v16 = vpop.f32.mrf.mxu3 }
 0x269   : > { %v1966_v14 = vadd.f32 %v1900_v16, %v1772_v11  ;;  %2141 = vmatmul.f32.gmra.mxu0 %v2014_v53  ;;  %v1578_v61 = vadd.f32 %v1514_v23, %v3736_v32 }
 0x26b   : > { %v2160_v41 = vadd.f32 %v2094_v22, %v1966_v14 }
 0x26d   : > { %2192 = vst [vmem:[%s3807_s20 + $0x78] sm:$0xff] %v2160_v41  ;;  %v2223_v31 = vadd.f32 %v2222_v25, %v2160_v41  ;;  %v2261_v44 = vmul.f32 %v2160_v41, %v2160_v41 }
 0x26e   : > { %v1709_v4 = vpop.f32.mrf.mxu2  ;;  %v2097_v0 = vpop.f32.mrf.mxu0 }
 0x26f   : > { %v2292_v45 = vadd.f32 %v2291_v50, %v2261_v44  ;;  %v1773_v33 = vadd.f32 %v1709_v4, %v1578_v61 }
 0x270   : > { %v1517_v48 = vpop.f32.mrf.mxu1  ;;  %v1903_v18 = vpop.f32.mrf.mxu3 }
 0x271   : > { %v1967_v62 = vadd.f32 %v1903_v18, %v1773_v33  ;;  %v1579_v47 = vadd.f32 %v1517_v48, %v3740_v6 }
 0x273   : > { %v2161_v8 = vadd.f32 %v2097_v0, %v1967_v62 }
 0x275   : > { %2193 = vst [vmem:[%s3807_s20 + $0x80] sm:$0xff] %v2161_v8  ;;  %v2224_v56 = vadd.f32 %v2223_v31, %v2161_v8  ;;  %v2262_v28 = vmul.f32 %v2161_v8, %v2161_v8 }
 0x276   : > { %v1712_v12 = vpop.f32.mrf.mxu2  ;;  %v2100_v9 = vpop.f32.mrf.mxu0 }
 0x277   : > { %v2293_v32 = vadd.f32 %v2292_v45, %v2262_v28  ;;  %v1774_v51 = vadd.f32 %v1712_v12, %v1579_v47 }
 0x278   : > { %v1520_v19 = vpop.f32.mrf.mxu1  ;;  %v1906_v35 = vpop.f32.mrf.mxu3 }
 0x279   : > { %v1968_v49 = vadd.f32 %v1906_v35, %v1774_v51  ;;  %v1580_v10 = vadd.f32 %v1520_v19, %v3744_v27 }
 0x27b   : > { %v2162_v15 = vadd.f32 %v2100_v9, %v1968_v49 }
 0x27d   : > { %2194 = vst [vmem:[%s3807_s20 + $0x88] sm:$0xff] %v2162_v15  ;;  %v2225_v24 = vadd.f32 %v2224_v56, %v2162_v15  ;;  %v2263_v58 = vmul.f32 %v2162_v15, %v2162_v15 }
 0x27e   : > { %v1715_v2 = vpop.f32.mrf.mxu2  ;;  %v2103_v13 = vpop.f32.mrf.mxu0 }
 0x27f   : > { %v2294_v6 = vadd.f32 %v2293_v32, %v2263_v58  ;;  %v1775_v20 = vadd.f32 %v1715_v2, %v1580_v10 }
 0x280   : > { %v1523_v29 = vpop.f32.mrf.mxu1  ;;  %v1909_v55 = vpop.f32.mrf.mxu3 }
 0x281   : > { %v1969_v57 = vadd.f32 %v1909_v55, %v1775_v20  ;;  %v1581_v59 = vadd.f32 %v1523_v29, %v3748_v34 }
 0x283   : > { %v2163_v36 = vadd.f32 %v2103_v13, %v1969_v57 }
 0x285   : > { %2195 = vst [vmem:[%s3807_s20 + $0x90] sm:$0xff] %v2163_v36  ;;  %v2226_v63 = vadd.f32 %v2225_v24, %v2163_v36  ;;  %v2264_v30 = vmul.f32 %v2163_v36, %v2163_v36 }
 0x286   : > { %v1718_v39 = vpop.f32.mrf.mxu2  ;;  %v2106_v3 = vpop.f32.mrf.mxu0 }
 0x287   : > { %v2295_v27 = vadd.f32 %v2294_v6, %v2264_v30  ;;  %v1776_v1 = vadd.f32 %v1718_v39, %v1581_v59 }
 0x288   : > { %v1526_v25 = vpop.f32.mrf.mxu1  ;;  %v1912_v46 = vpop.f32.mrf.mxu3 }
 0x289   : > { %v1970_v54 = vadd.f32 %v1912_v46, %v1776_v1  ;;  %v1582_v53 = vadd.f32 %v1526_v25, %v3752_v42 }
 0x28b   : > { %v2164_v22 = vadd.f32 %v2106_v3, %v1970_v54 }
 0x28d   : > { %2196 = vst [vmem:[%s3807_s20 + $0x98] sm:$0xff] %v2164_v22  ;;  %v2227_v50 = vadd.f32 %v2226_v63, %v2164_v22  ;;  %v2265_v11 = vmul.f32 %v2164_v22, %v2164_v22 }
 0x28e   : > { %v1721_v23 = vpop.f32.mrf.mxu2  ;;  %v2109_v16 = vpop.f32.mrf.mxu0 }
 0x28f   : > { %v2296_v34 = vadd.f32 %v2295_v27, %v2265_v11  ;;  %v1777_v14 = vadd.f32 %v1721_v23, %v1582_v53 }
 0x290   : > { %v1529_v41 = vpop.f32.mrf.mxu1  ;;  %v1915_v61 = vpop.f32.mrf.mxu3 }
 0x291   : > { %v1971_v31 = vadd.f32 %v1915_v61, %v1777_v14  ;;  %v1583_v4 = vadd.f32 %v1529_v41, %v3756_v37 }
 0x293   : > { %v2165_v44 = vadd.f32 %v2109_v16, %v1971_v31 }
 0x295   : > { %2197 = vst [vmem:[%s3807_s20 + $0xa0] sm:$0xff] %v2165_v44  ;;  %v2228_v0 = vadd.f32 %v2227_v50, %v2165_v44  ;;  %v2266_v45 = vmul.f32 %v2165_v44, %v2165_v44 }
 0x296   : > { %v1724_v33 = vpop.f32.mrf.mxu2  ;;  %v2112_v48 = vpop.f32.mrf.mxu0 }
 0x297   : > { %v2297_v42 = vadd.f32 %v2296_v34, %v2266_v45  ;;  %v1778_v18 = vadd.f32 %v1724_v33, %v1583_v4 }
 0x298   : > { %v1532_v62 = vpop.f32.mrf.mxu1  ;;  %v1918_v8 = vpop.f32.mrf.mxu3 }
 0x299   : > { %v1972_v47 = vadd.f32 %v1918_v8, %v1778_v18  ;;  %v1584_v28 = vadd.f32 %v1532_v62, %v3760_v60 }
 0x29b   : > { %v2166_v56 = vadd.f32 %v2112_v48, %v1972_v47 }
 0x29d   : > { %2198 = vst [vmem:[%s3807_s20 + $0xa8] sm:$0xff] %v2166_v56  ;;  %v2229_v12 = vadd.f32 %v2228_v0, %v2166_v56  ;;  %v2267_v9 = vmul.f32 %v2166_v56, %v2166_v56 }
 0x29e   : > { %v1727_v32 = vpop.f32.mrf.mxu2  ;;  %v2115_v51 = vpop.f32.mrf.mxu0 }
 0x29f   : > { %v2298_v37 = vadd.f32 %v2297_v42, %v2267_v9  ;;  %v1779_v19 = vadd.f32 %v1727_v32, %v1584_v28 }
 0x2a0   : > { %v1535_v35 = vpop.f32.mrf.mxu1  ;;  %v1921_v49 = vpop.f32.mrf.mxu3 }
 0x2a1   : > { %v1973_v15 = vadd.f32 %v1921_v49, %v1779_v19  ;;  %v1585_v24 = vadd.f32 %v1535_v35, %v3764_v5 }
 0x2a3   : > { %v2167_v10 = vadd.f32 %v2115_v51, %v1973_v15 }
 0x2a5   : > { %2199 = vst [vmem:[%s3807_s20 + $0xb0] sm:$0xff] %v2167_v10  ;;  %v2230_v58 = vadd.f32 %v2229_v12, %v2167_v10  ;;  %v2268_v2 = vmul.f32 %v2167_v10, %v2167_v10 }
 0x2a6   : > { %v1730_v13 = vpop.f32.mrf.mxu2  ;;  %v2118_v6 = vpop.f32.mrf.mxu0 }
 0x2a7   : > { %v2299_v60 = vadd.f32 %v2298_v37, %v2268_v2  ;;  %v1780_v20 = vadd.f32 %v1730_v13, %v1585_v24 }
 0x2a8   : > { %v1538_v29 = vpop.f32.mrf.mxu1  ;;  %v1924_v55 = vpop.f32.mrf.mxu3 }
 0x2a9   : > { %v1974_v57 = vadd.f32 %v1924_v55, %v1780_v20  ;;  %v1586_v59 = vadd.f32 %v1538_v29, %v3768_v43 }
 0x2ab   : > { %v2168_v36 = vadd.f32 %v2118_v6, %v1974_v57 }
 0x2ad   : > { %2200 = vst [vmem:[%s3807_s20 + $0xb8] sm:$0xff] %v2168_v36  ;;  %v2231_v63 = vadd.f32 %v2230_v58, %v2168_v36  ;;  %v2269_v30 = vmul.f32 %v2168_v36, %v2168_v36 }
 0x2ae   : > { %v1733_v39 = vpop.f32.mrf.mxu2  ;;  %v2121_v3 = vpop.f32.mrf.mxu0 }
 0x2af   : > { %v2300_v5 = vadd.f32 %v2299_v60, %v2269_v30  ;;  %v1781_v27 = vadd.f32 %v1733_v39, %v1586_v59 }
 0x2b0   : > { %v1541_v1 = vpop.f32.mrf.mxu1  ;;  %v1927_v25 = vpop.f32.mrf.mxu3 }
 0x2b1   : > { %v1975_v46 = vadd.f32 %v1927_v25, %v1781_v27  ;;  %v1587_v22 = vadd.f32 %v1541_v1, %v3772_v17 }
 0x2b3   : > { %v2169_v54 = vadd.f32 %v2121_v3, %v1975_v46 }
 0x2b5   : > { %2201 = vst [vmem:[%s3807_s20 + $0xc0] sm:$0xff] %v2169_v54  ;;  %v2232_v53 = vadd.f32 %v2231_v63, %v2169_v54  ;;  %v2270_v50 = vmul.f32 %v2169_v54, %v2169_v54 }
 0x2b6   : > { %v1736_v11 = vpop.f32.mrf.mxu2  ;;  %v2124_v23 = vpop.f32.mrf.mxu0 }
 0x2b7   : > { %v2301_v43 = vadd.f32 %v2300_v5, %v2270_v50  ;;  %v1782_v16 = vadd.f32 %v1736_v11, %v1587_v22 }
 0x2b8   : > { %v1544_v34 = vpop.f32.mrf.mxu1  ;;  %v1930_v14 = vpop.f32.mrf.mxu3 }
 0x2b9   : > { %v1976_v41 = vadd.f32 %v1930_v14, %v1782_v16  ;;  %v1588_v31 = vadd.f32 %v1544_v34, %v3776_v7 }
 0x2bb   : > { %v2170_v61 = vadd.f32 %v2124_v23, %v1976_v41 }
 0x2bd   : > { %2202 = vst [vmem:[%s3807_s20 + $0xc8] sm:$0xff] %v2170_v61  ;;  %v2233_v44 = vadd.f32 %v2232_v53, %v2170_v61  ;;  %v2271_v4 = vmul.f32 %v2170_v61, %v2170_v61 }
 0x2be   : > { %v1739_v0 = vpop.f32.mrf.mxu2  ;;  %v2127_v45 = vpop.f32.mrf.mxu0 }
 0x2bf   : > { %v2302_v17 = vadd.f32 %v2301_v43, %v2271_v4  ;;  %v1783_v33 = vadd.f32 %v1739_v0, %v1588_v31 }
 0x2c0   : > { %v1547_v48 = vpop.f32.mrf.mxu1  ;;  %v1933_v42 = vpop.f32.mrf.mxu3 }
 0x2c1   : > { %v1977_v18 = vadd.f32 %v1933_v42, %v1783_v33  ;;  %v1589_v8 = vadd.f32 %v1547_v48, %v3780_v26 }
 0x2c3   : > { %v2171_v62 = vadd.f32 %v2127_v45, %v1977_v18 }
 0x2c5   : > { %2203 = vst [vmem:[%s3807_s20 + $0xd0] sm:$0xff] %v2171_v62  ;;  %v2234_v47 = vadd.f32 %v2233_v44, %v2171_v62  ;;  %v2272_v56 = vmul.f32 %v2171_v62, %v2171_v62 }
 0x2c6   : > { %v1742_v28 = vpop.f32.mrf.mxu2  ;;  %v2130_v12 = vpop.f32.mrf.mxu0 }
 0x2c7   : > { %v2303_v7 = vadd.f32 %v2302_v17, %v2272_v56  ;;  %v1784_v9 = vadd.f32 %v1742_v28, %v1589_v8 }
 0x2c8   : > { %v1550_v32 = vpop.f32.mrf.mxu1  ;;  %v1936_v51 = vpop.f32.mrf.mxu3 }
 0x2c9   : > { %v1978_v37 = vadd.f32 %v1936_v51, %v1784_v9  ;;  %v1590_v35 = vadd.f32 %v1550_v32, %v3784_v52 }
 0x2cb   : > { %v2172_v19 = vadd.f32 %v2130_v12, %v1978_v37 }
 0x2cd   : > { %2204 = vst [vmem:[%s3807_s20 + $0xd8] sm:$0xff] %v2172_v19  ;;  %v2235_v49 = vadd.f32 %v2234_v47, %v2172_v19  ;;  %v2273_v15 = vmul.f32 %v2172_v19, %v2172_v19 }
 0x2ce   : > { %v1745_v10 = vpop.f32.mrf.mxu2  ;;  %v2133_v24 = vpop.f32.mrf.mxu0 }
 0x2cf   : > { %v2304_v26 = vadd.f32 %v2303_v7, %v2273_v15  ;;  %v1785_v58 = vadd.f32 %v1745_v10, %v1590_v35 }
 0x2d0   : > { %v1553_v2 = vpop.f32.mrf.mxu1  ;;  %v1939_v13 = vpop.f32.mrf.mxu3 }
 0x2d1   : > { %v1979_v6 = vadd.f32 %v1939_v13, %v1785_v58  ;;  %v1591_v20 = vadd.f32 %v1553_v2, %v3788_v21 }
 0x2d3   : > { %v2173_v60 = vadd.f32 %v2133_v24, %v1979_v6 }
 0x2d5   : > { %2205 = vst [vmem:[%s3807_s20 + $0xe0] sm:$0xff] %v2173_v60  ;;  %v2236_v29 = vadd.f32 %v2235_v49, %v2173_v60  ;;  %v2274_v55 = vmul.f32 %v2173_v60, %v2173_v60 }
 0x2d6   : > { %v1748_v57 = vpop.f32.mrf.mxu2  ;;  %v2136_v36 = vpop.f32.mrf.mxu0 }
 0x2d7   : > { %v2305_v52 = vadd.f32 %v2304_v26, %v2274_v55  ;;  %v1786_v59 = vadd.f32 %v1748_v57, %v1591_v20 }
 0x2d8   : > { %v1556_v63 = vpop.f32.mrf.mxu1  ;;  %v1942_v30 = vpop.f32.mrf.mxu3 }
 0x2d9   : > { %v1980_v39 = vadd.f32 %v1942_v30, %v1786_v59  ;;  %v1592_v5 = vadd.f32 %v1556_v63, %v3792_v40 }
 0x2db   : > { %v2174_v3 = vadd.f32 %v2136_v36, %v1980_v39 }
 0x2dd   : > { %2206 = vst [vmem:[%s3807_s20 + $0xe8] sm:$0xff] %v2174_v3  ;;  %v2237_v27 = vadd.f32 %v2236_v29, %v2174_v3  ;;  %v2275_v1 = vmul.f32 %v2174_v3, %v2174_v3 }
 0x2de   : > { %v1751_v25 = vpop.f32.mrf.mxu2  ;;  %v2139_v46 = vpop.f32.mrf.mxu0 }
 0x2df   : > { %v2306_v21 = vadd.f32 %v2305_v52, %v2275_v1  ;;  %v1787_v54 = vadd.f32 %v1751_v25, %v1592_v5 }
 0x2e0   : > { %v1945_v22 = vpop.f32.mrf.mxu3  ;;  %v1559_v50 = vpop.f32.mrf.mxu1 }
 0x2e1   : > { %v1981_v53 = vadd.f32 %v1945_v22, %v1787_v54  ;;  %v1593_v23 = vadd.f32 %v1559_v50, %v3796_v38 }
 0x2e3   : > { %v2175_v11 = vadd.f32 %v2139_v46, %v1981_v53 }
 0x2e5   : > { %2207 = vst [vmem:[%s3807_s20 + $0xf0] sm:$0xff] %v2175_v11  ;;  %v2238_v43 = vadd.f32 %v2237_v27, %v2175_v11  ;;  %v2276_v16 = vmul.f32 %v2175_v11, %v2175_v11 }
 0x2e6   : > { %v1754_v34 = vpop.f32.mrf.mxu2  ;;  %v2142_v61 = vpop.f32.mrf.mxu0 }
 0x2e7   : > { %v2307_v40 = vadd.f32 %v2306_v21, %v2276_v16  ;;  %v1788_v14 = vadd.f32 %v1754_v34, %v1593_v23 }
 0x2e8   : > { %v1948_v41 = vpop.f32.mrf.mxu3 }
 0x2e9   : > { %v1982_v31 = vadd.f32 %v1948_v41, %v1788_v14 }
 0x2eb   : > { %v2176_v44 = vadd.f32 %v2142_v61, %v1982_v31 }
 0x2ed   : > { %2208 = vst [vmem:[%s3807_s20 + $0xf8] sm:$0xff] %v2176_v44  ;;  %v2239_v4 = vadd.f32 %v2238_v43, %v2176_v44  ;;  %v2277_v0 = vmul.f32 %v2176_v44, %v2176_v44 }
 0x2ef   : > { %v2240_v45 = vrot.slane %v2239_v4, 4  ;;  %v2308_v17 = vadd.f32 %v2307_v40, %v2277_v0 }
 0x2f1   : > { %v2241_v33 = vadd.f32 %v2240_v45, %v2239_v4  ;;  %v2309_v48 = vrot.slane %v2308_v17, 4 }
 0x2f3   : > { %v2242_v42 = vrot.slane %v2241_v33, 2  ;;  %v2310_v38 = vadd.f32 %v2309_v48, %v2308_v17 }
 0x2f5   : > { %v2243_v18 = vadd.f32 %v2242_v42, %v2241_v33  ;;  %v2311_v62 = vrot.slane %v2310_v38, 2 }
 0x2f7   : > { %v2244_v8 = vrot.slane %v2243_v18, 1  ;;  %v2312_v47 = vadd.f32 %v2311_v62, %v2310_v38 }
 0x2f9   : > { %v2245_v56 = vadd.f32 %v2244_v8, %v2243_v18  ;;  %v2313_v28 = vrot.slane %v2312_v47, 1 }
 0x2fb   : > { %v2314_v12 = vadd.f32 %v2313_v28, %v2312_v47  ;;  %2315 = vst [vmem:[%s268_s25] sm:$0xff] %v2245_v56 }
 0x2fd   : > { %2316 = vst [vmem:[%s272_s28] sm:$0xff] %v2314_v12 }
 0x2fe PF: > { %s17_s21 = sadd.s32 1, %s2648_s21  }
 0x2ff   : > { %p14_p4 = scmp.ge.s32.totalorder %s17_s21, 4  }
 0x301   :  { %16 = sbr.rel (!%p14_p4) target bundleno = 1 (0x1), region = 101 }

</bundles_post_ra>
